<compile_context>
chip_gen: v7x
topology: tpu7x:2x2x1
jax: 0.10.0
libtpu: 0.0.40
codegen_flags: <defaults>
</compile_context>

<pallas_src>
import jax
import jax.numpy as jnp
from jax import lax
from jax.experimental import pallas as pl
from jax.experimental.pallas import tpu as pltpu


# ------------------------------ fused kernel ------------------------------ #
def _decoder_kernel(x_ref, w1_ref, b1_ref, w2_ref, b2_ref, w3_ref, b3_ref,
                    p1_ref, p2_ref, o_ref,
                    xp1, xqa1, xqb1, blk1,
                    xp2, xqa2, xqb2, blk2,
                    xp3, xqa3, xqb3):
    f32 = jnp.float32
    HIGH = jax.lax.Precision.HIGHEST

    def load_padded(xp, data, H, W, C):
        # xp rows: [0,2W) zero guard, [2W, 2W+HW) data, [2W+HW, 4W+HW) guard.
        HW = H * W
        xp[0:2 * W, :] = jnp.zeros((2 * W, C), f32)
        xp[2 * W + HW:4 * W + HW, :] = jnp.zeros((2 * W, C), f32)
        xp[2 * W:2 * W + HW, :] = data

    def build_taps(xp, xqa, xqb, H, W, C):
        # xqa/xqb rows q in [0,(H+1)W) <-> (u, v) = (q//W - 1, q%W).
        # lane group (dh, dw) holds:
        #   xqa: x[u+dh, v+dw]      (column taps {0,+1};  used by pw == 1)
        #   xqb: x[u+dh, v+dw-1]    (column taps {-1,0};  used by pw == 0)
        rows = (H + 1) * W
        ds = 2 * W
        col = lax.broadcasted_iota(jnp.int32, (rows, 1), 0) % W
        not_first = col != 0
        not_last = col != (W - 1)
        for dh in range(2):
            base = ds + (dh - 1) * W
            v_m1 = jnp.where(not_first, xp[pl.ds(base - 1, rows), :], 0.0)
            v_0 = xp[pl.ds(base, rows), :]
            v_p1 = jnp.where(not_last, xp[pl.ds(base + 1, rows), :], 0.0)
            g0, g1 = (2 * dh) * C, (2 * dh + 1) * C
            xqa[:, g0:g0 + C] = v_0
            xqa[:, g1:g1 + C] = v_p1
            xqb[:, g0:g0 + C] = v_m1
            xqb[:, g1:g1 + C] = v_0

    def parity_matmuls(xqa, xqb, w_ref, H, W):
        # One wide-K matmul per output parity (ph, pw); the window for parity
        # (ph, pw) is the contiguous slice starting at row ph*W of xqa/xqb.
        HW = H * W
        outs = []
        for p in range(4):
            ph, pw = p // 2, p % 2
            src = xqa if pw == 1 else xqb
            lhs = src[pl.ds(ph * W, HW), :]
            outs.append(jnp.dot(lhs, w_ref[p], preferred_element_type=f32))
        return outs

    # ---------------- layer 1: 4x4x48 -> 8x8x24, ReLU ---------------- #
    H, W, C = 4, 4, 48
    HW = H * W
    load_padded(xp1, x_ref[0, :, :], H, W, C)
    build_taps(xp1, xqa1, xqb1, H, W, C)
    outs = parity_matmuls(xqa1, xqb1, w1_ref, H, W)
    for p in range(4):
        blk1[p * HW:(p + 1) * HW, :] = outs[p]
    z1 = jnp.maximum(blk1[...] + b1_ref[...], 0.0)
    # depth-to-space: blocked (parity-major) rows -> spatial rows, via 0/1 perm.
    spat1 = jnp.dot(p1_ref[...], z1, preferred_element_type=f32,
                    precision=HIGH)                                # (64, 24)

    # ---------------- layer 2: 8x8x24 -> 16x16x12, ReLU ---------------- #
    H, W, C = 8, 8, 24
    HW = H * W
    load_padded(xp2, spat1, H, W, C)
    build_taps(xp2, xqa2, xqb2, H, W, C)
    outs = parity_matmuls(xqa2, xqb2, w2_ref, H, W)
    for p in range(4):
        blk2[p * HW:(p + 1) * HW, :] = outs[p]
    z2 = jnp.maximum(blk2[...] + b2_ref[...], 0.0)
    spat2 = jnp.dot(p2_ref[...], z2, preferred_element_type=f32,
                    precision=HIGH)                                # (256, 12)

    # --------------- layer 3: 16x16x12 -> 32x32x3, Sigmoid --------------- #
    H, W, C = 16, 16, 12
    load_padded(xp3, spat2, H, W, C)
    build_taps(xp3, xqa3, xqb3, H, W, C)
    # w3 is padded to 12 output lanes (parity p lives in columns [3p, 3p+3)),
    # so the four parity results accumulate into one lane-packed (256, 12).
    outs = parity_matmuls(xqa3, xqb3, w3_ref, H, W)
    acc = outs[0] + outs[1] + outs[2] + outs[3] + b3_ref[...]
    acc = pl.reciprocal(1.0 + jnp.exp(-acc), approx=False)   # sigmoid via EUP
    o_ref[0, :, :] = acc


def _decoder_call(xf, pk):
    """xf: (N, 16, 48) flat channels-last encoder output -> (N, 256, 12)."""
    N = xf.shape[0]
    return pl.pallas_call(
        _decoder_kernel,
        out_shape=jax.ShapeDtypeStruct((N, 256, 12), jnp.float32),
        grid_spec=pltpu.PrefetchScalarGridSpec(
            num_scalar_prefetch=0,
            grid=(N,),
            in_specs=[
                pl.BlockSpec((1, 16, 48), lambda n: (n, 0, 0)),    # x
                pl.BlockSpec((4, 192, 24), lambda n: (0, 0, 0)),   # w1
                pl.BlockSpec((1, 24), lambda n: (0, 0)),           # b1
                pl.BlockSpec((4, 96, 12), lambda n: (0, 0, 0)),    # w2
                pl.BlockSpec((1, 12), lambda n: (0, 0)),           # b2
                pl.BlockSpec((4, 48, 12), lambda n: (0, 0, 0)),    # w3 (padded)
                pl.BlockSpec((1, 12), lambda n: (0, 0)),           # b3 (packed)
                pl.BlockSpec((64, 64), lambda n: (0, 0)),          # perm 8x8
                pl.BlockSpec((256, 256), lambda n: (0, 0)),        # perm 16x16
            ],
            out_specs=pl.BlockSpec((1, 256, 12), lambda n: (n, 0, 0)),
            scratch_shapes=[
                pltpu.VMEM((32, 48), jnp.float32),    # xp1  (padded 4x4)
                pltpu.VMEM((20, 192), jnp.float32),   # xqa1
                pltpu.VMEM((20, 192), jnp.float32),   # xqb1
                pltpu.VMEM((64, 24), jnp.float32),    # blk1 (parity blocked)
                pltpu.VMEM((96, 24), jnp.float32),    # xp2  (padded 8x8)
                pltpu.VMEM((72, 96), jnp.float32),    # xqa2
                pltpu.VMEM((72, 96), jnp.float32),    # xqb2
                pltpu.VMEM((256, 12), jnp.float32),   # blk2
                pltpu.VMEM((320, 12), jnp.float32),   # xp3  (padded 16x16)
                pltpu.VMEM((272, 48), jnp.float32),   # xqa3
                pltpu.VMEM((272, 48), jnp.float32),   # xqb3
            ]),
        compiler_params=pltpu.CompilerParams(
            dimension_semantics=("parallel",)),
    )(xf, pk["w1"], pk["b1"], pk["w2"], pk["b2"], pk["w3"], pk["b3"],
      pk["p1"], pk["p2"])


# ----------------------- host-side weight preparation ---------------------- #
def pack_convt_weight(w):
    """w: (C_in, C_out, 4, 4) PyTorch ConvTranspose2d weight ->
    (4, 4, C_in, C_out) where [ph*2+pw, dh*2+dw] = w[:, :, 3-ph-2dh, 3-pw-2dw].
    """
    C_in, C_out, kH, kW = w.shape
    assert kH == 4 and kW == 4
    w_t = jnp.transpose(w, (2, 3, 0, 1))                  # (kH, kW, Cin, Cout)
    par = jnp.arange(2)
    off = jnp.arange(2)
    k_idx = 3 - par[:, None] - 2 * off[None, :]           # [parity, offset]
    KH = k_idx[:, None, :, None]                          # (ph, 1, dh, 1)
    KW = k_idx[None, :, None, :]                          # (1, pw, 1, dw)
    w_sub = w_t[KH, KW]                                   # (2,2,2,2,Cin,Cout)
    return w_sub.reshape(4, 4, C_in, C_out)


def make_perm(H, W):
    """0/1 matrix mapping parity-blocked rows (p*HW + a*W + b) to spatial rows
    ((2a+ph)*2W + 2b + pw) of the ConvT output."""
    HW = H * W
    size = 4 * HW
    s = jnp.arange(size)
    r, t = s // (2 * W), s % (2 * W)
    a, ph = r // 2, r % 2
    b, pw = t // 2, t % 2
    src = (ph * 2 + pw) * HW + a * W + b
    return jax.nn.one_hot(src, size, dtype=jnp.float32)


def pack_decoder_params(params):
    """Precompute all kernel-side constants once (outside jit)."""
    (w1, b1), (w2, b2), (w3, b3) = params
    ws1 = pack_convt_weight(w1).reshape(4, 4 * 48, 24)
    ws2 = pack_convt_weight(w2).reshape(4, 4 * 24, 12)
    ws3 = pack_convt_weight(w3).reshape(4, 4 * 12, 3)
    w3p = jnp.zeros((4, 48, 12), jnp.float32)
    for p in range(4):                       # parity p -> output lanes [3p,3p+3)
        w3p = w3p.at[p, :, 3 * p:3 * p + 3].set(ws3[p])
    return dict(
        w1=ws1, b1=b1.reshape(1, 24),
        w2=ws2, b2=b2.reshape(1, 12),
        w3=w3p, b3=jnp.tile(b3, 4).reshape(1, 12),
        p1=make_perm(4, 4), p2=make_perm(8, 8))


# ----------------------------- Decoder module ------------------------------ #
def init_decoder_params(key):
    # TODO(synk): the original module loads a pretrained checkpoint via
    # torch.load; weights here are randomly initialized with the same shapes.
    shapes = [((48, 24, 4, 4), (24,)),
              ((24, 12, 4, 4), (12,)),
              ((12, 3, 4, 4), (3,))]
    params = []
    for i, (wshape, bshape) in enumerate(shapes):
        kw, kb = jax.random.split(jax.random.fold_in(key, i))
        fan_in = wshape[0] * wshape[2] * wshape[3]
        bound = 1.0 / jnp.sqrt(fan_in)
        w = jax.random.uniform(kw, wshape, jnp.float32, -bound, bound)
        b = jax.random.uniform(kb, bshape, jnp.float32, -bound, bound)
        params.append((w, b))
    return params


def cifar10_decoder(x, pk):
    """x: (N, 48, 4, 4) NCHW -> (N, 3, 32, 32) NCHW."""
    N, C0, H0, W0 = x.shape
    xf = jnp.transpose(x, (0, 2, 3, 1)).reshape(N, H0 * W0, C0)
    out = _decoder_call(xf, pk)                      # (N, 256, 12)
    # rows = a*16 + b over the 16x16 base grid, lanes = (ph*2+pw)*3 + c.
    y = out.reshape(N, 16, 16, 2, 2, 3)
    y = jnp.transpose(y, (0, 1, 3, 2, 4, 5)).reshape(N, 32, 32, 3)
    return jnp.transpose(y, (0, 3, 1, 2))


# ----------------------------- Pure-JAX reference -------------------------- #
def _conv_transpose_ref(x, w, b, activation):
    Cin, Cout, kH, kW = w.shape
    w_conv = jnp.flip(w, axis=(2, 3)).transpose(1, 0, 2, 3)
    y = lax.conv_general_dilated(
        x, w_conv, window_strides=(1, 1),
        padding=[(kH - 2, kH - 2), (kW - 2, kW - 2)],
        lhs_dilation=(2, 2),
        dimension_numbers=("NCHW", "OIHW", "NCHW"))
    y = y + b.reshape(1, Cout, 1, 1)
    if activation == "relu":
        y = jnp.maximum(y, 0.0)
    elif activation == "sigmoid":
        y = 1.0 / (1.0 + jnp.exp(-y))
    return y


def decoder_ref(x, params):
    (w1, b1), (w2, b2), (w3, b3) = params
    x = _conv_transpose_ref(x, w1, b1, "relu")
    x = _conv_transpose_ref(x, w2, b2, "relu")
    x = _conv_transpose_ref(x, w3, b3, "sigmoid")
    return x


if __name__ == "__main__":
    key = jax.random.PRNGKey(0)
    params = init_decoder_params(jax.random.fold_in(key, 1))
    packed = pack_decoder_params(params)

    # CIFAR10 encoder output: (N, 48, 4, 4); keep batch small.
    x = jax.random.normal(jax.random.fold_in(key, 2), (2, 48, 4, 4),
                          dtype=jnp.float32)

    out = jax.block_until_ready(jax.jit(cifar10_decoder)(x, packed))
    assert out.shape == (2, 3, 32, 32), out.shape

    ref = jax.block_until_ready(decoder_ref(x, params))
    assert jnp.allclose(out, ref, atol=1e-4, rtol=1e-4), \
        float(jnp.max(jnp.abs(out - ref)))

    print("KERNEL_OK")
</pallas_src>

<mosaic_0001>
module attributes {stable_mosaic.version = 11 : i64} {
  func.func @_decoder_kernel(%arg0: i32, %arg1: memref<1x16x48xf32, #tpu.memory_space<vmem>>, %arg2: memref<4x192x24xf32, #tpu.memory_space<vmem>>, %arg3: memref<1x24xf32, #tpu.memory_space<vmem>>, %arg4: memref<4x96x12xf32, #tpu.memory_space<vmem>>, %arg5: memref<1x12xf32, #tpu.memory_space<vmem>>, %arg6: memref<4x48x12xf32, #tpu.memory_space<vmem>>, %arg7: memref<1x12xf32, #tpu.memory_space<vmem>>, %arg8: memref<64x64xf32, #tpu.memory_space<vmem>>, %arg9: memref<256x256xf32, #tpu.memory_space<vmem>>, %arg10: memref<1x256x12xf32, #tpu.memory_space<vmem>>, %arg11: memref<32x48xf32, #tpu.memory_space<vmem>>, %arg12: memref<20x192xf32, #tpu.memory_space<vmem>>, %arg13: memref<20x192xf32, #tpu.memory_space<vmem>>, %arg14: memref<64x24xf32, #tpu.memory_space<vmem>>, %arg15: memref<96x24xf32, #tpu.memory_space<vmem>>, %arg16: memref<72x96xf32, #tpu.memory_space<vmem>>, %arg17: memref<72x96xf32, #tpu.memory_space<vmem>>, %arg18: memref<256x12xf32, #tpu.memory_space<vmem>>, %arg19: memref<320x12xf32, #tpu.memory_space<vmem>>, %arg20: memref<272x48xf32, #tpu.memory_space<vmem>>, %arg21: memref<272x48xf32, #tpu.memory_space<vmem>>) attributes {dimension_semantics = [#tpu.dimension_semantics<parallel>], iteration_bounds = array<i64: 2>, scalar_prefetch = 0 : i64, scratch_operands = 11 : i64, tpu.core_type = #tpu.core_type<tc>, window_params = [{transform_indices = @transform_0, window_bounds = array<i64: 1, 16, 48>}, {pipeline_mode = #tpu.pipeline_mode<synchronous>, transform_indices = @transform_1, window_bounds = array<i64: 4, 192, 24>}, {pipeline_mode = #tpu.pipeline_mode<synchronous>, transform_indices = @transform_2, window_bounds = array<i64: 1, 24>}, {pipeline_mode = #tpu.pipeline_mode<synchronous>, transform_indices = @transform_3, window_bounds = array<i64: 4, 96, 12>}, {pipeline_mode = #tpu.pipeline_mode<synchronous>, transform_indices = @transform_4, window_bounds = array<i64: 1, 12>}, {pipeline_mode = #tpu.pipeline_mode<synchronous>, transform_indices = @transform_5, window_bounds = array<i64: 4, 48, 12>}, {pipeline_mode = #tpu.pipeline_mode<synchronous>, transform_indices = @transform_6, window_bounds = array<i64: 1, 12>}, {pipeline_mode = #tpu.pipeline_mode<synchronous>, transform_indices = @transform_7, window_bounds = array<i64: 64, 64>}, {pipeline_mode = #tpu.pipeline_mode<synchronous>, transform_indices = @transform_8, window_bounds = array<i64: 256, 256>}, {transform_indices = @transform_9, window_bounds = array<i64: 1, 256, 12>}]} {
    %c0 = arith.constant 0 : index
    %c0_0 = arith.constant 0 : index
    %c0_1 = arith.constant 0 : index
    %0 = vector.load %arg1[%c0, %c0_0, %c0_1] : memref<1x16x48xf32, #tpu.memory_space<vmem>>, vector<1x16x48xf32>
    %1 = vector.shape_cast %0 : vector<1x16x48xf32> to vector<16x48xf32>
    %cst = arith.constant 0.000000e+00 : f32
    %2 = vector.broadcast %cst : f32 to vector<8x48xf32>
    %c0_2 = arith.constant 0 : index
    %c0_3 = arith.constant 0 : index
    %3 = vector.load %arg11[%c0_2, %c0_3] : memref<32x48xf32, #tpu.memory_space<vmem>>, vector<8x48xf32>
    tpu.vector_store %arg11[%c0_2, %c0_3], %2 {strides = array<i32>} : memref<32x48xf32, #tpu.memory_space<vmem>>, vector<8x48xf32>,
    %cst_4 = arith.constant 0.000000e+00 : f32
    %4 = vector.broadcast %cst_4 : f32 to vector<8x48xf32>
    %c24 = arith.constant 24 : index
    %c0_5 = arith.constant 0 : index
    %5 = vector.load %arg11[%c24, %c0_5] : memref<32x48xf32, #tpu.memory_space<vmem>>, vector<8x48xf32>
    tpu.vector_store %arg11[%c24, %c0_5], %4 {strides = array<i32>} : memref<32x48xf32, #tpu.memory_space<vmem>>, vector<8x48xf32>,
    %c8 = arith.constant 8 : index
    %c0_6 = arith.constant 0 : index
    %6 = vector.load %arg11[%c8, %c0_6] : memref<32x48xf32, #tpu.memory_space<vmem>>, vector<16x48xf32>
    tpu.vector_store %arg11[%c8, %c0_6], %1 {strides = array<i32>} : memref<32x48xf32, #tpu.memory_space<vmem>>, vector<16x48xf32>,
    %7 = tpu.iota {dimensions = array<i32: 0>} : vector<20x1xi32>
    %c4_i32 = arith.constant 4 : i32
    %c0_i32 = arith.constant 0 : i32
    %8 = arith.cmpi eq, %c4_i32, %c0_i32 : i32
    %c1_i32 = arith.constant 1 : i32
    %9 = arith.select %8, %c1_i32, %c4_i32 : i32
    %10 = vector.broadcast %9 : i32 to vector<20x1xi32>
    %11 = arith.remsi %7, %10 : vector<20x1xi32>
    %c0_i32_7 = arith.constant 0 : i32
    %12 = vector.broadcast %c0_i32_7 : i32 to vector<20x1xi32>
    %13 = arith.cmpi ne, %11, %12 : vector<20x1xi32>
    %c0_i32_8 = arith.constant 0 : i32
    %14 = vector.broadcast %c0_i32_8 : i32 to vector<20x1xi32>
    %15 = arith.cmpi slt, %11, %14 : vector<20x1xi32>
    %c0_i32_9 = arith.constant 0 : i32
    %16 = arith.cmpi slt, %9, %c0_i32_9 : i32
    %17 = vector.broadcast %16 : i1 to vector<20x1xi1>
    %18 = vector.broadcast %17 : vector<20x1xi1> to vector<20x1xi1>
    %19 = arith.xori %15, %18 : vector<20x1xi1>
    %20 = arith.andi %19, %13 : vector<20x1xi1>
    %21 = vector.broadcast %9 : i32 to vector<20x1xi32>
    %22 = arith.addi %11, %21 : vector<20x1xi32>
    %23 = arith.select %20, %22, %11 : vector<20x1xi1>, vector<20x1xi32>
    %c0_i32_10 = arith.constant 0 : i32
    %24 = vector.broadcast %c0_i32_10 : i32 to vector<20x1xi32>
    %25 = arith.cmpi ne, %23, %24 : vector<20x1xi32>
    %c3_i32 = arith.constant 3 : i32
    %26 = vector.broadcast %c3_i32 : i32 to vector<20x1xi32>
    %27 = arith.cmpi ne, %23, %26 : vector<20x1xi32>
    %c3 = arith.constant 3 : index
    %c0_11 = arith.constant 0 : index
    %28 = vector.load %arg11[%c3, %c0_11] : memref<32x48xf32, #tpu.memory_space<vmem>>, vector<20x48xf32>
    %cst_12 = arith.constant 0.000000e+00 : f32
    %29 = vector.shape_cast %25 : vector<20x1xi1> to vector<20x1xi1>
    %30 = vector.broadcast %29 : vector<20x1xi1> to vector<20x48xi1>
    %31 = vector.broadcast %cst_12 : f32 to vector<20x48xf32>
    %32 = arith.select %30, %28, %31 : vector<20x48xi1>, vector<20x48xf32>
    %c4 = arith.constant 4 : index
    %c0_13 = arith.constant 0 : index
    %33 = vector.load %arg11[%c4, %c0_13] : memref<32x48xf32, #tpu.memory_space<vmem>>, vector<20x48xf32>
    %c5 = arith.constant 5 : index
    %c0_14 = arith.constant 0 : index
    %34 = vector.load %arg11[%c5, %c0_14] : memref<32x48xf32, #tpu.memory_space<vmem>>, vector<20x48xf32>
    %cst_15 = arith.constant 0.000000e+00 : f32
    %35 = vector.shape_cast %27 : vector<20x1xi1> to vector<20x1xi1>
    %36 = vector.broadcast %35 : vector<20x1xi1> to vector<20x48xi1>
    %37 = vector.broadcast %cst_15 : f32 to vector<20x48xf32>
    %38 = arith.select %36, %34, %37 : vector<20x48xi1>, vector<20x48xf32>
    %c0_16 = arith.constant 0 : index
    %c0_17 = arith.constant 0 : index
    %39 = vector.load %arg12[%c0_16, %c0_17] : memref<20x192xf32, #tpu.memory_space<vmem>>, vector<20x48xf32>
    tpu.vector_store %arg12[%c0_16, %c0_17], %33 {strides = array<i32>} : memref<20x192xf32, #tpu.memory_space<vmem>>, vector<20x48xf32>,
    %c0_18 = arith.constant 0 : index
    %c48 = arith.constant 48 : index
    %40 = vector.load %arg12[%c0_18, %c48] : memref<20x192xf32, #tpu.memory_space<vmem>>, vector<20x48xf32>
    tpu.vector_store %arg12[%c0_18, %c48], %38 {strides = array<i32>} : memref<20x192xf32, #tpu.memory_space<vmem>>, vector<20x48xf32>,
    %c0_19 = arith.constant 0 : index
    %c0_20 = arith.constant 0 : index
    %41 = vector.load %arg13[%c0_19, %c0_20] : memref<20x192xf32, #tpu.memory_space<vmem>>, vector<20x48xf32>
    tpu.vector_store %arg13[%c0_19, %c0_20], %32 {strides = array<i32>} : memref<20x192xf32, #tpu.memory_space<vmem>>, vector<20x48xf32>,
    %c0_21 = arith.constant 0 : index
    %c48_22 = arith.constant 48 : index
    %42 = vector.load %arg13[%c0_21, %c48_22] : memref<20x192xf32, #tpu.memory_space<vmem>>, vector<20x48xf32>
    tpu.vector_store %arg13[%c0_21, %c48_22], %33 {strides = array<i32>} : memref<20x192xf32, #tpu.memory_space<vmem>>, vector<20x48xf32>,
    %c7 = arith.constant 7 : index
    %c0_23 = arith.constant 0 : index
    %43 = vector.load %arg11[%c7, %c0_23] : memref<32x48xf32, #tpu.memory_space<vmem>>, vector<20x48xf32>
    %cst_24 = arith.constant 0.000000e+00 : f32
    %44 = vector.shape_cast %25 : vector<20x1xi1> to vector<20x1xi1>
    %45 = vector.broadcast %44 : vector<20x1xi1> to vector<20x48xi1>
    %46 = vector.broadcast %cst_24 : f32 to vector<20x48xf32>
    %47 = arith.select %45, %43, %46 : vector<20x48xi1>, vector<20x48xf32>
    %c8_25 = arith.constant 8 : index
    %c0_26 = arith.constant 0 : index
    %48 = vector.load %arg11[%c8_25, %c0_26] : memref<32x48xf32, #tpu.memory_space<vmem>>, vector<20x48xf32>
    %c9 = arith.constant 9 : index
    %c0_27 = arith.constant 0 : index
    %49 = vector.load %arg11[%c9, %c0_27] : memref<32x48xf32, #tpu.memory_space<vmem>>, vector<20x48xf32>
    %cst_28 = arith.constant 0.000000e+00 : f32
    %50 = vector.shape_cast %27 : vector<20x1xi1> to vector<20x1xi1>
    %51 = vector.broadcast %50 : vector<20x1xi1> to vector<20x48xi1>
    %52 = vector.broadcast %cst_28 : f32 to vector<20x48xf32>
    %53 = arith.select %51, %49, %52 : vector<20x48xi1>, vector<20x48xf32>
    %c0_29 = arith.constant 0 : index
    %c96 = arith.constant 96 : index
    %54 = vector.load %arg12[%c0_29, %c96] : memref<20x192xf32, #tpu.memory_space<vmem>>, vector<20x48xf32>
    tpu.vector_store %arg12[%c0_29, %c96], %48 {strides = array<i32>} : memref<20x192xf32, #tpu.memory_space<vmem>>, vector<20x48xf32>,
    %c0_30 = arith.constant 0 : index
    %c144 = arith.constant 144 : index
    %55 = vector.load %arg12[%c0_30, %c144] : memref<20x192xf32, #tpu.memory_space<vmem>>, vector<20x48xf32>
    tpu.vector_store %arg12[%c0_30, %c144], %53 {strides = array<i32>} : memref<20x192xf32, #tpu.memory_space<vmem>>, vector<20x48xf32>,
    %c0_31 = arith.constant 0 : index
    %c96_32 = arith.constant 96 : index
    %56 = vector.load %arg13[%c0_31, %c96_32] : memref<20x192xf32, #tpu.memory_space<vmem>>, vector<20x48xf32>
    tpu.vector_store %arg13[%c0_31, %c96_32], %47 {strides = array<i32>} : memref<20x192xf32, #tpu.memory_space<vmem>>, vector<20x48xf32>,
    %c0_33 = arith.constant 0 : index
    %c144_34 = arith.constant 144 : index
    %57 = vector.load %arg13[%c0_33, %c144_34] : memref<20x192xf32, #tpu.memory_space<vmem>>, vector<20x48xf32>
    tpu.vector_store %arg13[%c0_33, %c144_34], %48 {strides = array<i32>} : memref<20x192xf32, #tpu.memory_space<vmem>>, vector<20x48xf32>,
    %c0_35 = arith.constant 0 : index
    %c0_36 = arith.constant 0 : index
    %58 = vector.load %arg13[%c0_35, %c0_36] : memref<20x192xf32, #tpu.memory_space<vmem>>, vector<16x192xf32>
    %c0_37 = arith.constant 0 : index
    %c0_38 = arith.constant 0 : index
    %c0_39 = arith.constant 0 : index
    %59 = vector.load %arg2[%c0_37, %c0_38, %c0_39] : memref<4x192x24xf32, #tpu.memory_space<vmem>>, vector<1x192x24xf32>
    %60 = vector.shape_cast %59 : vector<1x192x24xf32> to vector<192x24xf32>
    %cst_40 = arith.constant dense<0.000000e+00> : vector<16x24xf32>
    %61 = tpu.matmul %58, %60, %cst_40 {dimension_numbers = #tpu.dot_dimension_numbers<[1], [0], [0], [1], [0, 0, 1, 1], [], []>} : vector<16x192xf32>, vector<192x24xf32>, vector<16x24xf32> -> vector<16x24xf32>
    %c0_41 = arith.constant 0 : index
    %c0_42 = arith.constant 0 : index
    %62 = vector.load %arg12[%c0_41, %c0_42] : memref<20x192xf32, #tpu.memory_space<vmem>>, vector<16x192xf32>
    %c1 = arith.constant 1 : index
    %c0_43 = arith.constant 0 : index
    %c0_44 = arith.constant 0 : index
    %63 = vector.load %arg2[%c1, %c0_43, %c0_44] : memref<4x192x24xf32, #tpu.memory_space<vmem>>, vector<1x192x24xf32>
    %64 = vector.shape_cast %63 : vector<1x192x24xf32> to vector<192x24xf32>
    %cst_45 = arith.constant dense<0.000000e+00> : vector<16x24xf32>
    %65 = tpu.matmul %62, %64, %cst_45 {dimension_numbers = #tpu.dot_dimension_numbers<[1], [0], [0], [1], [0, 0, 1, 1], [], []>} : vector<16x192xf32>, vector<192x24xf32>, vector<16x24xf32> -> vector<16x24xf32>
    %c4_46 = arith.constant 4 : index
    %c0_47 = arith.constant 0 : index
    %66 = vector.load %arg13[%c4_46, %c0_47] : memref<20x192xf32, #tpu.memory_space<vmem>>, vector<16x192xf32>
    %c2 = arith.constant 2 : index
    %c0_48 = arith.constant 0 : index
    %c0_49 = arith.constant 0 : index
    %67 = vector.load %arg2[%c2, %c0_48, %c0_49] : memref<4x192x24xf32, #tpu.memory_space<vmem>>, vector<1x192x24xf32>
    %68 = vector.shape_cast %67 : vector<1x192x24xf32> to vector<192x24xf32>
    %cst_50 = arith.constant dense<0.000000e+00> : vector<16x24xf32>
    %69 = tpu.matmul %66, %68, %cst_50 {dimension_numbers = #tpu.dot_dimension_numbers<[1], [0], [0], [1], [0, 0, 1, 1], [], []>} : vector<16x192xf32>, vector<192x24xf32>, vector<16x24xf32> -> vector<16x24xf32>
    %c4_51 = arith.constant 4 : index
    %c0_52 = arith.constant 0 : index
    %70 = vector.load %arg12[%c4_51, %c0_52] : memref<20x192xf32, #tpu.memory_space<vmem>>, vector<16x192xf32>
    %c3_53 = arith.constant 3 : index
    %c0_54 = arith.constant 0 : index
    %c0_55 = arith.constant 0 : index
    %71 = vector.load %arg2[%c3_53, %c0_54, %c0_55] : memref<4x192x24xf32, #tpu.memory_space<vmem>>, vector<1x192x24xf32>
    %72 = vector.shape_cast %71 : vector<1x192x24xf32> to vector<192x24xf32>
    %cst_56 = arith.constant dense<0.000000e+00> : vector<16x24xf32>
    %73 = tpu.matmul %70, %72, %cst_56 {dimension_numbers = #tpu.dot_dimension_numbers<[1], [0], [0], [1], [0, 0, 1, 1], [], []>} : vector<16x192xf32>, vector<192x24xf32>, vector<16x24xf32> -> vector<16x24xf32>
    %c0_57 = arith.constant 0 : index
    %c0_58 = arith.constant 0 : index
    %74 = vector.load %arg14[%c0_57, %c0_58] : memref<64x24xf32, #tpu.memory_space<vmem>>, vector<16x24xf32>
    tpu.vector_store %arg14[%c0_57, %c0_58], %61 {strides = array<i32>} : memref<64x24xf32, #tpu.memory_space<vmem>>, vector<16x24xf32>,
    %c16 = arith.constant 16 : index
    %c0_59 = arith.constant 0 : index
    %75 = vector.load %arg14[%c16, %c0_59] : memref<64x24xf32, #tpu.memory_space<vmem>>, vector<16x24xf32>
    tpu.vector_store %arg14[%c16, %c0_59], %65 {strides = array<i32>} : memref<64x24xf32, #tpu.memory_space<vmem>>, vector<16x24xf32>,
    %c32 = arith.constant 32 : index
    %c0_60 = arith.constant 0 : index
    %76 = vector.load %arg14[%c32, %c0_60] : memref<64x24xf32, #tpu.memory_space<vmem>>, vector<16x24xf32>
    tpu.vector_store %arg14[%c32, %c0_60], %69 {strides = array<i32>} : memref<64x24xf32, #tpu.memory_space<vmem>>, vector<16x24xf32>,
    %c48_61 = arith.constant 48 : index
    %c0_62 = arith.constant 0 : index
    %77 = vector.load %arg14[%c48_61, %c0_62] : memref<64x24xf32, #tpu.memory_space<vmem>>, vector<16x24xf32>
    tpu.vector_store %arg14[%c48_61, %c0_62], %73 {strides = array<i32>} : memref<64x24xf32, #tpu.memory_space<vmem>>, vector<16x24xf32>,
    %c0_63 = arith.constant 0 : index
    %c0_64 = arith.constant 0 : index
    %78 = vector.load %arg14[%c0_63, %c0_64] : memref<64x24xf32, #tpu.memory_space<vmem>>, vector<64x24xf32>
    %c0_65 = arith.constant 0 : index
    %c0_66 = arith.constant 0 : index
    %79 = vector.load %arg3[%c0_65, %c0_66] : memref<1x24xf32, #tpu.memory_space<vmem>>, vector<1x24xf32>
    %80 = vector.broadcast %79 : vector<1x24xf32> to vector<64x24xf32>
    %81 = arith.addf %78, %80 : vector<64x24xf32>
    %cst_67 = arith.constant 0.000000e+00 : f32
    %82 = vector.broadcast %cst_67 : f32 to vector<64x24xf32>
    %83 = arith.maximumf %81, %82 : vector<64x24xf32>
    %c0_68 = arith.constant 0 : index
    %c0_69 = arith.constant 0 : index
    %84 = vector.load %arg8[%c0_68, %c0_69] : memref<64x64xf32, #tpu.memory_space<vmem>>, vector<64x64xf32>
    %cst_70 = arith.constant dense<0.000000e+00> : vector<64x24xf32>
    %85 = tpu.matmul %84, %83, %cst_70 {dimension_numbers = #tpu.dot_dimension_numbers<[1], [0], [0], [1], [0, 0, 1, 1], [], []>, precision = #tpu.contract_precision<fp32>} : vector<64x64xf32>, vector<64x24xf32>, vector<64x24xf32> -> vector<64x24xf32>
    %cst_71 = arith.constant 0.000000e+00 : f32
    %86 = vector.broadcast %cst_71 : f32 to vector<16x24xf32>
    %c0_72 = arith.constant 0 : index
    %c0_73 = arith.constant 0 : index
    %87 = vector.load %arg15[%c0_72, %c0_73] : memref<96x24xf32, #tpu.memory_space<vmem>>, vector<16x24xf32>
    tpu.vector_store %arg15[%c0_72, %c0_73], %86 {strides = array<i32>} : memref<96x24xf32, #tpu.memory_space<vmem>>, vector<16x24xf32>,
    %cst_74 = arith.constant 0.000000e+00 : f32
    %88 = vector.broadcast %cst_74 : f32 to vector<16x24xf32>
    %c80 = arith.constant 80 : index
    %c0_75 = arith.constant 0 : index
    %89 = vector.load %arg15[%c80, %c0_75] : memref<96x24xf32, #tpu.memory_space<vmem>>, vector<16x24xf32>
    tpu.vector_store %arg15[%c80, %c0_75], %88 {strides = array<i32>} : memref<96x24xf32, #tpu.memory_space<vmem>>, vector<16x24xf32>,
    %c16_76 = arith.constant 16 : index
    %c0_77 = arith.constant 0 : index
    %90 = vector.load %arg15[%c16_76, %c0_77] : memref<96x24xf32, #tpu.memory_space<vmem>>, vector<64x24xf32>
    tpu.vector_store %arg15[%c16_76, %c0_77], %85 {strides = array<i32>} : memref<96x24xf32, #tpu.memory_space<vmem>>, vector<64x24xf32>,
    %91 = tpu.iota {dimensions = array<i32: 0>} : vector<72x1xi32>
    %c8_i32 = arith.constant 8 : i32
    %c0_i32_78 = arith.constant 0 : i32
    %92 = arith.cmpi eq, %c8_i32, %c0_i32_78 : i32
    %c1_i32_79 = arith.constant 1 : i32
    %93 = arith.select %92, %c1_i32_79, %c8_i32 : i32
    %94 = vector.broadcast %93 : i32 to vector<72x1xi32>
    %95 = arith.remsi %91, %94 : vector<72x1xi32>
    %c0_i32_80 = arith.constant 0 : i32
    %96 = vector.broadcast %c0_i32_80 : i32 to vector<72x1xi32>
    %97 = arith.cmpi ne, %95, %96 : vector<72x1xi32>
    %c0_i32_81 = arith.constant 0 : i32
    %98 = vector.broadcast %c0_i32_81 : i32 to vector<72x1xi32>
    %99 = arith.cmpi slt, %95, %98 : vector<72x1xi32>
    %c0_i32_82 = arith.constant 0 : i32
    %100 = arith.cmpi slt, %93, %c0_i32_82 : i32
    %101 = vector.broadcast %100 : i1 to vector<72x1xi1>
    %102 = vector.broadcast %101 : vector<72x1xi1> to vector<72x1xi1>
    %103 = arith.xori %99, %102 : vector<72x1xi1>
    %104 = arith.andi %103, %97 : vector<72x1xi1>
    %105 = vector.broadcast %93 : i32 to vector<72x1xi32>
    %106 = arith.addi %95, %105 : vector<72x1xi32>
    %107 = arith.select %104, %106, %95 : vector<72x1xi1>, vector<72x1xi32>
    %c0_i32_83 = arith.constant 0 : i32
    %108 = vector.broadcast %c0_i32_83 : i32 to vector<72x1xi32>
    %109 = arith.cmpi ne, %107, %108 : vector<72x1xi32>
    %c7_i32 = arith.constant 7 : i32
    %110 = vector.broadcast %c7_i32 : i32 to vector<72x1xi32>
    %111 = arith.cmpi ne, %107, %110 : vector<72x1xi32>
    %c7_84 = arith.constant 7 : index
    %c0_85 = arith.constant 0 : index
    %112 = vector.load %arg15[%c7_84, %c0_85] : memref<96x24xf32, #tpu.memory_space<vmem>>, vector<72x24xf32>
    %cst_86 = arith.constant 0.000000e+00 : f32
    %113 = vector.shape_cast %109 : vector<72x1xi1> to vector<72x1xi1>
    %114 = vector.broadcast %113 : vector<72x1xi1> to vector<72x24xi1>
    %115 = vector.broadcast %cst_86 : f32 to vector<72x24xf32>
    %116 = arith.select %114, %112, %115 : vector<72x24xi1>, vector<72x24xf32>
    %c8_87 = arith.constant 8 : index
    %c0_88 = arith.constant 0 : index
    %117 = vector.load %arg15[%c8_87, %c0_88] : memref<96x24xf32, #tpu.memory_space<vmem>>, vector<72x24xf32>
    %c9_89 = arith.constant 9 : index
    %c0_90 = arith.constant 0 : index
    %118 = vector.load %arg15[%c9_89, %c0_90] : memref<96x24xf32, #tpu.memory_space<vmem>>, vector<72x24xf32>
    %cst_91 = arith.constant 0.000000e+00 : f32
    %119 = vector.shape_cast %111 : vector<72x1xi1> to vector<72x1xi1>
    %120 = vector.broadcast %119 : vector<72x1xi1> to vector<72x24xi1>
    %121 = vector.broadcast %cst_91 : f32 to vector<72x24xf32>
    %122 = arith.select %120, %118, %121 : vector<72x24xi1>, vector<72x24xf32>
    %c0_92 = arith.constant 0 : index
    %c0_93 = arith.constant 0 : index
    %123 = vector.load %arg16[%c0_92, %c0_93] : memref<72x96xf32, #tpu.memory_space<vmem>>, vector<72x24xf32>
    tpu.vector_store %arg16[%c0_92, %c0_93], %117 {strides = array<i32>} : memref<72x96xf32, #tpu.memory_space<vmem>>, vector<72x24xf32>,
    %c0_94 = arith.constant 0 : index
    %c24_95 = arith.constant 24 : index
    %124 = vector.load %arg16[%c0_94, %c24_95] : memref<72x96xf32, #tpu.memory_space<vmem>>, vector<72x24xf32>
    tpu.vector_store %arg16[%c0_94, %c24_95], %122 {strides = array<i32>} : memref<72x96xf32, #tpu.memory_space<vmem>>, vector<72x24xf32>,
    %c0_96 = arith.constant 0 : index
    %c0_97 = arith.constant 0 : index
    %125 = vector.load %arg17[%c0_96, %c0_97] : memref<72x96xf32, #tpu.memory_space<vmem>>, vector<72x24xf32>
    tpu.vector_store %arg17[%c0_96, %c0_97], %116 {strides = array<i32>} : memref<72x96xf32, #tpu.memory_space<vmem>>, vector<72x24xf32>,
    %c0_98 = arith.constant 0 : index
    %c24_99 = arith.constant 24 : index
    %126 = vector.load %arg17[%c0_98, %c24_99] : memref<72x96xf32, #tpu.memory_space<vmem>>, vector<72x24xf32>
    tpu.vector_store %arg17[%c0_98, %c24_99], %117 {strides = array<i32>} : memref<72x96xf32, #tpu.memory_space<vmem>>, vector<72x24xf32>,
    %c15 = arith.constant 15 : index
    %c0_100 = arith.constant 0 : index
    %127 = vector.load %arg15[%c15, %c0_100] : memref<96x24xf32, #tpu.memory_space<vmem>>, vector<72x24xf32>
    %cst_101 = arith.constant 0.000000e+00 : f32
    %128 = vector.shape_cast %109 : vector<72x1xi1> to vector<72x1xi1>
    %129 = vector.broadcast %128 : vector<72x1xi1> to vector<72x24xi1>
    %130 = vector.broadcast %cst_101 : f32 to vector<72x24xf32>
    %131 = arith.select %129, %127, %130 : vector<72x24xi1>, vector<72x24xf32>
    %c16_102 = arith.constant 16 : index
    %c0_103 = arith.constant 0 : index
    %132 = vector.load %arg15[%c16_102, %c0_103] : memref<96x24xf32, #tpu.memory_space<vmem>>, vector<72x24xf32>
    %c17 = arith.constant 17 : index
    %c0_104 = arith.constant 0 : index
    %133 = vector.load %arg15[%c17, %c0_104] : memref<96x24xf32, #tpu.memory_space<vmem>>, vector<72x24xf32>
    %cst_105 = arith.constant 0.000000e+00 : f32
    %134 = vector.shape_cast %111 : vector<72x1xi1> to vector<72x1xi1>
    %135 = vector.broadcast %134 : vector<72x1xi1> to vector<72x24xi1>
    %136 = vector.broadcast %cst_105 : f32 to vector<72x24xf32>
    %137 = arith.select %135, %133, %136 : vector<72x24xi1>, vector<72x24xf32>
    %c0_106 = arith.constant 0 : index
    %c48_107 = arith.constant 48 : index
    %138 = vector.load %arg16[%c0_106, %c48_107] : memref<72x96xf32, #tpu.memory_space<vmem>>, vector<72x24xf32>
    tpu.vector_store %arg16[%c0_106, %c48_107], %132 {strides = array<i32>} : memref<72x96xf32, #tpu.memory_space<vmem>>, vector<72x24xf32>,
    %c0_108 = arith.constant 0 : index
    %c72 = arith.constant 72 : index
    %139 = vector.load %arg16[%c0_108, %c72] : memref<72x96xf32, #tpu.memory_space<vmem>>, vector<72x24xf32>
    tpu.vector_store %arg16[%c0_108, %c72], %137 {strides = array<i32>} : memref<72x96xf32, #tpu.memory_space<vmem>>, vector<72x24xf32>,
    %c0_109 = arith.constant 0 : index
    %c48_110 = arith.constant 48 : index
    %140 = vector.load %arg17[%c0_109, %c48_110] : memref<72x96xf32, #tpu.memory_space<vmem>>, vector<72x24xf32>
    tpu.vector_store %arg17[%c0_109, %c48_110], %131 {strides = array<i32>} : memref<72x96xf32, #tpu.memory_space<vmem>>, vector<72x24xf32>,
    %c0_111 = arith.constant 0 : index
    %c72_112 = arith.constant 72 : index
    %141 = vector.load %arg17[%c0_111, %c72_112] : memref<72x96xf32, #tpu.memory_space<vmem>>, vector<72x24xf32>
    tpu.vector_store %arg17[%c0_111, %c72_112], %132 {strides = array<i32>} : memref<72x96xf32, #tpu.memory_space<vmem>>, vector<72x24xf32>,
    %c0_113 = arith.constant 0 : index
    %c0_114 = arith.constant 0 : index
    %142 = vector.load %arg17[%c0_113, %c0_114] : memref<72x96xf32, #tpu.memory_space<vmem>>, vector<64x96xf32>
    %c0_115 = arith.constant 0 : index
    %c0_116 = arith.constant 0 : index
    %c0_117 = arith.constant 0 : index
    %143 = vector.load %arg4[%c0_115, %c0_116, %c0_117] : memref<4x96x12xf32, #tpu.memory_space<vmem>>, vector<1x96x12xf32>
    %144 = vector.shape_cast %143 : vector<1x96x12xf32> to vector<96x12xf32>
    %cst_118 = arith.constant dense<0.000000e+00> : vector<64x12xf32>
    %145 = tpu.matmul %142, %144, %cst_118 {dimension_numbers = #tpu.dot_dimension_numbers<[1], [0], [0], [1], [0, 0, 1, 1], [], []>} : vector<64x96xf32>, vector<96x12xf32>, vector<64x12xf32> -> vector<64x12xf32>
    %c0_119 = arith.constant 0 : index
    %c0_120 = arith.constant 0 : index
    %146 = vector.load %arg16[%c0_119, %c0_120] : memref<72x96xf32, #tpu.memory_space<vmem>>, vector<64x96xf32>
    %c1_121 = arith.constant 1 : index
    %c0_122 = arith.constant 0 : index
    %c0_123 = arith.constant 0 : index
    %147 = vector.load %arg4[%c1_121, %c0_122, %c0_123] : memref<4x96x12xf32, #tpu.memory_space<vmem>>, vector<1x96x12xf32>
    %148 = vector.shape_cast %147 : vector<1x96x12xf32> to vector<96x12xf32>
    %cst_124 = arith.constant dense<0.000000e+00> : vector<64x12xf32>
    %149 = tpu.matmul %146, %148, %cst_124 {dimension_numbers = #tpu.dot_dimension_numbers<[1], [0], [0], [1], [0, 0, 1, 1], [], []>} : vector<64x96xf32>, vector<96x12xf32>, vector<64x12xf32> -> vector<64x12xf32>
    %c8_125 = arith.constant 8 : index
    %c0_126 = arith.constant 0 : index
    %150 = vector.load %arg17[%c8_125, %c0_126] : memref<72x96xf32, #tpu.memory_space<vmem>>, vector<64x96xf32>
    %c2_127 = arith.constant 2 : index
    %c0_128 = arith.constant 0 : index
    %c0_129 = arith.constant 0 : index
    %151 = vector.load %arg4[%c2_127, %c0_128, %c0_129] : memref<4x96x12xf32, #tpu.memory_space<vmem>>, vector<1x96x12xf32>
    %152 = vector.shape_cast %151 : vector<1x96x12xf32> to vector<96x12xf32>
    %cst_130 = arith.constant dense<0.000000e+00> : vector<64x12xf32>
    %153 = tpu.matmul %150, %152, %cst_130 {dimension_numbers = #tpu.dot_dimension_numbers<[1], [0], [0], [1], [0, 0, 1, 1], [], []>} : vector<64x96xf32>, vector<96x12xf32>, vector<64x12xf32> -> vector<64x12xf32>
    %c8_131 = arith.constant 8 : index
    %c0_132 = arith.constant 0 : index
    %154 = vector.load %arg16[%c8_131, %c0_132] : memref<72x96xf32, #tpu.memory_space<vmem>>, vector<64x96xf32>
    %c3_133 = arith.constant 3 : index
    %c0_134 = arith.constant 0 : index
    %c0_135 = arith.constant 0 : index
    %155 = vector.load %arg4[%c3_133, %c0_134, %c0_135] : memref<4x96x12xf32, #tpu.memory_space<vmem>>, vector<1x96x12xf32>
    %156 = vector.shape_cast %155 : vector<1x96x12xf32> to vector<96x12xf32>
    %cst_136 = arith.constant dense<0.000000e+00> : vector<64x12xf32>
    %157 = tpu.matmul %154, %156, %cst_136 {dimension_numbers = #tpu.dot_dimension_numbers<[1], [0], [0], [1], [0, 0, 1, 1], [], []>} : vector<64x96xf32>, vector<96x12xf32>, vector<64x12xf32> -> vector<64x12xf32>
    %c0_137 = arith.constant 0 : index
    %c0_138 = arith.constant 0 : index
    %158 = vector.load %arg18[%c0_137, %c0_138] : memref<256x12xf32, #tpu.memory_space<vmem>>, vector<64x12xf32>
    tpu.vector_store %arg18[%c0_137, %c0_138], %145 {strides = array<i32>} : memref<256x12xf32, #tpu.memory_space<vmem>>, vector<64x12xf32>,
    %c64 = arith.constant 64 : index
    %c0_139 = arith.constant 0 : index
    %159 = vector.load %arg18[%c64, %c0_139] : memref<256x12xf32, #tpu.memory_space<vmem>>, vector<64x12xf32>
    tpu.vector_store %arg18[%c64, %c0_139], %149 {strides = array<i32>} : memref<256x12xf32, #tpu.memory_space<vmem>>, vector<64x12xf32>,
    %c128 = arith.constant 128 : index
    %c0_140 = arith.constant 0 : index
    %160 = vector.load %arg18[%c128, %c0_140] : memref<256x12xf32, #tpu.memory_space<vmem>>, vector<64x12xf32>
    tpu.vector_store %arg18[%c128, %c0_140], %153 {strides = array<i32>} : memref<256x12xf32, #tpu.memory_space<vmem>>, vector<64x12xf32>,
    %c192 = arith.constant 192 : index
    %c0_141 = arith.constant 0 : index
    %161 = vector.load %arg18[%c192, %c0_141] : memref<256x12xf32, #tpu.memory_space<vmem>>, vector<64x12xf32>
    tpu.vector_store %arg18[%c192, %c0_141], %157 {strides = array<i32>} : memref<256x12xf32, #tpu.memory_space<vmem>>, vector<64x12xf32>,
    %c0_142 = arith.constant 0 : index
    %c0_143 = arith.constant 0 : index
    %162 = vector.load %arg18[%c0_142, %c0_143] : memref<256x12xf32, #tpu.memory_space<vmem>>, vector<256x12xf32>
    %c0_144 = arith.constant 0 : index
    %c0_145 = arith.constant 0 : index
    %163 = vector.load %arg5[%c0_144, %c0_145] : memref<1x12xf32, #tpu.memory_space<vmem>>, vector<1x12xf32>
    %164 = vector.broadcast %163 : vector<1x12xf32> to vector<256x12xf32>
    %165 = arith.addf %162, %164 : vector<256x12xf32>
    %cst_146 = arith.constant 0.000000e+00 : f32
    %166 = vector.broadcast %cst_146 : f32 to vector<256x12xf32>
    %167 = arith.maximumf %165, %166 : vector<256x12xf32>
    %c0_147 = arith.constant 0 : index
    %c0_148 = arith.constant 0 : index
    %168 = vector.load %arg9[%c0_147, %c0_148] : memref<256x256xf32, #tpu.memory_space<vmem>>, vector<256x256xf32>
    %cst_149 = arith.constant dense<0.000000e+00> : vector<256x12xf32>
    %169 = tpu.matmul %168, %167, %cst_149 {dimension_numbers = #tpu.dot_dimension_numbers<[1], [0], [0], [1], [0, 0, 1, 1], [], []>, precision = #tpu.contract_precision<fp32>} : vector<256x256xf32>, vector<256x12xf32>, vector<256x12xf32> -> vector<256x12xf32>
    %cst_150 = arith.constant 0.000000e+00 : f32
    %170 = vector.broadcast %cst_150 : f32 to vector<32x12xf32>
    %c0_151 = arith.constant 0 : index
    %c0_152 = arith.constant 0 : index
    %171 = vector.load %arg19[%c0_151, %c0_152] : memref<320x12xf32, #tpu.memory_space<vmem>>, vector<32x12xf32>
    tpu.vector_store %arg19[%c0_151, %c0_152], %170 {strides = array<i32>} : memref<320x12xf32, #tpu.memory_space<vmem>>, vector<32x12xf32>,
    %cst_153 = arith.constant 0.000000e+00 : f32
    %172 = vector.broadcast %cst_153 : f32 to vector<32x12xf32>
    %c288 = arith.constant 288 : index
    %c0_154 = arith.constant 0 : index
    %173 = vector.load %arg19[%c288, %c0_154] : memref<320x12xf32, #tpu.memory_space<vmem>>, vector<32x12xf32>
    tpu.vector_store %arg19[%c288, %c0_154], %172 {strides = array<i32>} : memref<320x12xf32, #tpu.memory_space<vmem>>, vector<32x12xf32>,
    %c32_155 = arith.constant 32 : index
    %c0_156 = arith.constant 0 : index
    %174 = vector.load %arg19[%c32_155, %c0_156] : memref<320x12xf32, #tpu.memory_space<vmem>>, vector<256x12xf32>
    tpu.vector_store %arg19[%c32_155, %c0_156], %169 {strides = array<i32>} : memref<320x12xf32, #tpu.memory_space<vmem>>, vector<256x12xf32>,
    %175 = tpu.iota {dimensions = array<i32: 0>} : vector<272x1xi32>
    %c16_i32 = arith.constant 16 : i32
    %c0_i32_157 = arith.constant 0 : i32
    %176 = arith.cmpi eq, %c16_i32, %c0_i32_157 : i32
    %c1_i32_158 = arith.constant 1 : i32
    %177 = arith.select %176, %c1_i32_158, %c16_i32 : i32
    %178 = vector.broadcast %177 : i32 to vector<272x1xi32>
    %179 = arith.remsi %175, %178 : vector<272x1xi32>
    %c0_i32_159 = arith.constant 0 : i32
    %180 = vector.broadcast %c0_i32_159 : i32 to vector<272x1xi32>
    %181 = arith.cmpi ne, %179, %180 : vector<272x1xi32>
    %c0_i32_160 = arith.constant 0 : i32
    %182 = vector.broadcast %c0_i32_160 : i32 to vector<272x1xi32>
    %183 = arith.cmpi slt, %179, %182 : vector<272x1xi32>
    %c0_i32_161 = arith.constant 0 : i32
    %184 = arith.cmpi slt, %177, %c0_i32_161 : i32
    %185 = vector.broadcast %184 : i1 to vector<272x1xi1>
    %186 = vector.broadcast %185 : vector<272x1xi1> to vector<272x1xi1>
    %187 = arith.xori %183, %186 : vector<272x1xi1>
    %188 = arith.andi %187, %181 : vector<272x1xi1>
    %189 = vector.broadcast %177 : i32 to vector<272x1xi32>
    %190 = arith.addi %179, %189 : vector<272x1xi32>
    %191 = arith.select %188, %190, %179 : vector<272x1xi1>, vector<272x1xi32>
    %c0_i32_162 = arith.constant 0 : i32
    %192 = vector.broadcast %c0_i32_162 : i32 to vector<272x1xi32>
    %193 = arith.cmpi ne, %191, %192 : vector<272x1xi32>
    %c15_i32 = arith.constant 15 : i32
    %194 = vector.broadcast %c15_i32 : i32 to vector<272x1xi32>
    %195 = arith.cmpi ne, %191, %194 : vector<272x1xi32>
    %c15_163 = arith.constant 15 : index
    %c0_164 = arith.constant 0 : index
    %196 = vector.load %arg19[%c15_163, %c0_164] : memref<320x12xf32, #tpu.memory_space<vmem>>, vector<272x12xf32>
    %cst_165 = arith.constant 0.000000e+00 : f32
    %197 = vector.shape_cast %193 : vector<272x1xi1> to vector<272x1xi1>
    %198 = vector.broadcast %197 : vector<272x1xi1> to vector<272x12xi1>
    %199 = vector.broadcast %cst_165 : f32 to vector<272x12xf32>
    %200 = arith.select %198, %196, %199 : vector<272x12xi1>, vector<272x12xf32>
    %c16_166 = arith.constant 16 : index
    %c0_167 = arith.constant 0 : index
    %201 = vector.load %arg19[%c16_166, %c0_167] : memref<320x12xf32, #tpu.memory_space<vmem>>, vector<272x12xf32>
    %c17_168 = arith.constant 17 : index
    %c0_169 = arith.constant 0 : index
    %202 = vector.load %arg19[%c17_168, %c0_169] : memref<320x12xf32, #tpu.memory_space<vmem>>, vector<272x12xf32>
    %cst_170 = arith.constant 0.000000e+00 : f32
    %203 = vector.shape_cast %195 : vector<272x1xi1> to vector<272x1xi1>
    %204 = vector.broadcast %203 : vector<272x1xi1> to vector<272x12xi1>
    %205 = vector.broadcast %cst_170 : f32 to vector<272x12xf32>
    %206 = arith.select %204, %202, %205 : vector<272x12xi1>, vector<272x12xf32>
    %c0_171 = arith.constant 0 : index
    %c0_172 = arith.constant 0 : index
    %207 = vector.load %arg20[%c0_171, %c0_172] : memref<272x48xf32, #tpu.memory_space<vmem>>, vector<272x12xf32>
    tpu.vector_store %arg20[%c0_171, %c0_172], %201 {strides = array<i32>} : memref<272x48xf32, #tpu.memory_space<vmem>>, vector<272x12xf32>,
    %c0_173 = arith.constant 0 : index
    %c12 = arith.constant 12 : index
    %208 = vector.load %arg20[%c0_173, %c12] : memref<272x48xf32, #tpu.memory_space<vmem>>, vector<272x12xf32>
    tpu.vector_store %arg20[%c0_173, %c12], %206 {strides = array<i32>} : memref<272x48xf32, #tpu.memory_space<vmem>>, vector<272x12xf32>,
    %c0_174 = arith.constant 0 : index
    %c0_175 = arith.constant 0 : index
    %209 = vector.load %arg21[%c0_174, %c0_175] : memref<272x48xf32, #tpu.memory_space<vmem>>, vector<272x12xf32>
    tpu.vector_store %arg21[%c0_174, %c0_175], %200 {strides = array<i32>} : memref<272x48xf32, #tpu.memory_space<vmem>>, vector<272x12xf32>,
    %c0_176 = arith.constant 0 : index
    %c12_177 = arith.constant 12 : index
    %210 = vector.load %arg21[%c0_176, %c12_177] : memref<272x48xf32, #tpu.memory_space<vmem>>, vector<272x12xf32>
    tpu.vector_store %arg21[%c0_176, %c12_177], %201 {strides = array<i32>} : memref<272x48xf32, #tpu.memory_space<vmem>>, vector<272x12xf32>,
    %c31 = arith.constant 31 : index
    %c0_178 = arith.constant 0 : index
    %211 = vector.load %arg19[%c31, %c0_178] : memref<320x12xf32, #tpu.memory_space<vmem>>, vector<272x12xf32>
    %cst_179 = arith.constant 0.000000e+00 : f32
    %212 = vector.shape_cast %193 : vector<272x1xi1> to vector<272x1xi1>
    %213 = vector.broadcast %212 : vector<272x1xi1> to vector<272x12xi1>
    %214 = vector.broadcast %cst_179 : f32 to vector<272x12xf32>
    %215 = arith.select %213, %211, %214 : vector<272x12xi1>, vector<272x12xf32>
    %c32_180 = arith.constant 32 : index
    %c0_181 = arith.constant 0 : index
    %216 = vector.load %arg19[%c32_180, %c0_181] : memref<320x12xf32, #tpu.memory_space<vmem>>, vector<272x12xf32>
    %c33 = arith.constant 33 : index
    %c0_182 = arith.constant 0 : index
    %217 = vector.load %arg19[%c33, %c0_182] : memref<320x12xf32, #tpu.memory_space<vmem>>, vector<272x12xf32>
    %cst_183 = arith.constant 0.000000e+00 : f32
    %218 = vector.shape_cast %195 : vector<272x1xi1> to vector<272x1xi1>
    %219 = vector.broadcast %218 : vector<272x1xi1> to vector<272x12xi1>
    %220 = vector.broadcast %cst_183 : f32 to vector<272x12xf32>
    %221 = arith.select %219, %217, %220 : vector<272x12xi1>, vector<272x12xf32>
    %c0_184 = arith.constant 0 : index
    %c24_185 = arith.constant 24 : index
    %222 = vector.load %arg20[%c0_184, %c24_185] : memref<272x48xf32, #tpu.memory_space<vmem>>, vector<272x12xf32>
    tpu.vector_store %arg20[%c0_184, %c24_185], %216 {strides = array<i32>} : memref<272x48xf32, #tpu.memory_space<vmem>>, vector<272x12xf32>,
    %c0_186 = arith.constant 0 : index
    %c36 = arith.constant 36 : index
    %223 = vector.load %arg20[%c0_186, %c36] : memref<272x48xf32, #tpu.memory_space<vmem>>, vector<272x12xf32>
    tpu.vector_store %arg20[%c0_186, %c36], %221 {strides = array<i32>} : memref<272x48xf32, #tpu.memory_space<vmem>>, vector<272x12xf32>,
    %c0_187 = arith.constant 0 : index
    %c24_188 = arith.constant 24 : index
    %224 = vector.load %arg21[%c0_187, %c24_188] : memref<272x48xf32, #tpu.memory_space<vmem>>, vector<272x12xf32>
    tpu.vector_store %arg21[%c0_187, %c24_188], %215 {strides = array<i32>} : memref<272x48xf32, #tpu.memory_space<vmem>>, vector<272x12xf32>,
    %c0_189 = arith.constant 0 : index
    %c36_190 = arith.constant 36 : index
    %225 = vector.load %arg21[%c0_189, %c36_190] : memref<272x48xf32, #tpu.memory_space<vmem>>, vector<272x12xf32>
    tpu.vector_store %arg21[%c0_189, %c36_190], %216 {strides = array<i32>} : memref<272x48xf32, #tpu.memory_space<vmem>>, vector<272x12xf32>,
    %c0_191 = arith.constant 0 : index
    %c0_192 = arith.constant 0 : index
    %226 = vector.load %arg21[%c0_191, %c0_192] : memref<272x48xf32, #tpu.memory_space<vmem>>, vector<256x48xf32>
    %c0_193 = arith.constant 0 : index
    %c0_194 = arith.constant 0 : index
    %c0_195 = arith.constant 0 : index
    %227 = vector.load %arg6[%c0_193, %c0_194, %c0_195] : memref<4x48x12xf32, #tpu.memory_space<vmem>>, vector<1x48x12xf32>
    %228 = vector.shape_cast %227 : vector<1x48x12xf32> to vector<48x12xf32>
    %cst_196 = arith.constant dense<0.000000e+00> : vector<256x12xf32>
    %229 = tpu.matmul %226, %228, %cst_196 {dimension_numbers = #tpu.dot_dimension_numbers<[1], [0], [0], [1], [0, 0, 1, 1], [], []>} : vector<256x48xf32>, vector<48x12xf32>, vector<256x12xf32> -> vector<256x12xf32>
    %c0_197 = arith.constant 0 : index
    %c0_198 = arith.constant 0 : index
    %230 = vector.load %arg20[%c0_197, %c0_198] : memref<272x48xf32, #tpu.memory_space<vmem>>, vector<256x48xf32>
    %c1_199 = arith.constant 1 : index
    %c0_200 = arith.constant 0 : index
    %c0_201 = arith.constant 0 : index
    %231 = vector.load %arg6[%c1_199, %c0_200, %c0_201] : memref<4x48x12xf32, #tpu.memory_space<vmem>>, vector<1x48x12xf32>
    %232 = vector.shape_cast %231 : vector<1x48x12xf32> to vector<48x12xf32>
    %cst_202 = arith.constant dense<0.000000e+00> : vector<256x12xf32>
    %233 = tpu.matmul %230, %232, %cst_202 {dimension_numbers = #tpu.dot_dimension_numbers<[1], [0], [0], [1], [0, 0, 1, 1], [], []>} : vector<256x48xf32>, vector<48x12xf32>, vector<256x12xf32> -> vector<256x12xf32>
    %c16_203 = arith.constant 16 : index
    %c0_204 = arith.constant 0 : index
    %234 = vector.load %arg21[%c16_203, %c0_204] : memref<272x48xf32, #tpu.memory_space<vmem>>, vector<256x48xf32>
    %c2_205 = arith.constant 2 : index
    %c0_206 = arith.constant 0 : index
    %c0_207 = arith.constant 0 : index
    %235 = vector.load %arg6[%c2_205, %c0_206, %c0_207] : memref<4x48x12xf32, #tpu.memory_space<vmem>>, vector<1x48x12xf32>
    %236 = vector.shape_cast %235 : vector<1x48x12xf32> to vector<48x12xf32>
    %cst_208 = arith.constant dense<0.000000e+00> : vector<256x12xf32>
    %237 = tpu.matmul %234, %236, %cst_208 {dimension_numbers = #tpu.dot_dimension_numbers<[1], [0], [0], [1], [0, 0, 1, 1], [], []>} : vector<256x48xf32>, vector<48x12xf32>, vector<256x12xf32> -> vector<256x12xf32>
    %c16_209 = arith.constant 16 : index
    %c0_210 = arith.constant 0 : index
    %238 = vector.load %arg20[%c16_209, %c0_210] : memref<272x48xf32, #tpu.memory_space<vmem>>, vector<256x48xf32>
    %c3_211 = arith.constant 3 : index
    %c0_212 = arith.constant 0 : index
    %c0_213 = arith.constant 0 : index
    %239 = vector.load %arg6[%c3_211, %c0_212, %c0_213] : memref<4x48x12xf32, #tpu.memory_space<vmem>>, vector<1x48x12xf32>
    %240 = vector.shape_cast %239 : vector<1x48x12xf32> to vector<48x12xf32>
    %cst_214 = arith.constant dense<0.000000e+00> : vector<256x12xf32>
    %241 = tpu.matmul %238, %240, %cst_214 {dimension_numbers = #tpu.dot_dimension_numbers<[1], [0], [0], [1], [0, 0, 1, 1], [], []>} : vector<256x48xf32>, vector<48x12xf32>, vector<256x12xf32> -> vector<256x12xf32>
    %242 = arith.addf %229, %233 : vector<256x12xf32>
    %243 = arith.addf %242, %237 : vector<256x12xf32>
    %244 = arith.addf %243, %241 : vector<256x12xf32>
    %c0_215 = arith.constant 0 : index
    %c0_216 = arith.constant 0 : index
    %245 = vector.load %arg7[%c0_215, %c0_216] : memref<1x12xf32, #tpu.memory_space<vmem>>, vector<1x12xf32>
    %246 = vector.broadcast %245 : vector<1x12xf32> to vector<256x12xf32>
    %247 = arith.addf %244, %246 : vector<256x12xf32>
    %cst_217 = arith.constant 0.000000e+00 : f32
    %248 = vector.broadcast %cst_217 : f32 to vector<256x12xf32>
    %249 = arith.subf %248, %247 : vector<256x12xf32>
    %250 = math.exp %249 : vector<256x12xf32>
    %cst_218 = arith.constant 1.000000e+00 : f32
    %251 = vector.broadcast %cst_218 : f32 to vector<256x12xf32>
    %252 = arith.addf %251, %250 : vector<256x12xf32>
    %253 = tpu.reciprocal %252 : vector<256x12xf32> -> vector<256x12xf32>
    %c0_219 = arith.constant 0 : index
    %c0_220 = arith.constant 0 : index
    %c0_221 = arith.constant 0 : index
    %254 = vector.load %arg10[%c0_219, %c0_220, %c0_221] : memref<1x256x12xf32, #tpu.memory_space<vmem>>, vector<1x256x12xf32>
    %255 = vector.shape_cast %254 : vector<1x256x12xf32> to vector<256x12xf32>
    %256 = vector.shape_cast %253 : vector<256x12xf32> to vector<1x256x12xf32>
    tpu.vector_store %arg10[%c0_219, %c0_220, %c0_221], %256 {strides = array<i32>} : memref<1x256x12xf32, #tpu.memory_space<vmem>>, vector<1x256x12xf32>,
    return
  }
  func.func @transform_0(%arg0: i32) -> (i32, i32, i32) {
    %c0_i32 = arith.constant 0 : i32
    %c0_i32_0 = arith.constant 0 : i32
    %c0_i32_1 = arith.constant 0 : i32
    return %arg0, %c0_i32, %c0_i32_0 : i32, i32, i32
  }
  func.func @transform_1(%arg0: i32) -> (i32, i32, i32) {
    %c0_i32 = arith.constant 0 : i32
    %c0_i32_0 = arith.constant 0 : i32
    %c0_i32_1 = arith.constant 0 : i32
    %c0_i32_2 = arith.constant 0 : i32
    return %c0_i32, %c0_i32_0, %c0_i32_1 : i32, i32, i32
  }
  func.func @transform_2(%arg0: i32) -> (i32, i32) {
    %c0_i32 = arith.constant 0 : i32
    %c0_i32_0 = arith.constant 0 : i32
    %c0_i32_1 = arith.constant 0 : i32
    return %c0_i32, %c0_i32_0 : i32, i32
  }
  func.func @transform_3(%arg0: i32) -> (i32, i32, i32) {
    %c0_i32 = arith.constant 0 : i32
    %c0_i32_0 = arith.constant 0 : i32
    %c0_i32_1 = arith.constant 0 : i32
    %c0_i32_2 = arith.constant 0 : i32
    return %c0_i32, %c0_i32_0, %c0_i32_1 : i32, i32, i32
  }
  func.func @transform_4(%arg0: i32) -> (i32, i32) {
    %c0_i32 = arith.constant 0 : i32
    %c0_i32_0 = arith.constant 0 : i32
    %c0_i32_1 = arith.constant 0 : i32
    return %c0_i32, %c0_i32_0 : i32, i32
  }
  func.func @transform_5(%arg0: i32) -> (i32, i32, i32) {
    %c0_i32 = arith.constant 0 : i32
    %c0_i32_0 = arith.constant 0 : i32
    %c0_i32_1 = arith.constant 0 : i32
    %c0_i32_2 = arith.constant 0 : i32
    return %c0_i32, %c0_i32_0, %c0_i32_1 : i32, i32, i32
  }
  func.func @transform_6(%arg0: i32) -> (i32, i32) {
    %c0_i32 = arith.constant 0 : i32
    %c0_i32_0 = arith.constant 0 : i32
    %c0_i32_1 = arith.constant 0 : i32
    return %c0_i32, %c0_i32_0 : i32, i32
  }
  func.func @transform_7(%arg0: i32) -> (i32, i32) {
    %c0_i32 = arith.constant 0 : i32
    %c0_i32_0 = arith.constant 0 : i32
    %c0_i32_1 = arith.constant 0 : i32
    return %c0_i32, %c0_i32_0 : i32, i32
  }
  func.func @transform_8(%arg0: i32) -> (i32, i32) {
    %c0_i32 = arith.constant 0 : i32
    %c0_i32_0 = arith.constant 0 : i32
    %c0_i32_1 = arith.constant 0 : i32
    return %c0_i32, %c0_i32_0 : i32, i32
  }
  func.func @transform_9(%arg0: i32) -> (i32, i32, i32) {
    %c0_i32 = arith.constant 0 : i32
    %c0_i32_0 = arith.constant 0 : i32
    %c0_i32_1 = arith.constant 0 : i32
    return %arg0, %c0_i32, %c0_i32_0 : i32, i32, i32
  }
}

</mosaic_0001>

<bundles_post_ra>
// kernel: cifar10_decoder.1
= control target key start
LH: loop header
LB: loop body
LE: loop exit
PB: predicated region body
PF: predicated region fallthrough
CT: control target
= control target key end

     0   :  { %s17534_s0 = inlined_call_operand.hbm [shape: f32[2,16,48], index: 0, kind: input, shape index: {}]   ;;  %s17535_s1 = inlined_call_operand.vmem [shape: f32[4,192,24], index: 1, kind: input, shape index: {}]   ;;  %s17536_s2 = inlined_call_operand.hbm [shape: f32[1,24], index: 2, kind: input, shape index: {}]   ;;  %s17537_s3 = inlined_call_operand.vmem [shape: f32[4,96,12], index: 3, kind: input, shape index: {}]   ;;  %s17538_s4 = inlined_call_operand.hbm [shape: f32[1,12], index: 4, kind: input, shape index: {}]   ;;  %s17539_s5 = inlined_call_operand.vmem [shape: f32[4,48,12], index: 5, kind: input, shape index: {}]   ;;  %s17540_s6 = inlined_call_operand.hbm [shape: f32[1,12], index: 6, kind: input, shape index: {}]   ;;  %s17541_s7 = inlined_call_operand.hbm [shape: f32[64,64], index: 7, kind: input, shape index: {}]   ;;  %s17542_s8 = inlined_call_operand.hbm [shape: f32[256,256], index: 8, kind: input, shape index: {}]   ;;  %s17543_s9 = inlined_call_operand.vmem [shape: f32[2,256,12], index: 9, kind: output, shape index: {}]  }
   0x1   :  { %17787 = sst [smem:[#allocation145_spill]] %s17536_s2 }
   0x2   :  { %14 = vsyncpa [#allocation14], 0 }
   0x3   :  { %16 = vsyncpa [#allocation14 + $0x1], 0 }
   0x4   :  { %17 = vsyncpa [#allocation16], 0 }
   0x5   :  { %18 = vsyncpa [#allocation19], 0 }
   0x6   :  { %19 = vsyncpa [#allocation22], 0  ;;  %s12698_s30 = smov 0   ;;  %s12700_s10 = smov 0  }
   0x7   :  { %s12702_s11 = smov 0   ;;  %s12704_s12 = smov 0  }
   0x8 LB: > { %s12629_s13 = smov [#allocation15]   ;;  %s12719_s15 = sadd.s32 4294967295, %s12627_s12   ;;  %s12627_s12 = sphi %s12704_s12, %s18573_s12   ;;  %s12623_s11 = sphi %s12702_s11, %s18572_s11   ;;  %s12619_s10 = sphi %s12700_s10, %s18571_s10   ;;  %s12615_s30 = sphi %s12698_s30, %s18570_s30  }
   0x9   : > { %s266_s14 = sshll.u32 %s12629_s13, 4  ;;  %p9884_p0 = scmp.ge.s32.totalorder %s12627_s12, 1  ;;  %s12724_s14 = int_to_ptr.vmem [resolvable:$true] %s266_s14 }
   0xa   : > { %p17544_p1 = scmp.eq.s32.totalorder %s12719_s15, 0  ;;  %p250_p2 = scmp.lt.s32.totalorder %s12627_s12, 3 }
   0xb   : > { %s12630_s17 = smov [#allocation18]   ;;  %s12631_s19 = smov [#allocation17]  }
   0xc   : > { %p12726_p3 = pnand %p9884_p0, %p250_p2  ;;  %s294_s18 = sshll.u32 %s12630_s17, 4  ;;  %s12732_s18 = int_to_ptr.vmem [resolvable:$true] %s294_s18 }
   0xd   : > { %s280_s20 = sshll.u32 %s12631_s19, 4  ;;  %s12632_s22 = smov [#allocation20]   ;;  %s12740_s20 = int_to_ptr.vmem [resolvable:$true] %s280_s20 }
   0xe   : > { %s17788_s16 = scalar_select %p12726_p3, 1, 0 }
   0xf   : > { %p12202_p4 = pneg %p12726_p3  ;;  %s12742_s23 = sshll.u32 %s12632_s22, 4  ;;  %s305_s23 = int_to_ptr.vmem [resolvable:$true] %s12742_s23 }
  0x10   : > { %s17790_s2 = sld [smem:[#allocation145_spill]] }
  0x11   : > { %p12736_p5 = pnand %p12202_p4, %p17544_p1 }
  0x13   : > { %p12752_p7 = pneg %p12736_p5 }
  0x16   : > { %s12411_s26 = scalar_lea.hbm %s17790_s2, 16 }
  0x17   : > { %p12412_p6 = scmp.ne.s32.totalorder %s17790_s2, %s12411_s26  ;;  %p12418_p10 = scmp.lt.u32.totalorder %s12411_s26, %s17790_s2 }
  0x19   : > { %p12414_p8 = pnand %p12752_p7, %p12412_p6 }
  0x1b   : > { %p12415_p9 = pneg %p12414_p8 }
  0x1d   : > { %p12420_p11 = pnand %p12418_p10, %p12415_p9 }
  0x1f   : > { %12423 = shalt.err (!%p12420_p11)
}
  0x20   : > { %s12424_s19 = scalar_lea.vmem %s12724_s14, 16  ;;  %s12431_s22 = scalar_lea.vmem %s12724_s14, 32 }
  0x21   : > { %p12425_p12 = scmp.ne.s32.totalorder %s12724_s14, %s12424_s19  ;;  %p12432_p2 = scmp.lt.s32.totalorder %s12724_s14, %s12724_s14 }
  0x22   : > { %p12433_p4 = scmp.lt.s32.totalorder %s12431_s22, %s12424_s19 }
  0x23   : > { %p12427_p13 = pnand %p12425_p12, %p12752_p7 }
  0x24   : > { %p12434_p6 = por %p12433_p4, %p12432_p2 }
  0x25   : > { %p12428_p0 = pneg %p12427_p13 }
  0x27   : > { %p12435_p8 = pnand %p12434_p6, %p12428_p0 }
  0x29   : > { %12438 = shalt.err (!%p12435_p8)
}
  0x2a   : > { %12205 = dma.hbm_to_vmem [thread:$0]  (!%p12736_p5), %s17790_s2, 16, %s12724_s14, [#allocation16]  }
  0x2b   : > { %s12439_s28 = scalar_lea.hbm %s17540_s6, 16 }
  0x2c   : > { %p12440_p9 = scmp.ne.s32.totalorder %s17540_s6, %s12439_s28  ;;  %p12446_p12 = scmp.lt.u32.totalorder %s12439_s28, %s17540_s6 }
  0x2e   : > { %p12442_p10 = pnand %p12440_p9, %p12752_p7 }
  0x30   : > { %p12443_p11 = pneg %p12442_p10 }
  0x32   : > { %p12448_p13 = pnand %p12446_p12, %p12443_p11 }
  0x34   : > { %12451 = shalt.err (!%p12448_p13)
}
  0x35   : > { %s12452_s14 = scalar_lea.vmem %s12732_s18, 16  ;;  %s12459_s24 = scalar_lea.vmem %s12732_s18, 32 }
  0x36   : > { %p12453_p0 = scmp.ne.s32.totalorder %s12732_s18, %s12452_s14  ;;  %p12460_p6 = scmp.lt.s32.totalorder %s12732_s18, %s12732_s18 }
  0x37   : > { %p12461_p8 = scmp.lt.s32.totalorder %s12459_s24, %s12452_s14 }
  0x38   : > { %p12455_p2 = pnand %p12453_p0, %p12752_p7 }
  0x39   : > { %p12462_p9 = por %p12461_p8, %p12460_p6 }
  0x3a   : > { %p12456_p4 = pneg %p12455_p2 }
  0x3c   : > { %p12463_p10 = pnand %p12462_p9, %p12456_p4 }
  0x3e   : > { %12466 = shalt.err (!%p12463_p10)
}
  0x3f   : > { %12211 = dma.hbm_to_vmem [thread:$0]  (!%p12736_p5), %s17540_s6, 16, %s12732_s18, [#allocation19]  }
  0x40   : > { %s12467_s13 = scalar_lea.hbm %s17538_s4, 16 }
  0x41   : > { %p12468_p11 = scmp.ne.s32.totalorder %s17538_s4, %s12467_s13  ;;  %p12474_p0 = scmp.lt.u32.totalorder %s12467_s13, %s17538_s4 }
  0x43   : > { %p12470_p12 = pnand %p12468_p11, %p12752_p7 }
  0x45   : > { %p12471_p13 = pneg %p12470_p12 }
  0x47   : > { %p12476_p2 = pnand %p12474_p0, %p12471_p13 }
  0x49   : > { %12479 = shalt.err (!%p12476_p2)
}
  0x4a   : > { %s12480_s18 = scalar_lea.vmem %s12740_s20, 16  ;;  %s12487_s24 = scalar_lea.vmem %s12740_s20, 32 }
  0x4b   : > { %p12481_p4 = scmp.ne.s32.totalorder %s12740_s20, %s12480_s18  ;;  %p12488_p9 = scmp.lt.s32.totalorder %s12740_s20, %s12740_s20 }
  0x4c   : > { %p12489_p10 = scmp.lt.s32.totalorder %s12487_s24, %s12480_s18 }
  0x4d   : > { %p12483_p6 = pnand %p12481_p4, %p12752_p7 }
  0x4e   : > { %p12490_p11 = por %p12489_p10, %p12488_p9 }
  0x4f   : > { %p12484_p8 = pneg %p12483_p6 }
  0x51   : > { %p12491_p12 = pnand %p12490_p11, %p12484_p8 }
  0x53   : > { %12494 = shalt.err (!%p12491_p12)
}
  0x54   : > { %12208 = dma.hbm_to_vmem [thread:$0]  (!%p12736_p5), %s17538_s4, 16, %s12740_s20, [#allocation16]  }
  0x55   : > { %s12495_s13 = scalar_lea.hbm %s17541_s7, 1024 }
  0x56   : > { %p12496_p13 = scmp.ne.s32.totalorder %s17541_s7, %s12495_s13  ;;  %p12502_p4 = scmp.lt.u32.totalorder %s12495_s13, %s17541_s7 }
  0x58   : > { %p12498_p0 = pnand %p12496_p13, %p12752_p7 }
  0x5a   : > { %p12499_p2 = pneg %p12498_p0 }
  0x5c   : > { %p12504_p6 = pnand %p12502_p4, %p12499_p2 }
  0x5e   : > { %12507 = shalt.err (!%p12504_p6)
}
  0x5f   : > { %s12508_s18 = scalar_lea.vmem %s305_s23, 1024  ;;  %p12516_p11 = scmp.lt.s32.totalorder %s305_s23, %s305_s23 }
  0x60   : > { %p12509_p8 = scmp.ne.s32.totalorder %s305_s23, %s12508_s18  ;;  %p12517_p12 = scmp.lt.s32.totalorder %s12508_s18, %s12508_s18 }
  0x62   : > { %p12511_p9 = pnand %p12509_p8, %p12752_p7  ;;  %p12518_p1 = por %p12517_p12, %p12516_p11 }
  0x64   : > { %p12512_p10 = pneg %p12511_p9 }
  0x66   : > { %p12519_p3 = pnand %p12518_p1, %p12512_p10 }
  0x68   : > { %12522 = shalt.err (!%p12519_p3)
}
  0x69   : > { %s12633_s20 = smov 128   ;;  %s12634_s24 = smov 8  }
  0x6a   : > { %12214 = dma.hbm_to_vmem [thread:$0]  (!%p12736_p5), %s17541_s7, 1024, %s305_s23, [#allocation19], %s12633_s20, %s12633_s20, %s12634_s24  }
  0x6b   : > { %s12635_s27 = smov [#allocation21]   ;;  %s12523_s19 = scalar_lea.hbm %s17542_s8, 8192 }
  0x6c   : > { %s317_s28 = sshll.u32 %s12635_s27, 4  ;;  %p12524_p1 = scmp.ne.s32.totalorder %s17542_s8, %s12523_s19  ;;  %s318_s28 = int_to_ptr.vmem [resolvable:$true] %s317_s28 }
  0x6d   : > { %p12530_p0 = scmp.lt.u32.totalorder %s12523_s19, %s17542_s8 }
  0x6e   : > { %p12526_p3 = pnand %p12524_p1, %p12752_p7 }
  0x70   : > { %p12527_p13 = pneg %p12526_p3 }
  0x72   : > { %p12532_p2 = pnand %p12530_p0, %p12527_p13 }
  0x74   : > { %12535 = shalt.err (!%p12532_p2)
}
  0x75   : > { %s12536_s23 = scalar_lea.vmem %s318_s28, 8192  ;;  %p12544_p9 = scmp.lt.s32.totalorder %s318_s28, %s318_s28 }
  0x76   : > { %p12537_p4 = scmp.ne.s32.totalorder %s318_s28, %s12536_s23  ;;  %p12545_p10 = scmp.lt.s32.totalorder %s12536_s23, %s12536_s23 }
  0x78   : > { %p12539_p6 = pnand %p12537_p4, %p12752_p7  ;;  %p12546_p11 = por %p12545_p10, %p12544_p9 }
  0x7a   : > { %p12540_p8 = pneg %p12539_p6 }
  0x7c   : > { %p12547_p12 = pnand %p12546_p11, %p12540_p8 }
  0x7e   : > { %12550 = shalt.err (!%p12547_p12)
}
  0x7f   : > { %s12636_s25 = smov 256   ;;  %s12637_s2 = smov 16  }
  0x80   : > { %12217 = dma.hbm_to_vmem [thread:$0]  (!%p12736_p5), %s17542_s8, 8192, %s318_s28, [#allocation22], %s12636_s25, %s12636_s25, %s12637_s2  }
  0x81   : > { %s12863_s27 = sadd.s32 1, %s12627_s12   ;;  %s32_s17 = sadd.s32 1, %s12623_s11 }
  0x82   : > { %s29_s13 = ssub.s32 %s12627_s12, %s12863_s27  ;;  %p39_p1 = scmp.ne.s32.totalorder %s12623_s11, %s12619_s10 }
  0x83   : > { %p30_p7 = scmp.eq.s32.totalorder %s29_s13, 0  ;;  %p40_p3 = scmp.eq.s32.totalorder %s12627_s12, 0 }
  0x84   : > { %p45_p13 = scmp.ne.s32.totalorder %s12619_s10, %s12615_s30  ;;  %p17792_p2 = scmp.eq.s32.totalorder %s12719_s15, 0 }
  0x85   : > { %s12874_s19 = scalar_select %p30_p7, %s12623_s11, %s32_s17  }
  0x86   : > { %p41_p0 = por %p40_p3, %p39_p1  ;;  %p12878_p4 = por %p17792_p2, %p45_p13 }
  0x87   : > { %p12227_p6 = scmp.lt.s32.totalorder %s12627_s12, 2  ;;  %s331_s21 = sand.u32 1, %s12623_s11  }
  0x88   : > { %s9891_s28 = sshll.u32 %s331_s21, 4  ;;  %s10202_s14 = sshll.u32 %s12627_s12, 8 }
  0x89   : > { %s12888_s25 = scalar_lea.hbm %s17534_s0, %s10202_s14  ;;  %s335_s30 = scalar_lea.vmem [#allocation13], %s9891_s28 }
  0x8a   : > { %s342_s2 = sshll.u32 %s335_s30, 4  ;;  %p12892_p5 = pnand %p12227_p6, %p41_p0  ;;  %s12890_s2 = int_to_ptr.vmem [resolvable:$true] %s342_s2 }
  0x8b   : > { %s12896_s12 = scalar_lea.sflag [#allocation14], %s331_s21  ;;  %s12551_s26 = scalar_lea.hbm %s12888_s25, 256 }
  0x8c   : > { %p12552_p8 = scmp.ne.s32.totalorder %s12888_s25, %s12551_s26  ;;  %p12553_p9 = pneg %p12892_p5 }
  0x8d   : > { %s12556_s28 = scalar_lea.hbm %s17534_s0, 512  ;;  %p12557_p12 = scmp.lt.u32.totalorder %s12888_s25, %s17534_s0 }
  0x8e   : > { %p12554_p10 = pnand %p12553_p9, %p12552_p8  ;;  %p12558_p7 = scmp.lt.u32.totalorder %s12556_s28, %s12551_s26 }
  0x8f   : > { %p12560_p3 = scmp.lt.u32.totalorder %s12551_s26, %s12888_s25 }
  0x90   : > { %p12555_p11 = pneg %p12554_p10  ;;  %p12559_p1 = por %p12558_p7, %p12557_p12 }
  0x92   : > { %p12561_p13 = por %p12560_p3, %p12559_p1 }
  0x94   : > { %p12562_p0 = pnand %p12561_p13, %p12555_p11 }
  0x96   : > { %12565 = shalt.err (!%p12562_p0)
}
  0x97   : > { %s12566_s21 = scalar_lea.vmem %s12890_s2, 256  ;;  %s12638_s23 = smov [#allocation13]  }
  0x98   : > { %p12567_p2 = scmp.ne.s32.totalorder %s12890_s2, %s12566_s21  ;;  %s12571_s30 = sshll.u32 %s12638_s23, 4  ;;  %s12572_s30 = int_to_ptr.vmem [resolvable:$false] %s12571_s30 }
  0x99   : > { %s12573_s13 = scalar_lea.vmem %s12572_s30, 512  ;;  %p12574_p10 = scmp.lt.s32.totalorder %s12890_s2, %s12572_s30 }
  0x9a   : > { %p12569_p6 = pnand %p12567_p2, %p12553_p9  ;;  %p12575_p12 = scmp.lt.s32.totalorder %s12573_s13, %s12566_s21 }
  0x9c   : > { %p12570_p8 = pneg %p12569_p6  ;;  %p12576_p7 = por %p12575_p12, %p12574_p10 }
  0x9e   : > { %p12577_p1 = pnand %p12576_p7, %p12570_p8 }
  0xa0   : > { %12580 = shalt.err (!%p12577_p1)
}
  0xa1   : > { %12221 = dma.hbm_to_vmem [thread:$0]  (!%p12892_p5), %s12888_s25, 256, %s12890_s2, %s12896_s12, %s12633_s20, %s12633_s20, %s12634_s24  }
  0xa2   : > { %p17795_p9 = scmp.ne.s32.totalorder %s17788_s16, 0 }
  0xa4   : > { %354 = sbr.rel (%p17795_p9) target bundleno = 2890 (0xb4a), region = 56 }
  0xab   : > { %s356_s26 = sand.u32 1, %s12619_s10  }
  0xac   : > { %s9895_s17 = sshll.u32 %s356_s26, 4  ;;  %s357_s28 = scalar_lea.sflag [#allocation14], %s356_s26 }
  0xad   : > { %s360_s14 = scalar_lea.vmem [#allocation13], %s9895_s17 }
  0xae   : > { %12598 = dma.done.wait (%p12878_p4), %s357_s28, 256  }
  0xaf   : > { %12600 = vsyncadd (%p12878_p4), %s357_s28, 4294967040  ;;  %p17796_p11 = scmp.eq.s32.totalorder %s12719_s15, 0 }
  0xb1   : > { %12602 = dma.done.wait (%p17796_p11), [#allocation16], 32   ;;  %p17797_p3 = pmov %p17796_p11 }
  0xb3   : > { %12604 = vsyncadd (%p17797_p3), [#allocation16], 4294967264  ;;  %p17798_p5 = pmov %p17797_p3 }
  0xb4   : > { %p17799_p13 = pmov %p17797_p3 }
  0xb5   : > { %12606 = dma.done.wait (%p17798_p5), [#allocation19], 1040  }
  0xb6   : > { %12608 = vsyncadd (%p17799_p13), [#allocation19], 4294966256  ;;  %p17800_p0 = pmov %p17797_p3 }
  0xb8   : > { %12610 = dma.done.wait (%p17800_p0), [#allocation22], 8192   ;;  %p17801_p2 = pmov %p17800_p0 }
  0xb9   : > { %vm17781_vm0 = vcmask 392192   ;;  %v12639_v0 = vmov 0.0   ;;  %v427_v1 = vlaneseq  ;;  %vm17782_vm1 = vcmask 97280   ;;  %v420_v4 = vld [vmem:[%s360_s14] sm:$0xff]  ;;  %v421_v5 = vld [vmem:[%s360_s14 + $0x8] sm:$0xff]  ;;  %s12641_s12 = smov 16  }
  0xba   : > { %12612 = vsyncadd (%p17801_p2), [#allocation22], 4294959104  ;;  %423 = vst.msk [vmem:[#allocation2] sm:$0xff] %vm17781_vm0, %v12639_v0  ;;  %v17546_v2 = vmov 0.0|0.0   ;;  %v627_v6 = vld [vmem:[%s17535_s1] sm:$0xff]  ;;  %v628_v8 = vld [vmem:[%s17535_s1 + $0x8] sm:$0xff] }
  0xbb   : > { %424 = vst.msk [vmem:[#allocation2 + $0x18] sm:$0xff] %vm17781_vm0, %v12639_v0  ;;  %11084 = vmatprep.subr.bf16.mxu0 %v17546_v2  ;;  %11120 = vmatprep.subr.bf16.mxu1 %v17546_v2  ;;  %v12964_v3 = vshrl.u32 %v427_v1, 7  ;;  %425 = vst.msk [vmem:[#allocation2 + $0x8] sm:$0xff] %vm17781_vm0, %v420_v4  ;;  %v629_v9 = vld [vmem:[%s17535_s1 + $0x10] sm:$0xff]  ;;  %v11085_v11 = vpack.c.bf16 %v628_v8, %v627_v6  ;;  %v630_v12 = vld [vmem:[%s17535_s1 + $0x18] sm:$0xff]  ;;  %s12642_s18 = smov 96  }
  0xbc   : > { %5961 = vst.msk [vmem:[#allocation10 + $0x8] sm:$0xff] %vm17782_vm1, %v12639_v0  ;;  %5962 = vst.msk [vmem:[#allocation10 + $0x10] sm:$0xff] %vm17782_vm1, %v12639_v0  ;;  %v9905_v13 = vld [vmem:[%s17535_s1 + $0xc0] sm:$0xff]  ;;  %v9906_v14 = vld [vmem:[%s17535_s1 + $0xc8] sm:$0xff]  ;;  %v11088_v18 = vpack.c.bf16 %v630_v12, %v629_v9  ;;  %vm502_vm5 = vcmask 388096   ;;  %s12643_s16 = smov 48  }
  0xbd   : > { %5963 = vst.msk [vmem:[#allocation10 + $0x18] sm:$0xff] %vm17782_vm1, %v12639_v0  ;;  %5964 = vst.msk [vmem:[#allocation10 + $0x120] sm:$0xff] %vm17782_vm1, %v12639_v0  ;;  %v435_v7 = vand.u32 3, %v12964_v3  ;;  %v12979_v10 = vadd.s32 8, %v12964_v3  ;;  %v12991_v15 = vadd.s32 16, %v12964_v3  ;;  %v11121_v16 = vpack.c.bf16 %v9906_v14, %v9905_v13  ;;  %v9907_v17 = vld [vmem:[%s17535_s1 + $0xd0] sm:$0xff]  ;;  %11086 = vmatpush1.bf16.msra.mxu0 %v11085_v11 }
  0xbe   : > { %5965 = vst.msk [vmem:[#allocation10 + $0x128] sm:$0xff] %vm17782_vm1, %v12639_v0  ;;  %5966 = vst.msk [vmem:[#allocation10 + $0x130] sm:$0xff] %vm17782_vm1, %v12639_v0  ;;  %v9908_v19 = vld [vmem:[%s17535_s1 + $0xd8] sm:$0xff]  ;;  %11087 = vmatprep.subr.bf16.mxu0 %v17546_v2  ;;  %v631_v21 = vld [vmem:[%s17535_s1 + $0x20] sm:$0xff]  ;;  %vm568_vm9 = vcmask 130048   ;;  %vm588_vm10 = vcmask 523392  }
  0xbf   : > { %17802 = vst [vmem:[#allocation27_spill] sm:$0xff] %v12964_v3  ;;  %426 = vst.msk [vmem:[#allocation2 + $0x10] sm:$0xff] %vm17781_vm0, %v421_v5  ;;  %vm12999_vm2 = vcmp.ne.s32.totalorder %v435_v7, 0  ;;  %11122 = vmatpush1.bf16.msra.mxu1 %v11121_v16  ;;  %v632_v22 = vld [vmem:[%s17535_s1 + $0x28] sm:$0xff]  ;;  %v442_v23 = vand.u32 3, %v12979_v10  ;;  %v11124_v24 = vpack.c.bf16 %v9908_v19, %v9907_v17  ;;  %v9909_v25 = vld [vmem:[%s17535_s1 + $0xe0] sm:$0xff] }
  0xc0   : > { %17803 = vst [vmem:[#allocation28_spill] sm:$0xff] %v12979_v10  ;;  %17804 = vst [vmem:[#allocation29_spill] sm:$0xff] %v12991_v15  ;;  %11123 = vmatprep.subr.bf16.mxu1 %v17546_v2  ;;  %v9910_v26 = vld [vmem:[%s17535_s1 + $0xe8] sm:$0xff]  ;;  %v449_v30 = vand.u32 3, %v12991_v15  ;;  %v11091_v34 = vpack.c.bf16 %v632_v22, %v631_v21  ;;  %v633_v36 = vld [vmem:[%s17535_s1 + $0x30] sm:$0xff]  ;;  %vm13034_vm3 = vcmp.ne.s32.totalorder %v435_v7, 3 }
  0xc1   : > { %11089 = vmatpush1.bf16.msra.mxu0 %v11088_v18  ;;  %v634_v37 = vld [vmem:[%s17535_s1 + $0x38] sm:$0xff]  ;;  %vm13041_vm4 = vcmp.ne.s32.totalorder %v442_v23, 0  ;;  %v11127_v42 = vpack.c.bf16 %v9910_v26, %v9909_v25  ;;  %v9911_v43 = vld [vmem:[%s17535_s1 + $0xf0] sm:$0xff]  ;;  %v635_v53 = vld [vmem:[%s17535_s1 + $0x40] sm:$0xff]  ;;  %vm13117_vm7 = vcmp.ne.s32.totalorder %v442_v23, 3  ;;  %vm516_vm11 = vcmask 785792  }
  0xc2   : > { %v545_v27 = vld [vmem:[#allocation2 + $0x8] sm:$0xff]  ;;  %11090 = vmatprep.subr.bf16.mxu0 %v17546_v2  ;;  %vm13052_vm6 = vcmp.ne.s32.totalorder %v449_v30, 0  ;;  %v9912_v48 = vld [vmem:[%s17535_s1 + $0xf8] sm:$0xff]  ;;  %v11094_v51 = vpack.c.bf16 %v634_v37, %v633_v36  ;;  %v9913_v57 = vld [vmem:[%s17535_s1 + $0x100] sm:$0xff]  ;;  %vm13178_vm8 = vcmp.ne.s32.totalorder %v449_v30, 3  ;;  %vm566_vm12 = vcmask 1048320  }
  0xc3   : > { %v539_v28 = vld [vmem:[#allocation2 + $0x7] sm:$0xff]  ;;  %611 = vrot.lane.b32.xlu1 %v545_v27, %s12641_s12  ;;  %11125 = vmatpush1.bf16.msra.mxu1 %v11124_v24  ;;  %v11130_v56 = vpack.c.bf16 %v9912_v48, %v9911_v43  ;;  %v637_v60 = vld [vmem:[%s17535_s1 + $0x50] sm:$0xff]  ;;  %v638_v61 = vld [vmem:[%s17535_s1 + $0x58] sm:$0xff]  ;;  %vm651_vm13 = vcmask 523264   ;;  %vm519_vm14 = vcmask 781696   ;;  %vm574_vm15 = vcmask 125952  }
  0xc4   : > { %v473_v29 = vld [vmem:[#allocation2 + $0x3] sm:$0xff]  ;;  %v542_v31 = vsel %vm12999_vm2, %v539_v28, 0.0  ;;  %11126 = vmatprep.subr.bf16.mxu1 %v17546_v2  ;;  %v9915_v4 = vld [vmem:[%s17535_s1 + $0x110] sm:$0xff]  ;;  %v9916_v5 = vld [vmem:[%s17535_s1 + $0x118] sm:$0xff]  ;;  %v11100_v6 = vpack.c.bf16 %v638_v61, %v637_v60  ;;  %s12644_s21 = smov 24   ;;  %s12645_s17 = smov 72  }
  0xc5   : > { %v482_v32 = vsel %vm12999_vm2, %v473_v29, 0.0  ;;  %v485_v33 = vld [vmem:[#allocation2 + $0x4] sm:$0xff]  ;;  %596 = vrot.lane.b32.xlu0 %v542_v31, %s12642_s18  ;;  %11092 = vmatpush1.bf16.msra.mxu0 %v11091_v34  ;;  %v11136_v13 = vpack.c.bf16 %v9916_v5, %v9915_v4  ;;  %v641_v20 = vld [vmem:[%s17535_s1 + $0x70] sm:$0xff]  ;;  %v642_v21 = vld [vmem:[%s17535_s1 + $0x78] sm:$0xff]  ;;  %vm572_vm2 = vcmask 1044224   ;;  %s12646_s13 = smov 12  }
  0xc6   : > { %521 = vst.msk [vmem:[#allocation4] sm:$0xff] %vm17781_vm0, %v482_v32  ;;  %500 = vst.msk [vmem:[#allocation3] sm:$0xff] %vm17781_vm0, %v485_v33  ;;  %v486_v35 = vld [vmem:[#allocation2 + $0xc] sm:$0xff]  ;;  %v13064_v50 = vld [vmem:[#allocation2 + $0x14] sm:$0xf]  ;;  %11093 = vmatprep.subr.bf16.mxu0 %v17546_v2  ;;  %s12647_s29 = smov 36  }
  0xc7   : > { %v548_v39 = vld [vmem:[#allocation2 + $0x9] sm:$0xff]  ;;  %501 = vst.msk [vmem:[#allocation3 + $0x10] sm:$0xff] %vm17781_vm0, %v486_v35  ;;  %v475_v47 = vld [vmem:[#allocation2 + $0x13] sm:$0xf]  ;;  %557 = vrot.lane.b32.xlu1 %v545_v27, %s12642_s18  ;;  %11128 = vmatpush1.bf16.msra.mxu1 %v11127_v42  ;;  %v639_v7 = vld [vmem:[%s17535_s1 + $0x60] sm:$0xff]  ;;  %v11106_v27 = vpack.c.bf16 %v642_v21, %v641_v20  ;;  %p415_p4 = scmp.lt.s32.totalorder %s12719_s15, 1 }
  0xc8   : > { %v474_v41 = vld [vmem:[#allocation2 + $0xb] sm:$0xff]  ;;  %v484_v49 = vsel %vm13052_vm6, %v475_v47, 0.0  ;;  %v551_v52 = vsel %vm13034_vm3, %v548_v39, 0.0  ;;  %503 = vst.msk [vmem:[#allocation3 + $0x20] sm:$0xf] %vm502_vm5, %v13064_v50  ;;  %11129 = vmatprep.subr.bf16.mxu1 %v17546_v2  ;;  %v9917_v16 = vld [vmem:[%s17535_s1 + $0x120] sm:$0xff] }
  0xc9   : > { %v488_v44 = vld [vmem:[#allocation2 + $0x5] sm:$0xff]  ;;  %v483_v45 = vsel %vm13041_vm4, %v474_v41, 0.0  ;;  %527 = vrot.lane.b32.xlu0 %v485_v33, %s12643_s16  ;;  %523 = vst.msk [vmem:[#allocation4 + $0x20] sm:$0xf] %vm502_vm5, %v484_v49  ;;  %11095 = vmatpush1.bf16.msra.mxu0 %v11094_v51  ;;  %v546_v62 = vld [vmem:[#allocation2 + $0x10] sm:$0xff]  ;;  %v9920_v26 = vld [vmem:[%s17535_s1 + $0x138] sm:$0xff] }
  0xca   : > { %522 = vst.msk [vmem:[#allocation4 + $0x10] sm:$0xff] %vm17781_vm0, %v483_v45  ;;  %v636_v54 = vld [vmem:[%s17535_s1 + $0x48] sm:$0xff]  ;;  %v497_v55 = vsel %vm13034_vm3, %v488_v44, 0.0  ;;  %11096 = vmatprep.subr.bf16.mxu0 %v17546_v2  ;;  %v549_v12 = vld [vmem:[#allocation2 + $0x11] sm:$0xff]  ;;  %v643_v28 = vld [vmem:[%s17535_s1 + $0x80] sm:$0xff]  ;;  %vm880_vm3 = vcmask 1043456  }
  0xcb   : > { %v9914_v58 = vld [vmem:[%s17535_s1 + $0x108] sm:$0xff]  ;;  %579 = vrot.lane.b32.xlu1 %v551_v52, %s12641_s12  ;;  %v11097_v59 = vpack.c.bf16 %v636_v54, %v635_v53  ;;  %11131 = vmatpush1.bf16.msra.mxu1 %v11130_v56  ;;  %v552_v19 = vsel %vm13117_vm7, %v549_v12, 0.0  ;;  %v541_v24 = vld [vmem:[#allocation2 + $0x17] sm:$0xf]  ;;  %v9921_v33 = vld [vmem:[%s17535_s1 + $0x140] sm:$0xff]  ;;  %vm1100_vm5 = vcmask 195584  }
  0xcc   : > { %v11133_v63 = vpack.c.bf16 %v9914_v58, %v9913_v57  ;;  %v540_v1 = vld [vmem:[#allocation2 + $0xf] sm:$0xff]  ;;  %11132 = vmatprep.subr.bf16.mxu1 %v17546_v2  ;;  %v544_v31 = vsel %vm13052_vm6, %v541_v24, 0.0  ;;  %v646_v37 = vld [vmem:[%s17535_s1 + $0x98] sm:$0xff]  ;;  %v647_v46 = vld [vmem:[%s17535_s1 + $0xa0] sm:$0xff]  ;;  %2010 = vst.msk [vmem:[#allocation6] sm:$0xff] %vm1100_vm5, %v12639_v0  ;;  %s18575_s15 = smov (!%p415_p4, %s12719_s15), 1 }
  0xcd   : > { %507 = vrot.lane.b32.xlu0 %v497_v55, %s12643_s16  ;;  %11098 = vmatpush1.bf16.msra.mxu0 %v11097_v59  ;;  %v640_v8 = vld [vmem:[%s17535_s1 + $0x68] sm:$0xff]  ;;  %v543_v9 = vsel %vm13041_vm4, %v540_v1, 0.0  ;;  %v9919_v25 = vld [vmem:[%s17535_s1 + $0x130] sm:$0xff]  ;;  %v547_v38 = vld [vmem:[#allocation2 + $0x18] sm:$0xf]  ;;  %vm591_vm4 = vcmask 519296  }
  0xce   : > { %11099 = vmatprep.subr.bf16.mxu0 %v17546_v2  ;;  %v489_v14 = vld [vmem:[#allocation2 + $0xd] sm:$0xff]  ;;  %v11103_v18 = vpack.c.bf16 %v640_v8, %v639_v7  ;;  %v11142_v32 = vpack.c.bf16 %v9920_v26, %v9919_v25  ;;  %v550_v39 = vld [vmem:[#allocation2 + $0x19] sm:$0xf]  ;;  %v490_v42 = vld [vmem:[#allocation2 + $0x15] sm:$0xf]  ;;  %2011 = vst.msk [vmem:[#allocation6 + $0x8] sm:$0xff] %vm1100_vm5, %v12639_v0 }
  0xcf   : > { %529 = vrot.lane.b32.xlu1 %v486_v35, %s12643_s16  ;;  %11134 = vmatpush1.bf16.msra.mxu1 %v11133_v63  ;;  %v9918_v17 = vld [vmem:[%s17535_s1 + $0x128] sm:$0xff]  ;;  %v498_v22 = vsel %vm13117_vm7, %v489_v14, 0.0  ;;  %v645_v36 = vld [vmem:[%s17535_s1 + $0x90] sm:$0xff]  ;;  %v9924_v44 = vld [vmem:[%s17535_s1 + $0x158] sm:$0xff]  ;;  %v553_v30 = vsel %vm13178_vm8, %v550_v39, 0.0  ;;  %v499_v48 = vsel %vm13178_vm8, %v490_v42, 0.0 }
  0xd0   : > { %11135 = vmatprep.subr.bf16.mxu1 %v17546_v2  ;;  %v11139_v23 = vpack.c.bf16 %v9918_v17, %v9917_v16  ;;  %v644_v29 = vld [vmem:[%s17535_s1 + $0x88] sm:$0xff]  ;;  %v9923_v43 = vld [vmem:[%s17535_s1 + $0x150] sm:$0xff]  ;;  %v11112_v45 = vpack.c.bf16 %v646_v37, %v645_v36  ;;  %v650_v54 = vld [vmem:[%s17535_s1 + $0xb8] sm:$0xff]  ;;  %2012 = vst.msk [vmem:[#allocation6 + $0x50] sm:$0xff] %vm1100_vm5, %v12639_v0  ;;  %vm2280_vm7 = vcmask 392384  }
  0xd1   : > { %613 = vrot.lane.b32.xlu0 %v546_v62, %s12641_s12  ;;  %11101 = vmatpush1.bf16.msra.mxu0 %v11100_v6  ;;  %v9922_v34 = vld [vmem:[%s17535_s1 + $0x148] sm:$0xff]  ;;  %v11109_v35 = vpack.c.bf16 %v644_v29, %v643_v28  ;;  %v11148_v49 = vpack.c.bf16 %v9924_v44, %v9923_v43  ;;  %v649_v53 = vld [vmem:[%s17535_s1 + $0xb0] sm:$0xff]  ;;  %v9928_v57 = vld [vmem:[%s17535_s1 + $0x178] sm:$0xff]  ;;  %2013 = vst.msk [vmem:[#allocation6 + $0x58] sm:$0xff] %vm1100_vm5, %v12639_v0 }
  0xd2   : > { %11102 = vmatprep.subr.bf16.mxu0 %v17546_v2  ;;  %v11145_v40 = vpack.c.bf16 %v9922_v34, %v9921_v33  ;;  %v648_v47 = vld [vmem:[%s17535_s1 + $0xa8] sm:$0xff]  ;;  %v9927_v56 = vld [vmem:[%s17535_s1 + $0x170] sm:$0xff]  ;;  %v11118_v58 = vpack.c.bf16 %v650_v54, %v649_v53  ;;  %v9931_v5 = vld [vmem:[%s17535_s1 + $0x180] sm:$0xff] }
  0xd3   : > { %559 = vrot.lane.b32.xlu1 %v546_v62, %s12642_s18  ;;  %11137 = vmatpush1.bf16.msra.mxu1 %v11136_v13  ;;  %v9926_v51 = vld [vmem:[%s17535_s1 + $0x168] sm:$0xff]  ;;  %v11115_v52 = vpack.c.bf16 %v648_v47, %v647_v46  ;;  %v11154_v59 = vpack.c.bf16 %v9928_v57, %v9927_v56  ;;  %v9933_v11 = vld [vmem:[%s17535_s1 + $0x190] sm:$0xff]  ;;  %v9934_v13 = vld [vmem:[%s17535_s1 + $0x198] sm:$0xff] }
  0xd4   : > { %11138 = vmatprep.subr.bf16.mxu1 %v17546_v2  ;;  %v9932_v6 = vld [vmem:[%s17535_s1 + $0x188] sm:$0xff]  ;;  %v9957_v14 = vld [vmem:[%s17535_s1 + $0x240] sm:$0xff]  ;;  %v11160_v20 = vpack.c.bf16 %v9934_v13, %v9933_v11  ;;  %v9959_v25 = vld [vmem:[%s17535_s1 + $0x250] sm:$0xff] }
  0xd5   : > { %598 = vrot.lane.b32.xlu0 %v543_v9, %s12642_s18  ;;  %11104 = vmatpush1.bf16.msra.mxu0 %v11103_v18  ;;  %v11157_v9 = vpack.c.bf16 %v9932_v6, %v9931_v5  ;;  %v9958_v16 = vld [vmem:[%s17535_s1 + $0x248] sm:$0xff]  ;;  %v9960_v26 = vld [vmem:[%s17535_s1 + $0x258] sm:$0xff]  ;;  %v9963_v43 = vld [vmem:[%s17535_s1 + $0x270] sm:$0xff] }
  0xd6   : > { %11105 = vmatprep.subr.bf16.mxu0 %v17546_v2  ;;  %v11193_v21 = vpack.c.bf16 %v9958_v16, %v9957_v14  ;;  %v9936_v24 = vld [vmem:[%s17535_s1 + $0x1a8] sm:$0xff]  ;;  %v9938_v34 = vld [vmem:[%s17535_s1 + $0x1b8] sm:$0xff]  ;;  %v9941_v53 = vld [vmem:[%s17535_s1 + $0x1d0] sm:$0xff] }
  0xd7   : > { %581 = vrot.lane.b32.xlu1 %v552_v19, %s12641_s12  ;;  %11140 = vmatpush1.bf16.msra.mxu1 %v11139_v23  ;;  %v9962_v36 = vld [vmem:[%s17535_s1 + $0x268] sm:$0xff]  ;;  %v9964_v44 = vld [vmem:[%s17535_s1 + $0x278] sm:$0xff]  ;;  %v9943_v5 = vld [vmem:[%s17535_s1 + $0x1e0] sm:$0xff] }
  0xd8   : > { %11141 = vmatprep.subr.bf16.mxu1 %v17546_v2  ;;  %v9940_v42 = vld [vmem:[%s17535_s1 + $0x1c8] sm:$0xff]  ;;  %v9945_v14 = vld [vmem:[%s17535_s1 + $0x1f0] sm:$0xff]  ;;  %v9946_v16 = vld [vmem:[%s17535_s1 + $0x1f8] sm:$0xff] }
  0xd9   : > { %509 = vrot.lane.b32.xlu0 %v498_v22, %s12643_s16  ;;  %11107 = vmatpush1.bf16.msra.mxu0 %v11106_v27  ;;  %v9935_v22 = vld [vmem:[%s17535_s1 + $0x1a0] sm:$0xff] }
  0xda   : > { %11108 = vmatprep.subr.bf16.mxu0 %v17546_v2  ;;  %v11163_v29 = vpack.c.bf16 %v9936_v24, %v9935_v22  ;;  %v9948_v22 = vld [vmem:[%s17535_s1 + $0x208] sm:$0xff]  ;;  %v9972_v24 = vld [vmem:[%s17535_s1 + $0x2b8] sm:$0xff] }
  0xdb   : > { %531 = vrot.lane.b32.xlu1 %v13064_v50, %s12643_s16  ;;  %11143 = vmatpush1.bf16.msra.mxu1 %v11142_v32  ;;  %v9925_v50 = vld [vmem:[%s17535_s1 + $0x160] sm:$0xff]  ;;  %v9937_v32 = vld [vmem:[%s17535_s1 + $0x1b0] sm:$0xff] }
  0xdc   : > { %11144 = vmatprep.subr.bf16.mxu1 %v17546_v2  ;;  %v11151_v55 = vpack.c.bf16 %v9926_v51, %v9925_v50  ;;  %v11166_v37 = vpack.c.bf16 %v9938_v34, %v9937_v32  ;;  %v9951_v34 = vld [vmem:[%s17535_s1 + $0x220] sm:$0xff] }
  0xdd   : > { %600 = vrot.lane.b32.xlu0 %v544_v31, %s12642_s18  ;;  %11110 = vmatpush1.bf16.msra.mxu0 %v11109_v35  ;;  %v11196_v31 = vpack.c.bf16 %v9960_v26, %v9959_v25  ;;  %v9961_v35 = vld [vmem:[%s17535_s1 + $0x260] sm:$0xff] }
  0xde   : > { %11111 = vmatprep.subr.bf16.mxu0 %v17546_v2 }
  0xdf   : > { %561 = vrot.lane.b32.xlu1 %v547_v38, %s12642_s18  ;;  %11146 = vmatpush1.bf16.msra.mxu1 %v11145_v40  ;;  %v9939_v40 = vld [vmem:[%s17535_s1 + $0x1c0] sm:$0xff]  ;;  %s10203_s18 = sshll.u32 %s18575_s15, 8 }
  0xe0   : > { %11147 = vmatprep.subr.bf16.mxu1 %v17546_v2  ;;  %v11169_v51 = vpack.c.bf16 %v9940_v42, %v9939_v40  ;;  %v9953_v40 = vld [vmem:[%s17535_s1 + $0x230] sm:$0xff]  ;;  %v9977_v42 = vld [vmem:[%s17535_s1 + $0x2e0] sm:$0xff]  ;;  %s17437_s28 = scalar_lea.vmem %s17543_s9, %s10203_s18 }
  0xe1   : > { %615 = vrot.lane.b32.xlu0 %v547_v38, %s12641_s12  ;;  %11113 = vmatpush1.bf16.msra.mxu0 %v11112_v45  ;;  %v11199_v38 = vpack.c.bf16 %v9962_v36, %v9961_v35  ;;  %v9952_v35 = vld [vmem:[%s17535_s1 + $0x228] sm:$0xff]  ;;  %v9975_v36 = vld [vmem:[%s17535_s1 + $0x2d0] sm:$0xff] }
  0xe2   : > { %11114 = vmatprep.subr.bf16.mxu0 %v17546_v2 }
  0xe3   : > { %583 = vrot.lane.b32.xlu1 %v553_v30, %s12641_s12  ;;  %11149 = vmatpush1.bf16.msra.mxu1 %v11148_v49 }
  0xe4   : > { %11150 = vmatprep.subr.bf16.mxu1 %v17546_v2 }
  0xe5   : > { %511 = vrot.lane.b32.xlu0 %v499_v48, %s12643_s16  ;;  %11116 = vmatpush1.bf16.msra.mxu0 %v11115_v52  ;;  %v11202_v52 = vpack.c.bf16 %v9964_v44, %v9963_v43  ;;  %v9978_v43 = vld [vmem:[%s17535_s1 + $0x2e8] sm:$0xff] }
  0xe6   : > { %11117 = vmatprep.subr.bf16.mxu0 %v17546_v2 }
  0xe7   : > { %11152 = vmatpush1.bf16.msra.mxu1 %v11151_v55 }
  0xe8   : > { %11153 = vmatprep.subr.bf16.mxu1 %v17546_v2 }
  0xe9   : > { %11119 = vmatpush1.bf16.msra.mxu0 %v11118_v58  ;;  %v9942_v58 = vld [vmem:[%s17535_s1 + $0x1d8] sm:$0xff] }
  0xea   : > { %11156 = vmatprep.subr.bf16.mxu0 %v17546_v2 }
  0xeb   : > { %11155 = vmatpush1.bf16.msra.mxu1 %v11154_v59  ;;  %v9965_v59 = vld [vmem:[%s17535_s1 + $0x280] sm:$0xff] }
  0xec   : > { %11192 = vmatprep.subr.bf16.mxu1 %v17546_v2 }
 0x135   : > { %v612_v60 = vpop.permute.xlu1 %611 }
 0x137   : > { %v597_v61 = vpop.permute.xlu0 %596 }
 0x138   : > { %606 = vst.msk [vmem:[#allocation4 + $0x8] sm:$0xff] %vm568_vm9, %v597_v61 }
 0x139   : > { %620 = vst.msk [vmem:[#allocation4 + $0x8] sm:$0xff] %vm588_vm10, %v612_v60  ;;  %v558_v62 = vpop.permute.xlu1 %557  ;;  %v9966_v60 = vld [vmem:[%s17535_s1 + $0x288] sm:$0xff] }
 0x13a   : > { %569 = vst.msk [vmem:[#allocation3 + $0x8] sm:$0xff] %vm568_vm9, %v558_v62 }
 0x13b   : > { %v528_v63 = vpop.permute.xlu0 %527 }
 0x13c   : > { %536 = vst.msk [vmem:[#allocation4] sm:$0xff] %vm516_vm11, %v528_v63 }
 0x13d   : > { %605 = vst.msk [vmem:[#allocation4] sm:$0xff] %vm566_vm12, %v597_v61  ;;  %v580_v1 = vpop.permute.xlu1 %579 }
 0x13e   : > { %589 = vst.msk [vmem:[#allocation3 + $0x8] sm:$0xff] %vm588_vm10, %v580_v1  ;;  %v11172_v1 = vpack.c.bf16 %v9942_v58, %v9941_v53 }
 0x13f   : > { %v508_v4 = vpop.permute.xlu0 %507 }
 0x140   : > { %517 = vst.msk [vmem:[#allocation3] sm:$0xff] %vm516_vm11, %v508_v4  ;;  %v624_v7 = vld [vmem:[#allocation4 + $0x8] sm:$0xff]  ;;  %v11205_v4 = vpack.c.bf16 %v9966_v60, %v9965_v59 }
 0x141   : > { %567 = vst.msk [vmem:[#allocation3] sm:$0xff] %vm566_vm12, %v558_v62  ;;  %9903 = vmatprep.mubr.msk.f32.mxu0 %vm651_vm13, %v624_v7  ;;  %v530_v8 = vpop.permute.xlu1 %529  ;;  %v844_v39 = vld [vmem:[#allocation4 + $0x8] sm:$0xf0]  ;;  %v9944_v7 = vld [vmem:[%s17535_s1 + $0x1e8] sm:$0xff] }
 0x142   : > { %537 = vst.msk [vmem:[#allocation4 + $0x10] sm:$0xff] %vm516_vm11, %v530_v8  ;;  %v884_v47 = vrot.slane %v844_v39, 4  ;;  %v9967_v8 = vld [vmem:[%s17535_s1 + $0x290] sm:$0xff] }
 0x143   : > { %v614_v12 = vpop.permute.xlu0 %613 }
 0x144   : > { %v623_v17 = vld [vmem:[#allocation4] sm:$0xff] }
 0x145   : > { %723 = vmatmul.mubr.f32.vlgmr.msra.gmra.mrb[0].mxu0 %v623_v17  ;;  %v560_v18 = vpop.permute.xlu1 %559  ;;  %v734_v19 = vld [vmem:[#allocation3 + $0x8] sm:$0xff]  ;;  %v9969_v17 = vld [vmem:[%s17535_s1 + $0x2a0] sm:$0xff] }
 0x146   : > { %11158 = vmatpush1.bf16.msra.mxu0 %v11157_v9  ;;  %571 = vst.msk [vmem:[#allocation3 + $0x18] sm:$0xff] %vm568_vm9, %v560_v18  ;;  %9929 = vmatprep.mubr.msk.f32.mxu1 %vm651_vm13, %v734_v19  ;;  %v973_v46 = vld [vmem:[#allocation3 + $0x8] sm:$0xf0]  ;;  %v9968_v9 = vld [vmem:[%s17535_s1 + $0x298] sm:$0xff]  ;;  %v11178_v19 = vpack.c.bf16 %v9946_v16, %v9945_v14 }
 0x147   : > { %v599_v23 = vpop.permute.xlu0 %598  ;;  %11159 = vmatprep.subr.bf16.mxu0 %v17546_v2  ;;  %v1012_v56 = vrot.slane %v973_v46, 4  ;;  %v11208_v13 = vpack.c.bf16 %v9968_v9, %v9967_v8 }
 0x148   : > { %607 = vst.msk [vmem:[#allocation4 + $0x10] sm:$0xff] %vm566_vm12, %v599_v23  ;;  %v733_v27 = vld [vmem:[#allocation3] sm:$0xff] }
 0x149   : > { %608 = vst.msk [vmem:[#allocation4 + $0x18] sm:$0xff] %vm568_vm9, %v599_v23  ;;  %833 = vmatmul.mubr.f32.vlgmr.msra.gmra.mrb[0].mxu1 %v733_v27  ;;  %v582_v28 = vpop.permute.xlu1 %581  ;;  %v9971_v23 = vld [vmem:[%s17535_s1 + $0x2b0] sm:$0xff]  ;;  %v972_v60 = vld [vmem:[#allocation3] sm:$0xf0] }
 0x14a   : > { %621 = vst.msk [vmem:[#allocation4 + $0x18] sm:$0xff] %vm588_vm10, %v614_v12  ;;  %11161 = vmatpush1.bf16.msra.mxu0 %v11160_v20  ;;  %11194 = vmatpush1.bf16.msra.mxu1 %v11193_v21  ;;  %590 = vst.msk [vmem:[#allocation3 + $0x18] sm:$0xff] %vm588_vm10, %v582_v28  ;;  %v11175_v12 = vpack.c.bf16 %v9944_v7, %v9943_v5  ;;  %v9947_v21 = vld [vmem:[%s17535_s1 + $0x200] sm:$0xff]  ;;  %v11214_v26 = vpack.c.bf16 %v9972_v24, %v9971_v23  ;;  %v9949_v27 = vld [vmem:[%s17535_s1 + $0x210] sm:$0xff] }
 0x14b   : > { %v510_v33 = vpop.permute.xlu0 %509  ;;  %11162 = vmatprep.subr.bf16.mxu0 %v17546_v2  ;;  %11195 = vmatprep.subr.bf16.mxu1 %v17546_v2  ;;  %v11181_v25 = vpack.c.bf16 %v9948_v22, %v9947_v21  ;;  %v9950_v28 = vld [vmem:[%s17535_s1 + $0x218] sm:$0xff]  ;;  %v13480_v23 = vld [vmem:[#allocation15] ss:$0 sm:$0xff] }
 0x14c   : > { %518 = vst.msk [vmem:[#allocation3 + $0x10] sm:$0xff] %vm516_vm11, %v510_v33  ;;  %v11184_v32 = vpack.c.bf16 %v9950_v28, %v9949_v27 }
 0x14d   : > { %570 = vst.msk [vmem:[#allocation3 + $0x10] sm:$0xff] %vm566_vm12, %v560_v18  ;;  %v532_v41 = vpop.permute.xlu1 %531  ;;  %v9970_v18 = vld [vmem:[%s17535_s1 + $0x2a8] sm:$0xff] }
 0x14e   : > { %11164 = vmatpush1.bf16.msra.mxu0 %v11163_v29  ;;  %11197 = vmatpush1.bf16.msra.mxu1 %v11196_v31  ;;  %538 = vst.msk [vmem:[#allocation4 + $0x20] sm:$0xf] %vm519_vm14, %v532_v41  ;;  %v11211_v20 = vpack.c.bf16 %v9970_v18, %v9969_v17  ;;  %v9973_v29 = vld [vmem:[%s17535_s1 + $0x2c0] sm:$0xff]  ;;  %v9974_v31 = vld [vmem:[%s17535_s1 + $0x2c8] sm:$0xff]  ;;  %v9954_v41 = vld [vmem:[%s17535_s1 + $0x238] sm:$0xff] }
 0x14f   : > { %11165 = vmatprep.subr.bf16.mxu0 %v17546_v2  ;;  %11198 = vmatprep.subr.bf16.mxu1 %v17546_v2  ;;  %v601_v45 = vpop.permute.xlu0 %600  ;;  %v13314_v49 = vld [vmem:[#allocation4 + $0x10] sm:$0xff]  ;;  %v11217_v33 = vpack.c.bf16 %v9974_v31, %v9973_v29  ;;  %v11190_v44 = vpack.c.bf16 %v9954_v41, %v9953_v40 }
 0x150   : > { %610 = vst.msk [vmem:[#allocation4 + $0x28] sm:$0xf] %vm574_vm15, %v601_v45  ;;  %v882_v53 = vrot.slane %v13314_v49, 4 }
 0x151   : > { %v13307_v30 = vld [vmem:[#allocation4 + $0x18] sm:$0xff]  ;;  %609 = vst.msk [vmem:[#allocation4 + $0x20] sm:$0xf] %vm572_vm2, %v601_v45  ;;  %v13316_v50 = vld [vmem:[#allocation3 + $0x18] sm:$0xff]  ;;  %v562_v54 = vpop.permute.xlu1 %561  ;;  %v11223_v45 = vpack.c.bf16 %v9978_v43, %v9977_v42 }
 0x152   : > { %9904 = vmatprep.mubr.msk.f32.mxu0 %vm651_vm13, %v13307_v30  ;;  %v885_v48 = vrot.slane %v13307_v30, 4  ;;  %11167 = vmatpush1.bf16.msra.mxu0 %v11166_v37  ;;  %v1013_v57 = vrot.slane %v13316_v50, 4  ;;  %575 = vst.msk [vmem:[#allocation3 + $0x28] sm:$0xf] %vm574_vm15, %v562_v54  ;;  %v9976_v37 = vld [vmem:[%s17535_s1 + $0x2d8] sm:$0xff] }
 0x153   : > { %11200 = vmatpush1.bf16.msra.mxu1 %v11199_v38  ;;  %728 = vmatmul.mubr.f32.gmra.mrb[2].mxu0 %v13314_v49  ;;  %v616_v61 = vpop.permute.xlu0 %615  ;;  %v11187_v38 = vpack.c.bf16 %v9952_v35, %v9951_v34  ;;  %v11220_v39 = vpack.c.bf16 %v9976_v37, %v9975_v36  ;;  %v1141_v43 = vld [vmem:[#allocation20 + $0x8] sm:$0xff] }
 0x154   : > { %9930 = vmatprep.mubr.msk.f32.mxu1 %vm651_vm13, %v13316_v50  ;;  %v886_v55 = vsel %vm880_vm3, %v884_v47, %v885_v48  ;;  %11168 = vmatprep.subr.bf16.mxu0 %v17546_v2  ;;  %v13340_v62 = vld [vmem:[#allocation3 + $0x10] sm:$0xff]  ;;  %622 = vst.msk [vmem:[#allocation4 + $0x28] sm:$0xf] %vm591_vm4, %v616_v61  ;;  %v1014_v63 = vsel %vm880_vm3, %v1012_v56, %v1013_v57 }
 0x155   : > { %9955 = vmatprep.mubr.msk.f32.mxu0 %vm651_vm13, %v886_v55  ;;  %11201 = vmatprep.subr.bf16.mxu1 %v17546_v2  ;;  %v584_v6 = vpop.permute.xlu1 %583  ;;  %v843_v47 = vld [vmem:[#allocation4] sm:$0xf0] }
 0x156   : > { %838 = vmatmul.mubr.f32.gmra.mrb[2].mxu1 %v13340_v62  ;;  %11170 = vmatpush1.bf16.msra.mxu0 %v11169_v51  ;;  %592 = vst.msk [vmem:[#allocation3 + $0x28] sm:$0xf] %vm591_vm4, %v584_v6  ;;  %v9979_v51 = vld [vmem:[%s17535_s1 + $0x2f0] sm:$0xff]  ;;  %v881_v56 = vrot.slane %v843_v47, 4  ;;  %v1009_v6 = vrot.slane %v972_v60, 4 }
 0x157   : > { %11203 = vmatpush1.bf16.msra.mxu1 %v11202_v52  ;;  %9981 = vmatprep.mubr.msk.f32.mxu1 %vm651_vm13, %v1014_v63  ;;  %v512_v11 = vpop.permute.xlu0 %511  ;;  %v9980_v52 = vld [vmem:[%s17535_s1 + $0x2f8] sm:$0xff] }
 0x158   : > { %11171 = vmatprep.subr.bf16.mxu0 %v17546_v2  ;;  %11204 = vmatprep.subr.bf16.mxu1 %v17546_v2  ;;  %520 = vst.msk [vmem:[#allocation3 + $0x20] sm:$0xf] %vm519_vm14, %v512_v11  ;;  %v847_v55 = vld [vmem:[#allocation4 + $0x20] sm:$0xf]  ;;  %v11226_v58 = vpack.c.bf16 %v9980_v52, %v9979_v51  ;;  %v883_v61 = vsel %vm880_vm3, %v881_v56, %v882_v53  ;;  %v1142_v51 = vld [vmem:[#allocation20 + $0x10] sm:$0xff]  ;;  %v1144_v60 = vld [vmem:[#allocation20 + $0x20] sm:$0xff] }
 0x159   : > { %573 = vst.msk [vmem:[#allocation3 + $0x20] sm:$0xf] %vm572_vm2, %v562_v54  ;;  %v887_v63 = vrot.slane %v847_v55, 4  ;;  %v1155_v56 = vsel %vm651_vm13, %v1142_v51, 0 }
 0x15a   : > { %11173 = vmatpush1.bf16.msra.mxu0 %v11172_v1  ;;  %v1010_v1 = vrot.slane %v13340_v62, 4 }
 0x15b   : > { %11206 = vmatpush1.bf16.msra.mxu1 %v11205_v4  ;;  %11174 = vmatprep.subr.bf16.mxu0 %v17546_v2  ;;  %v848_v46 = vld [vmem:[#allocation4 + $0x28] sm:$0xf]  ;;  %v888_v7 = vsel %vm880_vm3, %v882_v53, %v887_v63 }
 0x15c   : > { %11207 = vmatprep.subr.bf16.mxu1 %v17546_v2  ;;  %v889_v54 = vrot.slane %v848_v46, 4  ;;  %v1011_v8 = vsel %vm880_vm3, %v1009_v6, %v1010_v1 }
 0x15d   : > { %v977_v59 = vld [vmem:[#allocation3 + $0x28] sm:$0xf] }
 0x15e   : > { %11176 = vmatpush1.bf16.msra.mxu0 %v11175_v12  ;;  %v890_v49 = vsel %vm880_vm3, %v885_v48, %v889_v54  ;;  %v1017_v4 = vrot.slane %v977_v59, 4  ;;  %v1140_v48 = vld [vmem:[#allocation20] sm:$0xff] }
 0x15f   : > { %11209 = vmatpush1.bf16.msra.mxu1 %v11208_v13  ;;  %11177 = vmatprep.subr.bf16.mxu0 %v17546_v2  ;;  %v1149_v50 = vsel %vm651_vm13, %v1140_v48, 0 }
 0x160   : > { %11210 = vmatprep.subr.bf16.mxu1 %v17546_v2  ;;  %v976_v5 = vld [vmem:[#allocation3 + $0x20] sm:$0xf]  ;;  %v1018_v62 = vsel %vm880_vm3, %v1013_v57, %v1017_v4  ;;  %v13468_v57 = vand.u32 4294901760, %v1149_v50 }
 0x161   : > { %v1015_v9 = vrot.slane %v976_v5, 4 }
 0x162   : > { %11179 = vmatpush1.bf16.msra.mxu0 %v11178_v19  ;;  %v13471_v11 = vsub.f32 %v1149_v50, %v13468_v57 }
 0x163   : > { %11212 = vmatpush1.bf16.msra.mxu1 %v11211_v20  ;;  %11180 = vmatprep.subr.bf16.mxu0 %v17546_v2  ;;  %v1016_v30 = vsel %vm880_vm3, %v1010_v1, %v1015_v9  ;;  %v13508_v1 = vand.u32 4294901760, %v1155_v56 }
 0x164   : > { %11213 = vmatprep.subr.bf16.mxu1 %v17546_v2  ;;  %v1247_v12 = vand.u32 4294901760, %v13471_v11 }
 0x166   : > { %11182 = vmatpush1.bf16.msra.mxu0 %v11181_v25  ;;  %v1248_v13 = vsub.f32 %v13471_v11, %v1247_v12 }
 0x167   : > { %11215 = vmatpush1.bf16.msra.mxu1 %v11214_v26  ;;  %11183 = vmatprep.subr.bf16.mxu0 %v17546_v2 }
 0x168   : > { %11216 = vmatprep.subr.bf16.mxu1 %v17546_v2  ;;  %v1249_v14 = vand.u32 4294901760, %v1248_v13 }
 0x16a   : > { %11185 = vmatpush1.bf16.msra.mxu0 %v11184_v32 }
 0x16b   : > { %11218 = vmatpush1.bf16.msra.mxu1 %v11217_v33  ;;  %11186 = vmatprep.subr.bf16.mxu0 %v17546_v2 }
 0x16c   : > { %11219 = vmatprep.subr.bf16.mxu1 %v17546_v2 }
 0x16e   : > { %11188 = vmatpush1.bf16.msra.mxu0 %v11187_v38 }
 0x16f   : > { %11221 = vmatpush1.bf16.msra.mxu1 %v11220_v39  ;;  %11189 = vmatprep.subr.bf16.mxu0 %v17546_v2 }
 0x170   : > { %11222 = vmatprep.subr.bf16.mxu1 %v17546_v2 }
 0x172   : > { %11191 = vmatpush1.bf16.msra.mxu0 %v11190_v44  ;;  %v1152_v44 = vsel %vm651_vm13, %v1141_v43, 0 }
 0x173   : > { %11224 = vmatpush1.bf16.msra.mxu1 %v11223_v45  ;;  %v13500_v47 = vand.u32 4294901760, %v1152_v44 }
 0x174   : > { %11225 = vmatprep.subr.bf16.mxu1 %v17546_v2 }
 0x175   : > { %962 = vmatmul.mubr.f32.vlgmr.msra.gmra.mrb[4].mxu0 %v883_v61  ;;  %v13506_v59 = vsub.f32 %v1152_v44, %v13500_v47 }
 0x176   : > { %9956 = vmatprep.mubr.msk.f32.mxu0 %vm651_vm13, %v890_v49 }
 0x177   : > { %11227 = vmatpush1.bf16.msra.mxu1 %v11226_v58  ;;  %v1143_v58 = vld [vmem:[#allocation20 + $0x18] sm:$0xff] }
 0x178   : > { %v1158_v49 = vsel %vm651_vm13, %v1143_v58, 0 }
 0x179   : > { %967 = vmatmul.mubr.f32.gmra.mrb[6].mxu0 %v888_v7  ;;  %v1161_v7 = vsel %vm651_vm13, %v1144_v60, 0  ;;  %v13519_v48 = vand.u32 4294901760, %v1158_v49 }
 0x17a   : > { %1090 = vmatmul.mubr.f32.vlgmr.msra.gmra.mrb[4].mxu1 %v1011_v8  ;;  %10548 = vmatprep.mubr.f32.mxu0 %v1249_v14  ;;  %v1145_v8 = vld [vmem:[#allocation20 + $0x28] sm:$0xff]  ;;  %v13522_v14 = vsub.f32 %v1155_v56, %v13508_v1 }
 0x17b   : > { %9982 = vmatprep.mubr.msk.f32.mxu1 %vm651_vm13, %v1018_v62  ;;  %v1257_v62 = vand.u32 4294901760, %v13506_v59 }
 0x17e   : > { %1095 = vmatmul.mubr.f32.gmra.mrb[6].mxu1 %v1016_v30 }
 0x218   : > { %v724_v16 = vpop.f32.mrb[0].mxu0 }
 0x219   : > { %1101 = vst.msk [vmem:[#allocation5] sm:$0xff] %vm1100_vm5, %v724_v16  ;;  %v726_v0 = vpop.f32.mrb[1].mxu0  ;;  %v13524_v16 = vand.u32 4294901760, %v1161_v7 }
 0x21a   : > { %v1164_v0 = vsel %vm651_vm13, %v1145_v8, 0 }
 0x21c   : > { %v834_v17 = vpop.f32.mrb[0].mxu1 }
 0x21d   : > { %1103 = vst.msk [vmem:[#allocation5 + $0x10] sm:$0xff] %vm1100_vm5, %v834_v17  ;;  %v836_v18 = vpop.f32.mrb[1].mxu1  ;;  %v1146_v17 = vld [vmem:[#allocation20 + $0x30] sm:$0xff] }
 0x220   : > { %v1109_v22 = vld [vmem:[#allocation5] sm:$0xff] }
 0x221   : > { %v1124_v26 = vadd.f32 %v13480_v23, %v1109_v22  ;;  %v1147_v22 = vld [vmem:[#allocation20 + $0x38] sm:$0xff] }
 0x223   : > { %v1132_v31 = vmax.f32 %v1124_v26, 0.0  ;;  %v1258_v26 = vsub.f32 %v13506_v59, %v1257_v62 }
 0x224   : > { %v1111_v25 = vld [vmem:[#allocation5 + $0x10] sm:$0xff] }
 0x225   : > { %v13485_v27 = vadd.f32 %v13480_v23, %v1111_v25  ;;  %v1173_v36 = vand.u32 4294901760, %v1132_v31 }
 0x226   : > { %v729_v19 = vpop.f32.mrb[2].mxu0 }
 0x227   : > { %1102 = vst.msk [vmem:[#allocation5 + $0x8] sm:$0xff] %vm1100_vm5, %v729_v19  ;;  %v731_v20 = vpop.f32.mrb[3].mxu0  ;;  %v1134_v35 = vmax.f32 %v13485_v27, 0.0  ;;  %v13516_v9 = vsub.f32 %v1132_v31, %v1173_v36  ;;  %v13539_v31 = vsub.f32 %v1158_v49, %v13519_v48 }
 0x229   : > { %v839_v21 = vpop.f32.mrb[2].mxu1  ;;  %v1179_v40 = vand.u32 4294901760, %v1134_v35  ;;  %v1328_v25 = vand.u32 4294901760, %v13516_v9  ;;  %v1277_v56 = vand.u32 4294901760, %v13539_v31 }
 0x22a   : > { %1104 = vst.msk [vmem:[#allocation5 + $0x18] sm:$0xff] %vm1100_vm5, %v839_v21  ;;  %v841_v24 = vpop.f32.mrb[3].mxu1 }
 0x22b   : > { %v13536_v27 = vsub.f32 %v1134_v35, %v1179_v40  ;;  %v1329_v44 = vsub.f32 %v13516_v9, %v1328_v25 }
 0x22e   : > { %v1110_v28 = vld [vmem:[#allocation5 + $0x8] sm:$0xff] }
 0x22f   : > { %v1125_v29 = vadd.f32 %v13480_v23, %v1110_v28 }
 0x231   : > { %v1112_v32 = vld [vmem:[#allocation5 + $0x18] sm:$0xff]  ;;  %v1133_v33 = vmax.f32 %v1125_v29, 0.0 }
 0x232   : > { %v1127_v34 = vadd.f32 %v13480_v23, %v1112_v32  ;;  %v1167_v32 = vsel %vm651_vm13, %v1146_v17, 0 }
 0x233   : > { %v1176_v37 = vand.u32 4294901760, %v1133_v33  ;;  %v13560_v51 = vand.u32 4294901760, %v1167_v32 }
 0x234   : > { %v1135_v38 = vmax.f32 %v1127_v34, 0.0  ;;  %v1267_v34 = vand.u32 4294901760, %v13522_v14 }
 0x235   : > { %v13490_v39 = vpack.c.bf16 %v1176_v37, %v1173_v36  ;;  %v13513_v6 = vsub.f32 %v1133_v33, %v1176_v37  ;;  %v13544_v36 = vsub.f32 %v1161_v7, %v13524_v16  ;;  %v13546_v37 = vand.u32 4294901760, %v1164_v0 }
 0x236   : > { %v1182_v41 = vand.u32 4294901760, %v1135_v38 }
 0x237   : > { %11229 = vmatprep.subr.bf16.mxu0 %v13490_v39  ;;  %v1335_v20 = vand.u32 4294901760, %v13513_v6  ;;  %v13571_v58 = vsub.f32 %v1164_v0, %v13546_v37  ;;  %v1287_v8 = vand.u32 4294901760, %v13544_v36 }
 0x238   : > { %v13493_v42 = vpack.c.bf16 %v1182_v41, %v1179_v40  ;;  %11231 = vmatpush3.bf16.msra.mxu0 %v13490_v39  ;;  %v13530_v21 = vsub.f32 %v1135_v38, %v1182_v41  ;;  %v1170_v38 = vsel %vm651_vm13, %v1147_v22, 0 }
 0x239   : > { %v1336_v40 = vsub.f32 %v13513_v6, %v1335_v20  ;;  %v13573_v60 = vand.u32 4294901760, %v1170_v38  ;;  %v1297_v22 = vand.u32 4294901760, %v13571_v58 }
 0x23a   : > { %11233 = vmatprep.subr.bf16.mxu0 %v13493_v42  ;;  %v1349_v43 = vand.u32 4294901760, %v13530_v21 }
 0x23c   : > { %11235 = vmatpush3.bf16.msra.mxu0 %v13493_v42  ;;  %v1350_v49 = vsub.f32 %v13530_v21, %v1349_v43 }
 0x248   : > { %v963_v45 = vpop.f32.mrb[4].mxu0 }
 0x249   : > { %1105 = vst.msk [vmem:[#allocation5 + $0x20] sm:$0xff] %vm1100_vm5, %v963_v45  ;;  %v965_v46 = vpop.f32.mrb[5].mxu0  ;;  %v1342_v45 = vand.u32 4294901760, %v13536_v27 }
 0x24b   : > { %v1343_v7 = vsub.f32 %v13536_v27, %v1342_v45 }
 0x24c   : > { %v968_v52 = vpop.f32.mrb[6].mxu0 }
 0x24d   : > { %v1091_v53 = vpop.f32.mrb[4].mxu1  ;;  %1106 = vst.msk [vmem:[#allocation5 + $0x28] sm:$0xff] %vm1100_vm5, %v968_v52  ;;  %v970_v54 = vpop.f32.mrb[7].mxu0 }
 0x24e   : > { %1107 = vst.msk [vmem:[#allocation5 + $0x30] sm:$0xff] %vm1100_vm5, %v1091_v53  ;;  %v1093_v55 = vpop.f32.mrb[5].mxu1 }
 0x24f   : > { %v1268_v55 = vsub.f32 %v13522_v14, %v1267_v34 }
 0x250   : > { %v1113_v63 = vld [vmem:[#allocation5 + $0x20] sm:$0xff] }
 0x251   : > { %v1096_v61 = vpop.f32.mrb[6].mxu1  ;;  %v1128_v5 = vadd.f32 %v13480_v23, %v1113_v63  ;;  %v1337_v63 = vand.u32 4294901760, %v1336_v40 }
 0x252   : > { %1108 = vst.msk [vmem:[#allocation5 + $0x38] sm:$0xff] %vm1100_vm5, %v1096_v61  ;;  %v1098_v4 = vpop.f32.mrb[7].mxu1 }
 0x253   : > { %v1136_v30 = vmax.f32 %v1128_v5, 0.0  ;;  %v1330_v5 = vand.u32 4294901760, %v1329_v44 }
 0x254   : > { %v1114_v50 = vld [vmem:[#allocation5 + $0x28] sm:$0xff] }
 0x255   : > { %v1115_v13 = vld [vmem:[#allocation5 + $0x30] sm:$0xff]  ;;  %v1129_v18 = vadd.f32 %v13480_v23, %v1114_v50  ;;  %v1185_v24 = vand.u32 4294901760, %v1136_v30 }
 0x256   : > { %v1130_v19 = vadd.f32 %v13480_v23, %v1115_v13 }
 0x257   : > { %v1137_v28 = vmax.f32 %v1129_v18, 0.0  ;;  %v13558_v46 = vsub.f32 %v1136_v30, %v1185_v24  ;;  %v13586_v30 = vsub.f32 %v1167_v32, %v13560_v51  ;;  %v1259_v18 = vand.u32 4294901760, %v1258_v26 }
 0x258   : > { %v1138_v29 = vmax.f32 %v1130_v19, 0.0  ;;  %v1278_v19 = vsub.f32 %v13539_v31, %v1277_v56  ;;  %v1351_v32 = vand.u32 4294901760, %v1350_v49  ;;  %v1269_v26 = vand.u32 4294901760, %v1268_v55 }
 0x259   : > { %v1116_v33 = vld [vmem:[#allocation5 + $0x38] sm:$0xff]  ;;  %v1188_v41 = vand.u32 4294901760, %v1137_v28  ;;  %v1356_v13 = vand.u32 4294901760, %v13558_v46 }
 0x25a   : > { %v1131_v35 = vadd.f32 %v13480_v23, %v1116_v33  ;;  %v1191_v23 = vand.u32 4294901760, %v1138_v29 }
 0x25b   : > { %v13562_v52 = vpack.c.bf16 %v1188_v41, %v1185_v24  ;;  %v13564_v54 = vsub.f32 %v1137_v28, %v1188_v41  ;;  %v13600_v24 = vsub.f32 %v1170_v38, %v13573_v60  ;;  %v11244_v28 = vpack.c.bf16 %v1337_v63, %v1330_v5 }
 0x25c   : > { %v1139_v53 = vmax.f32 %v1131_v35, 0.0  ;;  %v13591_v0 = vsub.f32 %v1138_v29, %v1191_v23  ;;  %v1288_v41 = vsub.f32 %v13544_v36, %v1287_v8  ;;  %v1307_v38 = vand.u32 4294901760, %v13586_v30 }
 0x25d   : > { %11237 = vmatprep.subr.bf16.mxu0 %v13562_v52  ;;  %v1363_v4 = vand.u32 4294901760, %v13564_v54  ;;  %v1344_v35 = vand.u32 4294901760, %v1343_v7  ;;  %v1357_v40 = vsub.f32 %v13558_v46, %v1356_v13  ;;  %v1317_v49 = vand.u32 4294901760, %v13600_v24 }
 0x25e   : > { %v1194_v61 = vand.u32 4294901760, %v1139_v53  ;;  %11239 = vmatpush3.bf16.msra.mxu0 %v13562_v52  ;;  %v1370_v44 = vand.u32 4294901760, %v13591_v0  ;;  %v1289_v5 = vand.u32 4294901760, %v1288_v41  ;;  %v1308_v7 = vsub.f32 %v13586_v30, %v1307_v38 }
 0x25f   : > { %v1364_v29 = vsub.f32 %v13564_v54, %v1363_v4  ;;  %v11248_v55 = vpack.c.bf16 %v1351_v32, %v1344_v35 }
 0x260   : > { %v13588_v50 = vpack.c.bf16 %v1194_v61, %v1191_v23  ;;  %v13593_v17 = vsub.f32 %v1139_v53, %v1194_v61  ;;  %v1279_v53 = vand.u32 4294901760, %v1278_v19  ;;  %v1298_v23 = vsub.f32 %v13571_v58, %v1297_v22 }
 0x261   : > { %v1365_v61 = vand.u32 4294901760, %v1364_v29  ;;  %v1358_v19 = vand.u32 4294901760, %v1357_v40 }
 0x262   : > { %11241 = vmatprep.subr.bf16.mxu0 %v13588_v50  ;;  %v1377_v33 = vand.u32 4294901760, %v13593_v17  ;;  %v1299_v29 = vand.u32 4294901760, %v1298_v23  ;;  %v11264_v23 = vpack.c.bf16 %v13530_v21, %v13536_v27  ;;  %v2574_v21 = vld [vmem:[%s17537_s3 + $0x20] sm:$0xff] }
 0x263   : > { %11243 = vmatpush3.bf16.msra.mxu0 %v13588_v50  ;;  %v11252_v32 = vpack.c.bf16 %v1365_v61, %v1358_v19  ;;  %v11292_v61 = vpack.c.bf16 %v1335_v20, %v1328_v25  ;;  %v2575_v25 = vld [vmem:[%s17537_s3 + $0x28] sm:$0xff] }
 0x264   : > { %11245 = vmatprep.subr.bf16.mxu0 %v11244_v28  ;;  %v1378_v63 = vsub.f32 %v13593_v17, %v1377_v33 }
 0x266   : > { %10549 = vmatmul.mubr.f32.vlgmr.msra.gmra.mrb[8].mxu0 %v1259_v18  ;;  %v1371_v18 = vsub.f32 %v13591_v0, %v1370_v44  ;;  %v1379_v35 = vand.u32 4294901760, %v1378_v63  ;;  %v11296_v63 = vpack.c.bf16 %v1349_v43, %v1342_v45  ;;  %v2039_v43 = vand.u32 7, %v12979_v10 }
 0x267   : > { %11247 = vmatpush3.bf16.msra.mxu0 %v11244_v28  ;;  %10551 = vmatprep.mubr.f32.mxu0 %v1269_v26  ;;  %v1318_v28 = vsub.f32 %v13600_v24, %v1317_v49  ;;  %v1309_v26 = vand.u32 4294901760, %v1308_v7  ;;  %v2046_v45 = vand.u32 7, %v12991_v15  ;;  %v9993_v7 = vld [vmem:[%s17537_s3 + $0x68] sm:$0xff] }
 0x268   : > { %11249 = vmatprep.subr.bf16.mxu0 %v11248_v55  ;;  %v1372_v41 = vand.u32 4294901760, %v1371_v18  ;;  %vm13774_vm8 = vcmp.ne.s32.totalorder %v2039_v43, 0  ;;  %vm13916_vm3 = vcmp.ne.s32.totalorder %v2039_v43, 7 }
 0x269   : > { %v1319_v40 = vand.u32 4294901760, %v1318_v28  ;;  %vm13780_vm9 = vcmp.ne.s32.totalorder %v2046_v45, 0  ;;  %v13826_v28 = vadd.s32 64, %v12964_v3  ;;  %vm13962_vm4 = vcmp.ne.s32.totalorder %v2046_v45, 7 }
 0x26a   : > { %10552 = vmatmul.mubr.f32.gmra.mrb[10].mxu0 %v1279_v53  ;;  %v11256_v2 = vpack.c.bf16 %v1379_v35, %v1372_v41  ;;  %v11260_v53 = vpack.c.bf16 %v13513_v6, %v13516_v9  ;;  %v2570_v6 = vld [vmem:[%s17537_s3] sm:$0xff]  ;;  %v2571_v9 = vld [vmem:[%s17537_s3 + $0x8] sm:$0xff]  ;;  %v13823_v35 = vadd.s32 56, %v12964_v3 }
 0x26b   : > { %11251 = vmatpush3.bf16.msra.mxu0 %v11248_v55  ;;  %10554 = vmatprep.mubr.f32.mxu0 %v1289_v5  ;;  %v11268_v55 = vpack.c.bf16 %v13564_v54, %v13558_v46  ;;  %17833 = vst [vmem:[#allocation35_spill] sm:$0xff] %v13826_v28 }
 0x26c   : > { %11253 = vmatprep.subr.bf16.mxu0 %v11252_v32  ;;  %17832 = vst [vmem:[#allocation34_spill] sm:$0xff] %v13823_v35 }
 0x26e   : > { %10555 = vmatmul.mubr.f32.gmra.mrb[12].mxu0 %v1299_v29 }
 0x26f   : > { %11255 = vmatpush3.bf16.msra.mxu0 %v11252_v32  ;;  %10557 = vmatprep.mubr.f32.mxu0 %v1309_v26 }
 0x270   : > { %11257 = vmatprep.subr.bf16.mxu0 %v11256_v2 }
 0x272   : > { %10558 = vmatmul.mubr.f32.gmra.mrb[14].mxu0 %v1319_v40  ;;  %v2580_v40 = vld [vmem:[%s17537_s3 + $0x50] sm:$0xff] }
 0x273   : > { %11259 = vmatpush3.bf16.msra.mxu0 %v11256_v2  ;;  %10576 = vmatprep.mubr.f32.mxu0 %v13468_v57  ;;  %v11272_v2 = vpack.c.bf16 %v13593_v17, %v13591_v0  ;;  %v2578_v17 = vld [vmem:[%s17537_s3 + $0x40] sm:$0xff] }
 0x274   : > { %11261 = vmatprep.subr.bf16.mxu0 %v11260_v53 }
 0x276   : > { %10577 = vmatmul.mubr.f32.vlgmr.msra.gmra.mrb[8].mxu0 %v13500_v47 }
 0x277   : > { %11263 = vmatpush3.bf16.msra.mxu0 %v11260_v53  ;;  %10579 = vmatprep.mubr.f32.mxu0 %v13508_v1  ;;  %v2581_v53 = vld [vmem:[%s17537_s3 + $0x58] sm:$0xff] }
 0x278   : > { %11265 = vmatprep.subr.bf16.mxu0 %v11264_v23 }
 0x27a   : > { %10580 = vmatmul.mubr.f32.gmra.mrb[10].mxu0 %v13519_v48 }
 0x27b   : > { %11267 = vmatpush3.bf16.msra.mxu0 %v11264_v23  ;;  %10582 = vmatprep.mubr.f32.mxu0 %v13524_v16 }
 0x27c   : > { %11269 = vmatprep.subr.bf16.mxu0 %v11268_v55 }
 0x27e   : > { %10583 = vmatmul.mubr.f32.gmra.mrb[12].mxu0 %v13546_v37 }
 0x27f   : > { %11271 = vmatpush3.bf16.msra.mxu0 %v11268_v55  ;;  %10585 = vmatprep.mubr.f32.mxu0 %v13560_v51 }
 0x280   : > { %11273 = vmatprep.subr.bf16.mxu0 %v11272_v2 }
 0x282   : > { %10586 = vmatmul.mubr.f32.gmra.mrb[14].mxu0 %v13573_v60 }
 0x283   : > { %11275 = vmatpush3.bf16.msra.mxu0 %v11272_v2  ;;  %10604 = vmatprep.mubr.f32.mxu0 %v13471_v11  ;;  %v11300_v11 = vpack.c.bf16 %v1363_v4, %v1356_v13 }
 0x284   : > { %11277 = vmatprep.subr.bf16.mxu0 %v13490_v39 }
 0x286   : > { %10605 = vmatmul.mubr.f32.vlgmr.msra.gmra.mrb[8].mxu0 %v13506_v59  ;;  %v2154_v59 = vld [vmem:[#allocation6 + $0x7] sm:$0xff] }
 0x287   : > { %11279 = vmatpush3.bf16.msra.mxu0 %v13490_v39  ;;  %10607 = vmatprep.mubr.f32.mxu0 %v13522_v14  ;;  %v2572_v14 = vld [vmem:[%s17537_s3 + $0x10] sm:$0xff] }
 0x288   : > { %11281 = vmatprep.subr.bf16.mxu0 %v13493_v42 }
 0x28a   : > { %10608 = vmatmul.mubr.f32.gmra.mrb[10].mxu0 %v13539_v31  ;;  %v11332_v31 = vpack.c.bf16 %v2575_v25, %v2574_v21 }
 0x28b   : > { %11283 = vmatpush3.bf16.msra.mxu0 %v13493_v42  ;;  %10610 = vmatprep.mubr.f32.mxu0 %v13544_v36  ;;  %v13755_v36 = vadd.s32 24, %v12964_v3 }
 0x28c   : > { %11285 = vmatprep.subr.bf16.mxu0 %v13562_v52 }
 0x28d   : > { %17820 = vst [vmem:[#allocation30_spill] sm:$0xff] %v13755_v36 }
 0x28e   : > { %10611 = vmatmul.mubr.f32.gmra.mrb[12].mxu0 %v13571_v58  ;;  %v2053_v58 = vand.u32 7, %v13755_v36 }
 0x28f   : > { %11287 = vmatpush3.bf16.msra.mxu0 %v13562_v52  ;;  %10613 = vmatprep.mubr.f32.mxu0 %v13586_v30  ;;  %v13785_v30 = vadd.s32 40, %v12964_v3 }
 0x290   : > { %11289 = vmatprep.subr.bf16.mxu0 %v13588_v50  ;;  %vm13806_vm10 = vcmp.ne.s32.totalorder %v2053_v58, 0 }
 0x291   : > { %17826 = vst [vmem:[#allocation32_spill] sm:$0xff] %v13785_v30  ;;  %v2067_v32 = vand.u32 7, %v13785_v30 }
 0x292   : > { %10614 = vmatmul.mubr.f32.gmra.mrb[14].mxu0 %v13600_v24 }
 0x293   : > { %11291 = vmatpush3.bf16.msra.mxu0 %v13588_v50  ;;  %10632 = vmatprep.mubr.f32.mxu0 %v1247_v12  ;;  %v11304_v12 = vpack.c.bf16 %v1377_v33, %v1370_v44  ;;  %vm13854_vm12 = vcmp.ne.s32.totalorder %v2067_v32, 0 }
 0x294   : > { %11293 = vmatprep.subr.bf16.mxu0 %v11292_v61 }
 0x296   : > { %10633 = vmatmul.mubr.f32.vlgmr.msra.gmra.mrb[8].mxu0 %v1257_v62  ;;  %v11324_v62 = vpack.c.bf16 %v2571_v9, %v2570_v6  ;;  %v2088_v6 = vand.u32 7, %v13826_v28 }
 0x297   : > { %11295 = vmatpush3.bf16.msra.mxu0 %v11292_v61  ;;  %10635 = vmatprep.mubr.f32.mxu0 %v1267_v34 }
 0x298   : > { %11297 = vmatprep.subr.bf16.mxu0 %v11296_v63  ;;  %11325 = vmatprep.subr.bf16.mxu1 %v11324_v62  ;;  %vm13896_vm15 = vcmp.ne.s32.totalorder %v2088_v6, 0 }
 0x299   : > { %11327 = vmatpush3.bf16.msra.mxu1 %v11324_v62 }
 0x29a   : > { %10636 = vmatmul.mubr.f32.gmra.mrb[10].mxu0 %v1277_v56 }
 0x29b   : > { %11299 = vmatpush3.bf16.msra.mxu0 %v11296_v63  ;;  %10638 = vmatprep.mubr.f32.mxu0 %v1287_v8  ;;  %v11344_v63 = vpack.c.bf16 %v2581_v53, %v2580_v40 }
 0x29c   : > { %11301 = vmatprep.subr.bf16.mxu0 %v11300_v11 }
 0x29e   : > { %10639 = vmatmul.mubr.f32.gmra.mrb[12].mxu0 %v1297_v22  ;;  %v2579_v22 = vld [vmem:[%s17537_s3 + $0x48] sm:$0xff] }
 0x29f   : > { %11303 = vmatpush3.bf16.msra.mxu0 %v11300_v11  ;;  %10641 = vmatprep.mubr.f32.mxu0 %v1307_v38 }
 0x2a0   : > { %11305 = vmatprep.subr.bf16.mxu0 %v11304_v12 }
 0x2a2   : > { %10642 = vmatmul.mubr.f32.gmra.mrb[14].mxu0 %v1317_v49  ;;  %v11340_v49 = vpack.c.bf16 %v2579_v22, %v2578_v17 }
 0x2a3   : > { %11307 = vmatpush3.bf16.msra.mxu0 %v11304_v12  ;;  %10660 = vmatprep.mubr.f32.mxu0 %v13468_v57 }
 0x2a4   : > { %11309 = vmatprep.subr.bf16.mxu0 %v13490_v39 }
 0x2a6   : > { %10661 = vmatmul.mubr.f32.vlgmr.msra.gmra.mrb[8].mxu0 %v13500_v47 }
 0x2a7   : > { %11311 = vmatpush3.bf16.msra.mxu0 %v13490_v39  ;;  %10663 = vmatprep.mubr.f32.mxu0 %v13508_v1  ;;  %v17817_v39 = vmov 0.0|0.0  }
 0x2a8   : > { %11313 = vmatprep.subr.bf16.mxu0 %v13493_v42 }
 0x2aa   : > { %10664 = vmatmul.mubr.f32.gmra.mrb[10].mxu0 %v13519_v48 }
 0x2ab   : > { %11315 = vmatpush3.bf16.msra.mxu0 %v13493_v42  ;;  %10666 = vmatprep.mubr.f32.mxu0 %v13524_v16  ;;  %v2190_v42 = vld [vmem:[#allocation6 + $0x8] sm:$0xff] }
 0x2ac   : > { %11317 = vmatprep.subr.bf16.mxu0 %v13562_v52  ;;  %2235 = vst.msk [vmem:[#allocation7] sm:$0xff] %vm1100_vm5, %v2190_v42  ;;  %2308 = vrot.lane.b32.xlu0 %v2190_v42, %s12644_s21 }
 0x2ae   : > { %10667 = vmatmul.mubr.f32.gmra.mrb[12].mxu0 %v13546_v37 }
 0x2af   : > { %11319 = vmatpush3.bf16.msra.mxu0 %v13562_v52  ;;  %10669 = vmatprep.mubr.f32.mxu0 %v13560_v51  ;;  %v2577_v52 = vld [vmem:[%s17537_s3 + $0x38] sm:$0xff] }
 0x2b0   : > { %11321 = vmatprep.subr.bf16.mxu0 %v13588_v50 }
 0x2b2   : > { %10670 = vmatmul.mubr.f32.gmra.mrb[14].mxu0 %v13573_v60 }
 0x2b3   : > { %11323 = vmatpush3.bf16.msra.mxu0 %v13588_v50  ;;  %10688 = vmatprep.mubr.f32.mxu0 %v13468_v57  ;;  %v2032_v57 = vand.u32 7, %v12964_v3  ;;  %v13788_v50 = vadd.s32 48, %v12964_v3 }
 0x2b4   : > { %11516 = vmatprep.subr.bf16.mxu0 %v17817_v39 }
 0x2b5   : > { %vm13726_vm6 = vcmp.ne.s32.totalorder %v2032_v57, 0  ;;  %17827 = vst [vmem:[#allocation33_spill] sm:$0xff] %v13788_v50  ;;  %v2074_v29 = vand.u32 7, %v13788_v50  ;;  %vm13910_vm2 = vcmp.ne.s32.totalorder %v2032_v57, 7 }
 0x2b6   : > { %10689 = vmatmul.mubr.f32.vlgmr.msra.gmra.mrb[8].mxu0 %v13500_v47 }
 0x2b7   : > { %10691 = vmatprep.mubr.f32.mxu0 %v13508_v1  ;;  %v2181_v1 = vsel %vm13726_vm6, %v2154_v59, 0.0  ;;  %vm13860_vm13 = vcmp.ne.s32.totalorder %v2074_v29, 0 }
 0x2b8   : > { %2290 = vst.msk [vmem:[#allocation8] sm:$0xff] %vm1100_vm5, %v2181_v1  ;;  %v2081_v1 = vand.u32 7, %v13823_v35 }
 0x2ba   : > { %10692 = vmatmul.mubr.f32.gmra.mrb[10].mxu0 %v13519_v48  ;;  %vm13890_vm14 = vcmp.ne.s32.totalorder %v2081_v1, 0 }
 0x2bb   : > { %10694 = vmatprep.mubr.f32.mxu0 %v13524_v16  ;;  %v2573_v16 = vld [vmem:[%s17537_s3 + $0x18] sm:$0xff] }
 0x2bc   : > { %v11328_v20 = vpack.c.bf16 %v2573_v16, %v2572_v14 }
 0x2be   : > { %10695 = vmatmul.mubr.f32.gmra.mrb[12].mxu0 %v13546_v37  ;;  %11329 = vmatprep.subr.bf16.mxu1 %v11328_v20  ;;  %v13758_v37 = vadd.s32 32, %v12964_v3 }
 0x2bf   : > { %10697 = vmatprep.mubr.f32.mxu0 %v13560_v51  ;;  %11331 = vmatpush3.bf16.msra.mxu1 %v11328_v20  ;;  %v2576_v51 = vld [vmem:[%s17537_s3 + $0x30] sm:$0xff] }
 0x2c0   : > { %17821 = vst [vmem:[#allocation31_spill] sm:$0xff] %v13758_v37  ;;  %11333 = vmatprep.subr.bf16.mxu1 %v11332_v31  ;;  %v11336_v56 = vpack.c.bf16 %v2577_v52, %v2576_v51 }
 0x2c2   : > { %10698 = vmatmul.mubr.f32.gmra.mrb[14].mxu0 %v13573_v60  ;;  %v2060_v60 = vand.u32 7, %v13758_v37 }
 0x2c3   : > { %11335 = vmatpush3.bf16.msra.mxu1 %v11332_v31 }
 0x2c4   : > { %11337 = vmatprep.subr.bf16.mxu1 %v11336_v56  ;;  %vm13814_vm11 = vcmp.ne.s32.totalorder %v2060_v60, 0 }
 0x2c7   : > { %11339 = vmatpush3.bf16.msra.mxu1 %v11336_v56 }
 0x2c8   : > { %11341 = vmatprep.subr.bf16.mxu1 %v11340_v49 }
 0x2cb   : > { %11343 = vmatpush3.bf16.msra.mxu1 %v11340_v49  ;;  %v9998_v49 = vld [vmem:[%s17537_s3 + $0x90] sm:$0xff] }
 0x2cc   : > { %11345 = vmatprep.subr.bf16.mxu1 %v11344_v63 }
 0x2cf   : > { %11347 = vmatpush3.bf16.msra.mxu1 %v11344_v63 }
 0x31e   : > { %v2309_v48 = vpop.permute.xlu0 %2308 }
 0x31f   : > { %2335 = vst.msk [vmem:[#allocation8] sm:$0xff] %vm2280_vm7, %v2309_v48 }
 0x389   : > { %v10690_v27 = vpop.f32.mrb[8].mxu0 }
 0x38a   : > { %2015 = vst.msk [vmem:[#allocation6 + $0x18] sm:$0xff] %vm1100_vm5, %v10690_v27  ;;  %v1964_v34 = vpop.f32.mrb[9].mxu0 }
 0x38b   : > { %2014 = vst.msk [vmem:[#allocation6 + $0x10] sm:$0xff] %vm1100_vm5, %v1964_v34 }
 0x38d   : > { %v10693_v46 = vpop.f32.mrb[10].mxu0 }
 0x38e   : > { %2017 = vst.msk [vmem:[#allocation6 + $0x28] sm:$0xff] %vm1100_vm5, %v10693_v46  ;;  %v1976_v54 = vpop.f32.mrb[11].mxu0 }
 0x38f   : > { %2016 = vst.msk [vmem:[#allocation6 + $0x20] sm:$0xff] %vm1100_vm5, %v1976_v54 }
 0x391   : > { %v10696_v13 = vpop.f32.mrb[12].mxu0  ;;  %v2363_v0 = vld [vmem:[#allocation6 + $0x18] sm:$0xff] }
 0x392   : > { %2019 = vst.msk [vmem:[#allocation6 + $0x38] sm:$0xff] %vm1100_vm5, %v10696_v13  ;;  %2528 = vrot.lane.b32.xlu1 %v2363_v0, %s12645_s17  ;;  %2312 = vrot.lane.b32.xlu0 %v2363_v0, %s12644_s21  ;;  %2237 = vst.msk [vmem:[#allocation7 + $0x10] sm:$0xff] %vm1100_vm5, %v2363_v0  ;;  %v1988_v24 = vpop.f32.mrb[13].mxu0  ;;  %v2362_v33 = vld [vmem:[#allocation6 + $0x10] sm:$0xff] }
 0x393   : > { %v2344_v38 = vld [vmem:[#allocation6 + $0xf] sm:$0xff]  ;;  %v2345_v44 = vld [vmem:[#allocation6 + $0x17] sm:$0xff]  ;;  %2018 = vst.msk [vmem:[#allocation6 + $0x30] sm:$0xff] %vm1100_vm5, %v1988_v24  ;;  %2236 = vst.msk [vmem:[#allocation7 + $0x8] sm:$0xff] %vm1100_vm5, %v2362_v33 }
 0x394   : > { %v2182_v5 = vsel %vm13774_vm8, %v2344_v38, 0.0  ;;  %v2183_v19 = vsel %vm13780_vm9, %v2345_v44, 0.0  ;;  %v2353_v27 = vsel %vm13726_vm6, %v2344_v38, 0.0  ;;  %v2354_v31 = vsel %vm13774_vm8, %v2345_v44, 0.0  ;;  %v2199_v34 = vld [vmem:[#allocation6 + $0x9] sm:$0xff]  ;;  %v2200_v46 = vld [vmem:[#allocation6 + $0x11] sm:$0xff] }
 0x395   : > { %2291 = vst.msk [vmem:[#allocation8 + $0x8] sm:$0xff] %vm1100_vm5, %v2182_v5  ;;  %2292 = vst.msk [vmem:[#allocation8 + $0x10] sm:$0xff] %vm1100_vm5, %v2183_v19  ;;  %v10699_v26 = vpop.f32.mrb[14].mxu0  ;;  %v13828_v41 = vld [vmem:[#allocation6 + $0x28] sm:$0xff]  ;;  %v2226_v43 = vsel %vm13910_vm2, %v2199_v34, 0.0  ;;  %v2380_v17 = vsel %vm13910_vm2, %v2200_v46, 0.0 }
 0x396   : > { %2021 = vst.msk [vmem:[#allocation6 + $0x48] sm:$0xff] %vm1100_vm5, %v10699_v26  ;;  %2400 = vrot.lane.b32.xlu1 %v2363_v0, %s12643_s16  ;;  %2526 = vrot.lane.b32.xlu0 %v2362_v33, %s12645_s17  ;;  %v2000_v23 = vpop.f32.mrb[15].mxu0  ;;  %2239 = vst.msk [vmem:[#allocation7 + $0x20] sm:$0xff] %vm1100_vm5, %v13828_v41  ;;  %v2364_v55 = vld [vmem:[#allocation6 + $0x20] sm:$0xff]  ;;  %v2227_v0 = vsel %vm13916_vm3, %v2200_v46, 0.0  ;;  %vm2149_vm6 = vcmp.ne.s32.totalorder %v2060_v60, 7 }
 0x397   : > { %v2347_v2 = vld [vmem:[#allocation6 + $0x27] sm:$0xff]  ;;  %v13841_v61 = vld [vmem:[#allocation6 + $0x1f] sm:$0xff]  ;;  %2020 = vst.msk [vmem:[#allocation6 + $0x40] sm:$0xff] %vm1100_vm5, %v2000_v23  ;;  %2238 = vst.msk [vmem:[#allocation7 + $0x18] sm:$0xff] %vm1100_vm5, %v2364_v55  ;;  %vm2150_vm8 = vcmp.ne.s32.totalorder %v2067_v32, 7 }
 0x398   : > { %v2184_v11 = vsel %vm13806_vm10, %v13841_v61, 0.0  ;;  %v2185_v12 = vsel %vm13814_vm11, %v2347_v2, 0.0  ;;  %v2356_v22 = vsel %vm13806_vm10, %v2347_v2, 0.0  ;;  %v2372_v24 = vld [vmem:[#allocation6 + $0x19] sm:$0xff]  ;;  %v2202_v8 = vld [vmem:[#allocation6 + $0x21] sm:$0xff]  ;;  %vm2152_vm10 = vcmp.ne.s32.totalorder %v2081_v1, 7 }
 0x399   : > { %2293 = vst.msk [vmem:[#allocation8 + $0x18] sm:$0xff] %vm1100_vm5, %v2184_v11  ;;  %2294 = vst.msk [vmem:[#allocation8 + $0x20] sm:$0xff] %vm1100_vm5, %v2185_v12  ;;  %v13866_v9 = vld [vmem:[#allocation6 + $0x38] sm:$0xff]  ;;  %v2381_v38 = vsel %vm13916_vm3, %v2372_v24, 0.0  ;;  %v9992_v5 = vld [vmem:[%s17537_s3 + $0x60] sm:$0xff]  ;;  %v2228_v45 = vsel %vm13962_vm4, %v2372_v24, 0.0 }
 0x39a   : > { %2398 = vrot.lane.b32.xlu0 %v2362_v33, %s12643_s16  ;;  %2310 = vrot.lane.b32.xlu1 %v2362_v33, %s12644_s21  ;;  %2241 = vst.msk [vmem:[#allocation7 + $0x30] sm:$0xff] %vm1100_vm5, %v13866_v9  ;;  %v13872_v62 = vld [vmem:[#allocation6 + $0x30] sm:$0xff]  ;;  %v2355_v33 = vsel %vm13780_vm9, %v13841_v61, 0.0  ;;  %v13982_v26 = vpack.c.bf16 %v9993_v7, %v9992_v5  ;;  %v2382_v18 = vsel %vm13962_vm4, %v2202_v8, 0.0  ;;  %vm2151_vm9 = vcmp.ne.s32.totalorder %v2074_v29, 7  ;;  %v9997_v24 = vld [vmem:[%s17537_s3 + $0x88] sm:$0xff] }
 0x39b   : > { %v13874_v48 = vld [vmem:[#allocation6 + $0x2f] sm:$0xff]  ;;  %v13876_v14 = vld [vmem:[#allocation6 + $0x37] sm:$0xff]  ;;  %2240 = vst.msk [vmem:[#allocation7 + $0x28] sm:$0xff] %vm1100_vm5, %v13872_v62 }
 0x39c   : > { %v2186_v16 = vsel %vm13854_vm12, %v13874_v48, 0.0  ;;  %v2187_v20 = vsel %vm13860_vm13, %v13876_v14, 0.0  ;;  %11349 = vmatprep.subr.bf16.mxu1 %v13982_v26  ;;  %v2203_v23 = vld [vmem:[#allocation6 + $0x29] sm:$0xff]  ;;  %v2204_v61 = vld [vmem:[#allocation6 + $0x31] sm:$0xff] }
 0x39d   : > { %2295 = vst.msk [vmem:[#allocation8 + $0x28] sm:$0xff] %vm1100_vm5, %v2186_v16  ;;  %2296 = vst.msk [vmem:[#allocation8 + $0x30] sm:$0xff] %vm1100_vm5, %v2187_v20  ;;  %v13904_v51 = vld [vmem:[#allocation6 + $0x48] sm:$0xff]  ;;  %v2231_v63 = vsel %vm2150_vm8, %v2204_v61, 0.0  ;;  %v2384_v60 = vsel %vm2149_vm6, %v2204_v61, 0.0  ;;  %v2379_v1 = vld [vmem:[#allocation6 + $0x51] sm:$0xff] }
 0x39e   : > { %2490 = vrot.lane.b32.xlu0 %v2353_v27, %s12643_s16  ;;  %2492 = vrot.lane.b32.xlu1 %v2354_v31, %s12643_s16  ;;  %v13920_v54 = vld [vmem:[#allocation6 + $0x40] sm:$0xff]  ;;  %2243 = vst.msk [vmem:[#allocation7 + $0x40] sm:$0xff] %vm1100_vm5, %v13904_v51  ;;  %v2352_v29 = vld [vmem:[#allocation6 + $0x4f] sm:$0xff] }
 0x39f   : > { %v2350_v56 = vld [vmem:[#allocation6 + $0x3f] sm:$0xff]  ;;  %v2351_v4 = vld [vmem:[#allocation6 + $0x47] sm:$0xff]  ;;  %2242 = vst.msk [vmem:[#allocation7 + $0x38] sm:$0xff] %vm1100_vm5, %v13920_v54  ;;  %v2361_v16 = vsel %vm13896_vm15, %v2352_v29, 0.0 }
 0x3a0   : > { %v2188_v57 = vsel %vm13890_vm14, %v2350_v56, 0.0  ;;  %v2189_v13 = vsel %vm13896_vm15, %v2351_v4, 0.0  ;;  %v2359_v40 = vsel %vm13860_vm13, %v2350_v56, 0.0  ;;  %v2360_v53 = vsel %vm13890_vm14, %v2351_v4, 0.0  ;;  %v2205_v32 = vld [vmem:[#allocation6 + $0x39] sm:$0xff]  ;;  %v2377_v42 = vld [vmem:[#allocation6 + $0x41] sm:$0xff] }
 0x3a1   : > { %2297 = vst.msk [vmem:[#allocation8 + $0x38] sm:$0xff] %vm1100_vm5, %v2188_v57  ;;  %2298 = vst.msk [vmem:[#allocation8 + $0x40] sm:$0xff] %vm1100_vm5, %v2189_v13  ;;  %vm13968_vm5 = vcmp.ne.s32.totalorder %v2053_v58, 7  ;;  %v2357_v58 = vsel %vm13814_vm11, %v13874_v48, 0.0  ;;  %v2232_v11 = vsel %vm2151_vm9, %v2205_v32, 0.0  ;;  %v2385_v12 = vsel %vm2150_vm8, %v2205_v32, 0.0 }
 0x3a2   : > { %2253 = vrot.lane.b32.xlu0 %v2226_v43, %s12644_s21  ;;  %2255 = vrot.lane.b32.xlu1 %v2227_v0, %s12644_s21  ;;  %v2229_v19 = vsel %vm13968_vm5, %v2202_v8, 0.0  ;;  %v2383_v2 = vsel %vm13968_vm5, %v2203_v23, 0.0  ;;  %v2386_v59 = vsel %vm2151_vm9, %v2377_v42, 0.0  ;;  %vm2153_vm11 = vcmp.ne.s32.totalorder %v2088_v6, 7  ;;  %v9994_v56 = vld [vmem:[%s17537_s3 + $0x70] sm:$0xff]  ;;  %v9995_v4 = vld [vmem:[%s17537_s3 + $0x78] sm:$0xff] }
 0x3a3   : > { %v2388_v21 = vsel %vm2153_vm11, %v2379_v1, 0.0  ;;  %vm2471_vm13 = vcmask 785984   ;;  %vm2582_vm14 = vcmask 785408   ;;  %v9999_v8 = vld [vmem:[%s17537_s3 + $0x98] sm:$0xff]  ;;  %v10012_v61 = vld [vmem:[%s17537_s3 + $0xc0] sm:$0xff] }
 0x3a6   : > { %2444 = vrot.lane.b32.xlu0 %v2380_v17, %s12645_s17  ;;  %2532 = vrot.lane.b32.xlu1 %v13828_v41, %s12645_s17  ;;  %v11352_v17 = vpack.c.bf16 %v9995_v4, %v9994_v56  ;;  %v10014_v56 = vld [vmem:[%s17537_s3 + $0xd0] sm:$0xff]  ;;  %v10015_v4 = vld [vmem:[%s17537_s3 + $0xd8] sm:$0xff] }
 0x3aa   : > { %2404 = vrot.lane.b32.xlu1 %v13828_v41, %s12643_s16  ;;  %2316 = vrot.lane.b32.xlu0 %v13828_v41, %s12644_s21  ;;  %v2358_v41 = vsel %vm13854_vm12, %v13876_v14, 0.0  ;;  %v2370_v14 = vld [vmem:[#allocation6 + $0x50] sm:$0xff]  ;;  %vm2425_vm12 = vcmask 589184  }
 0x3ae   : > { %2530 = vrot.lane.b32.xlu0 %v2364_v55, %s12645_s17  ;;  %2314 = vrot.lane.b32.xlu1 %v2364_v55, %s12644_s21 }
 0x3b2   : > { %2402 = vrot.lane.b32.xlu0 %v2364_v55, %s12643_s16  ;;  %2496 = vrot.lane.b32.xlu1 %v2356_v22, %s12643_s16  ;;  %v2230_v55 = vsel %vm2149_vm6, %v2203_v23, 0.0  ;;  %v9996_v22 = vld [vmem:[%s17537_s3 + $0x80] sm:$0xff] }
 0x3b3   : > { %v11356_v44 = vpack.c.bf16 %v9997_v24, %v9996_v22  ;;  %v10016_v24 = vld [vmem:[%s17537_s3 + $0xe0] sm:$0xff] }
 0x3b6   : > { %2494 = vrot.lane.b32.xlu0 %v2355_v33, %s12643_s16  ;;  %2446 = vrot.lane.b32.xlu1 %v2381_v38, %s12645_s17 }
 0x3ba   : > { %2257 = vrot.lane.b32.xlu0 %v2228_v45, %s12644_s21  ;;  %2259 = vrot.lane.b32.xlu1 %v2229_v19, %s12644_s21  ;;  %v11360_v45 = vpack.c.bf16 %v9999_v8, %v9998_v49  ;;  %v10000_v19 = vld [vmem:[%s17537_s3 + $0xa0] sm:$0xff] }
 0x3be   : > { %2536 = vrot.lane.b32.xlu1 %v13866_v9, %s12645_s17  ;;  %2320 = vrot.lane.b32.xlu0 %v13866_v9, %s12644_s21 }
 0x3c2   : > { %2534 = vrot.lane.b32.xlu0 %v13872_v62, %s12645_s17  ;;  %2318 = vrot.lane.b32.xlu1 %v13872_v62, %s12644_s21 }
 0x3c6   : > { %2498 = vrot.lane.b32.xlu0 %v2357_v58, %s12643_s16  ;;  %2500 = vrot.lane.b32.xlu1 %v2358_v41, %s12643_s16 }
 0x3ca   : > { %2540 = vrot.lane.b32.xlu1 %v13904_v51, %s12645_s17  ;;  %2538 = vrot.lane.b32.xlu0 %v13920_v54, %s12645_s17 }
 0x3ce   : > { %2502 = vrot.lane.b32.xlu0 %v2359_v40, %s12643_s16  ;;  %2322 = vrot.lane.b32.xlu1 %v13920_v54, %s12644_s21 }
 0x3d2   : > { %2448 = vrot.lane.b32.xlu0 %v2382_v18, %s12645_s17  ;;  %2504 = vrot.lane.b32.xlu1 %v2360_v53, %s12643_s16  ;;  %v10002_v18 = vld [vmem:[%s17537_s3 + $0xb0] sm:$0xff]  ;;  %v10003_v53 = vld [vmem:[%s17537_s3 + $0xb8] sm:$0xff] }
 0x3d6   : > { %2261 = vrot.lane.b32.xlu0 %v2230_v55, %s12644_s21  ;;  %2450 = vrot.lane.b32.xlu1 %v2383_v2, %s12645_s17  ;;  %v11368_v2 = vpack.c.bf16 %v10003_v53, %v10002_v18  ;;  %v10021_v18 = vld [vmem:[%s17537_s3 + $0x108] sm:$0xff] }
 0x3da   : > { %2406 = vrot.lane.b32.xlu0 %v13872_v62, %s12643_s16  ;;  %2263 = vrot.lane.b32.xlu1 %v2231_v63, %s12644_s21  ;;  %v2378_v62 = vld [vmem:[#allocation6 + $0x49] sm:$0xff] }
 0x3db   : > { %v2387_v48 = vsel %vm2152_vm10, %v2378_v62, 0.0  ;;  %v2234_v20 = vsel %vm2153_vm11, %v2378_v62, 0.0  ;;  %v10013_v63 = vld [vmem:[%s17537_s3 + $0xc8] sm:$0xff] }
 0x3de   : > { %2452 = vrot.lane.b32.xlu0 %v2384_v60, %s12645_s17  ;;  %2408 = vrot.lane.b32.xlu1 %v13866_v9, %s12643_s16  ;;  %v2233_v9 = vsel %vm2152_vm10, %v2377_v42, 0.0 }
 0x3e2   : > { %2410 = vrot.lane.b32.xlu0 %v13920_v54, %s12643_s16  ;;  %2412 = vrot.lane.b32.xlu1 %v13904_v51, %s12643_s16 }
 0x3e6   : > { %2265 = vrot.lane.b32.xlu0 %v2232_v11, %s12644_s21  ;;  %2454 = vrot.lane.b32.xlu1 %v2385_v12, %s12645_s17  ;;  %v14118_v11 = vpack.c.bf16 %v10013_v63, %v10012_v61  ;;  %v10023_v61 = vld [vmem:[%s17537_s3 + $0x118] sm:$0xff] }
 0x3ea   : > { %2456 = vrot.lane.b32.xlu0 %v2386_v59, %s12645_s17  ;;  %2267 = vrot.lane.b32.xlu1 %v2233_v9, %s12644_s21 }
 0x3ee   : > { %2324 = vrot.lane.b32.xlu0 %v13904_v51, %s12644_s21  ;;  %2458 = vrot.lane.b32.xlu1 %v2387_v48, %s12645_s17 }
 0x3f2   : > { %2506 = vrot.lane.b32.xlu1 %v2361_v16, %s12643_s16  ;;  %2542 = vrot.lane.b32.xlu0 %v2370_v14, %s12645_s17 }
 0x3f6   : > { %2269 = vrot.lane.b32.xlu1 %v2234_v20, %s12644_s21  ;;  %2414 = vrot.lane.b32.xlu0 %v2370_v14, %s12643_s16 }
 0x3fa   : > { %2460 = vrot.lane.b32.xlu1 %v2388_v21, %s12645_s17 }
 0x404   : > { %v2529_v27 = vpop.permute.xlu1 %2528  ;;  %v2313_v31 = vpop.permute.xlu0 %2312 }
 0x405   : > { %2337 = vst.msk [vmem:[#allocation8 + $0x10] sm:$0xff] %vm2280_vm7, %v2313_v31 }
 0x408   : > { %v2401_v25 = vpop.permute.xlu1 %2400  ;;  %v2527_v34 = vpop.permute.xlu0 %2526 }
 0x40c   : > { %v2399_v46 = vpop.permute.xlu0 %2398  ;;  %v2311_v51 = vpop.permute.xlu1 %2310 }
 0x40d   : > { %2336 = vst.msk [vmem:[#allocation8 + $0x8] sm:$0xff] %vm2280_vm7, %v2311_v51 }
 0x410   : > { %v2491_v6 = vpop.permute.xlu0 %2490  ;;  %v2493_v52 = vpop.permute.xlu1 %2492 }
 0x411   : > { %2517 = vst.msk [vmem:[#allocation8] sm:$0xff] %vm2425_vm12, %v2491_v6  ;;  %2518 = vst.msk [vmem:[#allocation8 + $0x8] sm:$0xff] %vm2425_vm12, %v2493_v52 }
 0x412   : > { %2553 = vst.msk [vmem:[#allocation8] sm:$0xff] %vm2471_vm13, %v2527_v34  ;;  %2554 = vst.msk [vmem:[#allocation8 + $0x8] sm:$0xff] %vm2471_vm13, %v2529_v27 }
 0x414   : > { %v2254_v47 = vpop.permute.xlu0 %2253  ;;  %v2256_v54 = vpop.permute.xlu1 %2255 }
 0x415   : > { %2281 = vst.msk [vmem:[#allocation7] sm:$0xff] %vm2280_vm7, %v2254_v47  ;;  %2282 = vst.msk [vmem:[#allocation7 + $0x8] sm:$0xff] %vm2280_vm7, %v2256_v54 }
 0x416   : > { %2426 = vst.msk [vmem:[#allocation7] sm:$0xff] %vm2425_vm12, %v2399_v46  ;;  %2427 = vst.msk [vmem:[#allocation7 + $0x8] sm:$0xff] %vm2425_vm12, %v2401_v25 }
 0x418   : > { %v2445_v57 = vpop.permute.xlu0 %2444  ;;  %v2533_v13 = vpop.permute.xlu1 %2532 }
 0x419   : > { %2472 = vst.msk [vmem:[#allocation7] sm:$0xff] %vm2471_vm13, %v2445_v57  ;;  %v2562_v43 = vld [vmem:[#allocation8] sm:$0xff]  ;;  %v14073_v0 = vld [vmem:[#allocation8 + $0x8] sm:$0xff] }
 0x41a   : > { %10724 = vmatprep.mubr.msk.f32.mxu1 %vm2582_vm14, %v2562_v43 }
 0x41b   : > { %10725 = vmatmul.mubr.msk.f32.vlgmr.msra.gmra.mrb[8].mxu1 %vm2582_vm14, %v14073_v0 }
 0x41c   : > { %v2405_v33 = vpop.permute.xlu1 %2404  ;;  %v2317_v38 = vpop.permute.xlu0 %2316  ;;  %11351 = vmatpush3.bf16.msra.mxu1 %v13982_v26  ;;  %v10001_v26 = vld [vmem:[%s17537_s3 + $0xa8] sm:$0xff] }
 0x41d   : > { %2339 = vst.msk [vmem:[#allocation8 + $0x20] sm:$0xff] %vm2280_vm7, %v2317_v38  ;;  %11353 = vmatprep.subr.bf16.mxu1 %v11352_v17  ;;  %v11364_v40 = vpack.c.bf16 %v10001_v26, %v10000_v19 }
 0x420   : > { %v2531_v5 = vpop.permute.xlu0 %2530  ;;  %v2315_v7 = vpop.permute.xlu1 %2314  ;;  %11355 = vmatpush3.bf16.msra.mxu1 %v11352_v17  ;;  %v2712_v57 = vld [vmem:[#allocation7] sm:$0xff]  ;;  %v11376_v17 = vpack.c.bf16 %v10015_v4, %v10014_v56  ;;  %v10039_v56 = vld [vmem:[%s17537_s3 + $0x158] sm:$0xff]  ;;  %v10041_v4 = vld [vmem:[%s17537_s3 + $0x168] sm:$0xff] }
 0x421   : > { %2338 = vst.msk [vmem:[#allocation8 + $0x18] sm:$0xff] %vm2280_vm7, %v2315_v7  ;;  %11357 = vmatprep.subr.bf16.mxu1 %v11356_v44  ;;  %v10018_v7 = vld [vmem:[%s17537_s3 + $0xf0] sm:$0xff] }
 0x424   : > { %v2403_v58 = vpop.permute.xlu0 %2402  ;;  %v2497_v41 = vpop.permute.xlu1 %2496  ;;  %11359 = vmatpush3.bf16.msra.mxu1 %v11356_v44 }
 0x425   : > { %2520 = vst.msk [vmem:[#allocation8 + $0x18] sm:$0xff] %vm2425_vm12, %v2497_v41  ;;  %11361 = vmatprep.subr.bf16.mxu1 %v11360_v45 }
 0x426   : > { %2556 = vst.msk [vmem:[#allocation8 + $0x18] sm:$0xff] %vm2471_vm13, %v2533_v13 }
 0x428   : > { %v2495_v23 = vpop.permute.xlu0 %2494  ;;  %v2447_v55 = vpop.permute.xlu1 %2446  ;;  %11363 = vmatpush3.bf16.msra.mxu1 %v11360_v45  ;;  %v10019_v45 = vld [vmem:[%s17537_s3 + $0xf8] sm:$0xff] }
 0x429   : > { %2519 = vst.msk [vmem:[#allocation8 + $0x10] sm:$0xff] %vm2425_vm12, %v2495_v23  ;;  %11365 = vmatprep.subr.bf16.mxu1 %v11364_v40  ;;  %v11384_v41 = vpack.c.bf16 %v10019_v45, %v10018_v7 }
 0x42a   : > { %2473 = vst.msk [vmem:[#allocation7 + $0x8] sm:$0xff] %vm2471_vm13, %v2447_v55  ;;  %2555 = vst.msk [vmem:[#allocation8 + $0x10] sm:$0xff] %vm2471_vm13, %v2531_v5 }
 0x42c   : > { %v2258_v60 = vpop.permute.xlu0 %2257  ;;  %v2260_v32 = vpop.permute.xlu1 %2259  ;;  %11367 = vmatpush3.bf16.msra.mxu1 %v11364_v40  ;;  %v10020_v40 = vld [vmem:[%s17537_s3 + $0x100] sm:$0xff] }
 0x42d   : > { %2283 = vst.msk [vmem:[#allocation7 + $0x10] sm:$0xff] %vm2280_vm7, %v2258_v60  ;;  %2284 = vst.msk [vmem:[#allocation7 + $0x18] sm:$0xff] %vm2280_vm7, %v2260_v32  ;;  %11369 = vmatprep.subr.bf16.mxu1 %v11368_v2  ;;  %v14128_v9 = vld [vmem:[#allocation8 + $0x18] sm:$0xff]  ;;  %v11388_v55 = vpack.c.bf16 %v10021_v18, %v10020_v40 }
 0x42e   : > { %2428 = vst.msk [vmem:[#allocation7 + $0x10] sm:$0xff] %vm2425_vm12, %v2403_v58  ;;  %2429 = vst.msk [vmem:[#allocation7 + $0x18] sm:$0xff] %vm2425_vm12, %v2405_v33  ;;  %v10017_v33 = vld [vmem:[%s17537_s3 + $0xe8] sm:$0xff] }
 0x42f   : > { %v11380_v8 = vpack.c.bf16 %v10017_v33, %v10016_v24 }
 0x430   : > { %v2537_v12 = vpop.permute.xlu1 %2536  ;;  %v2321_v42 = vpop.permute.xlu0 %2320  ;;  %11371 = vmatpush3.bf16.msra.mxu1 %v11368_v2  ;;  %v10022_v2 = vld [vmem:[%s17537_s3 + $0x110] sm:$0xff] }
 0x431   : > { %2341 = vst.msk [vmem:[#allocation8 + $0x30] sm:$0xff] %vm2280_vm7, %v2321_v42  ;;  %v14123_v59 = vld [vmem:[#allocation8 + $0x10] sm:$0xff]  ;;  %11373 = vmatprep.subr.bf16.mxu1 %v14118_v11  ;;  %v14172_v22 = vld [vmem:[#allocation7 + $0x8] sm:$0xff] }
 0x432   : > { %10727 = vmatprep.mubr.msk.f32.mxu1 %vm2582_vm14, %v14123_v59  ;;  %v10033_v42 = vld [vmem:[%s17537_s3 + $0x128] sm:$0xff] }
 0x433   : > { %10728 = vmatmul.mubr.msk.f32.gmra.mrb[10].mxu1 %vm2582_vm14, %v14128_v9 }
 0x434   : > { %v2535_v62 = vpop.permute.xlu0 %2534  ;;  %v2319_v48 = vpop.permute.xlu1 %2318 }
 0x435   : > { %2340 = vst.msk [vmem:[#allocation8 + $0x28] sm:$0xff] %vm2280_vm7, %v2319_v48 }
 0x438   : > { %v2499_v29 = vpop.permute.xlu0 %2498  ;;  %v2501_v14 = vpop.permute.xlu1 %2500 }
 0x439   : > { %2521 = vst.msk [vmem:[#allocation8 + $0x20] sm:$0xff] %vm2425_vm12, %v2499_v29  ;;  %2522 = vst.msk [vmem:[#allocation8 + $0x28] sm:$0xff] %vm2425_vm12, %v2501_v14 }
 0x43a   : > { %2557 = vst.msk [vmem:[#allocation8 + $0x20] sm:$0xff] %vm2471_vm13, %v2535_v62  ;;  %2558 = vst.msk [vmem:[#allocation8 + $0x28] sm:$0xff] %vm2471_vm13, %v2537_v12  ;;  %v10032_v12 = vld [vmem:[%s17537_s3 + $0x120] sm:$0xff] }
 0x43b   : > { %v11396_v29 = vpack.c.bf16 %v10033_v42, %v10032_v12 }
 0x43c   : > { %v2541_v16 = vpop.permute.xlu1 %2540  ;;  %v2539_v1 = vpop.permute.xlu0 %2538 }
 0x440   : > { %v2503_v20 = vpop.permute.xlu0 %2502  ;;  %v2323_v21 = vpop.permute.xlu1 %2322 }
 0x441   : > { %2523 = vst.msk [vmem:[#allocation8 + $0x30] sm:$0xff] %vm2425_vm12, %v2503_v20  ;;  %v14139_v27 = vld [vmem:[#allocation8 + $0x20] sm:$0xff]  ;;  %v14141_v31 = vld [vmem:[#allocation8 + $0x28] sm:$0xff] }
 0x442   : > { %2342 = vst.msk [vmem:[#allocation8 + $0x38] sm:$0xff] %vm2280_vm7, %v2323_v21  ;;  %10730 = vmatprep.mubr.msk.f32.mxu1 %vm2582_vm14, %v14139_v27  ;;  %v10034_v20 = vld [vmem:[%s17537_s3 + $0x130] sm:$0xff]  ;;  %v10035_v21 = vld [vmem:[%s17537_s3 + $0x138] sm:$0xff] }
 0x443   : > { %2559 = vst.msk [vmem:[#allocation8 + $0x30] sm:$0xff] %vm2471_vm13, %v2539_v1  ;;  %10731 = vmatmul.mubr.msk.f32.gmra.mrb[12].mxu1 %vm2582_vm14, %v14141_v31 }
 0x444   : > { %v2449_v25 = vpop.permute.xlu0 %2448  ;;  %v2505_v34 = vpop.permute.xlu1 %2504 }
 0x445   : > { %2474 = vst.msk [vmem:[#allocation7 + $0x10] sm:$0xff] %vm2471_vm13, %v2449_v25 }
 0x446   : > { %2524 = vst.msk [vmem:[#allocation8 + $0x38] sm:$0xff] %vm2425_vm12, %v2505_v34  ;;  %v11400_v34 = vpack.c.bf16 %v10035_v21, %v10034_v20 }
 0x447   : > { %2560 = vst.msk [vmem:[#allocation8 + $0x38] sm:$0xff] %vm2471_vm13, %v2541_v16 }
 0x448   : > { %v2262_v46 = vpop.permute.xlu0 %2261  ;;  %v2451_v51 = vpop.permute.xlu1 %2450 }
 0x449   : > { %2285 = vst.msk [vmem:[#allocation7 + $0x20] sm:$0xff] %vm2280_vm7, %v2262_v46  ;;  %v10036_v46 = vld [vmem:[%s17537_s3 + $0x140] sm:$0xff] }
 0x44a   : > { %2475 = vst.msk [vmem:[#allocation7 + $0x18] sm:$0xff] %vm2471_vm13, %v2451_v51  ;;  %v14153_v6 = vld [vmem:[#allocation8 + $0x30] sm:$0xff]  ;;  %v10037_v51 = vld [vmem:[%s17537_s3 + $0x148] sm:$0xff] }
 0x44b   : > { %10733 = vmatprep.mubr.msk.f32.mxu1 %vm2582_vm14, %v14153_v6 }
 0x44c   : > { %v2407_v52 = vpop.permute.xlu0 %2406  ;;  %v2264_v47 = vpop.permute.xlu1 %2263  ;;  %v14182_v38 = vld [vmem:[#allocation7 + $0x10] sm:$0xff] }
 0x44d   : > { %2430 = vst.msk [vmem:[#allocation7 + $0x20] sm:$0xff] %vm2425_vm12, %v2407_v52 }
 0x44e   : > { %2286 = vst.msk [vmem:[#allocation7 + $0x28] sm:$0xff] %vm2280_vm7, %v2264_v47  ;;  %v14159_v54 = vld [vmem:[#allocation8 + $0x38] sm:$0xff]  ;;  %v10038_v47 = vld [vmem:[%s17537_s3 + $0x150] sm:$0xff] }
 0x44f   : > { %10734 = vmatmul.mubr.msk.f32.gmra.mrb[14].mxu1 %vm2582_vm14, %v14159_v54 }
 0x450   : > { %10760 = vmatprep.mubr.msk.f32.mxu1 %vm2582_vm14, %v2712_v57  ;;  %v2453_v13 = vpop.permute.xlu0 %2452  ;;  %v2409_v43 = vpop.permute.xlu1 %2408  ;;  %v10042_v57 = vld [vmem:[%s17537_s3 + $0x170] sm:$0xff] }
 0x451   : > { %2476 = vst.msk [vmem:[#allocation7 + $0x20] sm:$0xff] %vm2471_vm13, %v2453_v13  ;;  %v14187_v5 = vld [vmem:[#allocation7 + $0x18] sm:$0xff] }
 0x452   : > { %2431 = vst.msk [vmem:[#allocation7 + $0x28] sm:$0xff] %vm2425_vm12, %v2409_v43  ;;  %v10043_v13 = vld [vmem:[%s17537_s3 + $0x178] sm:$0xff] }
 0x453   : > { %10761 = vmatmul.mubr.msk.f32.vlgmr.msra.gmra.mrb[16].mxu1 %vm2582_vm14, %v14172_v22 }
 0x454   : > { %10763 = vmatprep.mubr.msk.f32.mxu1 %vm2582_vm14, %v14182_v38  ;;  %11375 = vmatpush3.bf16.msra.mxu1 %v14118_v11  ;;  %v2411_v44 = vpop.permute.xlu0 %2410  ;;  %v2413_v49 = vpop.permute.xlu1 %2412  ;;  %v11392_v11 = vpack.c.bf16 %v10023_v61, %v10022_v2 }
 0x455   : > { %11377 = vmatprep.subr.bf16.mxu1 %v11376_v17 }
 0x457   : > { %10764 = vmatmul.mubr.msk.f32.gmra.mrb[18].mxu1 %vm2582_vm14, %v14187_v5 }
 0x458   : > { %11379 = vmatpush3.bf16.msra.mxu1 %v11376_v17  ;;  %v2266_v19 = vpop.permute.xlu0 %2265  ;;  %v2455_v26 = vpop.permute.xlu1 %2454  ;;  %v14197_v58 = vld [vmem:[#allocation7 + $0x20] sm:$0xff] }
 0x459   : > { %11381 = vmatprep.subr.bf16.mxu1 %v11380_v8  ;;  %2287 = vst.msk [vmem:[#allocation7 + $0x30] sm:$0xff] %vm2280_vm7, %v2266_v19  ;;  %10766 = vmatprep.mubr.msk.f32.mxu1 %vm2582_vm14, %v14197_v58  ;;  %v3299_v17 = vld [vmem:[#allocation21 + $0x8] sm:$0xff] }
 0x45a   : > { %2477 = vst.msk [vmem:[#allocation7 + $0x28] sm:$0xff] %vm2471_vm13, %v2455_v26  ;;  %v14298_v24 = vand.u32 4294901760, %v3299_v17 }
 0x45b   : > { %2432 = vst.msk [vmem:[#allocation7 + $0x30] sm:$0xff] %vm2425_vm12, %v2411_v44  ;;  %v14306_v44 = vld [vmem:[#allocation17] ss:$0 sm:$0xff] }
 0x45c   : > { %11383 = vmatpush3.bf16.msra.mxu1 %v11380_v8  ;;  %v2457_v53 = vpop.permute.xlu0 %2456  ;;  %v2268_v23 = vpop.permute.xlu1 %2267  ;;  %17850 = vst [vmem:[#allocation36_spill] sm:$0xff] %v14298_v24  ;;  %v14302_v33 = vsub.f32 %v3299_v17, %v14298_v24 }
 0x45d   : > { %11385 = vmatprep.subr.bf16.mxu1 %v11384_v41  ;;  %2478 = vst.msk [vmem:[#allocation7 + $0x30] sm:$0xff] %vm2471_vm13, %v2457_v53 }
 0x45e   : > { %2288 = vst.msk [vmem:[#allocation7 + $0x38] sm:$0xff] %vm2280_vm7, %v2268_v23  ;;  %17851 = vst [vmem:[#allocation37_spill] sm:$0xff] %v14302_v33  ;;  %4518 = vmatprep.mubr.f32.mxu0 %v14302_v33 }
 0x45f   : > { %2433 = vst.msk [vmem:[#allocation7 + $0x38] sm:$0xff] %vm2425_vm12, %v2413_v49 }
 0x460   : > { %11387 = vmatpush3.bf16.msra.mxu1 %v11384_v41  ;;  %v2325_v63 = vpop.permute.xlu0 %2324  ;;  %v2459_v60 = vpop.permute.xlu1 %2458 }
 0x461   : > { %v14219_v32 = vld [vmem:[#allocation7 + $0x28] sm:$0xff]  ;;  %11389 = vmatprep.subr.bf16.mxu1 %v11388_v55  ;;  %2343 = vst.msk [vmem:[#allocation8 + $0x40] sm:$0xff] %vm2280_vm7, %v2325_v63 }
 0x462   : > { %2479 = vst.msk [vmem:[#allocation7 + $0x38] sm:$0xff] %vm2471_vm13, %v2459_v60  ;;  %10767 = vmatmul.mubr.msk.f32.gmra.mrb[20].mxu1 %vm2582_vm14, %v14219_v32 }
 0x464   : > { %11391 = vmatpush3.bf16.msra.mxu1 %v11388_v55  ;;  %v2507_v62 = vpop.permute.xlu1 %2506  ;;  %v2718_v48 = vld [vmem:[#allocation7 + $0x30] sm:$0xff]  ;;  %v2543_v14 = vpop.permute.xlu0 %2542 }
 0x465   : > { %11393 = vmatprep.subr.bf16.mxu1 %v11392_v11  ;;  %2525 = vst.msk [vmem:[#allocation8 + $0x40] sm:$0xff] %vm2425_vm12, %v2507_v62  ;;  %10769 = vmatprep.mubr.msk.f32.mxu1 %vm2582_vm14, %v2718_v48 }
 0x466   : > { %2561 = vst.msk [vmem:[#allocation8 + $0x40] sm:$0xff] %vm2471_vm13, %v2543_v14 }
 0x468   : > { %11395 = vmatpush3.bf16.msra.mxu1 %v11392_v11  ;;  %v2270_v16 = vpop.permute.xlu1 %2269  ;;  %v2415_v25 = vpop.permute.xlu0 %2414 }
 0x469   : > { %v2719_v1 = vld [vmem:[#allocation7 + $0x38] sm:$0xff]  ;;  %11397 = vmatprep.subr.bf16.mxu1 %v11396_v29  ;;  %2289 = vst.msk [vmem:[#allocation7 + $0x40] sm:$0xff] %vm2280_vm7, %v2270_v16  ;;  %vm17784_vm7 = vcmask 195680  }
 0x46a   : > { %10770 = vmatmul.mubr.msk.f32.gmra.mrb[22].mxu1 %vm2582_vm14, %v2719_v1  ;;  %2434 = vst.msk [vmem:[#allocation7 + $0x40] sm:$0xff] %vm2425_vm12, %v2415_v25 }
 0x46b   : > { %10796 = vmatprep.mubr.msk.f32.mxu1 %vm2582_vm14, %v14073_v0  ;;  %v11404_v0 = vpack.c.bf16 %v10037_v51, %v10036_v46 }
 0x46c   : > { %v2461_v52 = vpop.permute.xlu1 %2460 }
 0x46d   : > { %2480 = vst.msk [vmem:[#allocation7 + $0x40] sm:$0xff] %vm2471_vm13, %v2461_v52 }
 0x46e   : > { %10797 = vmatmul.mubr.msk.f32.vlgmr.msra.gmra.mrb[24].mxu1 %vm2582_vm14, %v14123_v59  ;;  %v11408_v59 = vpack.c.bf16 %v10039_v56, %v10038_v47 }
 0x46f   : > { %11399 = vmatpush3.bf16.msra.mxu1 %v11396_v29  ;;  %10799 = vmatprep.mubr.msk.f32.mxu1 %vm2582_vm14, %v14128_v9  ;;  %v10040_v9 = vld [vmem:[%s17537_s3 + $0x160] sm:$0xff] }
 0x470   : > { %11401 = vmatprep.subr.bf16.mxu1 %v11400_v34 }
 0x472   : > { %10800 = vmatmul.mubr.msk.f32.gmra.mrb[26].mxu1 %vm2582_vm14, %v14139_v27  ;;  %v2869_v27 = vld [vmem:[#allocation8 + $0x40] sm:$0xff] }
 0x473   : > { %11403 = vmatpush3.bf16.msra.mxu1 %v11400_v34  ;;  %10802 = vmatprep.mubr.msk.f32.mxu1 %vm2582_vm14, %v14141_v31  ;;  %v11412_v31 = vpack.c.bf16 %v10041_v4, %v10040_v9 }
 0x474   : > { %11405 = vmatprep.subr.bf16.mxu1 %v11404_v0 }
 0x476   : > { %10803 = vmatmul.mubr.msk.f32.gmra.mrb[28].mxu1 %vm2582_vm14, %v14153_v6  ;;  %v11416_v6 = vpack.c.bf16 %v10043_v13, %v10042_v57 }
 0x477   : > { %11407 = vmatpush3.bf16.msra.mxu1 %v11404_v0  ;;  %10805 = vmatprep.mubr.msk.f32.mxu1 %vm2582_vm14, %v14159_v54  ;;  %v3019_v54 = vld [vmem:[#allocation7 + $0x40] sm:$0xff] }
 0x478   : > { %11409 = vmatprep.subr.bf16.mxu1 %v11408_v59 }
 0x47a   : > { %10806 = vmatmul.mubr.msk.f32.gmra.mrb[30].mxu1 %vm2582_vm14, %v2869_v27 }
 0x47b   : > { %11411 = vmatpush3.bf16.msra.mxu1 %v11408_v59  ;;  %10832 = vmatprep.mubr.msk.f32.mxu1 %vm2582_vm14, %v14172_v22 }
 0x47c   : > { %11413 = vmatprep.subr.bf16.mxu1 %v11412_v31 }
 0x47f   : > { %11415 = vmatpush3.bf16.msra.mxu1 %v11412_v31 }
 0x480   : > { %11417 = vmatprep.subr.bf16.mxu1 %v11416_v6 }
 0x483   : > { %11419 = vmatpush3.bf16.msra.mxu1 %v11416_v6 }
 0x484   : > { %11420 = vmatprep.subr.bf16.mxu1 %v17817_v39 }
 0x486   : > { %10833 = vmatmul.mubr.msk.f32.vlgmr.msra.gmra.mrb[32].mxu1 %vm2582_vm14, %v14182_v38  ;;  %v17548_v38 = vand.u32 4294901760, %v14302_v33 }
 0x487   : > { %10835 = vmatprep.mubr.msk.f32.mxu1 %vm2582_vm14, %v14187_v5 }
 0x488   : > { %v3461_v49 = vsub.f32 %v14302_v33, %v17548_v38  ;;  %v3305_v33 = vld [vmem:[#allocation21 + $0x38] sm:$0xff] }
 0x48a   : > { %10836 = vmatmul.mubr.msk.f32.gmra.mrb[34].mxu1 %vm2582_vm14, %v14197_v58  ;;  %v3462_v45 = vand.u32 4294901760, %v3461_v49 }
 0x48b   : > { %10838 = vmatprep.mubr.msk.f32.mxu1 %vm2582_vm14, %v14219_v32 }
 0x48e   : > { %10839 = vmatmul.mubr.msk.f32.gmra.mrb[36].mxu1 %vm2582_vm14, %v2718_v48 }
 0x48f   : > { %10841 = vmatprep.mubr.msk.f32.mxu1 %vm2582_vm14, %v2719_v1 }
 0x492   : > { %10842 = vmatmul.mubr.msk.f32.gmra.mrb[38].mxu1 %vm2582_vm14, %v3019_v54 }
 0x493   : > { %3463 = vmatprep.mubr.f32.mxu1 %v3462_v45 }
 0x4ee   : > { %v10726_v43 = vpop.f32.mrb[8].mxu1 }
 0x4ef   : > { %3164 = vst.msk [vmem:[#allocation9 + $0x8] sm:$0xff] %vm17782_vm1, %v10726_v43  ;;  %v2673_v22 = vpop.f32.mrb[9].mxu1 }
 0x4f0   : > { %3163 = vst.msk [vmem:[#allocation9] sm:$0xff] %vm17782_vm1, %v2673_v22 }
 0x4f6   : > { %v3196_v8 = vld [vmem:[#allocation9 + $0x8] sm:$0xff] }
 0x4f7   : > { %v3195_v5 = vld [vmem:[#allocation9] sm:$0xff]  ;;  %v3235_v7 = vadd.f32 %v14306_v44, %v3196_v8 }
 0x4f8   : > { %v3234_v19 = vadd.f32 %v14306_v44, %v3195_v5 }
 0x4f9   : > { %v3267_v26 = vmax.f32 %v3235_v7, 0.0 }
 0x4fa   : > { %v3266_v58 = vmax.f32 %v3234_v19, 0.0 }
 0x4fb   : > { %v3366_v41 = vand.u32 4294901760, %v3267_v26 }
 0x4fc   : > { %v3363_v40 = vand.u32 4294901760, %v3266_v58 }
 0x4fd   : > { %v3948_v18 = vsub.f32 %v3267_v26, %v3366_v41 }
 0x4fe   : > { %v14313_v53 = vpack.c.bf16 %v3366_v41, %v3363_v40  ;;  %v3941_v23 = vsub.f32 %v3266_v58, %v3363_v40 }
 0x4ff   : > { %v3949_v55 = vand.u32 4294901760, %v3948_v18 }
 0x500   : > { %17852 = vst [vmem:[#allocation38_spill] sm:$0xff] %v14313_v53  ;;  %11422 = vmatpush1.bf16.msra.mxu1 %v14313_v53  ;;  %v11517_v2 = vpack.c.bf16 %v3948_v18, %v3941_v23  ;;  %v3942_v61 = vand.u32 4294901760, %v3941_v23 }
 0x501   : > { %11423 = vmatprep.subr.bf16.mxu1 %v17817_v39  ;;  %v3950_v63 = vsub.f32 %v3948_v18, %v3949_v55 }
 0x502   : > { %11518 = vmatpush1.bf16.msra.mxu0 %v11517_v2  ;;  %v3943_v60 = vsub.f32 %v3941_v23, %v3942_v61  ;;  %v14317_v32 = vpack.c.bf16 %v3949_v55, %v3942_v61 }
 0x503   : > { %11519 = vmatprep.subr.bf16.mxu0 %v17817_v39  ;;  %v3951_v11 = vand.u32 4294901760, %v3950_v63 }
 0x504   : > { %17853 = vst [vmem:[#allocation39_spill] sm:$0xff] %v14317_v32  ;;  %v3944_v12 = vand.u32 4294901760, %v3943_v60 }
 0x506   : > { %v10729_v42 = vpop.f32.mrb[10].mxu1  ;;  %v14320_v62 = vpack.c.bf16 %v3951_v11, %v3944_v12 }
 0x507   : > { %3166 = vst.msk [vmem:[#allocation9 + $0x18] sm:$0xff] %vm17782_vm1, %v10729_v42  ;;  %v2683_v48 = vpop.f32.mrb[11].mxu1 }
 0x508   : > { %3165 = vst.msk [vmem:[#allocation9 + $0x10] sm:$0xff] %vm17782_vm1, %v2683_v48 }
 0x50e   : > { %v3198_v29 = vld [vmem:[#allocation9 + $0x18] sm:$0xff] }
 0x50f   : > { %v3197_v14 = vld [vmem:[#allocation9 + $0x10] sm:$0xff]  ;;  %v3237_v16 = vadd.f32 %v14306_v44, %v3198_v29 }
 0x510   : > { %v3236_v1 = vadd.f32 %v14306_v44, %v3197_v14 }
 0x511   : > { %v3269_v20 = vmax.f32 %v3237_v16, 0.0 }
 0x512   : > { %v3268_v21 = vmax.f32 %v3236_v1, 0.0 }
 0x513   : > { %v3372_v25 = vand.u32 4294901760, %v3269_v20 }
 0x514   : > { %v3369_v34 = vand.u32 4294901760, %v3268_v21 }
 0x515   : > { %v3962_v46 = vsub.f32 %v3269_v20, %v3372_v25 }
 0x516   : > { %v10732_v51 = vpop.f32.mrb[12].mxu1  ;;  %v14326_v52 = vpack.c.bf16 %v3372_v25, %v3369_v34  ;;  %v3955_v0 = vsub.f32 %v3268_v21, %v3369_v34 }
 0x517   : > { %3168 = vst.msk [vmem:[#allocation9 + $0x28] sm:$0xff] %vm17782_vm1, %v10732_v51  ;;  %v2693_v47 = vpop.f32.mrb[13].mxu1  ;;  %v3963_v56 = vand.u32 4294901760, %v3962_v46 }
 0x518   : > { %17854 = vst [vmem:[#allocation40_spill] sm:$0xff] %v14326_v52  ;;  %3167 = vst.msk [vmem:[#allocation9 + $0x20] sm:$0xff] %vm17782_vm1, %v2693_v47  ;;  %11425 = vmatpush1.bf16.msra.mxu1 %v14326_v52  ;;  %v11520_v59 = vpack.c.bf16 %v3962_v46, %v3955_v0  ;;  %v3956_v9 = vand.u32 4294901760, %v3955_v0 }
 0x519   : > { %11426 = vmatprep.subr.bf16.mxu1 %v17817_v39  ;;  %v3964_v4 = vsub.f32 %v3962_v46, %v3963_v56 }
 0x51a   : > { %11521 = vmatpush1.bf16.msra.mxu0 %v11520_v59  ;;  %v3957_v27 = vsub.f32 %v3955_v0, %v3956_v9  ;;  %v14332_v31 = vpack.c.bf16 %v3963_v56, %v3956_v9 }
 0x51b   : > { %11522 = vmatprep.subr.bf16.mxu0 %v17817_v39  ;;  %v3965_v57 = vand.u32 4294901760, %v3964_v4 }
 0x51c   : > { %17855 = vst [vmem:[#allocation41_spill] sm:$0xff] %v14332_v31  ;;  %v3958_v13 = vand.u32 4294901760, %v3957_v27 }
 0x51e   : > { %v3200_v6 = vld [vmem:[#allocation9 + $0x28] sm:$0xff]  ;;  %v14335_v54 = vpack.c.bf16 %v3965_v57, %v3958_v13 }
 0x51f   : > { %v3199_v43 = vld [vmem:[#allocation9 + $0x20] sm:$0xff]  ;;  %v3239_v17 = vadd.f32 %v14306_v44, %v3200_v6 }
 0x520   : > { %v3238_v22 = vadd.f32 %v14306_v44, %v3199_v43 }
 0x521   : > { %v3271_v8 = vmax.f32 %v3239_v17, 0.0 }
 0x522   : > { %v10735_v49 = vpop.f32.mrb[14].mxu1  ;;  %v3270_v7 = vmax.f32 %v3238_v22, 0.0 }
 0x523   : > { %3170 = vst.msk [vmem:[#allocation9 + $0x38] sm:$0xff] %vm17782_vm1, %v10735_v49  ;;  %v2703_v5 = vpop.f32.mrb[15].mxu1  ;;  %v3378_v45 = vand.u32 4294901760, %v3271_v8 }
 0x524   : > { %3169 = vst.msk [vmem:[#allocation9 + $0x30] sm:$0xff] %vm17782_vm1, %v2703_v5  ;;  %v3375_v19 = vand.u32 4294901760, %v3270_v7 }
 0x525   : > { %v3976_v58 = vsub.f32 %v3271_v8, %v3378_v45 }
 0x526   : > { %v10762_v26 = vpop.f32.mrb[16].mxu1  ;;  %v14342_v40 = vpack.c.bf16 %v3378_v45, %v3375_v19  ;;  %v3969_v18 = vsub.f32 %v3270_v7, %v3375_v19 }
 0x527   : > { %3172 = vst.msk [vmem:[#allocation9 + $0x48] sm:$0xff] %vm17782_vm1, %v10762_v26  ;;  %v2823_v41 = vpop.f32.mrb[17].mxu1  ;;  %v3977_v23 = vand.u32 4294901760, %v3976_v58 }
 0x528   : > { %17856 = vst [vmem:[#allocation42_spill] sm:$0xff] %v14342_v40  ;;  %3171 = vst.msk [vmem:[#allocation9 + $0x40] sm:$0xff] %vm17782_vm1, %v2823_v41  ;;  %11428 = vmatpush1.bf16.msra.mxu1 %v14342_v40  ;;  %v11523_v55 = vpack.c.bf16 %v3976_v58, %v3969_v18  ;;  %v3970_v2 = vand.u32 4294901760, %v3969_v18 }
 0x529   : > { %11429 = vmatprep.subr.bf16.mxu1 %v17817_v39  ;;  %v3978_v60 = vsub.f32 %v3976_v58, %v3977_v23 }
 0x52a   : > { %v10765_v61 = vpop.f32.mrb[18].mxu1  ;;  %v3202_v63 = vld [vmem:[#allocation9 + $0x38] sm:$0xff]  ;;  %11524 = vmatpush1.bf16.msra.mxu0 %v11523_v55  ;;  %v3971_v48 = vsub.f32 %v3969_v18, %v3970_v2  ;;  %v14349_v29 = vpack.c.bf16 %v3977_v23, %v3970_v2 }
 0x52b   : > { %3174 = vst.msk [vmem:[#allocation9 + $0x58] sm:$0xff] %vm17782_vm1, %v10765_v61  ;;  %v2833_v11 = vpop.f32.mrb[19].mxu1  ;;  %v3201_v12 = vld [vmem:[#allocation9 + $0x30] sm:$0xff]  ;;  %v3241_v42 = vadd.f32 %v14306_v44, %v3202_v63  ;;  %11525 = vmatprep.subr.bf16.mxu0 %v17817_v39  ;;  %v3979_v16 = vand.u32 4294901760, %v3978_v60 }
 0x52c   : > { %17857 = vst [vmem:[#allocation43_spill] sm:$0xff] %v14349_v29  ;;  %3173 = vst.msk [vmem:[#allocation9 + $0x50] sm:$0xff] %vm17782_vm1, %v2833_v11  ;;  %v3240_v14 = vadd.f32 %v14306_v44, %v3201_v12  ;;  %v3972_v20 = vand.u32 4294901760, %v3971_v48  ;;  %v3303_v29 = vld [vmem:[#allocation21 + $0x28] sm:$0xff] }
 0x52d   : > { %v3273_v1 = vmax.f32 %v3241_v42, 0.0 }
 0x52e   : > { %v3272_v21 = vmax.f32 %v3240_v14, 0.0  ;;  %v3204_v25 = vld [vmem:[#allocation9 + $0x48] sm:$0xff]  ;;  %v14355_v0 = vpack.c.bf16 %v3979_v16, %v3972_v20 }
 0x52f   : > { %v3384_v34 = vand.u32 4294901760, %v3273_v1  ;;  %v3203_v46 = vld [vmem:[#allocation9 + $0x40] sm:$0xff]  ;;  %v3243_v51 = vadd.f32 %v14306_v44, %v3204_v25 }
 0x530   : > { %v3381_v47 = vand.u32 4294901760, %v3272_v21  ;;  %v3242_v56 = vadd.f32 %v14306_v44, %v3203_v46 }
 0x531   : > { %v3990_v59 = vsub.f32 %v3273_v1, %v3384_v34  ;;  %v3275_v9 = vmax.f32 %v3243_v51, 0.0 }
 0x532   : > { %v14358_v4 = vpack.c.bf16 %v3384_v34, %v3381_v47  ;;  %v3983_v27 = vsub.f32 %v3272_v21, %v3381_v47  ;;  %v3274_v57 = vmax.f32 %v3242_v56, 0.0  ;;  %v3206_v13 = vld [vmem:[#allocation9 + $0x58] sm:$0xff] }
 0x533   : > { %v3390_v6 = vand.u32 4294901760, %v3275_v9  ;;  %v3205_v43 = vld [vmem:[#allocation9 + $0x50] sm:$0xff]  ;;  %v3245_v17 = vadd.f32 %v14306_v44, %v3206_v13  ;;  %v3991_v22 = vand.u32 4294901760, %v3990_v59 }
 0x534   : > { %17858 = vst [vmem:[#allocation44_spill] sm:$0xff] %v14358_v4  ;;  %11431 = vmatpush1.bf16.msra.mxu1 %v14358_v4  ;;  %v11526_v49 = vpack.c.bf16 %v3990_v59, %v3983_v27  ;;  %v3387_v8 = vand.u32 4294901760, %v3274_v57  ;;  %v3244_v5 = vadd.f32 %v14306_v44, %v3205_v43  ;;  %v3984_v7 = vand.u32 4294901760, %v3983_v27 }
 0x535   : > { %v10768_v45 = vpop.f32.mrb[20].mxu1  ;;  %11432 = vmatprep.subr.bf16.mxu1 %v17817_v39  ;;  %v4004_v19 = vsub.f32 %v3275_v9, %v3390_v6  ;;  %v3277_v26 = vmax.f32 %v3245_v17, 0.0  ;;  %v3992_v58 = vsub.f32 %v3990_v59, %v3991_v22 }
 0x536   : > { %3176 = vst.msk [vmem:[#allocation9 + $0x68] sm:$0xff] %vm17782_vm1, %v10768_v45  ;;  %v2843_v41 = vpop.f32.mrb[21].mxu1  ;;  %11527 = vmatpush1.bf16.msra.mxu0 %v11526_v49  ;;  %v14365_v18 = vpack.c.bf16 %v3390_v6, %v3387_v8  ;;  %v3997_v23 = vsub.f32 %v3274_v57, %v3387_v8  ;;  %v3276_v55 = vmax.f32 %v3244_v5, 0.0  ;;  %v3985_v2 = vsub.f32 %v3983_v27, %v3984_v7 }
 0x537   : > { %3175 = vst.msk [vmem:[#allocation9 + $0x60] sm:$0xff] %vm17782_vm1, %v2843_v41  ;;  %11528 = vmatprep.subr.bf16.mxu0 %v17817_v39  ;;  %v3396_v61 = vand.u32 4294901760, %v3277_v26  ;;  %v3993_v63 = vand.u32 4294901760, %v3992_v58  ;;  %v4005_v60 = vand.u32 4294901760, %v4004_v19  ;;  %v14378_v57 = vpack.c.bf16 %v3991_v22, %v3984_v7 }
 0x538   : > { %17859 = vst [vmem:[#allocation45_spill] sm:$0xff] %v14365_v18  ;;  %11434 = vmatpush1.bf16.msra.mxu1 %v14365_v18  ;;  %v11529_v11 = vpack.c.bf16 %v4004_v19, %v3997_v23  ;;  %v3393_v12 = vand.u32 4294901760, %v3276_v55  ;;  %v3986_v42 = vand.u32 4294901760, %v3985_v2  ;;  %v3998_v48 = vand.u32 4294901760, %v3997_v23 }
 0x539   : > { %11435 = vmatprep.subr.bf16.mxu1 %v17817_v39  ;;  %v4018_v14 = vsub.f32 %v3277_v26, %v3396_v61  ;;  %v4006_v16 = vsub.f32 %v4004_v19, %v4005_v60  ;;  %17861 = vst [vmem:[#allocation47_spill] sm:$0xff] %v14378_v57  ;;  %v3300_v57 = vld [vmem:[#allocation21 + $0x10] sm:$0xff] }
 0x53a   : > { %11530 = vmatpush1.bf16.msra.mxu0 %v11529_v11  ;;  %v14371_v1 = vpack.c.bf16 %v3396_v61, %v3393_v12  ;;  %v4011_v20 = vsub.f32 %v3276_v55, %v3393_v12  ;;  %v14373_v21 = vpack.c.bf16 %v3993_v63, %v3986_v42  ;;  %v3999_v25 = vsub.f32 %v3997_v23, %v3998_v48 }
 0x53b   : > { %11531 = vmatprep.subr.bf16.mxu0 %v17817_v39  ;;  %v4007_v34 = vand.u32 4294901760, %v4006_v16  ;;  %v4019_v46 = vand.u32 4294901760, %v4018_v14  ;;  %v14387_v7 = vpack.c.bf16 %v4005_v60, %v3998_v48 }
 0x53c   : > { %17860 = vst [vmem:[#allocation46_spill] sm:$0xff] %v14371_v1  ;;  %11437 = vmatpush1.bf16.msra.mxu1 %v14371_v1  ;;  %v11532_v51 = vpack.c.bf16 %v4018_v14, %v4011_v20  ;;  %v4000_v47 = vand.u32 4294901760, %v3999_v25  ;;  %v4012_v56 = vand.u32 4294901760, %v4011_v20 }
 0x53d   : > { %v10771_v59 = vpop.f32.mrb[22].mxu1  ;;  %11438 = vmatprep.subr.bf16.mxu1 %v17817_v39  ;;  %v3208_v9 = vld [vmem:[#allocation9 + $0x68] sm:$0xff]  ;;  %v4020_v27 = vsub.f32 %v4018_v14, %v4019_v46  ;;  %17862 = vst [vmem:[#allocation48_spill] sm:$0xff] %v14387_v7 }
 0x53e   : > { %3178 = vst.msk [vmem:[#allocation9 + $0x78] sm:$0xff] %vm17782_vm1, %v10771_v59  ;;  %v2853_v13 = vpop.f32.mrb[23].mxu1  ;;  %11533 = vmatpush1.bf16.msra.mxu0 %v11532_v51  ;;  %v3207_v6 = vld [vmem:[#allocation9 + $0x60] sm:$0xff]  ;;  %v3247_v43 = vadd.f32 %v14306_v44, %v3208_v9  ;;  %v14382_v17 = vpack.c.bf16 %v4007_v34, %v4000_v47  ;;  %v4013_v49 = vsub.f32 %v4011_v20, %v4012_v56 }
 0x53f   : > { %3177 = vst.msk [vmem:[#allocation9 + $0x70] sm:$0xff] %vm17782_vm1, %v2853_v13  ;;  %v3246_v8 = vadd.f32 %v14306_v44, %v3207_v6  ;;  %11534 = vmatprep.subr.bf16.mxu0 %v17817_v39  ;;  %v4021_v5 = vand.u32 4294901760, %v4020_v27  ;;  %v14389_v58 = vpack.c.bf16 %v4019_v46, %v4012_v56 }
 0x540   : > { %v3279_v45 = vmax.f32 %v3247_v43, 0.0  ;;  %v4014_v22 = vand.u32 4294901760, %v4013_v49 }
 0x541   : > { %v10798_v19 = vpop.f32.mrb[24].mxu1  ;;  %v3278_v26 = vmax.f32 %v3246_v8, 0.0  ;;  %17863 = vst [vmem:[#allocation49_spill] sm:$0xff] %v14389_v58 }
 0x542   : > { %3180 = vst.msk [vmem:[#allocation9 + $0x88] sm:$0xff] %vm17782_vm1, %v10798_v19  ;;  %v2973_v41 = vpop.f32.mrb[25].mxu1  ;;  %v3402_v23 = vand.u32 4294901760, %v3279_v45  ;;  %v14392_v55 = vpack.c.bf16 %v4021_v5, %v4014_v22 }
 0x543   : > { %3179 = vst.msk [vmem:[#allocation9 + $0x80] sm:$0xff] %vm17782_vm1, %v2973_v41  ;;  %v3399_v2 = vand.u32 4294901760, %v3278_v26 }
 0x544   : > { %v4032_v61 = vsub.f32 %v3279_v45, %v3402_v23 }
 0x545   : > { %v10801_v63 = vpop.f32.mrb[26].mxu1  ;;  %v14395_v11 = vpack.c.bf16 %v3402_v23, %v3399_v2  ;;  %v4025_v12 = vsub.f32 %v3278_v26, %v3399_v2  ;;  %v3210_v60 = vld [vmem:[#allocation9 + $0x78] sm:$0xff] }
 0x546   : > { %3182 = vst.msk [vmem:[#allocation9 + $0x98] sm:$0xff] %vm17782_vm1, %v10801_v63  ;;  %v2983_v42 = vpop.f32.mrb[27].mxu1  ;;  %v3209_v48 = vld [vmem:[#allocation9 + $0x70] sm:$0xff]  ;;  %v3249_v14 = vadd.f32 %v14306_v44, %v3210_v60  ;;  %v4033_v16 = vand.u32 4294901760, %v4032_v61 }
 0x547   : > { %17864 = vst [vmem:[#allocation50_spill] sm:$0xff] %v14395_v11  ;;  %3181 = vst.msk [vmem:[#allocation9 + $0x90] sm:$0xff] %vm17782_vm1, %v2983_v42  ;;  %11440 = vmatpush1.bf16.msra.mxu1 %v14395_v11  ;;  %v11535_v20 = vpack.c.bf16 %v4032_v61, %v4025_v12  ;;  %v3248_v25 = vadd.f32 %v14306_v44, %v3209_v48  ;;  %v4026_v34 = vand.u32 4294901760, %v4025_v12 }
 0x548   : > { %11441 = vmatprep.subr.bf16.mxu1 %v17817_v39  ;;  %v3281_v46 = vmax.f32 %v3249_v14, 0.0  ;;  %v4034_v51 = vsub.f32 %v4032_v61, %v4033_v16 }
 0x549   : > { %v10804_v47 = vpop.f32.mrb[28].mxu1  ;;  %11536 = vmatpush1.bf16.msra.mxu0 %v11535_v20  ;;  %v3280_v56 = vmax.f32 %v3248_v25, 0.0  ;;  %v3212_v59 = vld [vmem:[#allocation9 + $0x88] sm:$0xff]  ;;  %v4027_v9 = vsub.f32 %v4025_v12, %v4026_v34  ;;  %v14403_v27 = vpack.c.bf16 %v4033_v16, %v4026_v34 }
 0x54a   : > { %3184 = vst.msk [vmem:[#allocation9 + $0xa8] sm:$0xff] %vm17782_vm1, %v10804_v47  ;;  %v2993_v13 = vpop.f32.mrb[29].mxu1  ;;  %v3408_v6 = vand.u32 4294901760, %v3281_v46  ;;  %11537 = vmatprep.subr.bf16.mxu0 %v17817_v39  ;;  %v3211_v43 = vld [vmem:[#allocation9 + $0x80] sm:$0xff]  ;;  %v3251_v49 = vadd.f32 %v14306_v44, %v3212_v59  ;;  %v4035_v8 = vand.u32 4294901760, %v4034_v51 }
 0x54b   : > { %17865 = vst [vmem:[#allocation51_spill] sm:$0xff] %v14403_v27  ;;  %3183 = vst.msk [vmem:[#allocation9 + $0xa0] sm:$0xff] %vm17782_vm1, %v2993_v13  ;;  %v3405_v5 = vand.u32 4294901760, %v3280_v56  ;;  %v3250_v45 = vadd.f32 %v14306_v44, %v3211_v43  ;;  %v4028_v22 = vand.u32 4294901760, %v4027_v9 }
 0x54c   : > { %v14410_v19 = vsub.f32 %v3281_v46, %v3408_v6  ;;  %v3283_v26 = vmax.f32 %v3251_v49, 0.0 }
 0x54d   : > { %v10807_v41 = vpop.f32.mrb[30].mxu1  ;;  %v14412_v23 = vpack.c.bf16 %v3408_v6, %v3405_v5  ;;  %v14414_v2 = vsub.f32 %v3280_v56, %v3405_v5  ;;  %v3282_v61 = vmax.f32 %v3250_v45, 0.0  ;;  %v3214_v63 = vld [vmem:[#allocation9 + $0x98] sm:$0xff]  ;;  %v14416_v12 = vpack.c.bf16 %v4035_v8, %v4028_v22 }
 0x54e   : > { %3186 = vst.msk [vmem:[#allocation9 + $0xb8] sm:$0xff] %vm17782_vm1, %v10807_v41  ;;  %v3003_v60 = vpop.f32.mrb[31].mxu1  ;;  %v3414_v42 = vand.u32 4294901760, %v3283_v26  ;;  %v3213_v48 = vld [vmem:[#allocation9 + $0x90] sm:$0xff]  ;;  %v3253_v14 = vadd.f32 %v14306_v44, %v3214_v63  ;;  %v17551_v16 = vand.u32 4294901760, %v14410_v19 }
 0x54f   : > { %17866 = vst [vmem:[#allocation52_spill] sm:$0xff] %v14412_v23  ;;  %11443 = vmatpush1.bf16.msra.mxu1 %v14412_v23  ;;  %3185 = vst.msk [vmem:[#allocation9 + $0xb0] sm:$0xff] %vm17782_vm1, %v3003_v60  ;;  %v11538_v20 = vpack.c.bf16 %v14410_v19, %v14414_v2  ;;  %v3411_v25 = vand.u32 4294901760, %v3282_v61  ;;  %v3252_v34 = vadd.f32 %v14306_v44, %v3213_v48  ;;  %v17552_v46 = vand.u32 4294901760, %v14414_v2 }
 0x550   : > { %11444 = vmatprep.subr.bf16.mxu1 %v17817_v39  ;;  %v14428_v51 = vsub.f32 %v3283_v26, %v3414_v42  ;;  %v3285_v47 = vmax.f32 %v3253_v14, 0.0  ;;  %v4048_v56 = vsub.f32 %v14410_v19, %v17551_v16 }
 0x551   : > { %11539 = vmatpush1.bf16.msra.mxu0 %v11538_v20  ;;  %v14433_v59 = vpack.c.bf16 %v3414_v42, %v3411_v25  ;;  %v14435_v9 = vsub.f32 %v3282_v61, %v3411_v25  ;;  %v3284_v13 = vmax.f32 %v3252_v34, 0.0  ;;  %v3216_v6 = vld [vmem:[#allocation9 + $0xa8] sm:$0xff]  ;;  %v4041_v43 = vsub.f32 %v14414_v2, %v17552_v46 }
 0x552   : > { %11540 = vmatprep.subr.bf16.mxu0 %v17817_v39  ;;  %v3420_v49 = vand.u32 4294901760, %v3285_v47  ;;  %v3215_v8 = vld [vmem:[#allocation9 + $0xa0] sm:$0xff]  ;;  %v3255_v5 = vadd.f32 %v14306_v44, %v3216_v6  ;;  %v4049_v45 = vand.u32 4294901760, %v4048_v56  ;;  %v17549_v22 = vand.u32 4294901760, %v14428_v51 }
 0x553   : > { %17867 = vst [vmem:[#allocation53_spill] sm:$0xff] %v14433_v59  ;;  %11446 = vmatpush1.bf16.msra.mxu1 %v14433_v59  ;;  %v11541_v26 = vpack.c.bf16 %v14428_v51, %v14435_v9  ;;  %v3417_v41 = vand.u32 4294901760, %v3284_v13  ;;  %v3254_v61 = vadd.f32 %v14306_v44, %v3215_v8  ;;  %v4042_v63 = vand.u32 4294901760, %v4041_v43 }
 0x554   : > { %11447 = vmatprep.subr.bf16.mxu1 %v17817_v39  ;;  %v14448_v60 = vsub.f32 %v3285_v47, %v3420_v49  ;;  %v3287_v42 = vmax.f32 %v3255_v5, 0.0  ;;  %v17550_v48 = vand.u32 4294901760, %v14435_v9  ;;  %v4062_v14 = vsub.f32 %v14428_v51, %v17549_v22 }
 0x555   : > { %11542 = vmatpush1.bf16.msra.mxu0 %v11541_v26  ;;  %v14454_v20 = vpack.c.bf16 %v3420_v49, %v3417_v41  ;;  %v14456_v25 = vsub.f32 %v3284_v13, %v3417_v41  ;;  %v3286_v34 = vmax.f32 %v3254_v61, 0.0  ;;  %v3218_v56 = vld [vmem:[#allocation9 + $0xb8] sm:$0xff]  ;;  %v14458_v6 = vpack.c.bf16 %v4049_v45, %v4042_v63 }
 0x556   : > { %11543 = vmatprep.subr.bf16.mxu0 %v17817_v39  ;;  %v3426_v47 = vand.u32 4294901760, %v3287_v42  ;;  %v3217_v43 = vld [vmem:[#allocation9 + $0xb0] sm:$0xff]  ;;  %v3257_v8 = vadd.f32 %v14306_v44, %v3218_v56  ;;  %v4055_v5 = vsub.f32 %v14435_v9, %v17550_v48  ;;  %v4063_v38 = vand.u32 4294901760, %v4062_v14 }
 0x557   : > { %17868 = vst [vmem:[#allocation54_spill] sm:$0xff] %v14454_v20  ;;  %11449 = vmatpush1.bf16.msra.mxu1 %v14454_v20  ;;  %v11544_v13 = vpack.c.bf16 %v14448_v60, %v14456_v25  ;;  %v3423_v49 = vand.u32 4294901760, %v3286_v34  ;;  %v3256_v45 = vadd.f32 %v14306_v44, %v3217_v43  ;;  %v17554_v26 = vand.u32 4294901760, %v14456_v25 }
 0x558   : > { %11450 = vmatprep.subr.bf16.mxu1 %v17817_v39  ;;  %v14471_v41 = vsub.f32 %v3287_v42, %v3426_v47  ;;  %v3289_v61 = vmax.f32 %v3257_v8, 0.0  ;;  %v4056_v63 = vand.u32 4294901760, %v4055_v5  ;;  %v17553_v56 = vand.u32 4294901760, %v14448_v60 }
 0x559   : > { %v10834_v22 = vpop.f32.mrb[32].mxu1  ;;  %11545 = vmatpush1.bf16.msra.mxu0 %v11544_v13  ;;  %v14474_v14 = vpack.c.bf16 %v3426_v47, %v3423_v49  ;;  %v14476_v48 = vsub.f32 %v3286_v34, %v3423_v49  ;;  %v3288_v16 = vmax.f32 %v3256_v45, 0.0  ;;  %v4069_v43 = vsub.f32 %v14456_v25, %v17554_v26 }
 0x55a   : > { %3188 = vst.msk [vmem:[#allocation9 + $0xc8] sm:$0xff] %vm17782_vm1, %v10834_v22  ;;  %v3123_v46 = vpop.f32.mrb[33].mxu1  ;;  %11546 = vmatprep.subr.bf16.mxu0 %v17817_v39  ;;  %v3432_v42 = vand.u32 4294901760, %v3289_v61  ;;  %v14483_v8 = vpack.c.bf16 %v4063_v38, %v4056_v63  ;;  %v4076_v47 = vsub.f32 %v14448_v60, %v17553_v56  ;;  %v17556_v34 = vand.u32 4294901760, %v14471_v41 }
 0x55b   : > { %17869 = vst [vmem:[#allocation55_spill] sm:$0xff] %v14474_v14  ;;  %3187 = vst.msk [vmem:[#allocation9 + $0xc0] sm:$0xff] %vm17782_vm1, %v3123_v46  ;;  %11452 = vmatpush1.bf16.msra.mxu1 %v14474_v14  ;;  %v11547_v5 = vpack.c.bf16 %v14471_v41, %v14476_v48  ;;  %v3429_v22 = vand.u32 4294901760, %v3288_v16  ;;  %v4070_v13 = vand.u32 4294901760, %v4069_v43  ;;  %v17557_v49 = vand.u32 4294901760, %v14476_v48 }
 0x55c   : > { %11453 = vmatprep.subr.bf16.mxu1 %v17817_v39  ;;  %v14495_v38 = vsub.f32 %v3289_v61, %v3432_v42  ;;  %v4077_v45 = vand.u32 4294901760, %v4076_v47  ;;  %v4090_v63 = vsub.f32 %v14471_v41, %v17556_v34 }
 0x55d   : > { %v10837_v56 = vpop.f32.mrb[34].mxu1  ;;  %11548 = vmatpush1.bf16.msra.mxu0 %v11547_v5  ;;  %v14500_v46 = vpack.c.bf16 %v3432_v42, %v3429_v22  ;;  %v14502_v26 = vsub.f32 %v3288_v16, %v3429_v22  ;;  %v4083_v43 = vsub.f32 %v14476_v48, %v17557_v49 }
 0x55e   : > { %3190 = vst.msk [vmem:[#allocation9 + $0xd8] sm:$0xff] %vm17782_vm1, %v10837_v56  ;;  %v3133_v35 = vpop.f32.mrb[35].mxu1  ;;  %11549 = vmatprep.subr.bf16.mxu0 %v17817_v39  ;;  %v14509_v61 = vpack.c.bf16 %v4077_v45, %v4070_v13  ;;  %v4091_v47 = vand.u32 4294901760, %v4090_v63  ;;  %v17559_v34 = vand.u32 4294901760, %v14495_v38 }
 0x55f   : > { %17870 = vst [vmem:[#allocation56_spill] sm:$0xff] %v14500_v46  ;;  %3189 = vst.msk [vmem:[#allocation9 + $0xd0] sm:$0xff] %vm17782_vm1, %v3133_v35  ;;  %11455 = vmatpush1.bf16.msra.mxu1 %v14500_v46  ;;  %v11550_v16 = vpack.c.bf16 %v14495_v38, %v14502_v26  ;;  %v4084_v42 = vand.u32 4294901760, %v4083_v43  ;;  %v17564_v5 = vand.u32 4294901760, %v14502_v26 }
 0x560   : > { %11456 = vmatprep.subr.bf16.mxu1 %v17817_v39  ;;  %v4104_v56 = vsub.f32 %v14495_v38, %v17559_v34  ;;  %v3298_v34 = vld [vmem:[#allocation21] sm:$0xff] }
 0x561   : > { %v10840_v22 = vpop.f32.mrb[36].mxu1  ;;  %11551 = vmatpush1.bf16.msra.mxu0 %v11550_v16  ;;  %v3220_v13 = vld [vmem:[#allocation9 + $0xc8] sm:$0xff]  ;;  %v14521_v45 = vpack.c.bf16 %v4091_v47, %v4084_v42  ;;  %v4097_v35 = vsub.f32 %v14502_v26, %v17564_v5 }
 0x562   : > { %3192 = vst.msk [vmem:[#allocation9 + $0xe8] sm:$0xff] %vm17782_vm1, %v10840_v22  ;;  %v3143_v63 = vpop.f32.mrb[37].mxu1  ;;  %v3219_v43 = vld [vmem:[#allocation9 + $0xc0] sm:$0xff]  ;;  %v3259_v49 = vadd.f32 %v14306_v44, %v3220_v13  ;;  %11552 = vmatprep.subr.bf16.mxu0 %v17817_v39  ;;  %v4105_v30 = vand.u32 4294901760, %v4104_v56  ;;  %v14535_v56 = vand.u32 4294901760, %v3298_v34 }
 0x563   : > { %3191 = vst.msk [vmem:[#allocation9 + $0xe0] sm:$0xff] %vm17782_vm1, %v3143_v63  ;;  %v3258_v16 = vadd.f32 %v14306_v44, %v3219_v43  ;;  %v4098_v47 = vand.u32 4294901760, %v4097_v35 }
 0x564   : > { %v3291_v42 = vmax.f32 %v3259_v49, 0.0  ;;  %17871 = vst [vmem:[#allocation57_spill] sm:$0xff] %v14535_v56  ;;  %v14547_v27 = vsub.f32 %v3298_v34, %v14535_v56 }
 0x565   : > { %v10843_v3 = vpop.f32.mrb[38].mxu1  ;;  %v3290_v28 = vmax.f32 %v3258_v16, 0.0  ;;  %v3222_v50 = vld [vmem:[#allocation9 + $0xd8] sm:$0xff]  ;;  %v14531_v5 = vpack.c.bf16 %v4105_v30, %v4098_v47 }
 0x566   : > { %3194 = vst.msk [vmem:[#allocation9 + $0xf8] sm:$0xff] %vm17782_vm1, %v10843_v3  ;;  %v3153_v22 = vpop.f32.mrb[39].mxu1  ;;  %v3438_v36 = vand.u32 4294901760, %v3291_v42  ;;  %v3221_v13 = vld [vmem:[#allocation9 + $0xd0] sm:$0xff]  ;;  %v3261_v37 = vadd.f32 %v14306_v44, %v3222_v50  ;;  %v17875_v31 = vand.u32 4294901760, %v14547_v27 }
 0x567   : > { %3193 = vst.msk [vmem:[#allocation9 + $0xf0] sm:$0xff] %vm17782_vm1, %v3153_v22  ;;  %v3435_v63 = vand.u32 4294901760, %v3290_v28  ;;  %v3260_v35 = vadd.f32 %v14306_v44, %v3221_v13 }
 0x568   : > { %v14539_v49 = vsub.f32 %v3291_v42, %v3438_v36  ;;  %v3293_v43 = vmax.f32 %v3261_v37, 0.0 }
 0x569   : > { %v14541_v16 = vpack.c.bf16 %v3438_v36, %v3435_v63  ;;  %v14543_v30 = vsub.f32 %v3290_v28, %v3435_v63  ;;  %v3292_v3 = vmax.f32 %v3260_v35, 0.0  ;;  %v3224_v47 = vld [vmem:[#allocation9 + $0xe8] sm:$0xff] }
 0x56a   : > { %v3444_v15 = vand.u32 4294901760, %v3293_v43  ;;  %v3223_v10 = vld [vmem:[#allocation9 + $0xe0] sm:$0xff]  ;;  %v3263_v50 = vadd.f32 %v14306_v44, %v3224_v47 }
 0x56b   : > { %17872 = vst [vmem:[#allocation58_spill] sm:$0xff] %v14541_v16  ;;  %11458 = vmatpush1.bf16.msra.mxu1 %v14541_v16  ;;  %v11553_v42 = vpack.c.bf16 %v14539_v49, %v14543_v30  ;;  %v3441_v22 = vand.u32 4294901760, %v3292_v3  ;;  %v3262_v36 = vadd.f32 %v14306_v44, %v3223_v10  ;;  %v3301_v10 = vld [vmem:[#allocation21 + $0x18] sm:$0xff] }
 0x56c   : > { %11459 = vmatprep.subr.bf16.mxu1 %v17817_v39  ;;  %v14554_v37 = vsub.f32 %v3293_v43, %v3444_v15  ;;  %v3295_v28 = vmax.f32 %v3263_v50, 0.0 }
 0x56d   : > { %11554 = vmatpush1.bf16.msra.mxu0 %v11553_v42  ;;  %v14556_v13 = vpack.c.bf16 %v3444_v15, %v3441_v22  ;;  %v14558_v63 = vsub.f32 %v3292_v3, %v3441_v22  ;;  %v3294_v34 = vmax.f32 %v3262_v36, 0.0  ;;  %v3226_v35 = vld [vmem:[#allocation9 + $0xf8] sm:$0xff] }
 0x56e   : > { %11555 = vmatprep.subr.bf16.mxu0 %v17817_v39  ;;  %v3450_v47 = vand.u32 4294901760, %v3295_v28  ;;  %v3225_v58 = vld [vmem:[#allocation9 + $0xf0] sm:$0xff]  ;;  %v3265_v7 = vadd.f32 %v14306_v44, %v3226_v35 }
 0x56f   : > { %17873 = vst [vmem:[#allocation59_spill] sm:$0xff] %v14556_v13  ;;  %11461 = vmatpush1.bf16.msra.mxu1 %v14556_v13  ;;  %v11556_v43 = vpack.c.bf16 %v14554_v37, %v14558_v63  ;;  %v3447_v50 = vand.u32 4294901760, %v3294_v34  ;;  %v3264_v15 = vadd.f32 %v14306_v44, %v3225_v58  ;;  %v3467_v44 = vsub.f32 %v14547_v27, %v17875_v31  ;;  %v3302_v58 = vld [vmem:[#allocation21 + $0x20] sm:$0xff] }
 0x570   : > { %11462 = vmatprep.subr.bf16.mxu1 %v17817_v39  ;;  %v14568_v3 = vsub.f32 %v3295_v28, %v3450_v47  ;;  %v3297_v42 = vmax.f32 %v3265_v7, 0.0  ;;  %v14594_v24 = vand.u32 4294901760, %v3302_v58 }
 0x571   : > { %11557 = vmatpush1.bf16.msra.mxu0 %v11556_v43  ;;  %v14570_v22 = vpack.c.bf16 %v3450_v47, %v3447_v50  ;;  %v14572_v36 = vsub.f32 %v3294_v34, %v3447_v50  ;;  %v3296_v35 = vmax.f32 %v3264_v15, 0.0  ;;  %v14584_v47 = vand.u32 4294901760, %v3301_v10 }
 0x572   : > { %11558 = vmatprep.subr.bf16.mxu0 %v17817_v39  ;;  %v3456_v56 = vand.u32 4294901760, %v3297_v42  ;;  %v14586_v43 = vand.u32 4294901760, %v3300_v57  ;;  %v14588_v50 = vand.u32 4294901760, %v3303_v29  ;;  %17878 = vst [vmem:[#allocation63_spill] sm:$0xff] %v14594_v24  ;;  %v3468_v32 = vand.u32 4294901760, %v3467_v44 }
 0x573   : > { %17874 = vst [vmem:[#allocation60_spill] sm:$0xff] %v14570_v22  ;;  %11464 = vmatpush1.bf16.msra.mxu1 %v14570_v22  ;;  %v11559_v7 = vpack.c.bf16 %v14568_v3, %v14572_v36  ;;  %v3453_v28 = vand.u32 4294901760, %v3296_v35  ;;  %v3304_v22 = vld [vmem:[#allocation21 + $0x30] sm:$0xff]  ;;  %v14611_v44 = vsub.f32 %v3302_v58, %v14594_v24  ;;  %v17882_v24 = vand.u32 4294901760, %v14428_v51 }
 0x574   : > { %11465 = vmatprep.subr.bf16.mxu1 %v17817_v39  ;;  %v14582_v34 = vsub.f32 %v3297_v42, %v3456_v56  ;;  %17876 = vst [vmem:[#allocation61_spill] sm:$0xff] %v14588_v50 }
 0x575   : > { %11560 = vmatpush1.bf16.msra.mxu0 %v11559_v7  ;;  %v14590_v15 = vpack.c.bf16 %v3456_v56, %v3453_v28  ;;  %v14592_v31 = vsub.f32 %v3296_v35, %v3453_v28  ;;  %v14602_v7 = vsub.f32 %v3301_v10, %v14584_v47  ;;  %v14605_v56 = vsub.f32 %v3300_v57, %v14586_v43 }
 0x576   : > { %11561 = vmatprep.subr.bf16.mxu0 %v17817_v39  ;;  %v14608_v35 = vsub.f32 %v3303_v29, %v14588_v50  ;;  %v14613_v28 = vand.u32 4294901760, %v3305_v33  ;;  %v17879_v29 = vand.u32 4294901760, %v14414_v2  ;;  %v17884_v10 = vand.u32 4294901760, %v14456_v25  ;;  %v3307_v25 = vld [vmem:[#allocation21 + $0x48] sm:$0xff] }
 0x577   : > { %17877 = vst [vmem:[#allocation62_spill] sm:$0xff] %v14590_v15  ;;  %11467 = vmatpush1.bf16.msra.mxu1 %v14590_v15  ;;  %v11562_v42 = vpack.c.bf16 %v14582_v34, %v14592_v31  ;;  %v14615_v15 = vand.u32 4294901760, %v3304_v22  ;;  %v17896_v57 = vand.u32 4294901760, %v14539_v49 }
 0x578   : > { %11468 = vmatprep.subr.bf16.mxu1 %v17817_v39 }
 0x579   : > { %11563 = vmatpush1.bf16.msra.mxu0 %v11562_v42  ;;  %v17880_v42 = vand.u32 4294901760, %v14410_v19  ;;  %v17887_v19 = vand.u32 4294901760, %v14602_v7 }
 0x57a   : > { %3469 = vmatmul.mubr.f32.vlgmr.msra.gmra.mrb[40].mxu1 %v3468_v32  ;;  %11564 = vmatprep.subr.bf16.mxu0 %v17817_v39  ;;  %v17885_v32 = vand.u32 4294901760, %v14448_v60  ;;  %v3309_v60 = vld [vmem:[#allocation21 + $0x58] sm:$0xff] }
 0x57b   : > { %11470 = vmatpush1.bf16.msra.mxu1 %v14320_v62  ;;  %v14635_v13 = vpack.c.bf16 %v17880_v42, %v17879_v29  ;;  %v17881_v62 = vand.u32 4294901760, %v14435_v9  ;;  %v3476_v2 = vsub.f32 %v14602_v7, %v17887_v19  ;;  %v17888_v9 = vand.u32 4294901760, %v14605_v56 }
 0x57c   : > { %4521 = vmatmul.mubr.f32.vlgmr.msra.gmra.mrb[16].mxu0 %v14547_v27  ;;  %11471 = vmatprep.subr.bf16.mxu1 %v17817_v39  ;;  %v14647_v50 = vpack.c.bf16 %v17885_v32, %v17884_v10  ;;  %v17889_v10 = vand.u32 4294901760, %v14476_v48  ;;  %v17890_v29 = vand.u32 4294901760, %v14471_v41  ;;  %v17892_v32 = vand.u32 4294901760, %v14502_v26 }
 0x57d   : > { %v14641_v58 = vpack.c.bf16 %v17882_v24, %v17881_v62  ;;  %11566 = vmatpush1.bf16.msra.mxu0 %v14313_v53  ;;  %4527 = vmatprep.mubr.f32.mxu0 %v14602_v7  ;;  %v3482_v51 = vsub.f32 %v14605_v56, %v17888_v9  ;;  %v17893_v62 = vand.u32 4294901760, %v14495_v38  ;;  %v17895_v9 = vand.u32 4294901760, %v14543_v30 }
 0x57e   : > { %17886 = vst [vmem:[#allocation65_spill] sm:$0xff] %v14647_v50  ;;  %11567 = vmatprep.subr.bf16.mxu0 %v17817_v39  ;;  %v14664_v42 = vpack.c.bf16 %v17890_v29, %v17889_v10  ;;  %v14680_v48 = vsub.f32 %v3305_v33, %v14613_v28  ;;  %v3477_v41 = vand.u32 4294901760, %v3476_v2  ;;  %v17898_v10 = vand.u32 4294901760, %v14608_v35 }
 0x57f   : > { %17883 = vst [vmem:[#allocation64_spill] sm:$0xff] %v14641_v58  ;;  %v14670_v19 = vpack.c.bf16 %v17893_v62, %v17892_v32  ;;  %v14676_v24 = vpack.c.bf16 %v17896_v57, %v17895_v9  ;;  %11473 = vmatpush1.bf16.msra.mxu1 %v14335_v54  ;;  %v17899_v38 = vand.u32 4294901760, %v14558_v63  ;;  %v17900_v29 = vand.u32 4294901760, %v14554_v37 }
 0x580   : > { %17891 = vst [vmem:[#allocation66_spill] sm:$0xff] %v14664_v42  ;;  %v3491_v26 = vsub.f32 %v14608_v35, %v17898_v10  ;;  %4530 = vmatmul.mubr.f32.gmra.mrb[18].mxu0 %v14605_v56  ;;  %11474 = vmatprep.subr.bf16.mxu1 %v17817_v39  ;;  %v14694_v54 = vsub.f32 %v3304_v22, %v14615_v15  ;;  %v17902_v33 = vand.u32 4294901760, %v14572_v36  ;;  %v17903_v57 = vand.u32 4294901760, %v14568_v3  ;;  %v3306_v22 = vld [vmem:[#allocation21 + $0x40] sm:$0xff]  ;;  %v3317_v42 = vld [vmem:[#allocation21 + $0x98] sm:$0xff] }
 0x581   : > { %17894 = vst [vmem:[#allocation67_spill] sm:$0xff] %v14670_v19  ;;  %17897 = vst [vmem:[#allocation68_spill] sm:$0xff] %v14676_v24  ;;  %v14689_v32 = vpack.c.bf16 %v17900_v29, %v17899_v38  ;;  %v17905_v62 = vand.u32 4294901760, %v14592_v31  ;;  %v17906_v9 = vand.u32 4294901760, %v14582_v34  ;;  %11569 = vmatpush1.bf16.msra.mxu0 %v14326_v52  ;;  %4536 = vmatprep.mubr.f32.mxu0 %v14608_v35  ;;  %v14710_v38 = vand.u32 4294901760, %v3307_v25  ;;  %v3315_v24 = vld [vmem:[#allocation21 + $0x88] sm:$0xff] }
 0x582   : > { %v14700_v2 = vpack.c.bf16 %v17903_v57, %v17902_v33  ;;  %v17586_v29 = vand.u32 4294901760, %v14680_v48  ;;  %11570 = vmatprep.subr.bf16.mxu0 %v17817_v39  ;;  %3478 = vmatprep.mubr.f32.mxu1 %v3477_v41  ;;  %v3483_v33 = vand.u32 4294901760, %v3482_v51  ;;  %v17908_v57 = vand.u32 4294901760, %v14611_v44 }
 0x583   : > { %17901 = vst [vmem:[#allocation69_spill] sm:$0xff] %v14689_v32  ;;  %v14706_v10 = vpack.c.bf16 %v17906_v9, %v17905_v62  ;;  %v17588_v62 = vand.u32 4294901760, %v14694_v54  ;;  %11476 = vmatpush1.bf16.msra.mxu1 %v14355_v0  ;;  %v3492_v9 = vand.u32 4294901760, %v3491_v26  ;;  %v14729_v51 = vsub.f32 %v3307_v25, %v14710_v38  ;;  %v3308_v0 = vld [vmem:[#allocation21 + $0x50] sm:$0xff]  ;;  %v3311_v26 = vld [vmem:[#allocation21 + $0x68] sm:$0xff] }
 0x584   : > { %17904 = vst [vmem:[#allocation70_spill] sm:$0xff] %v14700_v2  ;;  %v3497_v53 = vsub.f32 %v14611_v44, %v17908_v57  ;;  %v3506_v52 = vsub.f32 %v14680_v48, %v17586_v29  ;;  %4539 = vmatmul.mubr.f32.gmra.mrb[20].mxu0 %v14611_v44  ;;  %11477 = vmatprep.subr.bf16.mxu1 %v17817_v39  ;;  %v14731_v41 = vand.u32 4294901760, %v3309_v60  ;;  %v14743_v2 = vand.u32 4294901760, %v3308_v0 }
 0x585   : > { %17907 = vst [vmem:[#allocation71_spill] sm:$0xff] %v14706_v10  ;;  %v14724_v10 = vand.u32 4294901760, %v3306_v22  ;;  %11572 = vmatpush1.bf16.msra.mxu0 %v14342_v40  ;;  %4545 = vmatprep.mubr.f32.mxu0 %v14680_v48  ;;  %v3512_v29 = vsub.f32 %v14694_v54, %v17588_v62 }
 0x586   : > { %11573 = vmatprep.subr.bf16.mxu0 %v17817_v39  ;;  %3484 = vmatmul.mubr.f32.gmra.mrb[42].mxu1 %v3483_v33  ;;  %v3498_v57 = vand.u32 4294901760, %v3497_v53  ;;  %v3507_v40 = vand.u32 4294901760, %v3506_v52  ;;  %v14748_v53 = vsub.f32 %v3309_v60, %v14731_v41  ;;  %v14750_v33 = vand.u32 4294901760, %v3311_v26 }
 0x587   : > { %11479 = vmatpush1.bf16.msra.mxu1 %v14373_v21  ;;  %3493 = vmatprep.mubr.f32.mxu1 %v3492_v9  ;;  %v14741_v25 = vsub.f32 %v3306_v22, %v14724_v10  ;;  %v3310_v21 = vld [vmem:[#allocation21 + $0x60] sm:$0xff]  ;;  %v17590_v52 = vand.u32 4294901760, %v14729_v51  ;;  %v3313_v9 = vld [vmem:[#allocation21 + $0x78] sm:$0xff]  ;;  %v3513_v22 = vand.u32 4294901760, %v3512_v29 }
 0x588   : > { %4548 = vmatmul.mubr.f32.gmra.mrb[22].mxu0 %v14694_v54  ;;  %11480 = vmatprep.subr.bf16.mxu1 %v17817_v39  ;;  %v14764_v32 = vand.u32 4294901760, %v3310_v21 }
 0x589   : > { %11575 = vmatpush1.bf16.msra.mxu0 %v14358_v4  ;;  %4554 = vmatprep.mubr.f32.mxu0 %v14729_v51  ;;  %v17591_v62 = vand.u32 4294901760, %v14741_v25  ;;  %v3521_v60 = vsub.f32 %v14729_v51, %v17590_v52  ;;  %v14762_v4 = vsub.f32 %v3308_v0, %v14743_v2  ;;  %v17593_v0 = vand.u32 4294901760, %v14748_v53 }
 0x58a   : > { %11576 = vmatprep.subr.bf16.mxu0 %v17817_v39  ;;  %3499 = vmatmul.mubr.f32.gmra.mrb[44].mxu1 %v3498_v57  ;;  %v3312_v57 = vld [vmem:[#allocation21 + $0x70] sm:$0xff] }
 0x58b   : > { %11482 = vmatpush1.bf16.msra.mxu1 %v14382_v17  ;;  %3508 = vmatprep.mubr.f32.mxu1 %v3507_v40  ;;  %v3527_v29 = vsub.f32 %v14741_v25, %v17591_v62  ;;  %v14772_v40 = vsub.f32 %v3311_v26, %v14750_v33  ;;  %v14774_v17 = vand.u32 4294901760, %v3313_v9  ;;  %v3522_v52 = vand.u32 4294901760, %v3521_v60 }
 0x58c   : > { %4557 = vmatmul.mubr.f32.gmra.mrb[24].mxu0 %v14741_v25  ;;  %11483 = vmatprep.subr.bf16.mxu1 %v17817_v39  ;;  %v17594_v62 = vand.u32 4294901760, %v14762_v4  ;;  %v3536_v26 = vsub.f32 %v14748_v53, %v17593_v0  ;;  %v14786_v60 = vsub.f32 %v3310_v21, %v14764_v32 }
 0x58d   : > { %11578 = vmatpush1.bf16.msra.mxu0 %v14365_v18  ;;  %4563 = vmatprep.mubr.f32.mxu0 %v14748_v53  ;;  %17909 = vst [vmem:[#allocation72_spill] sm:$0xff] %v14774_v17  ;;  %v3528_v19 = vand.u32 4294901760, %v3527_v29  ;;  %v14788_v18 = vand.u32 4294901760, %v3312_v57  ;;  %v3314_v29 = vld [vmem:[#allocation21 + $0x80] sm:$0xff]  ;;  %v17596_v21 = vand.u32 4294901760, %v14772_v40 }
 0x58e   : > { %11579 = vmatprep.subr.bf16.mxu0 %v17817_v39  ;;  %3514 = vmatmul.mubr.f32.gmra.mrb[46].mxu1 %v3513_v22  ;;  %v3542_v22 = vsub.f32 %v14762_v4, %v17594_v62  ;;  %v3537_v0 = vand.u32 4294901760, %v3536_v26  ;;  %v17599_v62 = vand.u32 4294901760, %v14786_v60 }
 0x58f   : > { %11485 = vmatpush1.bf16.msra.mxu1 %v14392_v55  ;;  %3523 = vmatprep.mubr.f32.mxu1 %v3522_v52  ;;  %17910 = vst [vmem:[#allocation73_spill] sm:$0xff] %v14788_v18  ;;  %v14796_v55 = vsub.f32 %v3313_v9, %v14774_v17  ;;  %v14798_v52 = vand.u32 4294901760, %v3315_v24  ;;  %v3551_v9 = vsub.f32 %v14772_v40, %v17596_v21 }
 0x590   : > { %4566 = vmatmul.mubr.f32.gmra.mrb[26].mxu0 %v14762_v4  ;;  %11486 = vmatprep.subr.bf16.mxu1 %v17817_v39  ;;  %v3543_v50 = vand.u32 4294901760, %v3542_v22  ;;  %v14810_v26 = vsub.f32 %v3312_v57, %v14788_v18  ;;  %v3316_v22 = vld [vmem:[#allocation21 + $0x90] sm:$0xff]  ;;  %v3319_v18 = vld [vmem:[#allocation21 + $0xa8] sm:$0xff] }
 0x591   : > { %11581 = vmatpush1.bf16.msra.mxu0 %v14371_v1  ;;  %4572 = vmatprep.mubr.f32.mxu0 %v14772_v40  ;;  %17911 = vst [vmem:[#allocation74_spill] sm:$0xff] %v14798_v52  ;;  %v14812_v1 = vand.u32 4294901760, %v3314_v29  ;;  %v3552_v21 = vand.u32 4294901760, %v3551_v9  ;;  %v17601_v57 = vand.u32 4294901760, %v14796_v55 }
 0x592   : > { %11582 = vmatprep.subr.bf16.mxu0 %v17817_v39  ;;  %3529 = vmatmul.mubr.f32.gmra.mrb[48].mxu1 %v3528_v19  ;;  %v3557_v19 = vsub.f32 %v14786_v60, %v17599_v62  ;;  %v17606_v62 = vand.u32 4294901760, %v14810_v26 }
 0x593   : > { %11488 = vmatpush1.bf16.msra.mxu1 %v14416_v12  ;;  %3538 = vmatprep.mubr.f32.mxu1 %v3537_v0  ;;  %17912 = vst [vmem:[#allocation75_spill] sm:$0xff] %v14812_v1  ;;  %v14820_v12 = vsub.f32 %v3315_v24, %v14798_v52  ;;  %v14822_v0 = vand.u32 4294901760, %v3317_v42  ;;  %v3566_v24 = vsub.f32 %v14796_v55, %v17601_v57  ;;  %v3321_v57 = vld [vmem:[#allocation21 + $0xb8] sm:$0xff] }
 0x594   : > { %4575 = vmatmul.mubr.f32.gmra.mrb[28].mxu0 %v14786_v60  ;;  %11489 = vmatprep.subr.bf16.mxu1 %v17817_v39  ;;  %v3558_v58 = vand.u32 4294901760, %v3557_v19  ;;  %v14834_v9 = vsub.f32 %v3314_v29, %v14812_v1  ;;  %v3318_v19 = vld [vmem:[#allocation21 + $0xa0] sm:$0xff] }
 0x595   : > { %11584 = vmatpush1.bf16.msra.mxu0 %v14395_v11  ;;  %4581 = vmatprep.mubr.f32.mxu0 %v14796_v55  ;;  %17913 = vst [vmem:[#allocation76_spill] sm:$0xff] %v14822_v0  ;;  %v14836_v11 = vand.u32 4294901760, %v3316_v22  ;;  %v3567_v52 = vand.u32 4294901760, %v3566_v24  ;;  %v17608_v29 = vand.u32 4294901760, %v14820_v12 }
 0x596   : > { %11585 = vmatprep.subr.bf16.mxu0 %v17817_v39  ;;  %3544 = vmatmul.mubr.f32.gmra.mrb[50].mxu1 %v3543_v50  ;;  %v3572_v50 = vsub.f32 %v14810_v26, %v17606_v62  ;;  %v17615_v62 = vand.u32 4294901760, %v14834_v9 }
 0x597   : > { %11491 = vmatpush1.bf16.msra.mxu1 %v14458_v6  ;;  %3553 = vmatprep.mubr.f32.mxu1 %v3552_v21  ;;  %17914 = vst [vmem:[#allocation77_spill] sm:$0xff] %v14836_v11  ;;  %v14844_v6 = vsub.f32 %v3317_v42, %v14822_v0  ;;  %v14846_v21 = vand.u32 4294901760, %v3319_v18  ;;  %v3581_v42 = vsub.f32 %v14820_v12, %v17608_v29  ;;  %v3323_v29 = vld [vmem:[#allocation21 + $0xc8] sm:$0xff] }
 0x598   : > { %4584 = vmatmul.mubr.f32.gmra.mrb[30].mxu0 %v14810_v26  ;;  %11492 = vmatprep.subr.bf16.mxu1 %v17817_v39  ;;  %v3573_v1 = vand.u32 4294901760, %v3572_v50  ;;  %v14858_v24 = vsub.f32 %v3316_v22, %v14836_v11  ;;  %v3320_v50 = vld [vmem:[#allocation21 + $0xb0] sm:$0xff] }
 0x599   : > { %11587 = vmatpush1.bf16.msra.mxu0 %v14412_v23  ;;  %4590 = vmatprep.mubr.f32.mxu0 %v14820_v12  ;;  %17915 = vst [vmem:[#allocation78_spill] sm:$0xff] %v14846_v21  ;;  %v14860_v23 = vand.u32 4294901760, %v3318_v19  ;;  %v3582_v0 = vand.u32 4294901760, %v3581_v42  ;;  %v17616_v22 = vand.u32 4294901760, %v14844_v6 }
 0x59a   : > { %11588 = vmatprep.subr.bf16.mxu0 %v17817_v39  ;;  %3559 = vmatmul.mubr.f32.gmra.mrb[52].mxu1 %v3558_v58  ;;  %17916 = vst [vmem:[#allocation79_spill] sm:$0xff] %v14858_v24  ;;  %v14862_v58 = vand.u32 4294901760, %v3321_v57  ;;  %v17624_v17 = vand.u32 4294901760, %v14858_v24 }
 0x59b   : > { %11494 = vmatpush1.bf16.msra.mxu1 %v14483_v8  ;;  %3568 = vmatprep.mubr.f32.mxu1 %v3567_v52  ;;  %17917 = vst [vmem:[#allocation80_spill] sm:$0xff] %v14860_v23  ;;  %v3587_v8 = vsub.f32 %v14834_v9, %v17615_v62  ;;  %v14870_v52 = vsub.f32 %v3319_v18, %v14846_v21  ;;  %v14876_v62 = vand.u32 4294901760, %v3320_v50 }
 0x59c   : > { %4593 = vmatmul.mubr.f32.gmra.mrb[32].mxu0 %v14834_v9  ;;  %11495 = vmatprep.subr.bf16.mxu1 %v17817_v39  ;;  %17918 = vst [vmem:[#allocation81_spill] sm:$0xff] %v14862_v58  ;;  %v3596_v18 = vsub.f32 %v14844_v6, %v17616_v22  ;;  %v14884_v42 = vsub.f32 %v3318_v19, %v14860_v23  ;;  %v17922_v22 = vand.u32 4294901760, %v14543_v30  ;;  %v17923_v19 = vand.u32 4294901760, %v14539_v49 }
 0x59d   : > { %11590 = vmatpush1.bf16.msra.mxu0 %v14433_v59  ;;  %4599 = vmatprep.mubr.f32.mxu0 %v14844_v6  ;;  %v3588_v11 = vand.u32 4294901760, %v3587_v8  ;;  %17919 = vst [vmem:[#allocation82_spill] sm:$0xff] %v14876_v62  ;;  %v14889_v8 = vand.u32 4294901760, %v3323_v29  ;;  %v17627_v21 = vand.u32 4294901760, %v14870_v52 }
 0x59e   : > { %11591 = vmatprep.subr.bf16.mxu0 %v17817_v39  ;;  %3574 = vmatmul.mubr.f32.gmra.mrb[54].mxu1 %v3573_v1  ;;  %17920 = vst [vmem:[#allocation83_spill] sm:$0xff] %v14884_v42  ;;  %v14887_v1 = vsub.f32 %v3321_v57, %v14862_v58  ;;  %v4111_v59 = vsub.f32 %v14543_v30, %v17922_v22  ;;  %v3325_v58 = vld [vmem:[#allocation21 + $0xd8] sm:$0xff]  ;;  %v3597_v23 = vand.u32 4294901760, %v3596_v18  ;;  %v17925_v22 = vand.u32 4294901760, %v14554_v37  ;;  %v3324_v18 = vld [vmem:[#allocation21 + $0xd0] sm:$0xff] }
 0x59f   : > { %11497 = vmatpush1.bf16.msra.mxu1 %v14509_v61  ;;  %3583 = vmatprep.mubr.f32.mxu1 %v3582_v0  ;;  %17921 = vst [vmem:[#allocation84_spill] sm:$0xff] %v14889_v8  ;;  %v3322_v61 = vld [vmem:[#allocation21 + $0xc0] sm:$0xff]  ;;  %v3602_v0 = vsub.f32 %v14858_v24, %v17624_v17  ;;  %v4118_v57 = vsub.f32 %v14539_v49, %v17923_v19  ;;  %v14925_v19 = vand.u32 4294901760, %v3325_v58 }
 0x5a0   : > { %4602 = vmatmul.mubr.f32.gmra.mrb[34].mxu0 %v14858_v24  ;;  %11498 = vmatprep.subr.bf16.mxu1 %v17817_v39  ;;  %v14907_v24 = vsub.f32 %v3320_v50, %v14876_v62  ;;  %v14909_v30 = vand.u32 4294901760, %v3322_v61  ;;  %v4132_v49 = vsub.f32 %v14554_v37, %v17925_v22  ;;  %v17926_v50 = vand.u32 4294901760, %v14558_v63  ;;  %v3327_v37 = vld [vmem:[#allocation21 + $0xe8] sm:$0xff] }
 0x5a1   : > { %11593 = vmatpush1.bf16.msra.mxu0 %v14454_v20  ;;  %4608 = vmatprep.mubr.f32.mxu0 %v14870_v52  ;;  %v3603_v17 = vand.u32 4294901760, %v3602_v0  ;;  %v17632_v20 = vand.u32 4294901760, %v14884_v42  ;;  %v4112_v22 = vand.u32 4294901760, %v4111_v59 }
 0x5a2   : > { %11594 = vmatprep.subr.bf16.mxu0 %v17817_v39  ;;  %3589 = vmatmul.mubr.f32.gmra.mrb[56].mxu1 %v3588_v11  ;;  %17924 = vst [vmem:[#allocation85_spill] sm:$0xff] %v14909_v30  ;;  %v3611_v11 = vsub.f32 %v14870_v52, %v17627_v21  ;;  %v4125_v0 = vsub.f32 %v14558_v63, %v17926_v50  ;;  %v4119_v21 = vand.u32 4294901760, %v4118_v57  ;;  %v17639_v50 = vand.u32 4294901760, %v14907_v24 }
 0x5a3   : > { %11500 = vmatpush1.bf16.msra.mxu1 %v14521_v45  ;;  %3598 = vmatprep.mubr.f32.mxu1 %v3597_v23  ;;  %v14920_v45 = vsub.f32 %v3323_v29, %v14889_v8  ;;  %v3617_v23 = vsub.f32 %v14884_v42, %v17632_v20  ;;  %v17635_v29 = vand.u32 4294901760, %v14887_v1  ;;  %v14934_v8 = vand.u32 4294901760, %v3324_v18 }
 0x5a4   : > { %4611 = vmatmul.mubr.f32.gmra.mrb[36].mxu0 %v14884_v42  ;;  %11501 = vmatprep.subr.bf16.mxu1 %v17817_v39  ;;  %v3612_v62 = vand.u32 4294901760, %v3611_v11  ;;  %v14939_v20 = vsub.f32 %v3322_v61, %v14909_v30  ;;  %v14941_v42 = vand.u32 4294901760, %v3327_v37  ;;  %v17928_v57 = vand.u32 4294901760, %v14572_v36  ;;  %v3326_v11 = vld [vmem:[#allocation21 + $0xe0] sm:$0xff] }
 0x5a5   : > { %11596 = vmatpush1.bf16.msra.mxu0 %v14474_v14  ;;  %4617 = vmatprep.mubr.f32.mxu0 %v14887_v1  ;;  %v3618_v63 = vand.u32 4294901760, %v3617_v23  ;;  %v4133_v14 = vand.u32 4294901760, %v4132_v49  ;;  %v3626_v59 = vsub.f32 %v14887_v1, %v17635_v29  ;;  %v17929_v61 = vand.u32 4294901760, %v14568_v3  ;;  %v3329_v23 = vld [vmem:[#allocation21 + $0xf8] sm:$0xff] }
 0x5a6   : > { %11597 = vmatprep.subr.bf16.mxu0 %v17817_v39  ;;  %3604 = vmatmul.mubr.f32.gmra.mrb[58].mxu1 %v3603_v17  ;;  %17927 = vst [vmem:[#allocation86_spill] sm:$0xff] %v14941_v42  ;;  %v4126_v17 = vand.u32 4294901760, %v4125_v0  ;;  %v11505_v29 = vpack.c.bf16 %v4119_v21, %v4112_v22  ;;  %v14960_v0 = vsub.f32 %v3325_v58, %v14925_v19  ;;  %v14971_v22 = vand.u32 4294901760, %v3326_v11 }
 0x5a7   : > { %11503 = vmatpush1.bf16.msra.mxu1 %v14531_v5  ;;  %3613 = vmatprep.mubr.f32.mxu1 %v3612_v62  ;;  %v4139_v5 = vsub.f32 %v14572_v36, %v17928_v57  ;;  %v4146_v49 = vsub.f32 %v14568_v3, %v17929_v61  ;;  %v3632_v62 = vsub.f32 %v14907_v24, %v17639_v50  ;;  %v3627_v30 = vand.u32 4294901760, %v3626_v59 }
 0x5a8   : > { %4620 = vmatmul.mubr.f32.gmra.mrb[38].mxu0 %v14907_v24  ;;  %11504 = vmatprep.subr.bf16.mxu1 %v17817_v39  ;;  %v17638_v36 = vand.u32 4294901760, %v14920_v45  ;;  %v14965_v3 = vsub.f32 %v3324_v18, %v14934_v8  ;;  %v17641_v61 = vand.u32 4294901760, %v14939_v20  ;;  %v14969_v21 = vsub.f32 %v3327_v37, %v14941_v42  ;;  %17930 = vst [vmem:[#allocation87_spill] sm:$0xff] %v14971_v22 }
 0x5a9   : > { %11599 = vmatpush1.bf16.msra.mxu0 %v14500_v46  ;;  %4626 = vmatprep.mubr.f32.mxu0 %v14920_v45  ;;  %v3633_v57 = vand.u32 4294901760, %v3632_v62  ;;  %v14973_v58 = vand.u32 4294901760, %v3329_v23  ;;  %v11508_v18 = vpack.c.bf16 %v4133_v14, %v4126_v17  ;;  %v4147_v62 = vand.u32 4294901760, %v4146_v49  ;;  %v3328_v46 = vld [vmem:[#allocation21 + $0xf0] sm:$0xff]  ;;  %v3331_v14 = vld [vmem:[#allocation21 + $0x108] sm:$0xff] }
 0x5aa   : > { %11600 = vmatprep.subr.bf16.mxu0 %v17817_v39  ;;  %3619 = vmatmul.mubr.f32.gmra.mrb[60].mxu1 %v3618_v63  ;;  %v3641_v59 = vsub.f32 %v14920_v45, %v17638_v36  ;;  %v4140_v63 = vand.u32 4294901760, %v4139_v5  ;;  %v3647_v37 = vsub.f32 %v14939_v20, %v17641_v61  ;;  %v17933_v36 = vand.u32 4294901760, %v14582_v34 }
 0x5ab   : > { %11506 = vmatpush1.bf16.msra.mxu1 %v11505_v29  ;;  %17931 = vst [vmem:[#allocation88_spill] sm:$0xff] %v14973_v58  ;;  %3628 = vmatprep.mubr.f32.mxu1 %v3627_v30  ;;  %v17932_v30 = vand.u32 4294901760, %v14592_v31  ;;  %v17643_v5 = vand.u32 4294901760, %v14960_v0  ;;  %v17648_v61 = vand.u32 4294901760, %v14965_v3 }
 0x5ac   : > { %4629 = vmatmul.mubr.f32.gmra.mrb[40].mxu0 %v14939_v20  ;;  %11507 = vmatprep.subr.bf16.mxu1 %v17817_v39  ;;  %v4160_v50 = vsub.f32 %v14582_v34, %v17933_v36  ;;  %v3642_v17 = vand.u32 4294901760, %v3641_v59  ;;  %v3648_v49 = vand.u32 4294901760, %v3647_v37  ;;  %v11511_v36 = vpack.c.bf16 %v4147_v62, %v4140_v63 }
 0x5ad   : > { %11602 = vmatpush1.bf16.msra.mxu0 %v14541_v16  ;;  %4635 = vmatprep.mubr.f32.mxu0 %v14960_v0  ;;  %v4153_v29 = vsub.f32 %v14592_v31, %v17932_v30  ;;  %v14995_v16 = vsub.f32 %v3326_v11, %v14971_v22  ;;  %v14998_v31 = vsub.f32 %v3329_v23, %v14973_v58  ;;  %v15007_v59 = vand.u32 4294901760, %v3331_v14  ;;  %v17936_v23 = vld [vmem:[#allocation59_spill] sm:$0xff] }
 0x5ae   : > { %11603 = vmatprep.subr.bf16.mxu0 %v17817_v39  ;;  %3634 = vmatmul.mubr.f32.gmra.mrb[62].mxu1 %v3633_v57  ;;  %v3656_v34 = vsub.f32 %v14960_v0, %v17643_v5  ;;  %v15005_v57 = vand.u32 4294901760, %v3328_v46  ;;  %v3662_v11 = vsub.f32 %v14965_v3, %v17648_v61  ;;  %v4161_v30 = vand.u32 4294901760, %v4160_v50 }
 0x5af   : > { %11509 = vmatpush1.bf16.msra.mxu1 %v11508_v18  ;;  %3643 = vmatprep.mubr.f32.mxu1 %v3642_v17  ;;  %17935 = vst [vmem:[#allocation90_spill] sm:$0xff] %v15007_v59  ;;  %v3330_v18 = vld [vmem:[#allocation21 + $0x100] sm:$0xff]  ;;  %v4154_v37 = vand.u32 4294901760, %v4153_v29  ;;  %v3333_v17 = vld [vmem:[#allocation21 + $0x118] sm:$0xff]  ;;  %v17649_v58 = vand.u32 4294901760, %v14969_v21  ;;  %v17654_v62 = vand.u32 4294901760, %v14995_v16 }
 0x5b0   : > { %4638 = vmatmul.mubr.f32.gmra.mrb[42].mxu0 %v14965_v3  ;;  %11510 = vmatprep.subr.bf16.mxu1 %v17817_v39  ;;  %17934 = vst [vmem:[#allocation89_spill] sm:$0xff] %v15005_v57  ;;  %v3657_v5 = vand.u32 4294901760, %v3656_v34  ;;  %v3663_v63 = vand.u32 4294901760, %v3662_v11  ;;  %v15017_v22 = vand.u32 4294901760, %v3330_v18  ;;  %v15025_v50 = vsub.f32 %v3328_v46, %v15005_v57  ;;  %v3335_v46 = vld [vmem:[#allocation21 + $0x128] sm:$0xff] }
 0x5b1   : > { %11605 = vmatpush1.bf16.msra.mxu0 %v17936_v23  ;;  %4644 = vmatprep.mubr.f32.mxu0 %v14969_v21  ;;  %v3671_v61 = vsub.f32 %v14969_v21, %v17649_v58  ;;  %v15027_v29 = vand.u32 4294901760, %v3333_v17  ;;  %v3677_v34 = vsub.f32 %v14995_v16, %v17654_v62  ;;  %v15035_v11 = vsub.f32 %v3331_v14, %v15007_v59 }
 0x5b2   : > { %11606 = vmatprep.subr.bf16.mxu0 %v17817_v39  ;;  %3649 = vmatmul.mubr.f32.gmra.mrb[64].mxu1 %v3648_v49  ;;  %17937 = vst [vmem:[#allocation91_spill] sm:$0xff] %v15017_v22  ;;  %v3332_v49 = vld [vmem:[#allocation21 + $0x110] sm:$0xff]  ;;  %v17655_v23 = vand.u32 4294901760, %v14998_v31  ;;  %v17658_v42 = vand.u32 4294901760, %v15025_v50  ;;  %v15041_v62 = vsub.f32 %v3330_v18, %v15017_v22  ;;  %v15057_v18 = vand.u32 4294901760, %v3335_v46 }
 0x5b3   : > { %11512 = vmatpush1.bf16.msra.mxu1 %v11511_v36  ;;  %3658 = vmatprep.mubr.f32.mxu1 %v3657_v5  ;;  %17938 = vst [vmem:[#allocation92_spill] sm:$0xff] %v15027_v29  ;;  %v17939_v36 = vld [vmem:[#allocation60_spill] sm:$0xff]  ;;  %v11514_v5 = vpack.c.bf16 %v4161_v30, %v4154_v37  ;;  %17940 = vst [vmem:[#allocation93_spill] sm:$0xff] %v15035_v11  ;;  %v3672_v58 = vand.u32 4294901760, %v3671_v61  ;;  %v3678_v57 = vand.u32 4294901760, %v3677_v34  ;;  %v15043_v37 = vand.u32 4294901760, %v3332_v49 }
 0x5b4   : > { %4647 = vmatmul.mubr.f32.gmra.mrb[44].mxu0 %v14995_v16  ;;  %11513 = vmatprep.subr.bf16.mxu1 %v17817_v39  ;;  %17941 = vst [vmem:[#allocation94_spill] sm:$0xff] %v15041_v62  ;;  %v3686_v61 = vsub.f32 %v14998_v31, %v17655_v23  ;;  %v15050_v14 = vsub.f32 %v3333_v17, %v15027_v29  ;;  %v3334_v30 = vld [vmem:[#allocation21 + $0x120] sm:$0xff]  ;;  %v17944_v34 = vld [vmem:[#allocation62_spill] sm:$0xff]  ;;  %17945 = vst [vmem:[#allocation97_spill] sm:$0xff] %v15057_v18  ;;  %v17666_v23 = vand.u32 4294901760, %v15041_v62 }
 0x5b5   : > { %11608 = vmatpush1.bf16.msra.mxu0 %v17939_v36  ;;  %4653 = vmatprep.mubr.f32.mxu0 %v14998_v31  ;;  %17942 = vst [vmem:[#allocation95_spill] sm:$0xff] %v15043_v37  ;;  %v3337_v36 = vld [vmem:[#allocation21 + $0x138] sm:$0xff]  ;;  %v15063_v29 = vsub.f32 %v3332_v49, %v15043_v37  ;;  %v3336_v22 = vld [vmem:[#allocation21 + $0x130] sm:$0xff]  ;;  %v15077_v49 = vsub.f32 %v3335_v46, %v15057_v18 }
 0x5b6   : > { %11609 = vmatprep.subr.bf16.mxu0 %v17817_v39  ;;  %3664 = vmatmul.mubr.f32.gmra.mrb[66].mxu1 %v3663_v63  ;;  %17943 = vst [vmem:[#allocation96_spill] sm:$0xff] %v15050_v14  ;;  %v3692_v63 = vsub.f32 %v15025_v50, %v17658_v42  ;;  %v15065_v42 = vand.u32 4294901760, %v3334_v30 }
 0x5b7   : > { %11515 = vmatpush1.bf16.msra.mxu1 %v11514_v5  ;;  %3673 = vmatprep.mubr.f32.mxu1 %v3672_v58  ;;  %v3687_v58 = vand.u32 4294901760, %v3686_v61  ;;  %v17663_v5 = vand.u32 4294901760, %v15035_v11  ;;  %17946 = vst [vmem:[#allocation98_spill] sm:$0xff] %v15063_v29  ;;  %v3707_v61 = vsub.f32 %v15041_v62, %v17666_v23  ;;  %17948 = vst [vmem:[#allocation100_spill] sm:$0xff] %v15077_v49  ;;  %v17674_v37 = vand.u32 4294901760, %v15063_v29 }
 0x5b8   : > { %4656 = vmatmul.mubr.f32.gmra.mrb[46].mxu0 %v15025_v50  ;;  %v3693_v17 = vand.u32 4294901760, %v3692_v63  ;;  %17947 = vst [vmem:[#allocation99_spill] sm:$0xff] %v15065_v42  ;;  %v15079_v63 = vand.u32 4294901760, %v3337_v36 }
 0x5b9   : > { %11611 = vmatpush1.bf16.msra.mxu0 %v17944_v34  ;;  %4662 = vmatprep.mubr.f32.mxu0 %v15035_v11  ;;  %v3701_v34 = vsub.f32 %v15035_v11, %v17663_v5  ;;  %v3339_v5 = vld [vmem:[#allocation21 + $0x148] sm:$0xff]  ;;  %v3708_v59 = vand.u32 4294901760, %v3707_v61  ;;  %v15088_v11 = vand.u32 4294901760, %v3336_v22  ;;  %v3722_v46 = vsub.f32 %v15063_v29, %v17674_v37 }
 0x5ba   : > { %11612 = vmatprep.subr.bf16.mxu0 %v17817_v39  ;;  %3679 = vmatmul.mubr.f32.gmra.mrb[68].mxu1 %v3678_v57  ;;  %v17671_v57 = vand.u32 4294901760, %v15050_v14  ;;  %17949 = vst [vmem:[#allocation101_spill] sm:$0xff] %v15079_v63  ;;  %v15097_v61 = vsub.f32 %v3337_v36, %v15079_v63  ;;  %v3340_v63 = vld [vmem:[#allocation21 + $0x150] sm:$0xff] }
 0x5bb   : > { %3688 = vmatprep.mubr.f32.mxu1 %v3687_v58  ;;  %v3702_v58 = vand.u32 4294901760, %v3701_v34  ;;  %17951 = vst [vmem:[#allocation103_spill] sm:$0xff] %v15088_v11  ;;  %v3338_v34 = vld [vmem:[#allocation21 + $0x140] sm:$0xff] }
 0x5bc   : > { %4665 = vmatmul.mubr.f32.gmra.mrb[48].mxu0 %v15041_v62  ;;  %v3716_v23 = vsub.f32 %v15050_v14, %v17671_v57  ;;  %v15086_v62 = vsub.f32 %v3334_v30, %v15065_v42  ;;  %17952 = vst [vmem:[#allocation104_spill] sm:$0xff] %v15097_v61  ;;  %v15099_v30 = vand.u32 4294901760, %v3339_v5  ;;  %v3723_v42 = vand.u32 4294901760, %v3722_v46 }
 0x5bd   : > { %4671 = vmatprep.mubr.f32.mxu0 %v15050_v14 }
 0x5be   : > { %3694 = vmatmul.mubr.f32.gmra.mrb[70].mxu1 %v3693_v17  ;;  %17950 = vst [vmem:[#allocation102_spill] sm:$0xff] %v15086_v62  ;;  %v3717_v18 = vand.u32 4294901760, %v3716_v23  ;;  %v17679_v17 = vand.u32 4294901760, %v15077_v49  ;;  %17953 = vst [vmem:[#allocation105_spill] sm:$0xff] %v15099_v30  ;;  %v17682_v57 = vand.u32 4294901760, %v15086_v62  ;;  %v15106_v23 = vsub.f32 %v3336_v22, %v15088_v11 }
 0x5bf   : > { %3703 = vmatprep.mubr.f32.mxu1 %v3702_v58  ;;  %v3341_v58 = vld [vmem:[#allocation21 + $0x158] sm:$0xff]  ;;  %v15117_v46 = vsub.f32 %v3339_v5, %v15099_v30  ;;  %v3342_v30 = vld [vmem:[#allocation21 + $0x160] sm:$0xff] }
 0x5c0   : > { %4674 = vmatmul.mubr.f32.gmra.mrb[50].mxu0 %v15063_v29  ;;  %v3731_v37 = vsub.f32 %v15077_v49, %v17679_v17  ;;  %17954 = vst [vmem:[#allocation106_spill] sm:$0xff] %v15106_v23  ;;  %v15108_v29 = vand.u32 4294901760, %v3338_v34  ;;  %v3737_v36 = vsub.f32 %v15086_v62, %v17682_v57  ;;  %v15119_v22 = vand.u32 4294901760, %v3341_v58 }
 0x5c1   : > { %4680 = vmatprep.mubr.f32.mxu0 %v15077_v49  ;;  %17956 = vst [vmem:[#allocation108_spill] sm:$0xff] %v15117_v46  ;;  %v17690_v17 = vand.u32 4294901760, %v15106_v23 }
 0x5c2   : > { %3709 = vmatmul.mubr.f32.gmra.mrb[72].mxu1 %v3708_v59  ;;  %17955 = vst [vmem:[#allocation107_spill] sm:$0xff] %v15108_v29  ;;  %v3732_v14 = vand.u32 4294901760, %v3731_v37  ;;  %v17687_v59 = vand.u32 4294901760, %v15097_v61  ;;  %17957 = vst [vmem:[#allocation109_spill] sm:$0xff] %v15119_v22  ;;  %v3738_v11 = vand.u32 4294901760, %v3737_v36  ;;  %v15126_v37 = vsub.f32 %v3338_v34, %v15108_v29 }
 0x5c3   : > { %3718 = vmatprep.mubr.f32.mxu1 %v3717_v18  ;;  %v3343_v18 = vld [vmem:[#allocation21 + $0x168] sm:$0xff]  ;;  %v3752_v5 = vsub.f32 %v15106_v23, %v17690_v17  ;;  %v15137_v36 = vsub.f32 %v3341_v58, %v15119_v22  ;;  %v3344_v22 = vld [vmem:[#allocation21 + $0x170] sm:$0xff] }
 0x5c4   : > { %4683 = vmatmul.mubr.f32.gmra.mrb[52].mxu0 %v15086_v62  ;;  %v3746_v57 = vsub.f32 %v15097_v61, %v17687_v59  ;;  %17958 = vst [vmem:[#allocation110_spill] sm:$0xff] %v15126_v37  ;;  %v15128_v62 = vand.u32 4294901760, %v3340_v63  ;;  %v15139_v34 = vand.u32 4294901760, %v3343_v18  ;;  %v17698_v59 = vand.u32 4294901760, %v15126_v37 }
 0x5c5   : > { %4689 = vmatprep.mubr.f32.mxu0 %v15097_v61  ;;  %17960 = vst [vmem:[#allocation112_spill] sm:$0xff] %v15137_v36  ;;  %v3753_v29 = vand.u32 4294901760, %v3752_v5 }
 0x5c6   : > { %3724 = vmatmul.mubr.f32.gmra.mrb[74].mxu1 %v3723_v42  ;;  %17959 = vst [vmem:[#allocation111_spill] sm:$0xff] %v15128_v62  ;;  %v3747_v49 = vand.u32 4294901760, %v3746_v57  ;;  %v17695_v42 = vand.u32 4294901760, %v15117_v46  ;;  %17961 = vst [vmem:[#allocation113_spill] sm:$0xff] %v15139_v34  ;;  %v15146_v57 = vsub.f32 %v3340_v63, %v15128_v62  ;;  %v3767_v58 = vsub.f32 %v15126_v37, %v17698_v59 }
 0x5c7   : > { %3733 = vmatprep.mubr.f32.mxu1 %v3732_v14  ;;  %v3345_v14 = vld [vmem:[#allocation21 + $0x178] sm:$0xff]  ;;  %v15157_v5 = vsub.f32 %v3343_v18, %v15139_v34  ;;  %v3346_v34 = vld [vmem:[#allocation21 + $0x180] sm:$0xff] }
 0x5c8   : > { %4692 = vmatmul.mubr.f32.gmra.mrb[54].mxu0 %v15106_v23  ;;  %v3761_v17 = vsub.f32 %v15117_v46, %v17695_v42  ;;  %17962 = vst [vmem:[#allocation114_spill] sm:$0xff] %v15146_v57  ;;  %v15148_v23 = vand.u32 4294901760, %v3342_v30  ;;  %v15159_v63 = vand.u32 4294901760, %v3345_v14  ;;  %v17706_v42 = vand.u32 4294901760, %v15146_v57 }
 0x5c9   : > { %4698 = vmatprep.mubr.f32.mxu0 %v15117_v46  ;;  %17964 = vst [vmem:[#allocation116_spill] sm:$0xff] %v15157_v5  ;;  %v3768_v62 = vand.u32 4294901760, %v3767_v58 }
 0x5ca   : > { %3739 = vmatmul.mubr.f32.gmra.mrb[76].mxu1 %v3738_v11  ;;  %17963 = vst [vmem:[#allocation115_spill] sm:$0xff] %v15148_v23  ;;  %v3762_v61 = vand.u32 4294901760, %v3761_v17  ;;  %v17703_v11 = vand.u32 4294901760, %v15137_v36  ;;  %17965 = vst [vmem:[#allocation117_spill] sm:$0xff] %v15159_v63  ;;  %v15166_v17 = vsub.f32 %v3342_v30, %v15148_v23  ;;  %v3782_v18 = vsub.f32 %v15146_v57, %v17706_v42 }
 0x5cb   : > { %3748 = vmatprep.mubr.f32.mxu1 %v3747_v49  ;;  %v3347_v49 = vld [vmem:[#allocation21 + $0x188] sm:$0xff]  ;;  %v15177_v58 = vsub.f32 %v3345_v14, %v15159_v63  ;;  %v3348_v63 = vld [vmem:[#allocation21 + $0x190] sm:$0xff] }
 0x5cc   : > { %4701 = vmatmul.mubr.f32.gmra.mrb[56].mxu0 %v15126_v37  ;;  %v3776_v59 = vsub.f32 %v15137_v36, %v17703_v11  ;;  %17966 = vst [vmem:[#allocation118_spill] sm:$0xff] %v15166_v17  ;;  %v15168_v37 = vand.u32 4294901760, %v3344_v22  ;;  %v15179_v30 = vand.u32 4294901760, %v3347_v49  ;;  %v17714_v11 = vand.u32 4294901760, %v15166_v17 }
 0x5cd   : > { %4707 = vmatprep.mubr.f32.mxu0 %v15137_v36  ;;  %17968 = vst [vmem:[#allocation120_spill] sm:$0xff] %v15177_v58  ;;  %v3783_v23 = vand.u32 4294901760, %v3782_v18 }
 0x5ce   : > { %3754 = vmatmul.mubr.f32.gmra.mrb[78].mxu1 %v3753_v29  ;;  %17967 = vst [vmem:[#allocation119_spill] sm:$0xff] %v15168_v37  ;;  %v3777_v46 = vand.u32 4294901760, %v3776_v59  ;;  %v17711_v29 = vand.u32 4294901760, %v15157_v5  ;;  %17969 = vst [vmem:[#allocation121_spill] sm:$0xff] %v15179_v30  ;;  %v15186_v59 = vsub.f32 %v3344_v22, %v15168_v37  ;;  %v3797_v14 = vsub.f32 %v15166_v17, %v17714_v11 }
 0x5cf   : > { %3763 = vmatprep.mubr.f32.mxu1 %v3762_v61  ;;  %v3349_v61 = vld [vmem:[#allocation21 + $0x198] sm:$0xff]  ;;  %v15197_v18 = vsub.f32 %v3347_v49, %v15179_v30  ;;  %v3350_v30 = vld [vmem:[#allocation21 + $0x1a0] sm:$0xff] }
 0x5d0   : > { %4710 = vmatmul.mubr.f32.gmra.mrb[58].mxu0 %v15146_v57  ;;  %v3791_v42 = vsub.f32 %v15157_v5, %v17711_v29  ;;  %17970 = vst [vmem:[#allocation122_spill] sm:$0xff] %v15186_v59  ;;  %v15188_v57 = vand.u32 4294901760, %v3346_v34  ;;  %v15199_v22 = vand.u32 4294901760, %v3349_v61  ;;  %v17722_v29 = vand.u32 4294901760, %v15186_v59 }
 0x5d1   : > { %4716 = vmatprep.mubr.f32.mxu0 %v15157_v5  ;;  %17972 = vst [vmem:[#allocation124_spill] sm:$0xff] %v15197_v18  ;;  %v3798_v37 = vand.u32 4294901760, %v3797_v14 }
 0x5d2   : > { %3769 = vmatmul.mubr.f32.gmra.mrb[80].mxu1 %v3768_v62  ;;  %17971 = vst [vmem:[#allocation123_spill] sm:$0xff] %v15188_v57  ;;  %v3792_v36 = vand.u32 4294901760, %v3791_v42  ;;  %v17719_v62 = vand.u32 4294901760, %v15177_v58  ;;  %17973 = vst [vmem:[#allocation125_spill] sm:$0xff] %v15199_v22  ;;  %v15206_v42 = vsub.f32 %v3346_v34, %v15188_v57  ;;  %v3812_v49 = vsub.f32 %v15186_v59, %v17722_v29 }
 0x5d3   : > { %3778 = vmatprep.mubr.f32.mxu1 %v3777_v46  ;;  %v3351_v46 = vld [vmem:[#allocation21 + $0x1a8] sm:$0xff]  ;;  %v15217_v14 = vsub.f32 %v3349_v61, %v15199_v22  ;;  %v3352_v22 = vld [vmem:[#allocation21 + $0x1b0] sm:$0xff] }
 0x5d4   : > { %4719 = vmatmul.mubr.f32.gmra.mrb[60].mxu0 %v15166_v17  ;;  %v3806_v11 = vsub.f32 %v15177_v58, %v17719_v62  ;;  %17974 = vst [vmem:[#allocation126_spill] sm:$0xff] %v15206_v42  ;;  %v15208_v17 = vand.u32 4294901760, %v3348_v63  ;;  %v15219_v34 = vand.u32 4294901760, %v3351_v46  ;;  %v17730_v62 = vand.u32 4294901760, %v15206_v42 }
 0x5d5   : > { %4725 = vmatprep.mubr.f32.mxu0 %v15177_v58  ;;  %17976 = vst [vmem:[#allocation128_spill] sm:$0xff] %v15217_v14  ;;  %v3813_v57 = vand.u32 4294901760, %v3812_v49 }
 0x5d6   : > { %3784 = vmatmul.mubr.f32.gmra.mrb[82].mxu1 %v3783_v23  ;;  %17975 = vst [vmem:[#allocation127_spill] sm:$0xff] %v15208_v17  ;;  %v3807_v5 = vand.u32 4294901760, %v3806_v11  ;;  %v17727_v23 = vand.u32 4294901760, %v15197_v18  ;;  %17977 = vst [vmem:[#allocation129_spill] sm:$0xff] %v15219_v34  ;;  %v15226_v11 = vsub.f32 %v3348_v63, %v15208_v17  ;;  %v3827_v61 = vsub.f32 %v15206_v42, %v17730_v62 }
 0x5d7   : > { %3793 = vmatprep.mubr.f32.mxu1 %v3792_v36  ;;  %v3353_v36 = vld [vmem:[#allocation21 + $0x1b8] sm:$0xff]  ;;  %v15237_v49 = vsub.f32 %v3351_v46, %v15219_v34  ;;  %v3354_v34 = vld [vmem:[#allocation21 + $0x1c0] sm:$0xff] }
 0x5d8   : > { %4728 = vmatmul.mubr.f32.gmra.mrb[62].mxu0 %v15186_v59  ;;  %v3821_v29 = vsub.f32 %v15197_v18, %v17727_v23  ;;  %17978 = vst [vmem:[#allocation130_spill] sm:$0xff] %v15226_v11  ;;  %v15228_v59 = vand.u32 4294901760, %v3350_v30  ;;  %v15239_v63 = vand.u32 4294901760, %v3353_v36  ;;  %v17738_v23 = vand.u32 4294901760, %v15226_v11 }
 0x5d9   : > { %4734 = vmatprep.mubr.f32.mxu0 %v15197_v18  ;;  %17980 = vst [vmem:[#allocation132_spill] sm:$0xff] %v15237_v49  ;;  %v3828_v17 = vand.u32 4294901760, %v3827_v61 }
 0x5da   : > { %3799 = vmatmul.mubr.f32.gmra.mrb[84].mxu1 %v3798_v37  ;;  %17979 = vst [vmem:[#allocation131_spill] sm:$0xff] %v15228_v59  ;;  %v3822_v58 = vand.u32 4294901760, %v3821_v29  ;;  %v17735_v37 = vand.u32 4294901760, %v15217_v14  ;;  %17981 = vst [vmem:[#allocation133_spill] sm:$0xff] %v15239_v63  ;;  %v15246_v29 = vsub.f32 %v3350_v30, %v15228_v59  ;;  %v3842_v46 = vsub.f32 %v15226_v11, %v17738_v23 }
 0x5db   : > { %3808 = vmatprep.mubr.f32.mxu1 %v3807_v5  ;;  %v3355_v5 = vld [vmem:[#allocation21 + $0x1c8] sm:$0xff]  ;;  %v15257_v61 = vsub.f32 %v3353_v36, %v15239_v63  ;;  %v3356_v63 = vld [vmem:[#allocation21 + $0x1d0] sm:$0xff] }
 0x5dc   : > { %4737 = vmatmul.mubr.f32.gmra.mrb[64].mxu0 %v15206_v42  ;;  %v3836_v62 = vsub.f32 %v15217_v14, %v17735_v37  ;;  %17982 = vst [vmem:[#allocation134_spill] sm:$0xff] %v15246_v29  ;;  %v15248_v42 = vand.u32 4294901760, %v3352_v22  ;;  %v15259_v30 = vand.u32 4294901760, %v3355_v5  ;;  %v17746_v37 = vand.u32 4294901760, %v15246_v29 }
 0x5dd   : > { %4743 = vmatprep.mubr.f32.mxu0 %v15217_v14  ;;  %17984 = vst [vmem:[#allocation136_spill] sm:$0xff] %v15257_v61  ;;  %v3843_v59 = vand.u32 4294901760, %v3842_v46 }
 0x5de   : > { %3814 = vmatmul.mubr.f32.gmra.mrb[86].mxu1 %v3813_v57  ;;  %17983 = vst [vmem:[#allocation135_spill] sm:$0xff] %v15248_v42  ;;  %v3837_v18 = vand.u32 4294901760, %v3836_v62  ;;  %v17743_v57 = vand.u32 4294901760, %v15237_v49  ;;  %17985 = vst [vmem:[#allocation137_spill] sm:$0xff] %v15259_v30  ;;  %v15266_v62 = vsub.f32 %v3352_v22, %v15248_v42  ;;  %v3857_v36 = vsub.f32 %v15246_v29, %v17746_v37 }
 0x5df   : > { %3823 = vmatprep.mubr.f32.mxu1 %v3822_v58  ;;  %v3357_v58 = vld [vmem:[#allocation21 + $0x1d8] sm:$0xff]  ;;  %v15277_v46 = vsub.f32 %v3355_v5, %v15259_v30  ;;  %v3358_v30 = vld [vmem:[#allocation21 + $0x1e0] sm:$0xff] }
 0x5e0   : > { %4746 = vmatmul.mubr.f32.gmra.mrb[66].mxu0 %v15226_v11  ;;  %v3851_v23 = vsub.f32 %v15237_v49, %v17743_v57  ;;  %17986 = vst [vmem:[#allocation138_spill] sm:$0xff] %v15266_v62  ;;  %v15268_v11 = vand.u32 4294901760, %v3354_v34  ;;  %v15279_v22 = vand.u32 4294901760, %v3357_v58  ;;  %v17754_v57 = vand.u32 4294901760, %v15266_v62 }
 0x5e1   : > { %4752 = vmatprep.mubr.f32.mxu0 %v15237_v49  ;;  %v3858_v42 = vand.u32 4294901760, %v3857_v36 }
 0x5e2   : > { %3829 = vmatmul.mubr.f32.gmra.mrb[88].mxu1 %v3828_v17  ;;  %17987 = vst [vmem:[#allocation139_spill] sm:$0xff] %v15268_v11  ;;  %v3852_v14 = vand.u32 4294901760, %v3851_v23  ;;  %v17751_v17 = vand.u32 4294901760, %v15257_v61  ;;  %17988 = vst [vmem:[#allocation140_spill] sm:$0xff] %v15279_v22  ;;  %v15286_v23 = vsub.f32 %v3354_v34, %v15268_v11  ;;  %v3872_v5 = vsub.f32 %v15266_v62, %v17754_v57 }
 0x5e3   : > { %3838 = vmatprep.mubr.f32.mxu1 %v3837_v18  ;;  %v3359_v18 = vld [vmem:[#allocation21 + $0x1e8] sm:$0xff]  ;;  %v15297_v36 = vsub.f32 %v3357_v58, %v15279_v22  ;;  %v3360_v22 = vld [vmem:[#allocation21 + $0x1f0] sm:$0xff] }
 0x5e4   : > { %4755 = vmatmul.mubr.f32.gmra.mrb[68].mxu0 %v15246_v29  ;;  %v3866_v37 = vsub.f32 %v15257_v61, %v17751_v17  ;;  %v15288_v29 = vand.u32 4294901760, %v3356_v63  ;;  %v15299_v34 = vand.u32 4294901760, %v3359_v18  ;;  %v17760_v17 = vand.u32 4294901760, %v15286_v23 }
 0x5e5   : > { %4761 = vmatprep.mubr.f32.mxu0 %v15257_v61  ;;  %v3873_v11 = vand.u32 4294901760, %v3872_v5 }
 0x5e6   : > { %3844 = vmatmul.mubr.f32.gmra.mrb[90].mxu1 %v3843_v59  ;;  %17989 = vst [vmem:[#allocation141_spill] sm:$0xff] %v15288_v29  ;;  %v3867_v49 = vand.u32 4294901760, %v3866_v37  ;;  %v17759_v59 = vand.u32 4294901760, %v15277_v46  ;;  %17990 = vst [vmem:[#allocation142_spill] sm:$0xff] %v15299_v34  ;;  %v15306_v37 = vsub.f32 %v3356_v63, %v15288_v29  ;;  %v3887_v58 = vsub.f32 %v15286_v23, %v17760_v17 }
 0x5e7   : > { %3853 = vmatprep.mubr.f32.mxu1 %v3852_v14  ;;  %v3361_v14 = vld [vmem:[#allocation21 + $0x1f8] sm:$0xff]  ;;  %v15317_v5 = vsub.f32 %v3359_v18, %v15299_v34 }
 0x5e8   : > { %4764 = vmatmul.mubr.f32.gmra.mrb[70].mxu0 %v15266_v62  ;;  %v3881_v57 = vsub.f32 %v15277_v46, %v17759_v59  ;;  %v15308_v62 = vand.u32 4294901760, %v3358_v30  ;;  %v15319_v63 = vand.u32 4294901760, %v3361_v14  ;;  %v17766_v59 = vand.u32 4294901760, %v15306_v37 }
 0x5e9   : > { %4770 = vmatprep.mubr.f32.mxu0 %v15277_v46 }
 0x5ea   : > { %3859 = vmatmul.mubr.f32.gmra.mrb[92].mxu1 %v3858_v42  ;;  %v3882_v61 = vand.u32 4294901760, %v3881_v57  ;;  %v17765_v42 = vand.u32 4294901760, %v15297_v36  ;;  %17991 = vst [vmem:[#allocation143_spill] sm:$0xff] %v15319_v63  ;;  %v15326_v29 = vsub.f32 %v3358_v30, %v15308_v62  ;;  %v15328_v57 = vand.u32 4294901760, %v3360_v22 }
 0x5eb   : > { %3868 = vmatprep.mubr.f32.mxu1 %v3867_v49  ;;  %v3888_v49 = vand.u32 4294901760, %v3887_v58  ;;  %v3902_v18 = vsub.f32 %v15306_v37, %v17766_v59  ;;  %v15337_v58 = vsub.f32 %v3361_v14, %v15319_v63 }
 0x5ec   : > { %4773 = vmatmul.mubr.f32.gmra.mrb[72].mxu0 %v15286_v23  ;;  %v3896_v17 = vsub.f32 %v15297_v36, %v17765_v42  ;;  %17992 = vst [vmem:[#allocation144_spill] sm:$0xff] %v15328_v57  ;;  %v17769_v30 = vand.u32 4294901760, %v15326_v29  ;;  %v15344_v59 = vsub.f32 %v3360_v22, %v15328_v57 }
 0x5ed   : > { %4779 = vmatprep.mubr.f32.mxu0 %v15297_v36  ;;  %v3903_v42 = vand.u32 4294901760, %v3902_v18  ;;  %v17774_v63 = vand.u32 4294901760, %v15337_v58 }
 0x5ee   : > { %3874 = vmatmul.mubr.f32.gmra.mrb[94].mxu1 %v3873_v11  ;;  %v3897_v34 = vand.u32 4294901760, %v3896_v17  ;;  %v17770_v11 = vand.u32 4294901760, %v15317_v5  ;;  %v3917_v17 = vsub.f32 %v15326_v29, %v17769_v30  ;;  %v17993_v30 = vld [vmem:[#allocation37_spill] sm:$0xff] }
 0x5ef   : > { %3883 = vmatprep.mubr.f32.mxu1 %v3882_v61  ;;  %v3926_v22 = vsub.f32 %v15337_v58, %v17774_v63  ;;  %v18106_v63 = vld [vmem:[#allocation122_spill] sm:$0xff] }
 0x5f0   : > { %4782 = vmatmul.mubr.f32.gmra.mrb[74].mxu0 %v15306_v37  ;;  %v3911_v61 = vsub.f32 %v15317_v5, %v17770_v11  ;;  %v3918_v18 = vand.u32 4294901760, %v3917_v17  ;;  %v17994_v11 = vand.u32 4294901760, %v17993_v30  ;;  %v17996_v17 = vld [vmem:[#allocation39_spill] sm:$0xff]  ;;  %v18001_v30 = vand.u32 4294901760, %v14608_v35 }
 0x5f1   : > { %4788 = vmatprep.mubr.f32.mxu0 %v15317_v5  ;;  %v18007_v35 = vand.u32 4294901760, %v14694_v54  ;;  %v18014_v54 = vand.u32 4294901760, %v14762_v4  ;;  %v18020_v4 = vand.u32 4294901760, %v14810_v26  ;;  %v18027_v26 = vld [vmem:[#allocation74_spill] sm:$0xff] }
 0x5f2   : > { %3889 = vmatmul.mubr.f32.gmra.mrb[96].mxu1 %v3888_v49  ;;  %v3912_v14 = vand.u32 4294901760, %v3911_v61  ;;  %v17773_v49 = vand.u32 4294901760, %v15344_v59  ;;  %v3927_v61 = vand.u32 4294901760, %v3926_v22  ;;  %v17999_v22 = vand.u32 4294901760, %v14605_v56  ;;  %v18006_v56 = vld [vmem:[#allocation61_spill] sm:$0xff] }
 0x5f3   : > { %3898 = vmatprep.mubr.f32.mxu1 %v3897_v34 }
 0x5f4   : > { %4791 = vmatmul.mubr.f32.gmra.mrb[76].mxu0 %v15326_v29  ;;  %v3932_v34 = vsub.f32 %v15344_v59, %v17773_v49  ;;  %v17998_v49 = vld [vmem:[#allocation36_spill] sm:$0xff] }
 0x5f5   : > { %4797 = vmatprep.mubr.f32.mxu0 %v15337_v58 }
 0x5f6   : > { %3904 = vmatmul.mubr.f32.gmra.mrb[98].mxu1 %v3903_v42  ;;  %v3933_v57 = vand.u32 4294901760, %v3932_v34  ;;  %v17995_v42 = vand.u32 4294901760, %v14547_v27  ;;  %v18002_v27 = vld [vmem:[#allocation57_spill] sm:$0xff]  ;;  %v18008_v34 = vld [vmem:[#allocation47_spill] sm:$0xff] }
 0x5f7   : > { %3913 = vmatprep.mubr.f32.mxu1 %v3912_v14  ;;  %v17997_v14 = vand.u32 4294901760, %v14602_v7  ;;  %v18003_v7 = vand.u32 4294901760, %v14611_v44  ;;  %v18010_v44 = vld [vmem:[#allocation63_spill] sm:$0xff] }
 0x5f8   : > { %4800 = vmatmul.mubr.f32.gmra.mrb[78].mxu0 %v15344_v59 }
 0x5f9   : > { %4904 = vmatprep.mubr.f32.mxu0 %v17994_v11  ;;  %v18000_v11 = vld [vmem:[#allocation41_spill] sm:$0xff] }
 0x5fa   : > { %3919 = vmatmul.mubr.f32.gmra.mrb[100].mxu1 %v3918_v18  ;;  %v18005_v18 = vand.u32 4294901760, %v14680_v48  ;;  %v18011_v48 = vand.u32 4294901760, %v14741_v25  ;;  %v18017_v25 = vand.u32 4294901760, %v14786_v60  ;;  %v18022_v60 = vld [vmem:[#allocation72_spill] sm:$0xff] }
 0x5fb   : > { %3928 = vmatprep.mubr.f32.mxu1 %v3927_v61  ;;  %v18009_v61 = vand.u32 4294901760, %v14729_v51  ;;  %v18015_v51 = vld [vmem:[#allocation49_spill] sm:$0xff] }
 0x5fc   : > { %4908 = vmatmul.mubr.f32.vlgmr.msra.gmra.mrb[16].mxu0 %v17995_v42  ;;  %v18012_v42 = vld [vmem:[#allocation48_spill] sm:$0xff] }
 0x5fd   : > { %11614 = vmatpush1.bf16.msra.mxu0 %v17996_v17  ;;  %4915 = vmatprep.mubr.f32.mxu0 %v17997_v14  ;;  %v18013_v17 = vand.u32 4294901760, %v14748_v53  ;;  %v18016_v14 = vand.u32 4294901760, %v14772_v40  ;;  %v18018_v53 = vld [vmem:[#allocation51_spill] sm:$0xff]  ;;  %v18021_v40 = vand.u32 4294901760, %v14820_v12 }
 0x5fe   : > { %11615 = vmatprep.subr.bf16.mxu0 %v17817_v39  ;;  %3934 = vmatmul.mubr.f32.gmra.mrb[102].mxu1 %v3933_v57  ;;  %v18004_v57 = vld [vmem:[#allocation43_spill] sm:$0xff] }
 0x5ff   : > { %4164 = vmatprep.mubr.f32.mxu1 %v17998_v49  ;;  %v18028_v12 = vld [vmem:[#allocation79_spill] sm:$0xff] }
 0x600   : > { %4919 = vmatmul.mubr.f32.gmra.mrb[18].mxu0 %v17999_v22  ;;  %v18019_v22 = vand.u32 4294901760, %v14796_v55  ;;  %v18023_v55 = vand.u32 4294901760, %v14834_v9  ;;  %v18032_v9 = vld [vmem:[#allocation75_spill] sm:$0xff] }
 0x601   : > { %11617 = vmatpush1.bf16.msra.mxu0 %v18000_v11  ;;  %4926 = vmatprep.mubr.f32.mxu0 %v18001_v30  ;;  %v18024_v11 = vld [vmem:[#allocation64_spill] sm:$0xff]  ;;  %v18025_v30 = vand.u32 4294901760, %v14844_v6 }
 0x602   : > { %11618 = vmatprep.subr.bf16.mxu0 %v17817_v39  ;;  %4166 = vmatmul.mubr.f32.vlgmr.msra.gmra.mrb[40].mxu1 %v18002_v27  ;;  %v18033_v6 = vld [vmem:[#allocation76_spill] sm:$0xff] }
 0x603   : > { %4171 = vmatprep.mubr.f32.mxu1 %v14584_v47 }
 0x604   : > { %4930 = vmatmul.mubr.f32.gmra.mrb[20].mxu0 %v18003_v7  ;;  %v18029_v7 = vand.u32 4294901760, %v18028_v12  ;;  %v18059_v12 = vld [vmem:[#allocation71_spill] sm:$0xff] }
 0x605   : > { %11620 = vmatpush1.bf16.msra.mxu0 %v18004_v57  ;;  %4937 = vmatprep.mubr.f32.mxu0 %v18005_v18  ;;  %v18030_v57 = vld [vmem:[#allocation65_spill] sm:$0xff]  ;;  %v18031_v18 = vand.u32 4294901760, %v14870_v52  ;;  %v18039_v52 = vld [vmem:[#allocation78_spill] sm:$0xff] }
 0x606   : > { %11621 = vmatprep.subr.bf16.mxu0 %v17817_v39  ;;  %4173 = vmatmul.mubr.f32.gmra.mrb[42].mxu1 %v14586_v43 }
 0x607   : > { %4178 = vmatprep.mubr.f32.mxu1 %v18006_v56 }
 0x608   : > { %4941 = vmatmul.mubr.f32.gmra.mrb[22].mxu0 %v18007_v35  ;;  %v18034_v35 = vld [vmem:[#allocation83_spill] sm:$0xff] }
 0x609   : > { %11623 = vmatpush1.bf16.msra.mxu0 %v18008_v34  ;;  %4948 = vmatprep.mubr.f32.mxu0 %v18009_v61  ;;  %v18035_v34 = vand.u32 4294901760, %v18034_v35  ;;  %v18036_v61 = vld [vmem:[#allocation66_spill] sm:$0xff] }
 0x60a   : > { %11624 = vmatprep.subr.bf16.mxu0 %v17817_v39  ;;  %4180 = vmatmul.mubr.f32.gmra.mrb[44].mxu1 %v18010_v44 }
 0x60b   : > { %4185 = vmatprep.mubr.f32.mxu1 %v14613_v28 }
 0x60c   : > { %4952 = vmatmul.mubr.f32.gmra.mrb[24].mxu0 %v18011_v48  ;;  %v18037_v48 = vand.u32 4294901760, %v14887_v1  ;;  %v18044_v1 = vld [vmem:[#allocation81_spill] sm:$0xff] }
 0x60d   : > { %11626 = vmatpush1.bf16.msra.mxu0 %v18012_v42  ;;  %4959 = vmatprep.mubr.f32.mxu0 %v18013_v17  ;;  %v18038_v42 = vld [vmem:[#allocation77_spill] sm:$0xff]  ;;  %v18040_v17 = vand.u32 4294901760, %v14907_v24  ;;  %v18048_v24 = vld [vmem:[#allocation82_spill] sm:$0xff] }
 0x60e   : > { %11627 = vmatprep.subr.bf16.mxu0 %v17817_v39  ;;  %4187 = vmatmul.mubr.f32.gmra.mrb[46].mxu1 %v14615_v15 }
 0x60f   : > { %4192 = vmatprep.mubr.f32.mxu1 %v14710_v38 }
 0x610   : > { %4963 = vmatmul.mubr.f32.gmra.mrb[26].mxu0 %v18014_v54  ;;  %v18041_v54 = vld [vmem:[#allocation67_spill] sm:$0xff] }
 0x611   : > { %11629 = vmatpush1.bf16.msra.mxu0 %v18015_v51  ;;  %4970 = vmatprep.mubr.f32.mxu0 %v18016_v14  ;;  %v18042_v51 = vand.u32 4294901760, %v14920_v45  ;;  %v18043_v14 = vld [vmem:[#allocation80_spill] sm:$0xff] }
 0x612   : > { %11630 = vmatprep.subr.bf16.mxu0 %v17817_v39  ;;  %4194 = vmatmul.mubr.f32.gmra.mrb[48].mxu1 %v14724_v10  ;;  %v18049_v45 = vld [vmem:[#allocation84_spill] sm:$0xff] }
 0x613   : > { %4199 = vmatprep.mubr.f32.mxu1 %v14731_v41 }
 0x614   : > { %4974 = vmatmul.mubr.f32.gmra.mrb[28].mxu0 %v18017_v25  ;;  %v18045_v25 = vand.u32 4294901760, %v14939_v20  ;;  %v18053_v20 = vld [vmem:[#allocation85_spill] sm:$0xff] }
 0x615   : > { %11632 = vmatpush1.bf16.msra.mxu0 %v18018_v53  ;;  %4981 = vmatprep.mubr.f32.mxu0 %v18019_v22  ;;  %v18046_v53 = vld [vmem:[#allocation68_spill] sm:$0xff]  ;;  %v18047_v22 = vand.u32 4294901760, %v14960_v0  ;;  %v18054_v0 = vand.u32 4294901760, %v14995_v16  ;;  %v18062_v16 = vld [vmem:[#allocation87_spill] sm:$0xff] }
 0x616   : > { %11633 = vmatprep.subr.bf16.mxu0 %v17817_v39  ;;  %4201 = vmatmul.mubr.f32.gmra.mrb[50].mxu1 %v14743_v2 }
 0x617   : > { %4206 = vmatprep.mubr.f32.mxu1 %v14750_v33 }
 0x618   : > { %4985 = vmatmul.mubr.f32.gmra.mrb[30].mxu0 %v18020_v4  ;;  %v18050_v4 = vand.u32 4294901760, %v14965_v3  ;;  %v18057_v3 = vld [vmem:[#allocation86_spill] sm:$0xff] }
 0x619   : > { %11635 = vmatpush1.bf16.msra.mxu0 %v14635_v13  ;;  %4992 = vmatprep.mubr.f32.mxu0 %v18021_v40  ;;  %v18026_v13 = vld [vmem:[#allocation73_spill] sm:$0xff] }
 0x61a   : > { %11636 = vmatprep.subr.bf16.mxu0 %v17817_v39  ;;  %4208 = vmatmul.mubr.f32.gmra.mrb[52].mxu1 %v14764_v32  ;;  %v18051_v40 = vld [vmem:[#allocation69_spill] sm:$0xff] }
 0x61b   : > { %4213 = vmatprep.mubr.f32.mxu1 %v18022_v60 }
 0x61c   : > { %4996 = vmatmul.mubr.f32.gmra.mrb[32].mxu0 %v18023_v55  ;;  %v18052_v55 = vand.u32 4294901760, %v14969_v21  ;;  %v18058_v21 = vand.u32 4294901760, %v15025_v50  ;;  %v18069_v50 = vld [vmem:[#allocation90_spill] sm:$0xff] }
 0x61d   : > { %11638 = vmatpush1.bf16.msra.mxu0 %v18024_v11  ;;  %5003 = vmatprep.mubr.f32.mxu0 %v18025_v30  ;;  %v18055_v11 = vld [vmem:[#allocation70_spill] sm:$0xff]  ;;  %v18056_v30 = vand.u32 4294901760, %v14998_v31  ;;  %v18063_v31 = vld [vmem:[#allocation88_spill] sm:$0xff] }
 0x61e   : > { %11639 = vmatprep.subr.bf16.mxu0 %v17817_v39  ;;  %4215 = vmatmul.mubr.f32.gmra.mrb[54].mxu1 %v18026_v13 }
 0x61f   : > { %4220 = vmatprep.mubr.f32.mxu1 %v18027_v26 }
 0x620   : > { %5007 = vmatmul.mubr.f32.gmra.mrb[34].mxu0 %v18029_v7  ;;  %v18060_v7 = vld [vmem:[#allocation93_spill] sm:$0xff] }
 0x621   : > { %11641 = vmatpush1.bf16.msra.mxu0 %v18030_v57  ;;  %5014 = vmatprep.mubr.f32.mxu0 %v18031_v18  ;;  %v18061_v57 = vand.u32 4294901760, %v18060_v7  ;;  %v18064_v18 = vld [vmem:[#allocation94_spill] sm:$0xff]  ;;  %v18084_v7 = vld [vmem:[#allocation108_spill] sm:$0xff] }
 0x622   : > { %11642 = vmatprep.subr.bf16.mxu0 %v17817_v39  ;;  %4222 = vmatmul.mubr.f32.gmra.mrb[56].mxu1 %v18032_v9  ;;  %v18065_v35 = vand.u32 4294901760, %v18064_v18  ;;  %v18086_v18 = vld [vmem:[#allocation99_spill] sm:$0xff] }
 0x623   : > { %4227 = vmatprep.mubr.f32.mxu1 %v18033_v6 }
 0x624   : > { %5018 = vmatmul.mubr.f32.gmra.mrb[36].mxu0 %v18035_v34  ;;  %v18066_v34 = vld [vmem:[#allocation96_spill] sm:$0xff] }
 0x625   : > { %11644 = vmatpush1.bf16.msra.mxu0 %v18036_v61  ;;  %5025 = vmatprep.mubr.f32.mxu0 %v18037_v48  ;;  %v18067_v61 = vand.u32 4294901760, %v18066_v34  ;;  %v18068_v48 = vld [vmem:[#allocation89_spill] sm:$0xff]  ;;  %v18088_v34 = vld [vmem:[#allocation110_spill] sm:$0xff] }
 0x626   : > { %11645 = vmatprep.subr.bf16.mxu0 %v17817_v39  ;;  %4229 = vmatmul.mubr.f32.gmra.mrb[58].mxu1 %v18038_v42 }
 0x627   : > { %4234 = vmatprep.mubr.f32.mxu1 %v18039_v52 }
 0x628   : > { %5029 = vmatmul.mubr.f32.gmra.mrb[38].mxu0 %v18040_v17  ;;  %v18070_v17 = vld [vmem:[#allocation98_spill] sm:$0xff] }
 0x629   : > { %11647 = vmatpush1.bf16.msra.mxu0 %v18041_v54  ;;  %5036 = vmatprep.mubr.f32.mxu0 %v18042_v51  ;;  %v18071_v54 = vand.u32 4294901760, %v18070_v17  ;;  %v18072_v51 = vld [vmem:[#allocation100_spill] sm:$0xff] }
 0x62a   : > { %11648 = vmatprep.subr.bf16.mxu0 %v17817_v39  ;;  %4236 = vmatmul.mubr.f32.gmra.mrb[60].mxu1 %v18043_v14  ;;  %v18090_v17 = vld [vmem:[#allocation112_spill] sm:$0xff] }
 0x62b   : > { %4241 = vmatprep.mubr.f32.mxu1 %v18044_v1 }
 0x62c   : > { %5040 = vmatmul.mubr.f32.gmra.mrb[40].mxu0 %v18045_v25  ;;  %v18073_v25 = vand.u32 4294901760, %v18072_v51  ;;  %v18092_v51 = vld [vmem:[#allocation103_spill] sm:$0xff] }
 0x62d   : > { %11650 = vmatpush1.bf16.msra.mxu0 %v18046_v53  ;;  %5047 = vmatprep.mubr.f32.mxu0 %v18047_v22  ;;  %v18074_v53 = vld [vmem:[#allocation91_spill] sm:$0xff]  ;;  %v18075_v22 = vld [vmem:[#allocation92_spill] sm:$0xff] }
 0x62e   : > { %11651 = vmatprep.subr.bf16.mxu0 %v17817_v39  ;;  %4243 = vmatmul.mubr.f32.gmra.mrb[62].mxu1 %v18048_v24 }
 0x62f   : > { %4248 = vmatprep.mubr.f32.mxu1 %v18049_v45 }
 0x630   : > { %5051 = vmatmul.mubr.f32.gmra.mrb[42].mxu0 %v18050_v4  ;;  %v18076_v4 = vld [vmem:[#allocation102_spill] sm:$0xff] }
 0x631   : > { %11653 = vmatpush1.bf16.msra.mxu0 %v18051_v40  ;;  %5058 = vmatprep.mubr.f32.mxu0 %v18052_v55  ;;  %v18077_v40 = vand.u32 4294901760, %v18076_v4  ;;  %v18078_v55 = vld [vmem:[#allocation104_spill] sm:$0xff]  ;;  %v18094_v4 = vld [vmem:[#allocation114_spill] sm:$0xff] }
 0x632   : > { %11654 = vmatprep.subr.bf16.mxu0 %v17817_v39  ;;  %4250 = vmatmul.mubr.f32.gmra.mrb[64].mxu1 %v18053_v20 }
 0x633   : > { %4255 = vmatprep.mubr.f32.mxu1 %v14925_v19 }
 0x634   : > { %5062 = vmatmul.mubr.f32.gmra.mrb[44].mxu0 %v18054_v0  ;;  %v18079_v0 = vand.u32 4294901760, %v18078_v55  ;;  %v18096_v55 = vld [vmem:[#allocation116_spill] sm:$0xff] }
 0x635   : > { %11656 = vmatpush1.bf16.msra.mxu0 %v18055_v11  ;;  %5069 = vmatprep.mubr.f32.mxu0 %v18056_v30  ;;  %v18080_v11 = vld [vmem:[#allocation95_spill] sm:$0xff]  ;;  %v18081_v30 = vld [vmem:[#allocation97_spill] sm:$0xff] }
 0x636   : > { %11657 = vmatprep.subr.bf16.mxu0 %v17817_v39  ;;  %4257 = vmatmul.mubr.f32.gmra.mrb[66].mxu1 %v14934_v8 }
 0x637   : > { %4262 = vmatprep.mubr.f32.mxu1 %v18057_v3 }
 0x638   : > { %5073 = vmatmul.mubr.f32.gmra.mrb[46].mxu0 %v18058_v21  ;;  %v18082_v21 = vld [vmem:[#allocation106_spill] sm:$0xff] }
 0x639   : > { %11659 = vmatpush1.bf16.msra.mxu0 %v18059_v12  ;;  %5080 = vmatprep.mubr.f32.mxu0 %v18061_v57  ;;  %v18083_v12 = vand.u32 4294901760, %v18082_v21  ;;  %v18085_v57 = vand.u32 4294901760, %v18084_v7  ;;  %v18098_v21 = vld [vmem:[#allocation107_spill] sm:$0xff]  ;;  %v18100_v7 = vld [vmem:[#allocation118_spill] sm:$0xff] }
 0x63a   : > { %11660 = vmatprep.subr.bf16.mxu0 %v17817_v39  ;;  %4264 = vmatmul.mubr.f32.gmra.mrb[68].mxu1 %v18062_v16 }
 0x63b   : > { %4269 = vmatprep.mubr.f32.mxu1 %v18063_v31 }
 0x63c   : > { %5084 = vmatmul.mubr.f32.gmra.mrb[48].mxu0 %v18065_v35  ;;  %v18087_v35 = vld [vmem:[#allocation101_spill] sm:$0xff] }
 0x63d   : > { %5091 = vmatprep.mubr.f32.mxu0 %v18067_v61  ;;  %v18089_v61 = vand.u32 4294901760, %v18088_v34  ;;  %v18102_v34 = vld [vmem:[#allocation120_spill] sm:$0xff] }
 0x63e   : > { %4271 = vmatmul.mubr.f32.gmra.mrb[70].mxu1 %v18068_v48 }
 0x63f   : > { %4276 = vmatprep.mubr.f32.mxu1 %v18069_v50 }
 0x640   : > { %5095 = vmatmul.mubr.f32.gmra.mrb[50].mxu0 %v18071_v54  ;;  %v18091_v54 = vand.u32 4294901760, %v18090_v17  ;;  %v18104_v17 = vld [vmem:[#allocation111_spill] sm:$0xff] }
 0x641   : > { %5102 = vmatprep.mubr.f32.mxu0 %v18073_v25  ;;  %v18093_v25 = vld [vmem:[#allocation105_spill] sm:$0xff] }
 0x642   : > { %4278 = vmatmul.mubr.f32.gmra.mrb[72].mxu1 %v18074_v53 }
 0x643   : > { %4283 = vmatprep.mubr.f32.mxu1 %v18075_v22 }
 0x644   : > { %5106 = vmatmul.mubr.f32.gmra.mrb[52].mxu0 %v18077_v40  ;;  %v18095_v40 = vand.u32 4294901760, %v18094_v4  ;;  %v18107_v4 = vand.u32 4294901760, %v18106_v63 }
 0x645   : > { %5113 = vmatprep.mubr.f32.mxu0 %v18079_v0  ;;  %v18097_v0 = vand.u32 4294901760, %v18096_v55 }
 0x646   : > { %4285 = vmatmul.mubr.f32.gmra.mrb[74].mxu1 %v18080_v11 }
 0x647   : > { %4290 = vmatprep.mubr.f32.mxu1 %v18081_v30 }
 0x648   : > { %5117 = vmatmul.mubr.f32.gmra.mrb[54].mxu0 %v18083_v12  ;;  %v18099_v12 = vld [vmem:[#allocation109_spill] sm:$0xff] }
 0x649   : > { %5124 = vmatprep.mubr.f32.mxu0 %v18085_v57  ;;  %v18101_v57 = vand.u32 4294901760, %v18100_v7 }
 0x64a   : > { %4292 = vmatmul.mubr.f32.gmra.mrb[76].mxu1 %v18086_v18 }
 0x64b   : > { %4297 = vmatprep.mubr.f32.mxu1 %v18087_v35 }
 0x64c   : > { %5128 = vmatmul.mubr.f32.gmra.mrb[56].mxu0 %v18089_v61  ;;  %v18103_v61 = vand.u32 4294901760, %v18102_v34 }
 0x64d   : > { %5135 = vmatprep.mubr.f32.mxu0 %v18091_v54  ;;  %v18105_v54 = vld [vmem:[#allocation113_spill] sm:$0xff] }
 0x64e   : > { %4299 = vmatmul.mubr.f32.gmra.mrb[78].mxu1 %v18092_v51 }
 0x64f   : > { %4304 = vmatprep.mubr.f32.mxu1 %v18093_v25 }
 0x650   : > { %5139 = vmatmul.mubr.f32.gmra.mrb[58].mxu0 %v18095_v40  ;;  %v18108_v40 = vld [vmem:[#allocation124_spill] sm:$0xff] }
 0x651   : > { %5146 = vmatprep.mubr.f32.mxu0 %v18097_v0  ;;  %v18109_v55 = vand.u32 4294901760, %v18108_v40  ;;  %v18110_v0 = vld [vmem:[#allocation115_spill] sm:$0xff] }
 0x652   : > { %4306 = vmatmul.mubr.f32.gmra.mrb[80].mxu1 %v18098_v21  ;;  %v18111_v21 = vld [vmem:[#allocation117_spill] sm:$0xff] }
 0x653   : > { %4311 = vmatprep.mubr.f32.mxu1 %v18099_v12  ;;  %v18112_v12 = vld [vmem:[#allocation126_spill] sm:$0xff] }
 0x654   : > { %5150 = vmatmul.mubr.f32.gmra.mrb[60].mxu0 %v18101_v57  ;;  %v18113_v7 = vand.u32 4294901760, %v18112_v12  ;;  %v18114_v57 = vld [vmem:[#allocation128_spill] sm:$0xff] }
 0x655   : > { %5157 = vmatprep.mubr.f32.mxu0 %v18103_v61  ;;  %v18115_v34 = vand.u32 4294901760, %v18114_v57  ;;  %v18116_v61 = vld [vmem:[#allocation119_spill] sm:$0xff] }
 0x656   : > { %4313 = vmatmul.mubr.f32.gmra.mrb[82].mxu1 %v18104_v17  ;;  %v18117_v17 = vld [vmem:[#allocation121_spill] sm:$0xff] }
 0x657   : > { %4318 = vmatprep.mubr.f32.mxu1 %v18105_v54  ;;  %v18118_v54 = vld [vmem:[#allocation130_spill] sm:$0xff] }
 0x658   : > { %5161 = vmatmul.mubr.f32.gmra.mrb[62].mxu0 %v18107_v4  ;;  %v18119_v63 = vand.u32 4294901760, %v18118_v54  ;;  %v18120_v4 = vld [vmem:[#allocation132_spill] sm:$0xff] }
 0x659   : > { %5168 = vmatprep.mubr.f32.mxu0 %v18109_v55  ;;  %v18121_v40 = vand.u32 4294901760, %v18120_v4  ;;  %v18122_v55 = vld [vmem:[#allocation123_spill] sm:$0xff] }
 0x65a   : > { %4320 = vmatmul.mubr.f32.gmra.mrb[84].mxu1 %v18110_v0  ;;  %v18123_v0 = vld [vmem:[#allocation125_spill] sm:$0xff]  ;;  %v18133_v4 = vld [vmem:[#allocation131_spill] sm:$0xff] }
 0x65b   : > { %4325 = vmatprep.mubr.f32.mxu1 %v18111_v21  ;;  %v18124_v21 = vld [vmem:[#allocation134_spill] sm:$0xff] }
 0x65c   : > { %5172 = vmatmul.mubr.f32.gmra.mrb[64].mxu0 %v18113_v7  ;;  %v18125_v12 = vand.u32 4294901760, %v18124_v21  ;;  %v18126_v7 = vld [vmem:[#allocation136_spill] sm:$0xff]  ;;  %v18135_v21 = vand.u32 4294901760, %v15286_v23  ;;  %v18143_v23 = vand.u32 4294901760, %v15326_v29  ;;  %v18149_v29 = vld [vmem:[#allocation38_spill] sm:$0xff] }
 0x65d   : > { %5179 = vmatprep.mubr.f32.mxu0 %v18115_v34  ;;  %v18127_v57 = vand.u32 4294901760, %v18126_v7  ;;  %v18128_v34 = vld [vmem:[#allocation127_spill] sm:$0xff] }
 0x65e   : > { %4327 = vmatmul.mubr.f32.gmra.mrb[86].mxu1 %v18116_v61  ;;  %v18129_v61 = vld [vmem:[#allocation129_spill] sm:$0xff]  ;;  %v18137_v7 = vld [vmem:[#allocation135_spill] sm:$0xff] }
 0x65f   : > { %4332 = vmatprep.mubr.f32.mxu1 %v18117_v17  ;;  %v18130_v17 = vld [vmem:[#allocation138_spill] sm:$0xff] }
 0x660   : > { %5183 = vmatmul.mubr.f32.gmra.mrb[66].mxu0 %v18119_v63  ;;  %v18131_v54 = vand.u32 4294901760, %v18130_v17  ;;  %v18132_v63 = vand.u32 4294901760, %v15277_v46  ;;  %v18139_v17 = vand.u32 4294901760, %v15306_v37  ;;  %v18140_v46 = vand.u32 4294901760, %v15317_v5  ;;  %v18148_v5 = vld [vmem:[#allocation143_spill] sm:$0xff] }
 0x661   : > { %5190 = vmatprep.mubr.f32.mxu0 %v18121_v40  ;;  %v18134_v40 = vld [vmem:[#allocation133_spill] sm:$0xff]  ;;  %v18147_v37 = vand.u32 4294901760, %v15344_v59  ;;  %v18151_v59 = vld [vmem:[#allocation40_spill] sm:$0xff] }
 0x662   : > { %4334 = vmatmul.mubr.f32.gmra.mrb[88].mxu1 %v18122_v55 }
 0x663   : > { %4339 = vmatprep.mubr.f32.mxu1 %v18123_v0 }
 0x664   : > { %5194 = vmatmul.mubr.f32.gmra.mrb[68].mxu0 %v18125_v12  ;;  %v18136_v12 = vand.u32 4294901760, %v15297_v36  ;;  %v18144_v36 = vand.u32 4294901760, %v15337_v58  ;;  %v18150_v58 = vld [vmem:[#allocation144_spill] sm:$0xff] }
 0x665   : > { %5201 = vmatprep.mubr.f32.mxu0 %v18127_v57  ;;  %v18138_v57 = vld [vmem:[#allocation137_spill] sm:$0xff] }
 0x666   : > { %4341 = vmatmul.mubr.f32.gmra.mrb[90].mxu1 %v18128_v34 }
 0x667   : > { %4346 = vmatprep.mubr.f32.mxu1 %v18129_v61 }
 0x668   : > { %5205 = vmatmul.mubr.f32.gmra.mrb[70].mxu0 %v18131_v54  ;;  %v18141_v54 = vld [vmem:[#allocation139_spill] sm:$0xff] }
 0x669   : > { %5212 = vmatprep.mubr.f32.mxu0 %v18132_v63  ;;  %v18142_v63 = vld [vmem:[#allocation140_spill] sm:$0xff] }
 0x66a   : > { %4348 = vmatmul.mubr.f32.gmra.mrb[92].mxu1 %v18133_v4 }
 0x66b   : > { %4353 = vmatprep.mubr.f32.mxu1 %v18134_v40 }
 0x66c   : > { %5216 = vmatmul.mubr.f32.gmra.mrb[72].mxu0 %v18135_v21  ;;  %v18145_v21 = vld [vmem:[#allocation141_spill] sm:$0xff] }
 0x66d   : > { %5223 = vmatprep.mubr.f32.mxu0 %v18136_v12  ;;  %v18146_v12 = vld [vmem:[#allocation142_spill] sm:$0xff] }
 0x66e   : > { %4355 = vmatmul.mubr.f32.gmra.mrb[94].mxu1 %v18137_v7 }
 0x66f   : > { %4360 = vmatprep.mubr.f32.mxu1 %v18138_v57 }
 0x670   : > { %5227 = vmatmul.mubr.f32.gmra.mrb[74].mxu0 %v18139_v17  ;;  %v18152_v17 = vld [vmem:[#allocation42_spill] sm:$0xff] }
 0x671   : > { %5234 = vmatprep.mubr.f32.mxu0 %v18140_v46  ;;  %v18153_v46 = vld [vmem:[#allocation44_spill] sm:$0xff] }
 0x672   : > { %4362 = vmatmul.mubr.f32.gmra.mrb[96].mxu1 %v18141_v54 }
 0x673   : > { %4367 = vmatprep.mubr.f32.mxu1 %v18142_v63 }
 0x674   : > { %5238 = vmatmul.mubr.f32.gmra.mrb[76].mxu0 %v18143_v23  ;;  %v18154_v23 = vld [vmem:[#allocation45_spill] sm:$0xff] }
 0x675   : > { %5245 = vmatprep.mubr.f32.mxu0 %v18144_v36  ;;  %v18155_v36 = vld [vmem:[#allocation46_spill] sm:$0xff] }
 0x676   : > { %4369 = vmatmul.mubr.f32.gmra.mrb[98].mxu1 %v18145_v21 }
 0x677   : > { %4374 = vmatprep.mubr.f32.mxu1 %v18146_v12 }
 0x678   : > { %5249 = vmatmul.mubr.f32.gmra.mrb[78].mxu0 %v18147_v37  ;;  %v18156_v37 = vld [vmem:[#allocation50_spill] sm:$0xff] }
 0x679   : > { %5415 = vmatprep.mubr.f32.mxu0 %v17998_v49 }
 0x67a   : > { %4376 = vmatmul.mubr.f32.gmra.mrb[100].mxu1 %v15308_v62 }
 0x67b   : > { %4381 = vmatprep.mubr.f32.mxu1 %v18148_v5 }
 0x67c   : > { %5417 = vmatmul.mubr.f32.vlgmr.msra.gmra.mrb[16].mxu0 %v18002_v27 }
 0x67d   : > { %11662 = vmatpush1.bf16.msra.mxu0 %v18149_v29  ;;  %5422 = vmatprep.mubr.f32.mxu0 %v14584_v47  ;;  %v18157_v29 = vld [vmem:[#allocation52_spill] sm:$0xff] }
 0x67e   : > { %11663 = vmatprep.subr.bf16.mxu0 %v17817_v39  ;;  %4383 = vmatmul.mubr.f32.gmra.mrb[102].mxu1 %v18150_v58 }
 0x680   : > { %5424 = vmatmul.mubr.f32.gmra.mrb[18].mxu0 %v14586_v43 }
 0x681   : > { %11665 = vmatpush1.bf16.msra.mxu0 %v18151_v59  ;;  %5429 = vmatprep.mubr.f32.mxu0 %v18006_v56  ;;  %v18158_v59 = vld [vmem:[#allocation53_spill] sm:$0xff] }
 0x682   : > { %11666 = vmatprep.subr.bf16.mxu0 %v17817_v39 }
 0x684   : > { %5431 = vmatmul.mubr.f32.gmra.mrb[20].mxu0 %v18010_v44 }
 0x685   : > { %11668 = vmatpush1.bf16.msra.mxu0 %v18152_v17  ;;  %5436 = vmatprep.mubr.f32.mxu0 %v14613_v28  ;;  %v18159_v17 = vld [vmem:[#allocation54_spill] sm:$0xff] }
 0x686   : > { %11669 = vmatprep.subr.bf16.mxu0 %v17817_v39 }
 0x688   : > { %5438 = vmatmul.mubr.f32.gmra.mrb[22].mxu0 %v14615_v15 }
 0x689   : > { %11671 = vmatpush1.bf16.msra.mxu0 %v18153_v46  ;;  %5443 = vmatprep.mubr.f32.mxu0 %v14710_v38  ;;  %v18160_v46 = vld [vmem:[#allocation55_spill] sm:$0xff] }
 0x68a   : > { %11672 = vmatprep.subr.bf16.mxu0 %v17817_v39 }
 0x68c   : > { %5445 = vmatmul.mubr.f32.gmra.mrb[24].mxu0 %v14724_v10 }
 0x68d   : > { %11674 = vmatpush1.bf16.msra.mxu0 %v18154_v23  ;;  %5450 = vmatprep.mubr.f32.mxu0 %v14731_v41  ;;  %v18161_v23 = vld [vmem:[#allocation56_spill] sm:$0xff] }
 0x68e   : > { %11675 = vmatprep.subr.bf16.mxu0 %v17817_v39 }
 0x690   : > { %5452 = vmatmul.mubr.f32.gmra.mrb[26].mxu0 %v14743_v2 }
 0x691   : > { %11677 = vmatpush1.bf16.msra.mxu0 %v18155_v36  ;;  %5457 = vmatprep.mubr.f32.mxu0 %v14750_v33  ;;  %v18162_v36 = vld [vmem:[#allocation58_spill] sm:$0xff] }
 0x692   : > { %11678 = vmatprep.subr.bf16.mxu0 %v17817_v39 }
 0x694   : > { %5459 = vmatmul.mubr.f32.gmra.mrb[28].mxu0 %v14764_v32 }
 0x695   : > { %11680 = vmatpush1.bf16.msra.mxu0 %v18156_v37  ;;  %5464 = vmatprep.mubr.f32.mxu0 %v18022_v60  ;;  %v18163_v37 = vld [vmem:[#allocation59_spill] sm:$0xff] }
 0x696   : > { %11681 = vmatprep.subr.bf16.mxu0 %v17817_v39 }
 0x698   : > { %5466 = vmatmul.mubr.f32.gmra.mrb[30].mxu0 %v18026_v13 }
 0x699   : > { %11683 = vmatpush1.bf16.msra.mxu0 %v18157_v29  ;;  %5471 = vmatprep.mubr.f32.mxu0 %v18027_v26  ;;  %v18164_v29 = vld [vmem:[#allocation60_spill] sm:$0xff] }
 0x69a   : > { %11684 = vmatprep.subr.bf16.mxu0 %v17817_v39 }
 0x69c   : > { %5473 = vmatmul.mubr.f32.gmra.mrb[32].mxu0 %v18032_v9 }
 0x69d   : > { %11686 = vmatpush1.bf16.msra.mxu0 %v18158_v59  ;;  %5478 = vmatprep.mubr.f32.mxu0 %v18033_v6  ;;  %v18165_v59 = vld [vmem:[#allocation62_spill] sm:$0xff] }
 0x69e   : > { %11687 = vmatprep.subr.bf16.mxu0 %v17817_v39 }
 0x6a0   : > { %5480 = vmatmul.mubr.f32.gmra.mrb[34].mxu0 %v18038_v42 }
 0x6a1   : > { %11689 = vmatpush1.bf16.msra.mxu0 %v18159_v17  ;;  %5485 = vmatprep.mubr.f32.mxu0 %v18039_v52  ;;  %v18167_v17 = vld [vmem:[#allocation109_spill] sm:$0xff] }
 0x6a2   : > { %11690 = vmatprep.subr.bf16.mxu0 %v17817_v39 }
 0x6a4   : > { %5487 = vmatmul.mubr.f32.gmra.mrb[36].mxu0 %v18043_v14 }
 0x6a5   : > { %11692 = vmatpush1.bf16.msra.mxu0 %v18160_v46  ;;  %5492 = vmatprep.mubr.f32.mxu0 %v18044_v1  ;;  %v18168_v46 = vld [vmem:[#allocation111_spill] sm:$0xff] }
 0x6a6   : > { %11693 = vmatprep.subr.bf16.mxu0 %v17817_v39 }
 0x6a8   : > { %5494 = vmatmul.mubr.f32.gmra.mrb[38].mxu0 %v18048_v24 }
 0x6a9   : > { %11695 = vmatpush1.bf16.msra.mxu0 %v18161_v23  ;;  %5499 = vmatprep.mubr.f32.mxu0 %v18049_v45  ;;  %v18169_v23 = vld [vmem:[#allocation113_spill] sm:$0xff] }
 0x6aa   : > { %11696 = vmatprep.subr.bf16.mxu0 %v17817_v39 }
 0x6ac   : > { %5501 = vmatmul.mubr.f32.gmra.mrb[40].mxu0 %v18053_v20 }
 0x6ad   : > { %11698 = vmatpush1.bf16.msra.mxu0 %v18162_v36  ;;  %5506 = vmatprep.mubr.f32.mxu0 %v14925_v19  ;;  %v18170_v36 = vld [vmem:[#allocation115_spill] sm:$0xff] }
 0x6ae   : > { %11699 = vmatprep.subr.bf16.mxu0 %v17817_v39 }
 0x6b0   : > { %5508 = vmatmul.mubr.f32.gmra.mrb[42].mxu0 %v14934_v8 }
 0x6b1   : > { %11701 = vmatpush1.bf16.msra.mxu0 %v18163_v37  ;;  %5513 = vmatprep.mubr.f32.mxu0 %v18057_v3  ;;  %v18171_v37 = vld [vmem:[#allocation117_spill] sm:$0xff] }
 0x6b2   : > { %11702 = vmatprep.subr.bf16.mxu0 %v17817_v39 }
 0x6b4   : > { %5515 = vmatmul.mubr.f32.gmra.mrb[44].mxu0 %v18062_v16 }
 0x6b5   : > { %11704 = vmatpush1.bf16.msra.mxu0 %v18164_v29  ;;  %5520 = vmatprep.mubr.f32.mxu0 %v18063_v31 }
 0x6b6   : > { %11705 = vmatprep.subr.bf16.mxu0 %v17817_v39  ;;  %v18166_v39 = vld [vmem:[#allocation107_spill] sm:$0xff] }
 0x6b8   : > { %5522 = vmatmul.mubr.f32.gmra.mrb[46].mxu0 %v18068_v48 }
 0x6b9   : > { %11707 = vmatpush1.bf16.msra.mxu0 %v18165_v59  ;;  %5527 = vmatprep.mubr.f32.mxu0 %v18069_v50 }
 0x6bc   : > { %5529 = vmatmul.mubr.f32.gmra.mrb[48].mxu0 %v18074_v53 }
 0x6bd   : > { %5534 = vmatprep.mubr.f32.mxu0 %v18075_v22 }
 0x6c0   : > { %5536 = vmatmul.mubr.f32.gmra.mrb[50].mxu0 %v18080_v11 }
 0x6c1   : > { %5541 = vmatprep.mubr.f32.mxu0 %v18081_v30 }
 0x6c4   : > { %5543 = vmatmul.mubr.f32.gmra.mrb[52].mxu0 %v18086_v18 }
 0x6c5   : > { %5548 = vmatprep.mubr.f32.mxu0 %v18087_v35  ;;  %v18173_v35 = vld [vmem:[#allocation119_spill] sm:$0xff] }
 0x6c8   : > { %5550 = vmatmul.mubr.f32.gmra.mrb[54].mxu0 %v18092_v51  ;;  %v18174_v51 = vld [vmem:[#allocation121_spill] sm:$0xff] }
 0x6c9   : > { %5555 = vmatprep.mubr.f32.mxu0 %v18093_v25 }
 0x6cc   : > { %5557 = vmatmul.mubr.f32.gmra.mrb[56].mxu0 %v18166_v39 }
 0x6cd   : > { %5562 = vmatprep.mubr.f32.mxu0 %v18167_v17 }
 0x6d0   : > { %5564 = vmatmul.mubr.f32.gmra.mrb[58].mxu0 %v18168_v46 }
 0x6d1   : > { %5569 = vmatprep.mubr.f32.mxu0 %v18169_v23 }
 0x6d4   : > { %5571 = vmatmul.mubr.f32.gmra.mrb[60].mxu0 %v18170_v36 }
 0x6d5   : > { %5576 = vmatprep.mubr.f32.mxu0 %v18171_v37  ;;  %v15662_v29 = vpop.f32.mrb[40].mxu1 }
 0x6d6   : > { %18172 = vst [vmem:[#allocation37_spill] sm:$0xff] %v15662_v29  ;;  %v4169_v59 = vpop.f32.mrb[41].mxu1 }
 0x6d8   : > { %5578 = vmatmul.mubr.f32.gmra.mrb[62].mxu0 %v18173_v35 }
 0x6d9   : > { %5583 = vmatprep.mubr.f32.mxu0 %v18174_v51  ;;  %v15666_v25 = vpop.f32.mrb[42].mxu1 }
 0x6da   : > { %18175 = vst [vmem:[#allocation39_spill] sm:$0xff] %v15666_v25  ;;  %v4176_v39 = vpop.f32.mrb[43].mxu1 }
 0x6dc   : > { %5585 = vmatmul.mubr.f32.gmra.mrb[64].mxu0 %v18122_v55 }
 0x6dd   : > { %5590 = vmatprep.mubr.f32.mxu0 %v18123_v0  ;;  %v15670_v46 = vpop.f32.mrb[44].mxu1 }
 0x6de   : > { %18176 = vst [vmem:[#allocation36_spill] sm:$0xff] %v15670_v46  ;;  %v4183_v23 = vpop.f32.mrb[45].mxu1 }
 0x6e0   : > { %5592 = vmatmul.mubr.f32.gmra.mrb[66].mxu0 %v18128_v34 }
 0x6e1   : > { %5597 = vmatprep.mubr.f32.mxu0 %v18129_v61  ;;  %v15674_v29 = vpop.f32.mrb[46].mxu1 }
 0x6e2   : > { %18177 = vst [vmem:[#allocation41_spill] sm:$0xff] %v15674_v29  ;;  %v4190_v59 = vpop.f32.mrb[47].mxu1 }
 0x6e4   : > { %5599 = vmatmul.mubr.f32.gmra.mrb[68].mxu0 %v18133_v4 }
 0x6e5   : > { %5604 = vmatprep.mubr.f32.mxu0 %v18134_v40  ;;  %v15678_v25 = vpop.f32.mrb[48].mxu1 }
 0x6e6   : > { %18178 = vst [vmem:[#allocation57_spill] sm:$0xff] %v15678_v25  ;;  %v4197_v39 = vpop.f32.mrb[49].mxu1 }
 0x6e8   : > { %5606 = vmatmul.mubr.f32.gmra.mrb[70].mxu0 %v18137_v7 }
 0x6e9   : > { %5611 = vmatprep.mubr.f32.mxu0 %v18138_v57  ;;  %v15682_v46 = vpop.f32.mrb[50].mxu1 }
 0x6ea   : > { %18179 = vst [vmem:[#allocation43_spill] sm:$0xff] %v15682_v46  ;;  %v4204_v23 = vpop.f32.mrb[51].mxu1 }
 0x6ec   : > { %5613 = vmatmul.mubr.f32.gmra.mrb[72].mxu0 %v18141_v54 }
 0x6ed   : > { %5618 = vmatprep.mubr.f32.mxu0 %v18142_v63  ;;  %v15686_v29 = vpop.f32.mrb[52].mxu1 }
 0x6ee   : > { %18180 = vst [vmem:[#allocation61_spill] sm:$0xff] %v15686_v29  ;;  %v4211_v59 = vpop.f32.mrb[53].mxu1 }
 0x6f0   : > { %5620 = vmatmul.mubr.f32.gmra.mrb[74].mxu0 %v18145_v21 }
 0x6f1   : > { %5625 = vmatprep.mubr.f32.mxu0 %v18146_v12  ;;  %v15690_v25 = vpop.f32.mrb[54].mxu1 }
 0x6f2   : > { %18181 = vst [vmem:[#allocation47_spill] sm:$0xff] %v15690_v25  ;;  %v4218_v39 = vpop.f32.mrb[55].mxu1 }
 0x6f4   : > { %5627 = vmatmul.mubr.f32.gmra.mrb[76].mxu0 %v15308_v62 }
 0x6f5   : > { %5632 = vmatprep.mubr.f32.mxu0 %v18148_v5  ;;  %v15694_v46 = vpop.f32.mrb[56].mxu1 }
 0x6f6   : > { %18182 = vst [vmem:[#allocation63_spill] sm:$0xff] %v15694_v46  ;;  %v4225_v23 = vpop.f32.mrb[57].mxu1 }
 0x6f8   : > { %5634 = vmatmul.mubr.f32.gmra.mrb[78].mxu0 %v18150_v58 }
 0x6f9   : > { %5736 = vmatprep.mubr.f32.mxu0 %v17998_v49  ;;  %v15698_v29 = vpop.f32.mrb[58].mxu1 }
 0x6fa   : > { %v4232_v59 = vpop.f32.mrb[59].mxu1 }
 0x6fc   : > { %5738 = vmatmul.mubr.f32.vlgmr.msra.gmra.mrb[16].mxu0 %v18002_v27 }
 0x6fd   : > { %5743 = vmatprep.mubr.f32.mxu0 %v14584_v47  ;;  %v15702_v25 = vpop.f32.mrb[60].mxu1 }
 0x6fe   : > { %v4239_v39 = vpop.f32.mrb[61].mxu1 }
 0x700   : > { %5745 = vmatmul.mubr.f32.gmra.mrb[18].mxu0 %v14586_v43 }
 0x701   : > { %5750 = vmatprep.mubr.f32.mxu0 %v18006_v56  ;;  %v15706_v46 = vpop.f32.mrb[62].mxu1 }
 0x702   : > { %v4246_v23 = vpop.f32.mrb[63].mxu1 }
 0x704   : > { %5752 = vmatmul.mubr.f32.gmra.mrb[20].mxu0 %v18010_v44 }
 0x705   : > { %5757 = vmatprep.mubr.f32.mxu0 %v14613_v28  ;;  %v15710_v49 = vpop.f32.mrb[64].mxu1 }
 0x706   : > { %v4253_v59 = vpop.f32.mrb[65].mxu1 }
 0x708   : > { %5759 = vmatmul.mubr.f32.gmra.mrb[22].mxu0 %v14615_v15 }
 0x709   : > { %5764 = vmatprep.mubr.f32.mxu0 %v14710_v38  ;;  %v15714_v47 = vpop.f32.mrb[66].mxu1 }
 0x70a   : > { %v4260_v27 = vpop.f32.mrb[67].mxu1 }
 0x70c   : > { %5766 = vmatmul.mubr.f32.gmra.mrb[24].mxu0 %v14724_v10 }
 0x70d   : > { %5771 = vmatprep.mubr.f32.mxu0 %v14731_v41  ;;  %v15718_v43 = vpop.f32.mrb[68].mxu1 }
 0x70e   : > { %v4267_v56 = vpop.f32.mrb[69].mxu1 }
 0x70f   : > { %v18188_v56 = vld [vmem:[#allocation113_spill] sm:$0xff] }
 0x710   : > { %5773 = vmatmul.mubr.f32.gmra.mrb[26].mxu0 %v14743_v2 }
 0x711   : > { %5778 = vmatprep.mubr.f32.mxu0 %v14750_v33  ;;  %v15722_v28 = vpop.f32.mrb[70].mxu1 }
 0x712   : > { %v4274_v44 = vpop.f32.mrb[71].mxu1 }
 0x714   : > { %5780 = vmatmul.mubr.f32.gmra.mrb[28].mxu0 %v14764_v32 }
 0x715   : > { %5785 = vmatprep.mubr.f32.mxu0 %v18022_v60  ;;  %v15726_v15 = vpop.f32.mrb[72].mxu1 }
 0x716   : > { %v4281_v38 = vpop.f32.mrb[73].mxu1 }
 0x718   : > { %5787 = vmatmul.mubr.f32.gmra.mrb[30].mxu0 %v18026_v13 }
 0x719   : > { %5792 = vmatprep.mubr.f32.mxu0 %v18027_v26  ;;  %v15730_v10 = vpop.f32.mrb[74].mxu1 }
 0x71a   : > { %v4288_v41 = vpop.f32.mrb[75].mxu1 }
 0x71b   : > { %v6671_v41 = vld [vmem:[#allocation10 + $0x11] sm:$0xff] }
 0x71c   : > { %5794 = vmatmul.mubr.f32.gmra.mrb[32].mxu0 %v18032_v9  ;;  %6875 = vrot.lane.b32.xlu0 %v6671_v41, %s12646_s13  ;;  %v10057_v41 = vld [vmem:[%s17539_s5 + $0x50] sm:$0xff] }
 0x71d   : > { %5799 = vmatprep.mubr.f32.mxu0 %v18033_v6  ;;  %v15734_v2 = vpop.f32.mrb[76].mxu1 }
 0x71e   : > { %v4295_v33 = vpop.f32.mrb[77].mxu1 }
 0x720   : > { %5801 = vmatmul.mubr.f32.gmra.mrb[34].mxu0 %v18038_v42 }
 0x721   : > { %5806 = vmatprep.mubr.f32.mxu0 %v18039_v52  ;;  %v15738_v32 = vpop.f32.mrb[78].mxu1 }
 0x722   : > { %v4302_v60 = vpop.f32.mrb[79].mxu1 }
 0x723   : > { %v18199_v60 = vld [vmem:[#allocation36_spill] sm:$0xff] }
 0x724   : > { %5808 = vmatmul.mubr.f32.gmra.mrb[36].mxu0 %v18043_v14 }
 0x725   : > { %5813 = vmatprep.mubr.f32.mxu0 %v18044_v1  ;;  %v15742_v13 = vpop.f32.mrb[80].mxu1 }
 0x726   : > { %v4309_v26 = vpop.f32.mrb[81].mxu1 }
 0x728   : > { %5815 = vmatmul.mubr.f32.gmra.mrb[38].mxu0 %v18048_v24 }
 0x729   : > { %5820 = vmatprep.mubr.f32.mxu0 %v18049_v45  ;;  %v15746_v9 = vpop.f32.mrb[82].mxu1 }
 0x72a   : > { %v4316_v6 = vpop.f32.mrb[83].mxu1 }
 0x72c   : > { %5822 = vmatmul.mubr.f32.gmra.mrb[40].mxu0 %v18053_v20 }
 0x72d   : > { %5827 = vmatprep.mubr.f32.mxu0 %v14925_v19  ;;  %v15750_v42 = vpop.f32.mrb[84].mxu1 }
 0x72e   : > { %v4323_v52 = vpop.f32.mrb[85].mxu1 }
 0x730   : > { %5829 = vmatmul.mubr.f32.gmra.mrb[42].mxu0 %v14934_v8 }
 0x731   : > { %5834 = vmatprep.mubr.f32.mxu0 %v18057_v3  ;;  %v15754_v14 = vpop.f32.mrb[86].mxu1 }
 0x732   : > { %v4330_v1 = vpop.f32.mrb[87].mxu1 }
 0x734   : > { %5836 = vmatmul.mubr.f32.gmra.mrb[44].mxu0 %v18062_v16 }
 0x735   : > { %5841 = vmatprep.mubr.f32.mxu0 %v18063_v31  ;;  %v15758_v24 = vpop.f32.mrb[88].mxu1 }
 0x736   : > { %v4337_v45 = vpop.f32.mrb[89].mxu1 }
 0x738   : > { %5843 = vmatmul.mubr.f32.gmra.mrb[46].mxu0 %v18068_v48  ;;  %v18183_v48 = vld [vmem:[#allocation101_spill] sm:$0xff] }
 0x739   : > { %5848 = vmatprep.mubr.f32.mxu0 %v18069_v50  ;;  %v15762_v19 = vpop.f32.mrb[90].mxu1 }
 0x73a   : > { %v4344_v20 = vpop.f32.mrb[91].mxu1 }
 0x73c   : > { %5850 = vmatmul.mubr.f32.gmra.mrb[48].mxu0 %v18074_v53  ;;  %v18184_v53 = vld [vmem:[#allocation103_spill] sm:$0xff] }
 0x73d   : > { %5855 = vmatprep.mubr.f32.mxu0 %v18075_v22  ;;  %v15766_v8 = vpop.f32.mrb[92].mxu1  ;;  %v18185_v22 = vld [vmem:[#allocation105_spill] sm:$0xff] }
 0x73e   : > { %v4351_v3 = vpop.f32.mrb[93].mxu1 }
 0x740   : > { %5857 = vmatmul.mubr.f32.gmra.mrb[50].mxu0 %v18080_v11  ;;  %v18186_v11 = vld [vmem:[#allocation107_spill] sm:$0xff] }
 0x741   : > { %5862 = vmatprep.mubr.f32.mxu0 %v18081_v30  ;;  %v15770_v16 = vpop.f32.mrb[94].mxu1 }
 0x742   : > { %v4358_v31 = vpop.f32.mrb[95].mxu1 }
 0x743   : > { %v10055_v31 = vld [vmem:[%s17539_s5 + $0x40] sm:$0xff] }
 0x744   : > { %5864 = vmatmul.mubr.f32.gmra.mrb[52].mxu0 %v18086_v18  ;;  %v18187_v18 = vld [vmem:[#allocation111_spill] sm:$0xff] }
 0x745   : > { %5869 = vmatprep.mubr.f32.mxu0 %v18183_v48  ;;  %v15774_v50 = vpop.f32.mrb[96].mxu1  ;;  %v10056_v48 = vld [vmem:[%s17539_s5 + $0x48] sm:$0xff] }
 0x746   : > { %v4365_v39 = vpop.f32.mrb[97].mxu1 }
 0x748   : > { %5871 = vmatmul.mubr.f32.gmra.mrb[54].mxu0 %v18184_v53  ;;  %v18201_v53 = vld [vmem:[#allocation31_spill] sm:$0xff] }
 0x749   : > { %5876 = vmatprep.mubr.f32.mxu0 %v18185_v22  ;;  %v15778_v23 = vpop.f32.mrb[98].mxu1  ;;  %v6057_v22 = vand.u32 15, %v18201_v53 }
 0x74a   : > { %v4372_v59 = vpop.f32.mrb[99].mxu1 }
 0x74b   : > { %v11712_v59 = vpack.c.bf16 %v10056_v48, %v10055_v31  ;;  %vm15875_vm3 = vcmp.ne.s32.totalorder %v6057_v22, 0 }
 0x74c   : > { %5878 = vmatmul.mubr.f32.gmra.mrb[56].mxu0 %v18186_v11  ;;  %v18202_v11 = vld [vmem:[#allocation41_spill] sm:$0xff] }
 0x74d   : > { %5883 = vmatprep.mubr.f32.mxu0 %v18167_v17  ;;  %v15782_v30 = vpop.f32.mrb[100].mxu1 }
 0x74e   : > { %v4379_v27 = vpop.f32.mrb[101].mxu1 }
 0x750   : > { %5885 = vmatmul.mubr.f32.gmra.mrb[58].mxu0 %v18187_v18 }
 0x751   : > { %5890 = vmatprep.mubr.f32.mxu0 %v18188_v56  ;;  %v15786_v44 = vpop.f32.mrb[102].mxu1 }
 0x752   : > { %v4386_v38 = vpop.f32.mrb[103].mxu1 }
 0x754   : > { %5892 = vmatmul.mubr.f32.gmra.mrb[60].mxu0 %v18170_v36 }
 0x755   : > { %5897 = vmatprep.mubr.f32.mxu0 %v18171_v37 }
 0x758   : > { %5899 = vmatmul.mubr.f32.gmra.mrb[62].mxu0 %v18173_v35  ;;  %v15808_v35 = vld [vmem:[#allocation10 + $0x10] sm:$0xff] }
 0x759   : > { %5904 = vmatprep.mubr.f32.mxu0 %v18174_v51  ;;  %18189 = vst [vmem:[#allocation48_spill] sm:$0xff] %v15808_v35  ;;  %6807 = vst.msk [vmem:[#allocation11] sm:$0xff] %vm17782_vm1, %v15808_v35 }
 0x75c   : > { %5906 = vmatmul.mubr.f32.gmra.mrb[64].mxu0 %v18122_v55 }
 0x75d   : > { %5911 = vmatprep.mubr.f32.mxu0 %v18123_v0  ;;  %v15813_v0 = vld [vmem:[#allocation10 + $0x18] sm:$0xff] }
 0x75e   : > { %18190 = vst [vmem:[#allocation49_spill] sm:$0xff] %v15813_v0  ;;  %6808 = vst.msk [vmem:[#allocation11 + $0x8] sm:$0xff] %vm17782_vm1, %v15813_v0 }
 0x760   : > { %5913 = vmatmul.mubr.f32.gmra.mrb[66].mxu0 %v18128_v34 }
 0x761   : > { %5918 = vmatprep.mubr.f32.mxu0 %v18129_v61 }
 0x764   : > { %5920 = vmatmul.mubr.f32.gmra.mrb[68].mxu0 %v18133_v4 }
 0x765   : > { %5925 = vmatprep.mubr.f32.mxu0 %v18134_v40  ;;  %v18192_v40 = vld [vmem:[#allocation28_spill] sm:$0xff] }
 0x768   : > { %5927 = vmatmul.mubr.f32.gmra.mrb[70].mxu0 %v18137_v7  ;;  %v6036_v7 = vand.u32 15, %v18192_v40 }
 0x769   : > { %5932 = vmatprep.mubr.f32.mxu0 %v18138_v57  ;;  %v18193_v57 = vld [vmem:[#allocation29_spill] sm:$0xff] }
 0x76a   : > { %vm15829_vm15 = vcmp.ne.s32.totalorder %v6036_v7, 15 }
 0x76c   : > { %5934 = vmatmul.mubr.f32.gmra.mrb[72].mxu0 %v18141_v54  ;;  %v6043_v54 = vand.u32 15, %v18193_v57 }
 0x76d   : > { %5939 = vmatprep.mubr.f32.mxu0 %v18142_v63  ;;  %v18194_v63 = vld [vmem:[#allocation39_spill] sm:$0xff] }
 0x76e   : > { %vm15833_vm2 = vcmp.ne.s32.totalorder %v6043_v54, 0 }
 0x770   : > { %5941 = vmatmul.mubr.f32.gmra.mrb[74].mxu0 %v18145_v21 }
 0x771   : > { %5946 = vmatprep.mubr.f32.mxu0 %v18146_v12 }
 0x774   : > { %5948 = vmatmul.mubr.f32.gmra.mrb[76].mxu0 %v15308_v62  ;;  %v18191_v62 = vld [vmem:[#allocation37_spill] sm:$0xff] }
 0x775   : > { %5953 = vmatprep.mubr.f32.mxu0 %v18148_v5  ;;  %v10053_v5 = vld [vmem:[%s17539_s5 + $0x30] sm:$0xff] }
 0x778   : > { %5955 = vmatmul.mubr.f32.gmra.mrb[78].mxu0 %v18150_v58  ;;  %v10054_v58 = vld [vmem:[%s17539_s5 + $0x38] sm:$0xff] }
 0x779   : > { %v11708_v33 = vpack.c.bf16 %v10054_v58, %v10053_v5  ;;  %v18207_v5 = vld [vmem:[#allocation30_spill] sm:$0xff] }
 0x77a   : > { %v6050_v58 = vand.u32 15, %v18207_v5 }
 0x77b   : > { %11709 = vmatprep.subr.bf16.mxu1 %v11708_v33 }
 0x77c   : > { %11711 = vmatpush3.bf16.msra.mxu1 %v11708_v33  ;;  %vm15904_vm4 = vcmp.ne.s32.totalorder %v6050_v58, 15 }
 0x77d   : > { %11713 = vmatprep.subr.bf16.mxu1 %v11712_v59 }
 0x780   : > { %11715 = vmatpush3.bf16.msra.mxu1 %v11712_v59 }
 0x78e   : > { %v6876_v51 = vpop.permute.xlu0 %6875 }
 0x78f   : > { %6978 = vst.msk [vmem:[#allocation11] sm:$0xff] %vm17784_vm7, %v6876_v51  ;;  %v10058_v51 = vld [vmem:[%s17539_s5 + $0x58] sm:$0xff] }
 0x7cf   : > { %v5739_v61 = vpop.f32.mrb[16].mxu0 }
 0x7d0   : > { %v11756_v55 = vadd.f32 %v5739_v61, %v18191_v62  ;;  %v5741_v34 = vpop.f32.mrb[17].mxu0 }
 0x7d1   : > { %v18206_v34 = vld [vmem:[#allocation57_spill] sm:$0xff] }
 0x7d2   : > { %5968 = vst.msk [vmem:[#allocation10 + $0x20] sm:$0xff] %vm17782_vm1, %v11756_v55  ;;  %v11716_v55 = vpack.c.bf16 %v10058_v51, %v10057_v41  ;;  %v18216_v51 = vld [vmem:[#allocation47_spill] sm:$0xff] }
 0x7d3   : > { %v5746_v4 = vpop.f32.mrb[18].mxu0 }
 0x7d4   : > { %v11757_v21 = vadd.f32 %v5746_v4, %v18194_v63  ;;  %v5748_v12 = vpop.f32.mrb[19].mxu0  ;;  %11717 = vmatprep.subr.bf16.mxu1 %v11716_v55 }
 0x7d5   : > { %11719 = vmatpush3.bf16.msra.mxu1 %v11716_v55 }
 0x7d6   : > { %5969 = vst.msk [vmem:[#allocation10 + $0x28] sm:$0xff] %vm17782_vm1, %v11757_v21 }
 0x7d7   : > { %v5753_v17 = vpop.f32.mrb[20].mxu0 }
 0x7d8   : > { %v11758_v26 = vadd.f32 %v5753_v17, %v18199_v60  ;;  %v5755_v6 = vpop.f32.mrb[21].mxu0  ;;  %v18208_v17 = vld [vmem:[#allocation33_spill] sm:$0xff]  ;;  %v18209_v60 = vld [vmem:[#allocation43_spill] sm:$0xff] }
 0x7d9   : > { %v15838_v52 = vld [vmem:[#allocation10 + $0x20] sm:$0xff]  ;;  %v6071_v33 = vand.u32 15, %v18208_v17 }
 0x7da   : > { %18200 = vst [vmem:[#allocation51_spill] sm:$0xff] %v15838_v52  ;;  %v6672_v1 = vld [vmem:[#allocation10 + $0x19] sm:$0xff]  ;;  %5970 = vst.msk [vmem:[#allocation10 + $0x30] sm:$0xff] %vm17782_vm1, %v11758_v26  ;;  %7420 = vrot.lane.b32.xlu0 %v15838_v52, %s12644_s21 }
 0x7db   : > { %v6503_v45 = vld [vmem:[#allocation10 + $0x1f] sm:$0xff]  ;;  %v6774_v20 = vsel %vm15829_vm15, %v6672_v1, 0.0  ;;  %6809 = vst.msk [vmem:[#allocation11 + $0x10] sm:$0xff] %vm17782_vm1, %v15838_v52  ;;  %v5760_v39 = vpop.f32.mrb[22].mxu0  ;;  %vm15908_vm5 = vcmp.ne.s32.totalorder %v6071_v33, 0 }
 0x7dc   : > { %v6605_v3 = vsel %vm15833_vm2, %v6503_v45, 0.0  ;;  %6877 = vrot.lane.b32.xlu1 %v6774_v20, %s12646_s13  ;;  %v11759_v27 = vadd.f32 %v5760_v39, %v18202_v11  ;;  %v5762_v18 = vpop.f32.mrb[23].mxu0  ;;  %v18214_v39 = vld [vmem:[#allocation61_spill] sm:$0xff] }
 0x7dd   : > { %7014 = vst.msk [vmem:[#allocation12 + $0x10] sm:$0xff] %vm17782_vm1, %v6605_v3  ;;  %v15859_v56 = vld [vmem:[#allocation10 + $0x28] sm:$0xff] }
 0x7de   : > { %18203 = vst [vmem:[#allocation72_spill] sm:$0xff] %v15859_v56  ;;  %v6504_v38 = vld [vmem:[#allocation10 + $0x27] sm:$0xff]  ;;  %5971 = vst.msk [vmem:[#allocation10 + $0x38] sm:$0xff] %vm17782_vm1, %v11759_v27  ;;  %7084 = vrot.lane.b32.xlu0 %v15838_v52, %s12646_s13 }
 0x7df   : > { %6810 = vst.msk [vmem:[#allocation11 + $0x18] sm:$0xff] %vm17782_vm1, %v15859_v56  ;;  %7015 = vst.msk [vmem:[#allocation12 + $0x18] sm:$0xff] %vm17782_vm1, %v6504_v38  ;;  %v5767_v61 = vpop.f32.mrb[24].mxu0  ;;  %v7318_v7 = vld [vmem:[#allocation10 + $0x21] sm:$0xff] }
 0x7e0   : > { %7422 = vrot.lane.b32.xlu1 %v15859_v56, %s12644_s21  ;;  %v11760_v4 = vadd.f32 %v5767_v61, %v18206_v34  ;;  %v5769_v40 = vpop.f32.mrb[25].mxu0  ;;  %v18215_v38 = vld [vmem:[#allocation35_spill] sm:$0xff] }
 0x7e1   : > { %v7286_v57 = vld [vmem:[#allocation10 + $0x30] sm:$0xff]  ;;  %v6085_v41 = vand.u32 15, %v18215_v38 }
 0x7e2   : > { %v15880_v54 = vld [vmem:[#allocation10 + $0x2f] sm:$0xff]  ;;  %5972 = vst.msk [vmem:[#allocation10 + $0x40] sm:$0xff] %vm17782_vm1, %v11760_v4  ;;  %7591 = vrot.lane.b32.xlu0 %v7318_v7, %s12647_s29  ;;  %6811 = vst.msk [vmem:[#allocation11 + $0x20] sm:$0xff] %vm17782_vm1, %v7286_v57 }
 0x7e3   : > { %v6607_v63 = vsel %vm15875_vm3, %v15880_v54, 0.0  ;;  %v5774_v21 = vpop.f32.mrb[26].mxu0  ;;  %v7319_v12 = vld [vmem:[#allocation10 + $0x29] sm:$0xff]  ;;  %vm15942_vm6 = vcmp.ne.s32.totalorder %v6085_v41, 0 }
 0x7e4   : > { %7086 = vrot.lane.b32.xlu1 %v15859_v56, %s12646_s13  ;;  %7016 = vst.msk [vmem:[#allocation12 + $0x20] sm:$0xff] %vm17782_vm1, %v6607_v63  ;;  %v11761_v26 = vadd.f32 %v5774_v21, %v18209_v60  ;;  %v5776_v6 = vpop.f32.mrb[27].mxu0  ;;  %v7353_v20 = vsel %vm15829_vm15, %v7319_v12, 0.0  ;;  %v6776_v11 = vsel %vm15904_vm4, %v7319_v12, 0.0  ;;  %v18219_v63 = vld [vmem:[#allocation27_spill] sm:$0xff] }
 0x7e5   : > { %v15894_v1 = vld [vmem:[#allocation10 + $0x38] sm:$0xff]  ;;  %v6001_v21 = vadd.s32 80, %v18219_v63  ;;  %v18220_v12 = vld [vmem:[#allocation63_spill] sm:$0xff]  ;;  %v6005_v31 = vadd.s32 112, %v18219_v63  ;;  %v6000_v48 = vadd.s32 72, %v18219_v63 }
 0x7e6   : > { %v7219_v45 = vld [vmem:[#allocation10 + $0x37] sm:$0xff]  ;;  %5973 = vst.msk [vmem:[#allocation10 + $0x48] sm:$0xff] %vm17782_vm1, %v11761_v26  ;;  %6879 = vrot.lane.b32.xlu0 %v7318_v7, %s12646_s13  ;;  %6812 = vst.msk [vmem:[#allocation11 + $0x28] sm:$0xff] %vm17782_vm1, %v15894_v1  ;;  %v6021_v7 = vadd.s32 240, %v18219_v63 }
 0x7e7   : > { %7017 = vst.msk [vmem:[#allocation12 + $0x28] sm:$0xff] %vm17782_vm1, %v7219_v45  ;;  %v5781_v3 = vpop.f32.mrb[28].mxu0  ;;  %v6099_v6 = vand.u32 15, %v6001_v21 }
 0x7e8   : > { %7593 = vrot.lane.b32.xlu1 %v7353_v20, %s12647_s29  ;;  %v11762_v53 = vadd.f32 %v5781_v3, %v18214_v39  ;;  %v5783_v36 = vpop.f32.mrb[29].mxu0 }
 0x7e9   : > { %v15913_v22 = vld [vmem:[#allocation10 + $0x40] sm:$0xff]  ;;  %vm15977_vm8 = vcmp.ne.s32.totalorder %v6099_v6, 0 }
 0x7ea   : > { %v15915_v59 = vld [vmem:[#allocation10 + $0x3f] sm:$0xff]  ;;  %5974 = vst.msk [vmem:[#allocation10 + $0x50] sm:$0xff] %vm17782_vm1, %v11762_v53  ;;  %7424 = vrot.lane.b32.xlu0 %v7286_v57, %s12644_s21  ;;  %6813 = vst.msk [vmem:[#allocation11 + $0x30] sm:$0xff] %vm17782_vm1, %v15913_v22 }
 0x7eb   : > { %v6609_v27 = vsel %vm15908_vm5, %v15915_v59, 0.0  ;;  %v5788_v18 = vpop.f32.mrb[30].mxu0 }
 0x7ec   : > { %6881 = vrot.lane.b32.xlu1 %v6776_v11, %s12646_s13  ;;  %7018 = vst.msk [vmem:[#allocation12 + $0x30] sm:$0xff] %vm17782_vm1, %v6609_v27  ;;  %v11763_v61 = vadd.f32 %v5788_v18, %v18216_v51  ;;  %v5790_v55 = vpop.f32.mrb[31].mxu0  ;;  %v7320_v11 = vld [vmem:[#allocation10 + $0x31] sm:$0xff]  ;;  %v7321_v51 = vld [vmem:[#allocation10 + $0x39] sm:$0xff] }
 0x7ed   : > { %v15930_v34 = vld [vmem:[#allocation10 + $0x48] sm:$0xff] }
 0x7ee   : > { %v15932_v4 = vld [vmem:[#allocation10 + $0x47] sm:$0xff]  ;;  %5975 = vst.msk [vmem:[#allocation10 + $0x58] sm:$0xff] %vm17782_vm1, %v11763_v61  ;;  %7902 = vrot.lane.b32.xlu0 %v7286_v57, %s12647_s29  ;;  %6814 = vst.msk [vmem:[#allocation11 + $0x38] sm:$0xff] %vm17782_vm1, %v15930_v34 }
 0x7ef   : > { %7019 = vst.msk [vmem:[#allocation12 + $0x38] sm:$0xff] %vm17782_vm1, %v15932_v4  ;;  %v5795_v40 = vpop.f32.mrb[32].mxu0  ;;  %v18223_v61 = vld [vmem:[#allocation32_spill] sm:$0xff] }
 0x7f0   : > { %7426 = vrot.lane.b32.xlu1 %v15894_v1, %s12644_s21  ;;  %v11764_v5 = vadd.f32 %v5795_v40, %v18220_v12  ;;  %v5797_v58 = vpop.f32.mrb[33].mxu0  ;;  %v6064_v55 = vand.u32 15, %v18223_v61 }
 0x7f1   : > { %v15948_v17 = vld [vmem:[#allocation10 + $0x50] sm:$0xff] }
 0x7f2   : > { %v15950_v33 = vld [vmem:[#allocation10 + $0x4f] sm:$0xff]  ;;  %5976 = vst.msk [vmem:[#allocation10 + $0x60] sm:$0xff] %vm17782_vm1, %v11764_v5  ;;  %7088 = vrot.lane.b32.xlu0 %v7286_v57, %s12646_s13  ;;  %6815 = vst.msk [vmem:[#allocation11 + $0x40] sm:$0xff] %vm17782_vm1, %v15948_v17  ;;  %v7252_v57 = vsel %vm15833_vm2, %v15880_v54, 0.0  ;;  %v6003_v54 = vadd.s32 96, %v18219_v63  ;;  %vm16015_vm9 = vcmp.ne.s32.totalorder %v6064_v55, 15 }
 0x7f3   : > { %v6611_v60 = vsel %vm15942_vm6, %v15950_v33, 0.0  ;;  %v5802_v26 = vpop.f32.mrb[34].mxu0  ;;  %v6007_v55 = vadd.s32 128, %v18219_v63 }
 0x7f4   : > { %7768 = vrot.lane.b32.xlu1 %v7219_v45, %s12644_s21  ;;  %7020 = vst.msk [vmem:[#allocation12 + $0x40] sm:$0xff] %vm17782_vm1, %v6611_v60  ;;  %v11765_v20 = vadd.f32 %v5802_v26, %v15698_v29  ;;  %v5804_v3 = vpop.f32.mrb[35].mxu0  ;;  %v6113_v40 = vand.u32 15, %v6003_v54 }
 0x7f5   : > { %v15965_v39 = vld [vmem:[#allocation10 + $0x58] sm:$0xff] }
 0x7f6   : > { %v15967_v53 = vld [vmem:[#allocation10 + $0x57] sm:$0xff]  ;;  %5977 = vst.msk [vmem:[#allocation10 + $0x68] sm:$0xff] %vm17782_vm1, %v11765_v20  ;;  %7766 = vrot.lane.b32.xlu0 %v7252_v57, %s12644_s21  ;;  %6816 = vst.msk [vmem:[#allocation11 + $0x48] sm:$0xff] %vm17782_vm1, %v15965_v39  ;;  %vm16019_vm10 = vcmp.ne.s32.totalorder %v6113_v40, 0 }
 0x7f7   : > { %7021 = vst.msk [vmem:[#allocation12 + $0x48] sm:$0xff] %vm17782_vm1, %v15967_v53  ;;  %v5809_v29 = vpop.f32.mrb[36].mxu0 }
 0x7f8   : > { %7904 = vrot.lane.b32.xlu1 %v15894_v1, %s12647_s29  ;;  %v11766_v45 = vadd.f32 %v5809_v29, %v15702_v25  ;;  %v5811_v36 = vpop.f32.mrb[37].mxu0  ;;  %v6778_v29 = vsel %vm16015_vm9, %v7321_v51, 0.0 }
 0x7f9   : > { %v15983_v27 = vld [vmem:[#allocation10 + $0x60] sm:$0xff]  ;;  %v6127_v36 = vand.u32 15, %v6005_v31 }
 0x7fa   : > { %v15985_v18 = vld [vmem:[#allocation10 + $0x5f] sm:$0xff]  ;;  %5978 = vst.msk [vmem:[#allocation10 + $0x70] sm:$0xff] %vm17782_vm1, %v11766_v45  ;;  %7595 = vrot.lane.b32.xlu0 %v7320_v11, %s12647_s29  ;;  %6817 = vst.msk [vmem:[#allocation11 + $0x50] sm:$0xff] %vm17782_vm1, %v15983_v27 }
 0x7fb   : > { %v7258_v38 = vsel %vm15942_vm6, %v15985_v18, 0.0  ;;  %v6613_v25 = vsel %vm15977_vm8, %v15985_v18, 0.0  ;;  %v5816_v41 = vpop.f32.mrb[38].mxu0  ;;  %vm16058_vm11 = vcmp.ne.s32.totalorder %v6127_v36, 0 }
 0x7fc   : > { %7090 = vrot.lane.b32.xlu1 %v15894_v1, %s12646_s13  ;;  %7022 = vst.msk [vmem:[#allocation12 + $0x50] sm:$0xff] %vm17782_vm1, %v6613_v25  ;;  %v11767_v21 = vadd.f32 %v5816_v41, %v15706_v46  ;;  %v5818_v12 = vpop.f32.mrb[39].mxu0  ;;  %v7355_v1 = vsel %vm15904_vm4, %v7321_v51, 0.0  ;;  %v6011_v46 = vadd.s32 160, %v18219_v63 }
 0x7fd   : > { %v16002_v5 = vld [vmem:[#allocation10 + $0x68] sm:$0xff] }
 0x7fe   : > { %v16004_v58 = vld [vmem:[#allocation10 + $0x67] sm:$0xff]  ;;  %5979 = vst.msk [vmem:[#allocation10 + $0x78] sm:$0xff] %vm17782_vm1, %v11767_v21  ;;  %6883 = vrot.lane.b32.xlu0 %v7320_v11, %s12646_s13  ;;  %6818 = vst.msk [vmem:[#allocation11 + $0x58] sm:$0xff] %vm17782_vm1, %v16002_v5 }
 0x7ff   : > { %7023 = vst.msk [vmem:[#allocation12 + $0x58] sm:$0xff] %vm17782_vm1, %v16004_v58  ;;  %v5823_v60 = vpop.f32.mrb[40].mxu0 }
 0x800   : > { %7597 = vrot.lane.b32.xlu1 %v7355_v1, %s12647_s29  ;;  %v11768_v6 = vadd.f32 %v5823_v60, %v15710_v49  ;;  %v5825_v20 = vpop.f32.mrb[41].mxu0 }
 0x801   : > { %v16025_v3 = vld [vmem:[#allocation10 + $0x70] sm:$0xff] }
 0x802   : > { %v16027_v57 = vld [vmem:[#allocation10 + $0x6f] sm:$0xff]  ;;  %5980 = vst.msk [vmem:[#allocation10 + $0x80] sm:$0xff] %vm17782_vm1, %v11768_v6  ;;  %7428 = vrot.lane.b32.xlu0 %v15913_v22, %s12644_s21  ;;  %6819 = vst.msk [vmem:[#allocation11 + $0x60] sm:$0xff] %vm17782_vm1, %v16025_v3  ;;  %v6141_v6 = vand.u32 15, %v6007_v55 }
 0x803   : > { %v6615_v54 = vsel %vm16019_vm10, %v16027_v57, 0.0  ;;  %v5830_v45 = vpop.f32.mrb[42].mxu0 }
 0x804   : > { %6885 = vrot.lane.b32.xlu1 %v6778_v29, %s12646_s13  ;;  %7024 = vst.msk [vmem:[#allocation12 + $0x60] sm:$0xff] %vm17782_vm1, %v6615_v54  ;;  %v11769_v11 = vadd.f32 %v5830_v45, %v15714_v47  ;;  %v5832_v25 = vpop.f32.mrb[43].mxu0  ;;  %v7254_v29 = vsel %vm15875_vm3, %v15915_v59, 0.0  ;;  %vm16098_vm12 = vcmp.ne.s32.totalorder %v6141_v6, 0  ;;  %v6009_v59 = vadd.s32 144, %v18219_v63 }
 0x805   : > { %v16045_v41 = vld [vmem:[#allocation10 + $0x78] sm:$0xff] }
 0x806   : > { %v16047_v51 = vld [vmem:[#allocation10 + $0x77] sm:$0xff]  ;;  %5981 = vst.msk [vmem:[#allocation10 + $0x88] sm:$0xff] %vm17782_vm1, %v11769_v11  ;;  %7906 = vrot.lane.b32.xlu0 %v15913_v22, %s12647_s29  ;;  %6820 = vst.msk [vmem:[#allocation11 + $0x68] sm:$0xff] %vm17782_vm1, %v16045_v41  ;;  %v7322_v11 = vld [vmem:[#allocation10 + $0x41] sm:$0xff]  ;;  %v6155_v6 = vand.u32 15, %v6009_v59 }
 0x807   : > { %7025 = vst.msk [vmem:[#allocation12 + $0x68] sm:$0xff] %vm17782_vm1, %v16047_v51  ;;  %v5837_v61 = vpop.f32.mrb[44].mxu0 }
 0x808   : > { %7430 = vrot.lane.b32.xlu1 %v15930_v34, %s12644_s21  ;;  %v11770_v40 = vadd.f32 %v5837_v61, %v15718_v43  ;;  %v5839_v21 = vpop.f32.mrb[45].mxu0  ;;  %vm16140_vm14 = vcmp.ne.s32.totalorder %v6155_v6, 0 }
 0x809   : > { %v16064_v12 = vld [vmem:[#allocation10 + $0x80] sm:$0xff]  ;;  %v7323_v21 = vld [vmem:[#allocation10 + $0x49] sm:$0xff] }
 0x80a   : > { %v16066_v1 = vld [vmem:[#allocation10 + $0x7f] sm:$0xff]  ;;  %5982 = vst.msk [vmem:[#allocation10 + $0x90] sm:$0xff] %vm17782_vm1, %v11770_v40  ;;  %7092 = vrot.lane.b32.xlu0 %v15913_v22, %s12646_s13  ;;  %6821 = vst.msk [vmem:[#allocation11 + $0x70] sm:$0xff] %vm17782_vm1, %v16064_v12 }
 0x80b   : > { %v6617_v43 = vsel %vm16058_vm11, %v16066_v1, 0.0  ;;  %v5844_v31 = vpop.f32.mrb[46].mxu0 }
 0x80c   : > { %7772 = vrot.lane.b32.xlu1 %v15932_v4, %s12644_s21  ;;  %7026 = vst.msk [vmem:[#allocation12 + $0x70] sm:$0xff] %vm17782_vm1, %v6617_v43  ;;  %v11771_v22 = vadd.f32 %v5844_v31, %v15722_v28  ;;  %v5846_v20 = vpop.f32.mrb[47].mxu0  ;;  %v18232_v43 = vld [vmem:[#allocation34_spill] sm:$0xff] }
 0x80d   : > { %v16086_v54 = vld [vmem:[#allocation10 + $0x88] sm:$0xff]  ;;  %v6078_v31 = vand.u32 15, %v18232_v43 }
 0x80e   : > { %v16088_v45 = vld [vmem:[#allocation10 + $0x87] sm:$0xff]  ;;  %5983 = vst.msk [vmem:[#allocation10 + $0x98] sm:$0xff] %vm17782_vm1, %v11771_v22  ;;  %7770 = vrot.lane.b32.xlu0 %v7254_v29, %s12644_s21  ;;  %6822 = vst.msk [vmem:[#allocation11 + $0x78] sm:$0xff] %vm17782_vm1, %v16086_v54 }
 0x80f   : > { %7027 = vst.msk [vmem:[#allocation12 + $0x78] sm:$0xff] %vm17782_vm1, %v16088_v45  ;;  %v5851_v28 = vpop.f32.mrb[48].mxu0  ;;  %vm16136_vm13 = vcmp.ne.s32.totalorder %v6078_v31, 15 }
 0x810   : > { %7908 = vrot.lane.b32.xlu1 %v15930_v34, %s12647_s29  ;;  %v11772_v4 = vadd.f32 %v5851_v28, %v15726_v15  ;;  %v5853_v36 = vpop.f32.mrb[49].mxu0  ;;  %v6780_v43 = vsel %vm16136_vm13, %v7323_v21, 0.0 }
 0x811   : > { %v16104_v25 = vld [vmem:[#allocation10 + $0x90] sm:$0xff] }
 0x812   : > { %v16106_v61 = vld [vmem:[#allocation10 + $0x8f] sm:$0xff]  ;;  %5984 = vst.msk [vmem:[#allocation10 + $0xa0] sm:$0xff] %vm17782_vm1, %v11772_v4  ;;  %7599 = vrot.lane.b32.xlu0 %v7322_v11, %s12647_s29  ;;  %6823 = vst.msk [vmem:[#allocation11 + $0x80] sm:$0xff] %vm17782_vm1, %v16104_v25 }
 0x813   : > { %v6619_v15 = vsel %vm16098_vm12, %v16106_v61, 0.0  ;;  %v5858_v40 = vpop.f32.mrb[50].mxu0  ;;  %v7331_v26 = vld [vmem:[#allocation10 + $0x89] sm:$0xff] }
 0x814   : > { %7094 = vrot.lane.b32.xlu1 %v15930_v34, %s12646_s13  ;;  %7028 = vst.msk [vmem:[#allocation12 + $0x80] sm:$0xff] %vm17782_vm1, %v6619_v15  ;;  %v11773_v22 = vadd.f32 %v5858_v40, %v15730_v10  ;;  %v5860_v20 = vpop.f32.mrb[51].mxu0  ;;  %v7357_v34 = vsel %vm16015_vm9, %v7323_v21, 0.0  ;;  %v6017_v10 = vadd.s32 208, %v18219_v63 }
 0x815   : > { %v16123_v29 = vld [vmem:[#allocation10 + $0x98] sm:$0xff] }
 0x816   : > { %v16125_v28 = vld [vmem:[#allocation10 + $0x97] sm:$0xff]  ;;  %5985 = vst.msk [vmem:[#allocation10 + $0xa8] sm:$0xff] %vm17782_vm1, %v11773_v22  ;;  %6887 = vrot.lane.b32.xlu0 %v7322_v11, %s12646_s13  ;;  %6824 = vst.msk [vmem:[#allocation11 + $0x88] sm:$0xff] %vm17782_vm1, %v16123_v29  ;;  %v6169_v22 = vand.u32 15, %v6011_v46  ;;  %v6013_v46 = vadd.s32 176, %v18219_v63 }
 0x817   : > { %7029 = vst.msk [vmem:[#allocation12 + $0x88] sm:$0xff] %vm17782_vm1, %v16125_v28  ;;  %v5865_v59 = vpop.f32.mrb[52].mxu0 }
 0x818   : > { %7601 = vrot.lane.b32.xlu1 %v7357_v34, %s12647_s29  ;;  %v11774_v36 = vadd.f32 %v5865_v59, %v15734_v2  ;;  %v5867_v11 = vpop.f32.mrb[53].mxu0  ;;  %vm16179_vm15 = vcmp.ne.s32.totalorder %v6169_v22, 0 }
 0x819   : > { %v16146_v15 = vld [vmem:[#allocation10 + $0xa0] sm:$0xff] }
 0x81a   : > { %v16148_v40 = vld [vmem:[#allocation10 + $0x9f] sm:$0xff]  ;;  %5986 = vst.msk [vmem:[#allocation10 + $0xb0] sm:$0xff] %vm17782_vm1, %v11774_v36  ;;  %7432 = vrot.lane.b32.xlu0 %v15948_v17, %s12644_s21  ;;  %6825 = vst.msk [vmem:[#allocation11 + $0x90] sm:$0xff] %vm17782_vm1, %v16146_v15 }
 0x81b   : > { %v6621_v31 = vsel %vm16140_vm14, %v16148_v40, 0.0  ;;  %v5872_v6 = vpop.f32.mrb[54].mxu0  ;;  %v7333_v47 = vld [vmem:[#allocation10 + $0x99] sm:$0xff] }
 0x81c   : > { %6889 = vrot.lane.b32.xlu1 %v6780_v43, %s12646_s13  ;;  %7030 = vst.msk [vmem:[#allocation12 + $0x90] sm:$0xff] %vm17782_vm1, %v6621_v31  ;;  %v11775_v20 = vadd.f32 %v5872_v6, %v15738_v32  ;;  %v5874_v21 = vpop.f32.mrb[55].mxu0 }
 0x81d   : > { %v16166_v34 = vld [vmem:[#allocation10 + $0xa8] sm:$0xff]  ;;  %v6183_v21 = vand.u32 15, %v6013_v46 }
 0x81e   : > { %v16168_v59 = vld [vmem:[#allocation10 + $0xa7] sm:$0xff]  ;;  %5987 = vst.msk [vmem:[#allocation10 + $0xb8] sm:$0xff] %vm17782_vm1, %v11775_v20  ;;  %7910 = vrot.lane.b32.xlu0 %v15948_v17, %s12647_s29  ;;  %6826 = vst.msk [vmem:[#allocation11 + $0x98] sm:$0xff] %vm17782_vm1, %v16166_v34 }
 0x81f   : > { %7031 = vst.msk [vmem:[#allocation12 + $0x98] sm:$0xff] %vm17782_vm1, %v16168_v59  ;;  %v5879_v36 = vpop.f32.mrb[56].mxu0  ;;  %vm16220_vm2 = vcmp.ne.s32.totalorder %v6183_v21, 0 }
 0x820   : > { %7434 = vrot.lane.b32.xlu1 %v15965_v39, %s12644_s21  ;;  %v11776_v11 = vadd.f32 %v5879_v36, %v15742_v13  ;;  %v5881_v43 = vpop.f32.mrb[57].mxu0 }
 0x821   : > { %v16185_v31 = vld [vmem:[#allocation10 + $0xb0] sm:$0xff] }
 0x822   : > { %v16187_v6 = vld [vmem:[#allocation10 + $0xaf] sm:$0xff]  ;;  %5988 = vst.msk [vmem:[#allocation10 + $0xc0] sm:$0xff] %vm17782_vm1, %v11776_v11  ;;  %7096 = vrot.lane.b32.xlu0 %v15948_v17, %s12646_s13  ;;  %6827 = vst.msk [vmem:[#allocation11 + $0xa0] sm:$0xff] %vm17782_vm1, %v16185_v31  ;;  %v7256_v11 = vsel %vm15908_vm5, %v15950_v33, 0.0  ;;  %v6029_v33 = vand.u32 15, %v18219_v63 }
 0x823   : > { %v6623_v13 = vsel %vm16179_vm15, %v16187_v6, 0.0  ;;  %v5886_v20 = vpop.f32.mrb[58].mxu0  ;;  %v7335_v62 = vld [vmem:[#allocation10 + $0xa9] sm:$0xff] }
 0x824   : > { %7776 = vrot.lane.b32.xlu1 %v15967_v53, %s12644_s21  ;;  %7032 = vst.msk [vmem:[#allocation12 + $0xa0] sm:$0xff] %vm17782_vm1, %v6623_v13  ;;  %v11777_v17 = vadd.f32 %v5886_v20, %v15746_v9  ;;  %v5888_v36 = vpop.f32.mrb[59].mxu0  ;;  %v6015_v53 = vadd.s32 192, %v18219_v63  ;;  %v7324_v20 = vld [vmem:[#allocation10 + $0x51] sm:$0xff] }
 0x825   : > { %v16207_v43 = vld [vmem:[#allocation10 + $0xb8] sm:$0xff] }
 0x826   : > { %v16209_v22 = vld [vmem:[#allocation10 + $0xb7] sm:$0xff]  ;;  %5989 = vst.msk [vmem:[#allocation10 + $0xc8] sm:$0xff] %vm17782_vm1, %v11777_v17  ;;  %7774 = vrot.lane.b32.xlu0 %v7256_v11, %s12644_s21  ;;  %6828 = vst.msk [vmem:[#allocation11 + $0xa8] sm:$0xff] %vm17782_vm1, %v16207_v43 }
 0x827   : > { %7033 = vst.msk [vmem:[#allocation12 + $0xa8] sm:$0xff] %vm17782_vm1, %v16209_v22  ;;  %v5893_v9 = vpop.f32.mrb[60].mxu0 }
 0x828   : > { %7912 = vrot.lane.b32.xlu1 %v15965_v39, %s12647_s29  ;;  %v11778_v46 = vadd.f32 %v5893_v9, %v15750_v42  ;;  %v5895_v13 = vpop.f32.mrb[61].mxu0  ;;  %v7325_v9 = vld [vmem:[#allocation10 + $0x59] sm:$0xff] }
 0x829   : > { %v16226_v17 = vld [vmem:[#allocation10 + $0xc0] sm:$0xff]  ;;  %v6092_v13 = vand.u32 15, %v6000_v48  ;;  %v7359_v21 = vsel %vm16136_vm13, %v7325_v9, 0.0 }
 0x82a   : > { %v16228_v36 = vld [vmem:[#allocation10 + $0xbf] sm:$0xff]  ;;  %5990 = vst.msk [vmem:[#allocation10 + $0xd0] sm:$0xff] %vm17782_vm1, %v11778_v46  ;;  %7603 = vrot.lane.b32.xlu0 %v7324_v20, %s12647_s29  ;;  %6829 = vst.msk [vmem:[#allocation11 + $0xb0] sm:$0xff] %vm17782_vm1, %v16226_v17  ;;  %v6197_v46 = vand.u32 15, %v6015_v53 }
 0x82b   : > { %v6625_v42 = vsel %vm16220_vm2, %v16228_v36, 0.0  ;;  %v5900_v11 = vpop.f32.mrb[62].mxu0  ;;  %vm16257_vm3 = vcmp.ne.s32.totalorder %v6092_v13, 15  ;;  %v6211_v13 = vand.u32 15, %v6017_v10  ;;  %v6019_v10 = vadd.s32 224, %v18219_v63  ;;  %v7337_v4 = vld [vmem:[#allocation10 + $0xb9] sm:$0xff] }
 0x82c   : > { %7098 = vrot.lane.b32.xlu1 %v15965_v39, %s12646_s13  ;;  %7034 = vst.msk [vmem:[#allocation12 + $0xb0] sm:$0xff] %vm17782_vm1, %v6625_v42  ;;  %v11779_v2 = vadd.f32 %v5900_v11, %v15754_v14  ;;  %v5902_v55 = vpop.f32.mrb[63].mxu0  ;;  %vm16261_vm4 = vcmp.ne.s32.totalorder %v6197_v46, 0  ;;  %v6023_v14 = vadd.s32 256, %v18219_v63 }
 0x82d   : > { %v16244_v60 = vld [vmem:[#allocation10 + $0xc8] sm:$0xff]  ;;  %vm16300_vm5 = vcmp.ne.s32.totalorder %v6211_v13, 0 }
 0x82e   : > { %v16246_v49 = vld [vmem:[#allocation10 + $0xc7] sm:$0xff]  ;;  %5991 = vst.msk [vmem:[#allocation10 + $0xd8] sm:$0xff] %vm17782_vm1, %v11779_v2  ;;  %6891 = vrot.lane.b32.xlu0 %v7324_v20, %s12646_s13  ;;  %6830 = vst.msk [vmem:[#allocation11 + $0xb8] sm:$0xff] %vm17782_vm1, %v16244_v60 }
 0x82f   : > { %7035 = vst.msk [vmem:[#allocation12 + $0xb8] sm:$0xff] %vm17782_vm1, %v16246_v49  ;;  %v5907_v39 = vpop.f32.mrb[64].mxu0 }
 0x830   : > { %7605 = vrot.lane.b32.xlu1 %v7359_v21, %s12647_s29  ;;  %v11780_v2 = vadd.f32 %v5907_v39, %v15758_v24  ;;  %v5909_v48 = vpop.f32.mrb[65].mxu0  ;;  %v6782_v21 = vsel %vm16257_vm3, %v7325_v9, 0.0 }
 0x831   : > { %v16267_v53 = vld [vmem:[#allocation10 + $0xd0] sm:$0xff] }
 0x832   : > { %v16269_v20 = vld [vmem:[#allocation10 + $0xcf] sm:$0xff]  ;;  %5992 = vst.msk [vmem:[#allocation10 + $0xe0] sm:$0xff] %vm17782_vm1, %v11780_v2  ;;  %7436 = vrot.lane.b32.xlu0 %v15983_v27, %s12644_s21  ;;  %6831 = vst.msk [vmem:[#allocation11 + $0xc0] sm:$0xff] %vm17782_vm1, %v16267_v53 }
 0x833   : > { %v6627_v24 = vsel %vm16261_vm4, %v16269_v20, 0.0  ;;  %v5914_v11 = vpop.f32.mrb[66].mxu0  ;;  %v7339_v32 = vld [vmem:[#allocation10 + $0xc9] sm:$0xff] }
 0x834   : > { %6893 = vrot.lane.b32.xlu1 %v6782_v21, %s12646_s13  ;;  %7036 = vst.msk [vmem:[#allocation12 + $0xc0] sm:$0xff] %vm17782_vm1, %v6627_v24  ;;  %v11781_v46 = vadd.f32 %v5914_v11, %v15762_v19  ;;  %v5916_v9 = vpop.f32.mrb[67].mxu0 }
 0x835   : > { %v16287_v39 = vld [vmem:[#allocation10 + $0xd8] sm:$0xff] }
 0x836   : > { %v16289_v2 = vld [vmem:[#allocation10 + $0xd7] sm:$0xff]  ;;  %5993 = vst.msk [vmem:[#allocation10 + $0xe8] sm:$0xff] %vm17782_vm1, %v11781_v46  ;;  %7914 = vrot.lane.b32.xlu0 %v15983_v27, %s12647_s29  ;;  %6832 = vst.msk [vmem:[#allocation11 + $0xc8] sm:$0xff] %vm17782_vm1, %v16287_v39 }
 0x837   : > { %7037 = vst.msk [vmem:[#allocation12 + $0xc8] sm:$0xff] %vm17782_vm1, %v16289_v2  ;;  %v5921_v48 = vpop.f32.mrb[68].mxu0 }
 0x838   : > { %7438 = vrot.lane.b32.xlu1 %v16002_v5, %s12644_s21  ;;  %v11782_v21 = vadd.f32 %v5921_v48, %v15766_v8  ;;  %v5923_v24 = vpop.f32.mrb[69].mxu0  ;;  %v6225_v48 = vand.u32 15, %v6019_v10  ;;  %v18247_v10 = vmov 0 }
 0x839   : > { %v16306_v11 = vld [vmem:[#allocation10 + $0xe0] sm:$0xff] }
 0x83a   : > { %v16308_v46 = vld [vmem:[#allocation10 + $0xdf] sm:$0xff]  ;;  %5994 = vst.msk [vmem:[#allocation10 + $0xf0] sm:$0xff] %vm17782_vm1, %v11782_v21  ;;  %7100 = vrot.lane.b32.xlu0 %v15983_v27, %s12646_s13  ;;  %6833 = vst.msk [vmem:[#allocation11 + $0xd0] sm:$0xff] %vm17782_vm1, %v16306_v11  ;;  %vm16342_vm9 = vcmp.ne.s32.totalorder %v6225_v48, 0 }
 0x83b   : > { %v6629_v8 = vsel %vm16300_vm5, %v16308_v46, 0.0  ;;  %v5928_v9 = vpop.f32.mrb[70].mxu0  ;;  %v18248_v10 = vsel %vm16342_vm9, 4294967295, %v18247_v10 }
 0x83c   : > { %7780 = vrot.lane.b32.xlu1 %v16004_v58, %s12644_s21  ;;  %7038 = vst.msk [vmem:[#allocation12 + $0xd0] sm:$0xff] %vm17782_vm1, %v6629_v8  ;;  %v11783_v27 = vadd.f32 %v5928_v9, %v15770_v16  ;;  %v5930_v21 = vpop.f32.mrb[71].mxu0  ;;  %v6002_v58 = vadd.s32 88, %v18219_v63  ;;  %v7326_v8 = vld [vmem:[#allocation10 + $0x61] sm:$0xff] }
 0x83d   : > { %v16325_v24 = vld [vmem:[#allocation10 + $0xe8] sm:$0xff] }
 0x83e   : > { %v16327_v13 = vld [vmem:[#allocation10 + $0xe7] sm:$0xff]  ;;  %5995 = vst.msk [vmem:[#allocation10 + $0xf8] sm:$0xff] %vm17782_vm1, %v11783_v27  ;;  %7778 = vrot.lane.b32.xlu0 %v7258_v38, %s12644_s21  ;;  %6834 = vst.msk [vmem:[#allocation11 + $0xd8] sm:$0xff] %vm17782_vm1, %v16325_v24 }
 0x83f   : > { %7039 = vst.msk [vmem:[#allocation12 + $0xd8] sm:$0xff] %vm17782_vm1, %v16327_v13  ;;  %v5935_v16 = vpop.f32.mrb[72].mxu0 }
 0x840   : > { %7916 = vrot.lane.b32.xlu1 %v16002_v5, %s12647_s29  ;;  %v11784_v18 = vadd.f32 %v5935_v16, %v15774_v50  ;;  %v5937_v38 = vpop.f32.mrb[73].mxu0  ;;  %v7327_v16 = vld [vmem:[#allocation10 + $0x69] sm:$0xff] }
 0x841   : > { %v16348_v9 = vld [vmem:[#allocation10 + $0xf0] sm:$0xff]  ;;  %v6106_v38 = vand.u32 15, %v6002_v58  ;;  %v7361_v0 = vsel %vm16257_vm3, %v7327_v16, 0.0  ;;  %vm17785_vm3 = vcmask 294080  }
 0x842   : > { %v16350_v27 = vld [vmem:[#allocation10 + $0xef] sm:$0xff]  ;;  %5996 = vst.msk [vmem:[#allocation10 + $0x100] sm:$0xff] %vm17782_vm1, %v11784_v18  ;;  %7607 = vrot.lane.b32.xlu0 %v7326_v8, %s12647_s29  ;;  %6835 = vst.msk [vmem:[#allocation11 + $0xe0] sm:$0xff] %vm17782_vm1, %v16348_v9  ;;  %v6239_v18 = vand.u32 15, %v6021_v7 }
 0x843   : > { %v6631_v50 = vsel %vm16342_vm9, %v16350_v27, 0.0  ;;  %v5942_v21 = vpop.f32.mrb[74].mxu0  ;;  %vm16379_vm6 = vcmp.ne.s32.totalorder %v6106_v38, 15  ;;  %v6253_v38 = vand.u32 15, %v6023_v14  ;;  %vm18255_vm9 = vcmask 97280  }
 0x844   : > { %7102 = vrot.lane.b32.xlu1 %v16002_v5, %s12646_s13  ;;  %7040 = vst.msk [vmem:[#allocation12 + $0xe0] sm:$0xff] %vm17782_vm1, %v6631_v50  ;;  %v11785_v42 = vadd.f32 %v5942_v21, %v15778_v23  ;;  %v5944_v56 = vpop.f32.mrb[75].mxu0  ;;  %vm16383_vm13 = vcmp.ne.s32.totalorder %v6239_v18, 0 }
 0x845   : > { %v16366_v48 = vld [vmem:[#allocation10 + $0xf8] sm:$0xff]  ;;  %vm16424_vm0 = vcmp.ne.s32.totalorder %v6253_v38, 0 }
 0x846   : > { %v16368_v52 = vld [vmem:[#allocation10 + $0xf7] sm:$0xff]  ;;  %5997 = vst.msk [vmem:[#allocation10 + $0x108] sm:$0xff] %vm17782_vm1, %v11785_v42  ;;  %6895 = vrot.lane.b32.xlu0 %v7326_v8, %s12646_s13  ;;  %6836 = vst.msk [vmem:[#allocation11 + $0xe8] sm:$0xff] %vm17782_vm1, %v16366_v48 }
 0x847   : > { %7041 = vst.msk [vmem:[#allocation12 + $0xe8] sm:$0xff] %vm17782_vm1, %v16368_v52  ;;  %v5949_v5 = vpop.f32.mrb[76].mxu0 }
 0x848   : > { %7609 = vrot.lane.b32.xlu1 %v7361_v0, %s12647_s29  ;;  %v11786_v42 = vadd.f32 %v5949_v5, %v15782_v30  ;;  %v5951_v58 = vpop.f32.mrb[77].mxu0  ;;  %v6784_v0 = vsel %vm16379_vm6, %v7327_v16, 0.0 }
 0x849   : > { %v16389_v7 = vld [vmem:[#allocation10 + $0x100] sm:$0xff] }
 0x84a   : > { %v16391_v8 = vld [vmem:[#allocation10 + $0xff] sm:$0xff]  ;;  %5998 = vst.msk [vmem:[#allocation10 + $0x110] sm:$0xff] %vm17782_vm1, %v11786_v42  ;;  %7440 = vrot.lane.b32.xlu0 %v16025_v3, %s12644_s21  ;;  %6837 = vst.msk [vmem:[#allocation11 + $0xf0] sm:$0xff] %vm17782_vm1, %v16389_v7 }
 0x84b   : > { %v6633_v30 = vsel %vm16383_vm13, %v16391_v8, 0.0  ;;  %v5956_v21 = vpop.f32.mrb[78].mxu0 }
 0x84c   : > { %6897 = vrot.lane.b32.xlu1 %v6784_v0, %s12646_s13  ;;  %7042 = vst.msk [vmem:[#allocation12 + $0xf0] sm:$0xff] %vm17782_vm1, %v6633_v30  ;;  %v11787_v16 = vadd.f32 %v5956_v21, %v15786_v44  ;;  %v5958_v18 = vpop.f32.mrb[79].mxu0  ;;  %v7421_v5 = vpop.permute.xlu0 %7420  ;;  %v6024_v44 = vadd.s32 264, %v18219_v63 }
 0x84d   : > { %7523 = vst.msk [vmem:[#allocation11] sm:$0xff] %vm17785_vm3, %v7421_v5  ;;  %v16410_v58 = vld [vmem:[#allocation10 + $0x108] sm:$0xff] }
 0x84e   : > { %v6878_v42 = vpop.permute.xlu1 %6877  ;;  %v16412_v50 = vld [vmem:[#allocation10 + $0x107] sm:$0xff]  ;;  %5999 = vst.msk [vmem:[#allocation10 + $0x118] sm:$0xff] %vm17782_vm1, %v11787_v16  ;;  %7918 = vrot.lane.b32.xlu0 %v16025_v3, %s12647_s29  ;;  %6838 = vst.msk [vmem:[#allocation11 + $0xf8] sm:$0xff] %vm17782_vm1, %v16410_v58 }
 0x84f   : > { %6979 = vst.msk [vmem:[#allocation11 + $0x8] sm:$0xff] %vm17784_vm7, %v6878_v42  ;;  %v18258_v42 = vsel %vm15977_vm8, %v16027_v57, 0.0  ;;  %v7329_v57 = vld [vmem:[#allocation10 + $0x79] sm:$0xff]  ;;  %vm18260_vm8 = vcmask 294080  }
 0x850   : > { %7043 = vst.msk [vmem:[#allocation12 + $0xf8] sm:$0xff] %vm17782_vm1, %v16412_v50  ;;  %7442 = vrot.lane.b32.xlu1 %v16045_v41, %s12644_s21  ;;  %v7085_v14 = vpop.permute.xlu0 %7084  ;;  %vm7693_vm1 = vcmask 392480  }
 0x851   : > { %7184 = vst.msk [vmem:[#allocation12 + $0x10] sm:$0xff] %vm17784_vm7, %v7085_v14  ;;  %v16429_v30 = vld [vmem:[#allocation10 + $0x110] sm:$0xff]  ;;  %vm18256_vm7 = vmmov %vm18255_vm9 }
 0x852   : > { %v7423_v0 = vpop.permute.xlu1 %7422  ;;  %v16431_v21 = vld [vmem:[#allocation10 + $0x10f] sm:$0xff]  ;;  %7104 = vrot.lane.b32.xlu0 %v16025_v3, %s12646_s13  ;;  %6839 = vst.msk [vmem:[#allocation11 + $0x100] sm:$0xff] %vm18255_vm9, %v16429_v30  ;;  %vm18259_vm9 = vmmov %vm18256_vm7 }
 0x853   : > { %7524 = vst.msk [vmem:[#allocation11 + $0x8] sm:$0xff] %vm17785_vm3, %v7423_v0  ;;  %v6635_v16 = vsel %vm16424_vm0, %v16431_v21, 0.0  ;;  %vm18257_vm3 = vcmask 195680  }
 0x854   : > { %7784 = vrot.lane.b32.xlu1 %v16047_v51, %s12644_s21  ;;  %7044 = vst.msk [vmem:[#allocation12 + $0x100] sm:$0xff] %vm18256_vm7, %v6635_v16  ;;  %v7592_v18 = vpop.permute.xlu0 %7591  ;;  %v6004_v51 = vadd.s32 104, %v18219_v63  ;;  %v7328_v16 = vld [vmem:[#allocation10 + $0x71] sm:$0xff] }
 0x855   : > { %7694 = vst.msk [vmem:[#allocation11] sm:$0xff] %vm7693_vm1, %v7592_v18  ;;  %v16448_v5 = vld [vmem:[#allocation10 + $0x118] sm:$0xff] }
 0x856   : > { %v7087_v3 = vpop.permute.xlu1 %7086  ;;  %7782 = vrot.lane.b32.xlu0 %v18258_v42, %s12644_s21  ;;  %v16456_v14 = vld [vmem:[#allocation10 + $0x117] sm:$0xff]  ;;  %6840 = vst.msk [vmem:[#allocation11 + $0x108] sm:$0xff] %vm18259_vm9, %v16448_v5  ;;  %v6120_v18 = vand.u32 15, %v6004_v51  ;;  %vm18261_vm9 = vcmask 392192  }
 0x857   : > { %7185 = vst.msk [vmem:[#allocation12 + $0x18] sm:$0xff] %vm18257_vm3, %v7087_v3 }
 0x858   : > { %7920 = vrot.lane.b32.xlu1 %v16045_v41, %s12647_s29  ;;  %7045 = vst.msk [vmem:[#allocation12 + $0x108] sm:$0xff] %vm18256_vm7, %v16456_v14  ;;  %v6880_v0 = vpop.permute.xlu0 %6879  ;;  %vm18262_vm7 = vmmov %vm18257_vm3 }
 0x859   : > { %6980 = vst.msk [vmem:[#allocation11 + $0x10] sm:$0xff] %vm18257_vm3, %v6880_v0  ;;  %v7363_v0 = vsel %vm16379_vm6, %v7329_v57, 0.0  ;;  %vm16477_vm3 = vcmp.ne.s32.totalorder %v6120_v18, 15  ;;  %vm18265_vm6 = vmmov %vm18262_vm7 }
 0x85a   : > { %v7594_v37 = vpop.permute.xlu1 %7593  ;;  %7611 = vrot.lane.b32.xlu0 %v7328_v16, %s12647_s29  ;;  %v6786_v23 = vsel %vm16477_vm3, %v7329_v57, 0.0 }
 0x85b   : > { %7695 = vst.msk [vmem:[#allocation11 + $0x8] sm:$0xff] %vm7693_vm1, %v7594_v37 }
 0x85c   : > { %7106 = vrot.lane.b32.xlu1 %v16045_v41, %s12646_s13  ;;  %v7425_v3 = vpop.permute.xlu0 %7424  ;;  %v8072_v42 = vld [vmem:[#allocation11] sm:$0xff] }
 0x85d   : > { %7525 = vst.msk [vmem:[#allocation11 + $0x10] sm:$0xff] %vm18260_vm8, %v7425_v3  ;;  %10856 = vmatprep.mubr.msk.f32.mxu1 %vm18261_vm9, %v8072_v42  ;;  %v18269_v42 = vsel %vm16019_vm10, %v16066_v1, 0.0 }
 0x85e   : > { %v6882_v38 = vpop.permute.xlu1 %6881  ;;  %6899 = vrot.lane.b32.xlu0 %v7328_v16, %s12646_s13 }
 0x85f   : > { %6981 = vst.msk [vmem:[#allocation11 + $0x18] sm:$0xff] %vm18262_vm7, %v6882_v38  ;;  %vm18266_vm7 = vmmov %vm18260_vm8 }
 0x860   : > { %7613 = vrot.lane.b32.xlu1 %v7363_v0, %s12647_s29  ;;  %v7903_v51 = vpop.permute.xlu0 %7902  ;;  %vm18270_vm10 = vmmov %vm18266_vm7 }
 0x862   : > { %v7427_v37 = vpop.permute.xlu1 %7426  ;;  %v8073_v35 = vld [vmem:[#allocation11 + $0x8] sm:$0xff]  ;;  %7444 = vrot.lane.b32.xlu0 %v16064_v12, %s12644_s21 }
 0x863   : > { %7526 = vst.msk [vmem:[#allocation11 + $0x18] sm:$0xff] %vm18260_vm8, %v7427_v37  ;;  %10857 = vmatmul.mubr.msk.f32.vlgmr.msra.gmra.mrb[104].mxu1 %vm18261_vm9, %v8073_v35  ;;  %vm18267_vm8 = vmmov %vm18266_vm7 }
 0x864   : > { %6901 = vrot.lane.b32.xlu1 %v6786_v23, %s12646_s13  ;;  %v7089_v38 = vpop.permute.xlu0 %7088  ;;  %vm18268_vm9 = vmmov %vm18265_vm6 }
 0x865   : > { %7186 = vst.msk [vmem:[#allocation12 + $0x20] sm:$0xff] %vm18265_vm6, %v7089_v38 }
 0x866   : > { %v7769_v16 = vpop.permute.xlu1 %7768  ;;  %7922 = vrot.lane.b32.xlu0 %v16064_v12, %s12647_s29 }
 0x867   : > { %7867 = vst.msk [vmem:[#allocation12 + $0x18] sm:$0xff] %vm18266_vm7, %v7769_v16  ;;  %vm18271_vm7 = vcmask 392192   ;;  %v7365_v16 = vsel %vm16477_vm3, %v7331_v26, 0.0 }
 0x868   : > { %7446 = vrot.lane.b32.xlu1 %v16086_v54, %s12644_s21  ;;  %v7767_v35 = vpop.permute.xlu0 %7766 }
 0x869   : > { %7866 = vst.msk [vmem:[#allocation12 + $0x10] sm:$0xff] %vm18267_vm8, %v7767_v35  ;;  %vm18272_vm8 = vmmov %vm18265_vm6 }
 0x86a   : > { %v7905_v18 = vpop.permute.xlu1 %7904  ;;  %8002 = vst.msk [vmem:[#allocation12 + $0x10] sm:$0xff] %vm7693_vm1, %v7903_v51  ;;  %7108 = vrot.lane.b32.xlu0 %v16064_v12, %s12646_s13  ;;  %v6006_v12 = vadd.s32 120, %v18219_v63  ;;  %v7330_v51 = vld [vmem:[#allocation10 + $0x81] sm:$0xff]  ;;  %vm18277_vm3 = vmmov %vm18272_vm8 }
 0x86b   : > { %8003 = vst.msk [vmem:[#allocation12 + $0x18] sm:$0xff] %vm7693_vm1, %v7905_v18 }
 0x86c   : > { %7788 = vrot.lane.b32.xlu1 %v16088_v45, %s12644_s21  ;;  %v7596_v57 = vpop.permute.xlu0 %7595  ;;  %v6134_v1 = vand.u32 15, %v6006_v12 }
 0x86d   : > { %7696 = vst.msk [vmem:[#allocation11 + $0x10] sm:$0xff] %vm7693_vm1, %v7596_v57 }
 0x86e   : > { %v7091_v3 = vpop.permute.xlu1 %7090  ;;  %7786 = vrot.lane.b32.xlu0 %v18269_v42, %s12644_s21 }
 0x86f   : > { %7187 = vst.msk [vmem:[#allocation12 + $0x28] sm:$0xff] %vm18268_vm9, %v7091_v3  ;;  %vm16523_vm9 = vcmp.ne.s32.totalorder %v6134_v1, 15 }
 0x870   : > { %7924 = vrot.lane.b32.xlu1 %v16086_v54, %s12647_s29  ;;  %v6884_v0 = vpop.permute.xlu0 %6883  ;;  %v6788_v41 = vsel %vm16523_vm9, %v7331_v26, 0.0  ;;  %v18281_v26 = vsel %vm16058_vm11, %v16106_v61, 0.0 }
 0x871   : > { %6982 = vst.msk [vmem:[#allocation11 + $0x20] sm:$0xff] %vm18265_vm6, %v6884_v0  ;;  %vm18275_vm6 = vmmov %vm18270_vm10 }
 0x872   : > { %v7598_v45 = vpop.permute.xlu1 %7597  ;;  %7615 = vrot.lane.b32.xlu0 %v7330_v51, %s12647_s29 }
 0x873   : > { %7697 = vst.msk [vmem:[#allocation11 + $0x18] sm:$0xff] %vm7693_vm1, %v7598_v45 }
 0x874   : > { %7110 = vrot.lane.b32.xlu1 %v16086_v54, %s12646_s13  ;;  %v7429_v37 = vpop.permute.xlu0 %7428  ;;  %v8074_v23 = vld [vmem:[#allocation11 + $0x10] sm:$0xff] }
 0x875   : > { %7527 = vst.msk [vmem:[#allocation11 + $0x20] sm:$0xff] %vm18270_vm10, %v7429_v37  ;;  %10859 = vmatprep.mubr.msk.f32.mxu1 %vm18271_vm7, %v8074_v23  ;;  %vm18276_vm10 = vmmov %vm18271_vm7  ;;  %v7332_v37 = vld [vmem:[#allocation10 + $0x91] sm:$0xff] }
 0x876   : > { %v6886_v38 = vpop.permute.xlu1 %6885  ;;  %6903 = vrot.lane.b32.xlu0 %v7330_v51, %s12646_s13  ;;  %vm18278_vm7 = vmmov %vm18275_vm6 }
 0x877   : > { %6983 = vst.msk [vmem:[#allocation11 + $0x28] sm:$0xff] %vm18272_vm8, %v6886_v38  ;;  %vm18279_vm8 = vmmov %vm18275_vm6 }
 0x878   : > { %7617 = vrot.lane.b32.xlu1 %v7365_v16, %s12647_s29  ;;  %v7907_v35 = vpop.permute.xlu0 %7906  ;;  %vm18283_vm11 = vmmov %vm18278_vm7 }
 0x87a   : > { %v7431_v18 = vpop.permute.xlu1 %7430  ;;  %v8075_v57 = vld [vmem:[#allocation11 + $0x18] sm:$0xff]  ;;  %7448 = vrot.lane.b32.xlu0 %v16104_v25, %s12644_s21 }
 0x87b   : > { %7528 = vst.msk [vmem:[#allocation11 + $0x28] sm:$0xff] %vm18275_vm6, %v7431_v18  ;;  %10860 = vmatmul.mubr.msk.f32.gmra.mrb[106].mxu1 %vm18276_vm10, %v8075_v57  ;;  %vm18280_vm6 = vmmov %vm18277_vm3 }
 0x87c   : > { %6905 = vrot.lane.b32.xlu1 %v6788_v41, %s12646_s13  ;;  %v7093_v3 = vpop.permute.xlu0 %7092  ;;  %vm18282_vm10 = vmmov %vm18277_vm3 }
 0x87d   : > { %7188 = vst.msk [vmem:[#allocation12 + $0x30] sm:$0xff] %vm18277_vm3, %v7093_v3  ;;  %vm18284_vm3 = vcmask 392192  }
 0x87e   : > { %v7773_v42 = vpop.permute.xlu1 %7772  ;;  %7926 = vrot.lane.b32.xlu0 %v16104_v25, %s12647_s29 }
 0x87f   : > { %7869 = vst.msk [vmem:[#allocation12 + $0x28] sm:$0xff] %vm18278_vm7, %v7773_v42  ;;  %vm18285_vm7 = vmmov %vm18280_vm6 }
 0x880   : > { %7450 = vrot.lane.b32.xlu1 %v16123_v29, %s12644_s21  ;;  %v7771_v12 = vpop.permute.xlu0 %7770 }
 0x881   : > { %7868 = vst.msk [vmem:[#allocation12 + $0x20] sm:$0xff] %vm18279_vm8, %v7771_v12 }
 0x882   : > { %v7909_v0 = vpop.permute.xlu1 %7908  ;;  %8004 = vst.msk [vmem:[#allocation12 + $0x20] sm:$0xff] %vm7693_vm1, %v7907_v35  ;;  %7112 = vrot.lane.b32.xlu0 %v16104_v25, %s12646_s13  ;;  %v6008_v25 = vadd.s32 136, %v18219_v63  ;;  %v7367_v35 = vsel %vm16523_vm9, %v7333_v47, 0.0  ;;  %vm18290_vm9 = vmmov %vm18285_vm7 }
 0x883   : > { %8005 = vst.msk [vmem:[#allocation12 + $0x28] sm:$0xff] %vm7693_vm1, %v7909_v0 }
 0x884   : > { %7792 = vrot.lane.b32.xlu1 %v16125_v28, %s12644_s21  ;;  %v7600_v45 = vpop.permute.xlu0 %7599  ;;  %v6148_v61 = vand.u32 15, %v6008_v25 }
 0x885   : > { %7698 = vst.msk [vmem:[#allocation11 + $0x20] sm:$0xff] %vm7693_vm1, %v7600_v45 }
 0x886   : > { %v7095_v51 = vpop.permute.xlu1 %7094  ;;  %7790 = vrot.lane.b32.xlu0 %v18281_v26, %s12644_s21  ;;  %vm16569_vm8 = vcmp.ne.s32.totalorder %v6148_v61, 15  ;;  %v18293_v26 = vsel %vm16098_vm12, %v16148_v40, 0.0 }
 0x887   : > { %7189 = vst.msk [vmem:[#allocation12 + $0x38] sm:$0xff] %vm18280_vm6, %v7095_v51  ;;  %vm18288_vm6 = vmmov %vm18283_vm11  ;;  %v6790_v54 = vsel %vm16569_vm8, %v7333_v47, 0.0  ;;  %v7369_v61 = vsel %vm16569_vm8, %v7335_v62, 0.0 }
 0x888   : > { %7928 = vrot.lane.b32.xlu1 %v16123_v29, %s12647_s29  ;;  %v6888_v1 = vpop.permute.xlu0 %6887 }
 0x889   : > { %6984 = vst.msk [vmem:[#allocation11 + $0x30] sm:$0xff] %vm18282_vm10, %v6888_v1  ;;  %vm18289_vm10 = vmmov %vm18284_vm3  ;;  %v7334_v1 = vld [vmem:[#allocation10 + $0xa1] sm:$0xff] }
 0x88a   : > { %v7602_v28 = vpop.permute.xlu1 %7601  ;;  %7619 = vrot.lane.b32.xlu0 %v7332_v37, %s12647_s29 }
 0x88b   : > { %7699 = vst.msk [vmem:[#allocation11 + $0x28] sm:$0xff] %vm7693_vm1, %v7602_v28 }
 0x88c   : > { %7114 = vrot.lane.b32.xlu1 %v16123_v29, %s12646_s13  ;;  %v7433_v23 = vpop.permute.xlu0 %7432  ;;  %v8076_v38 = vld [vmem:[#allocation11 + $0x20] sm:$0xff] }
 0x88d   : > { %7529 = vst.msk [vmem:[#allocation11 + $0x30] sm:$0xff] %vm18283_vm11, %v7433_v23  ;;  %10862 = vmatprep.mubr.msk.f32.mxu1 %vm18284_vm3, %v8076_v38  ;;  %vm18291_vm11 = vmmov %vm18288_vm6 }
 0x88e   : > { %v6890_v16 = vpop.permute.xlu1 %6889  ;;  %6907 = vrot.lane.b32.xlu0 %v7332_v37, %s12646_s13  ;;  %vm18292_vm3 = vmmov %vm18288_vm6 }
 0x88f   : > { %6985 = vst.msk [vmem:[#allocation11 + $0x38] sm:$0xff] %vm18285_vm7, %v6890_v16  ;;  %vm18295_vm12 = vmmov %vm18292_vm3 }
 0x890   : > { %7621 = vrot.lane.b32.xlu1 %v7367_v35, %s12647_s29  ;;  %v7911_v18 = vpop.permute.xlu0 %7910 }
 0x892   : > { %v7435_v57 = vpop.permute.xlu1 %7434  ;;  %v8077_v41 = vld [vmem:[#allocation11 + $0x28] sm:$0xff]  ;;  %7452 = vrot.lane.b32.xlu0 %v16146_v15, %s12644_s21 }
 0x893   : > { %7530 = vst.msk [vmem:[#allocation11 + $0x38] sm:$0xff] %vm18288_vm6, %v7435_v57  ;;  %10863 = vmatmul.mubr.msk.f32.gmra.mrb[108].mxu1 %vm18289_vm10, %v8077_v41  ;;  %vm18294_vm6 = vmmov %vm18285_vm7 }
 0x894   : > { %6909 = vrot.lane.b32.xlu1 %v6790_v54, %s12646_s13  ;;  %v7097_v3 = vpop.permute.xlu0 %7096  ;;  %vm18300_vm8 = vmmov %vm18294_vm6 }
 0x895   : > { %7190 = vst.msk [vmem:[#allocation12 + $0x40] sm:$0xff] %vm18290_vm9, %v7097_v3  ;;  %vm18296_vm9 = vmmov %vm18294_vm6 }
 0x896   : > { %v7777_v42 = vpop.permute.xlu1 %7776  ;;  %7930 = vrot.lane.b32.xlu0 %v16146_v15, %s12647_s29 }
 0x897   : > { %7871 = vst.msk [vmem:[#allocation12 + $0x38] sm:$0xff] %vm18291_vm11, %v7777_v42  ;;  %v18304_v42 = vsel %vm16140_vm14, %v16187_v6, 0.0  ;;  %vm18306_vm14 = vmmov %vm18292_vm3 }
 0x898   : > { %7454 = vrot.lane.b32.xlu1 %v16166_v34, %s12644_s21  ;;  %v7775_v12 = vpop.permute.xlu0 %7774 }
 0x899   : > { %7870 = vst.msk [vmem:[#allocation12 + $0x30] sm:$0xff] %vm18292_vm3, %v7775_v12 }
 0x89a   : > { %v7913_v0 = vpop.permute.xlu1 %7912  ;;  %8006 = vst.msk [vmem:[#allocation12 + $0x30] sm:$0xff] %vm7693_vm1, %v7911_v18  ;;  %7116 = vrot.lane.b32.xlu0 %v16146_v15, %s12646_s13  ;;  %v6010_v15 = vadd.s32 152, %v18219_v63 }
 0x89b   : > { %8007 = vst.msk [vmem:[#allocation12 + $0x38] sm:$0xff] %vm7693_vm1, %v7913_v0  ;;  %v7336_v0 = vld [vmem:[#allocation10 + $0xb1] sm:$0xff] }
 0x89c   : > { %7796 = vrot.lane.b32.xlu1 %v16168_v59, %s12644_s21  ;;  %v7604_v45 = vpop.permute.xlu0 %7603  ;;  %v6162_v40 = vand.u32 15, %v6010_v15 }
 0x89d   : > { %7700 = vst.msk [vmem:[#allocation11 + $0x30] sm:$0xff] %vm7693_vm1, %v7604_v45 }
 0x89e   : > { %v7099_v51 = vpop.permute.xlu1 %7098  ;;  %7794 = vrot.lane.b32.xlu0 %v18293_v26, %s12644_s21  ;;  %vm16615_vm11 = vcmp.ne.s32.totalorder %v6162_v40, 15 }
 0x89f   : > { %7191 = vst.msk [vmem:[#allocation12 + $0x48] sm:$0xff] %vm18285_vm7, %v7099_v51  ;;  %vm18299_vm7 = vmmov %vm18289_vm10  ;;  %v6792_v35 = vsel %vm16615_vm11, %v7335_v62, 0.0  ;;  %v7371_v15 = vsel %vm16615_vm11, %v7337_v4, 0.0 }
 0x8a0   : > { %7932 = vrot.lane.b32.xlu1 %v16166_v34, %s12647_s29  ;;  %v6892_v25 = vpop.permute.xlu0 %6891 }
 0x8a1   : > { %6986 = vst.msk [vmem:[#allocation11 + $0x40] sm:$0xff] %vm18294_vm6, %v6892_v25  ;;  %vm18301_vm6 = vmmov %vm18292_vm3 }
 0x8a2   : > { %v7606_v59 = vpop.permute.xlu1 %7605  ;;  %7623 = vrot.lane.b32.xlu0 %v7334_v1, %s12647_s29 }
 0x8a3   : > { %7701 = vst.msk [vmem:[#allocation11 + $0x38] sm:$0xff] %vm7693_vm1, %v7606_v59 }
 0x8a4   : > { %7118 = vrot.lane.b32.xlu1 %v16166_v34, %s12646_s13  ;;  %v7437_v28 = vpop.permute.xlu0 %7436  ;;  %v8078_v37 = vld [vmem:[#allocation11 + $0x30] sm:$0xff] }
 0x8a5   : > { %7531 = vst.msk [vmem:[#allocation11 + $0x40] sm:$0xff] %vm18295_vm12, %v7437_v28  ;;  %10865 = vmatprep.mubr.msk.f32.mxu1 %vm18289_vm10, %v8078_v37  ;;  %vm18302_vm12 = vmmov %vm18292_vm3 }
 0x8a6   : > { %v6894_v47 = vpop.permute.xlu1 %6893  ;;  %6911 = vrot.lane.b32.xlu0 %v7334_v1, %s12646_s13  ;;  %vm18303_vm10 = vmmov %vm18300_vm8 }
 0x8a7   : > { %6987 = vst.msk [vmem:[#allocation11 + $0x48] sm:$0xff] %vm18296_vm9, %v6894_v47  ;;  %vm18305_vm9 = vmmov %vm18300_vm8 }
 0x8a8   : > { %7625 = vrot.lane.b32.xlu1 %v7369_v61, %s12647_s29  ;;  %v7915_v23 = vpop.permute.xlu0 %7914 }
 0x8aa   : > { %v7439_v38 = vpop.permute.xlu1 %7438  ;;  %v8079_v16 = vld [vmem:[#allocation11 + $0x38] sm:$0xff]  ;;  %7456 = vrot.lane.b32.xlu0 %v16185_v31, %s12644_s21 }
 0x8ab   : > { %7532 = vst.msk [vmem:[#allocation11 + $0x48] sm:$0xff] %vm18292_vm3, %v7439_v38  ;;  %10866 = vmatmul.mubr.msk.f32.gmra.mrb[110].mxu1 %vm18299_vm7, %v8079_v16  ;;  %vm18307_vm3 = vmmov %vm18299_vm7  ;;  %v7338_v16 = vld [vmem:[#allocation10 + $0xc1] sm:$0xff] }
 0x8ac   : > { %6913 = vrot.lane.b32.xlu1 %v6792_v35, %s12646_s13  ;;  %v7101_v29 = vpop.permute.xlu0 %7100  ;;  %vm18308_vm7 = vmmov %vm18300_vm8 }
 0x8ad   : > { %7192 = vst.msk [vmem:[#allocation12 + $0x50] sm:$0xff] %vm18300_vm8, %v7101_v29  ;;  %vm18312_vm11 = vmmov %vm18308_vm7 }
 0x8ae   : > { %v7781_v18 = vpop.permute.xlu1 %7780  ;;  %7934 = vrot.lane.b32.xlu0 %v16185_v31, %s12647_s29 }
 0x8af   : > { %7873 = vst.msk [vmem:[#allocation12 + $0x48] sm:$0xff] %vm18301_vm6, %v7781_v18 }
 0x8b0   : > { %7458 = vrot.lane.b32.xlu1 %v16207_v43, %s12644_s21  ;;  %v7779_v57 = vpop.permute.xlu0 %7778 }
 0x8b1   : > { %7872 = vst.msk [vmem:[#allocation12 + $0x40] sm:$0xff] %vm18302_vm12, %v7779_v57  ;;  %vm18311_vm12 = vmmov %vm18307_vm3 }
 0x8b2   : > { %v7917_v41 = vpop.permute.xlu1 %7916  ;;  %8008 = vst.msk [vmem:[#allocation12 + $0x40] sm:$0xff] %vm7693_vm1, %v7915_v23  ;;  %7120 = vrot.lane.b32.xlu0 %v16185_v31, %s12646_s13  ;;  %v6012_v31 = vadd.s32 168, %v18219_v63  ;;  %v18316_v23 = vsel %vm16179_vm15, %v16228_v36, 0.0  ;;  %vm18318_vm15 = vmmov %vm18301_vm6 }
 0x8b3   : > { %8009 = vst.msk [vmem:[#allocation12 + $0x48] sm:$0xff] %vm7693_vm1, %v7917_v41  ;;  %v10092_v41 = vld [vmem:[%s17539_s5 + $0x68] sm:$0xff] }
 0x8b4   : > { %7800 = vrot.lane.b32.xlu1 %v16209_v22, %s12644_s21  ;;  %v7608_v54 = vpop.permute.xlu0 %7607  ;;  %v6176_v6 = vand.u32 15, %v6012_v31 }
 0x8b5   : > { %7702 = vst.msk [vmem:[#allocation11 + $0x40] sm:$0xff] %vm7693_vm1, %v7608_v54 }
 0x8b6   : > { %v7103_v3 = vpop.permute.xlu1 %7102  ;;  %7798 = vrot.lane.b32.xlu0 %v18304_v42, %s12644_s21  ;;  %vm16661_vm8 = vcmp.ne.s32.totalorder %v6176_v6, 15  ;;  %v18327_v6 = vsel %vm16220_vm2, %v16269_v20, 0.0  ;;  %v7341_v20 = vld [vmem:[#allocation10 + $0xd9] sm:$0xff] }
 0x8b7   : > { %7193 = vst.msk [vmem:[#allocation12 + $0x58] sm:$0xff] %vm18303_vm10, %v7103_v3  ;;  %v6794_v62 = vsel %vm16661_vm8, %v7337_v4, 0.0  ;;  %vm18313_vm10 = vmmov %vm18301_vm6  ;;  %v7373_v57 = vsel %vm16661_vm8, %v7339_v32, 0.0 }
 0x8b8   : > { %7936 = vrot.lane.b32.xlu1 %v16207_v43, %s12647_s29  ;;  %v6896_v12 = vpop.permute.xlu0 %6895 }
 0x8b9   : > { %6988 = vst.msk [vmem:[#allocation11 + $0x50] sm:$0xff] %vm18305_vm9, %v6896_v12  ;;  %vm18314_vm9 = vmmov %vm18301_vm6 }
 0x8ba   : > { %v7610_v22 = vpop.permute.xlu1 %7609  ;;  %7627 = vrot.lane.b32.xlu0 %v7336_v0, %s12647_s29  ;;  %vm18323_vm8 = vmmov %vm18314_vm9 }
 0x8bb   : > { %7703 = vst.msk [vmem:[#allocation11 + $0x48] sm:$0xff] %vm7693_vm1, %v7610_v22 }
 0x8bc   : > { %7122 = vrot.lane.b32.xlu1 %v16207_v43, %s12646_s13  ;;  %v7441_v45 = vpop.permute.xlu0 %7440  ;;  %v8080_v51 = vld [vmem:[#allocation11 + $0x40] sm:$0xff] }
 0x8bd   : > { %7533 = vst.msk [vmem:[#allocation11 + $0x50] sm:$0xff] %vm18306_vm14, %v7441_v45  ;;  %10868 = vmatprep.mubr.msk.f32.mxu1 %vm18307_vm3, %v8080_v51  ;;  %vm18315_vm14 = vmmov %vm18308_vm7  ;;  %v6016_v45 = vadd.s32 200, %v18219_v63 }
 0x8be   : > { %v6898_v26 = vpop.permute.xlu1 %6897  ;;  %6915 = vrot.lane.b32.xlu0 %v7336_v0, %s12646_s13  ;;  %vm18317_vm3 = vmmov %vm18308_vm7 }
 0x8bf   : > { %6989 = vst.msk [vmem:[#allocation11 + $0x58] sm:$0xff] %vm18308_vm7, %v6898_v26  ;;  %vm18319_vm7 = vmmov %vm18311_vm12  ;;  %v6204_v43 = vand.u32 15, %v6016_v45 }
 0x8c0   : > { %7629 = vrot.lane.b32.xlu1 %v7371_v15, %s12647_s29  ;;  %v7919_v25 = vpop.permute.xlu0 %7918  ;;  %v7340_v15 = vld [vmem:[#allocation10 + $0xd1] sm:$0xff]  ;;  %vm18329_vm2 = vmmov %vm18317_vm3 }
 0x8c2   : > { %v7443_v59 = vpop.permute.xlu1 %7442  ;;  %v8081_v1 = vld [vmem:[#allocation11 + $0x48] sm:$0xff]  ;;  %7460 = vrot.lane.b32.xlu0 %v16226_v17, %s12644_s21 }
 0x8c3   : > { %7534 = vst.msk [vmem:[#allocation11 + $0x58] sm:$0xff] %vm18301_vm6, %v7443_v59  ;;  %10869 = vmatmul.mubr.msk.f32.gmra.mrb[112].mxu1 %vm18311_vm12, %v8081_v1  ;;  %vm18320_vm6 = vmmov %vm18317_vm3 }
 0x8c4   : > { %6917 = vrot.lane.b32.xlu1 %v6794_v62, %s12646_s13  ;;  %v7105_v40 = vpop.permute.xlu0 %7104 }
 0x8c5   : > { %7194 = vst.msk [vmem:[#allocation12 + $0x60] sm:$0xff] %vm18312_vm11, %v7105_v40  ;;  %vm18324_vm11 = vmmov %vm18319_vm7  ;;  %v6501_v40 = vld [vmem:[#allocation10 + $0xf] sm:$0xff] }
 0x8c6   : > { %v7785_v28 = vpop.permute.xlu1 %7784  ;;  %7938 = vrot.lane.b32.xlu0 %v16226_v17, %s12647_s29 }
 0x8c7   : > { %7875 = vst.msk [vmem:[#allocation12 + $0x58] sm:$0xff] %vm18313_vm10, %v7785_v28  ;;  %vm18325_vm10 = vmmov %vm18317_vm3 }
 0x8c8   : > { %7462 = vrot.lane.b32.xlu1 %v16244_v60, %s12644_s21  ;;  %v7783_v37 = vpop.permute.xlu0 %7782 }
 0x8c9   : > { %7874 = vst.msk [vmem:[#allocation12 + $0x50] sm:$0xff] %vm18314_vm9, %v7783_v37  ;;  %vm18326_vm9 = vmmov %vm18323_vm8 }
 0x8ca   : > { %v7921_v47 = vpop.permute.xlu1 %7920  ;;  %8010 = vst.msk [vmem:[#allocation12 + $0x50] sm:$0xff] %vm7693_vm1, %v7919_v25  ;;  %7124 = vrot.lane.b32.xlu0 %v16226_v17, %s12646_s13  ;;  %v6014_v17 = vadd.s32 184, %v18219_v63 }
 0x8cb   : > { %8011 = vst.msk [vmem:[#allocation12 + $0x58] sm:$0xff] %vm7693_vm1, %v7921_v47 }
 0x8cc   : > { %7804 = vrot.lane.b32.xlu1 %v16246_v49, %s12644_s21  ;;  %v7612_v61 = vpop.permute.xlu0 %7611  ;;  %v6190_v36 = vand.u32 15, %v6014_v17  ;;  %v10094_v17 = vld [vmem:[%s17539_s5 + $0x78] sm:$0xff] }
 0x8cd   : > { %7704 = vst.msk [vmem:[#allocation11 + $0x50] sm:$0xff] %vm7693_vm1, %v7612_v61 }
 0x8ce   : > { %v7107_v34 = vpop.permute.xlu1 %7106  ;;  %7802 = vrot.lane.b32.xlu0 %v18316_v23, %s12644_s21  ;;  %vm16713_vm12 = vcmp.ne.s32.totalorder %v6190_v36, 15  ;;  %v10093_v23 = vld [vmem:[%s17539_s5 + $0x70] sm:$0xff] }
 0x8cf   : > { %7195 = vst.msk [vmem:[#allocation12 + $0x68] sm:$0xff] %vm18315_vm14, %v7107_v34  ;;  %v6796_v22 = vsel %vm16713_vm12, %v7339_v32, 0.0  ;;  %vm18328_vm14 = vmmov %vm18323_vm8  ;;  %v7375_v1 = vsel %vm16713_vm12, %v7341_v20, 0.0  ;;  %v6018_v34 = vadd.s32 216, %v18219_v63  ;;  %v7342_v36 = vld [vmem:[#allocation10 + $0xe1] sm:$0xff] }
 0x8d0   : > { %7940 = vrot.lane.b32.xlu1 %v16244_v60, %s12647_s29  ;;  %v6900_v38 = vpop.permute.xlu0 %6899  ;;  %vm18336_vm12 = vmmov %vm18323_vm8 }
 0x8d1   : > { %6990 = vst.msk [vmem:[#allocation11 + $0x60] sm:$0xff] %vm18317_vm3, %v6900_v38  ;;  %vm16746_vm3 = vcmp.ne.s32.totalorder %v6029_v33, 0 }
 0x8d2   : > { %v7614_v49 = vpop.permute.xlu1 %7613  ;;  %7631 = vrot.lane.b32.xlu0 %v7338_v16, %s12647_s29  ;;  %v6603_v28 = vsel %vm16746_vm3, %v6501_v40, 0.0 }
 0x8d3   : > { %7705 = vst.msk [vmem:[#allocation11 + $0x58] sm:$0xff] %vm7693_vm1, %v7614_v49 }
 0x8d4   : > { %7126 = vrot.lane.b32.xlu1 %v16244_v60, %s12646_s13  ;;  %v7445_v35 = vpop.permute.xlu0 %7444  ;;  %v8082_v29 = vld [vmem:[#allocation11 + $0x50] sm:$0xff] }
 0x8d5   : > { %7535 = vst.msk [vmem:[#allocation11 + $0x60] sm:$0xff] %vm18318_vm15, %v7445_v35  ;;  %10871 = vmatprep.mubr.msk.f32.mxu1 %vm18319_vm7, %v8082_v29  ;;  %v10091_v60 = vld [vmem:[%s17539_s5 + $0x60] sm:$0xff]  ;;  %vm16751_vm15 = vcmp.ne.s32.totalorder %v6204_v43, 15  ;;  %vm18334_vm7 = vcmask 97280   ;;  %v6218_v29 = vand.u32 15, %v6018_v34 }
 0x8d6   : > { %v6902_v18 = vpop.permute.xlu1 %6901  ;;  %6919 = vrot.lane.b32.xlu0 %v7338_v16, %s12646_s13  ;;  %v11720_v3 = vpack.c.bf16 %v10092_v41, %v10091_v60  ;;  %7012 = vst.msk [vmem:[#allocation12] sm:$0xff] %vm18334_vm7, %v6603_v28  ;;  %v6798_v61 = vsel %vm16751_vm15, %v7341_v20, 0.0  ;;  %v11724_v16 = vpack.c.bf16 %v10094_v17, %v10093_v23  ;;  %v7343_v35 = vld [vmem:[#allocation10 + $0xe9] sm:$0xff] }
 0x8d7   : > { %6991 = vst.msk [vmem:[#allocation11 + $0x68] sm:$0xff] %vm18320_vm6, %v6902_v18  ;;  %vm18335_vm6 = vmmov %vm18329_vm2  ;;  %v7377_v41 = vsel %vm16751_vm15, %v7343_v35, 0.0  ;;  %v7347_v34 = vld [vmem:[#allocation10 + $0x109] sm:$0xff] }
 0x8d8   : > { %7633 = vrot.lane.b32.xlu1 %v7373_v57, %s12647_s29  ;;  %v7923_v42 = vpop.permute.xlu0 %7922  ;;  %11721 = vmatprep.subr.bf16.mxu1 %v11720_v3 }
 0x8d9   : > { %11723 = vmatpush3.bf16.msra.mxu1 %v11720_v3 }
 0x8da   : > { %v7447_v31 = vpop.permute.xlu1 %7446  ;;  %v8083_v12 = vld [vmem:[#allocation11 + $0x58] sm:$0xff]  ;;  %7464 = vrot.lane.b32.xlu0 %v16267_v53, %s12644_s21  ;;  %11725 = vmatprep.subr.bf16.mxu1 %v11724_v16 }
 0x8db   : > { %7536 = vst.msk [vmem:[#allocation11 + $0x68] sm:$0xff] %vm18323_vm8, %v7447_v31  ;;  %10872 = vmatmul.mubr.msk.f32.gmra.mrb[114].mxu1 %vm18324_vm11, %v8083_v12  ;;  %vm18337_vm8 = vmmov %vm18324_vm11  ;;  %v6020_v12 = vadd.s32 232, %v18219_v63 }
 0x8dc   : > { %6921 = vrot.lane.b32.xlu1 %v6796_v22, %s12646_s13  ;;  %v7109_v0 = vpop.permute.xlu0 %7108  ;;  %vm18338_vm11 = vmmov %vm18329_vm2 }
 0x8dd   : > { %7196 = vst.msk [vmem:[#allocation12 + $0x70] sm:$0xff] %vm18325_vm10, %v7109_v0  ;;  %11727 = vmatpush3.bf16.msra.mxu1 %v11724_v16  ;;  %vm18339_vm10 = vmmov %vm18326_vm9  ;;  %v6232_v45 = vand.u32 15, %v6020_v12  ;;  %v10130_v12 = vld [vmem:[%s17539_s5 + $0x98] sm:$0xff] }
 0x8de   : > { %v7789_v4 = vpop.permute.xlu1 %7788  ;;  %7806 = vrot.lane.b32.xlu0 %v18327_v6, %s12644_s21  ;;  %vm18343_vm7 = vmmov %vm18339_vm10  ;;  %v7345_v6 = vld [vmem:[#allocation10 + $0xf9] sm:$0xff] }
 0x8df   : > { %7877 = vst.msk [vmem:[#allocation12 + $0x68] sm:$0xff] %vm18326_vm9, %v7789_v4  ;;  %vm18340_vm9 = vmmov %vm18337_vm8  ;;  %v7344_v4 = vld [vmem:[#allocation10 + $0xf1] sm:$0xff] }
 0x8e0   : > { %7466 = vrot.lane.b32.xlu1 %v16287_v39, %s12644_s21  ;;  %v7787_v51 = vpop.permute.xlu0 %7786  ;;  %vm18344_vm15 = vmmov %vm18343_vm7 }
 0x8e1   : > { %7876 = vst.msk [vmem:[#allocation12 + $0x60] sm:$0xff] %vm18328_vm14, %v7787_v51  ;;  %vm16784_vm14 = vcmp.ne.s32.totalorder %v6218_v29, 15 }
 0x8e2   : > { %v7925_v26 = vpop.permute.xlu1 %7924  ;;  %8012 = vst.msk [vmem:[#allocation12 + $0x60] sm:$0xff] %vm7693_vm1, %v7923_v42  ;;  %7635 = vrot.lane.b32.xlu0 %v7340_v15, %s12647_s29  ;;  %v6800_v31 = vsel %vm16784_vm14, %v7343_v35, 0.0 }
 0x8e3   : > { %8013 = vst.msk [vmem:[#allocation12 + $0x68] sm:$0xff] %vm7693_vm1, %v7925_v26 }
 0x8e4   : > { %7808 = vrot.lane.b32.xlu1 %v16289_v2, %s12644_s21  ;;  %v7616_v25 = vpop.permute.xlu0 %7615  ;;  %v6022_v2 = vadd.s32 248, %v18219_v63 }
 0x8e5   : > { %7706 = vst.msk [vmem:[#allocation11 + $0x60] sm:$0xff] %vm7693_vm1, %v7616_v25  ;;  %v10095_v25 = vld [vmem:[%s17539_s5 + $0x80] sm:$0xff] }
 0x8e6   : > { %v7111_v59 = vpop.permute.xlu1 %7110  ;;  %6923 = vrot.lane.b32.xlu0 %v7340_v15, %s12646_s13  ;;  %v7379_v15 = vsel %vm16784_vm14, %v7345_v6, 0.0  ;;  %v6246_v23 = vand.u32 15, %v6022_v2  ;;  %vm18352_vm14 = vmmov %vm18343_vm7 }
 0x8e7   : > { %7197 = vst.msk [vmem:[#allocation12 + $0x78] sm:$0xff] %vm18329_vm2, %v7111_v59  ;;  %v10096_v59 = vld [vmem:[%s17539_s5 + $0x88] sm:$0xff] }
 0x8e8   : > { %7637 = vrot.lane.b32.xlu1 %v7375_v1, %s12647_s29  ;;  %v6904_v37 = vpop.permute.xlu0 %6903  ;;  %v11728_v40 = vpack.c.bf16 %v10096_v59, %v10095_v25 }
 0x8e9   : > { %6992 = vst.msk [vmem:[#allocation11 + $0x70] sm:$0xff] %vm18335_vm6, %v6904_v37  ;;  %vm18345_vm6 = vmmov %vm18329_vm2 }
 0x8ea   : > { %v7618_v47 = vpop.permute.xlu1 %7617  ;;  %7468 = vrot.lane.b32.xlu0 %v16306_v11, %s12644_s21  ;;  %11729 = vmatprep.subr.bf16.mxu1 %v11728_v40 }
 0x8eb   : > { %7707 = vst.msk [vmem:[#allocation11 + $0x68] sm:$0xff] %vm7693_vm1, %v7618_v47  ;;  %11731 = vmatpush3.bf16.msra.mxu1 %v11728_v40 }
 0x8ec   : > { %6925 = vrot.lane.b32.xlu1 %v6798_v61, %s12646_s13  ;;  %v7449_v38 = vpop.permute.xlu0 %7448  ;;  %v8084_v49 = vld [vmem:[#allocation11 + $0x60] sm:$0xff] }
 0x8ed   : > { %7537 = vst.msk [vmem:[#allocation11 + $0x70] sm:$0xff] %vm18336_vm12, %v7449_v38  ;;  %10874 = vmatprep.mubr.msk.f32.mxu1 %vm18337_vm8, %v8084_v49  ;;  %vm16808_vm12 = vcmp.ne.s32.totalorder %v6232_v45, 15  ;;  %vm18348_vm8 = vmmov %vm18329_vm2  ;;  %v7346_v61 = vld [vmem:[#allocation10 + $0x101] sm:$0xff] }
 0x8ee   : > { %v6906_v32 = vpop.permute.xlu1 %6905  ;;  %7639 = vrot.lane.b32.xlu0 %v7342_v36, %s12647_s29  ;;  %v6802_v1 = vsel %vm16808_vm12, %v7345_v6, 0.0  ;;  %v7381_v16 = vsel %vm16808_vm12, %v7347_v34, 0.0 }
 0x8ef   : > { %6993 = vst.msk [vmem:[#allocation11 + $0x78] sm:$0xff] %vm18338_vm11, %v6906_v32  ;;  %vm18349_vm11 = vmmov %vm18343_vm7  ;;  %v6502_v32 = vld [vmem:[#allocation10 + $0x17] sm:$0xff] }
 0x8f0   : > { %7470 = vrot.lane.b32.xlu1 %v16325_v24, %s12644_s21  ;;  %v7927_v18 = vpop.permute.xlu0 %7926 }
 0x8f2   : > { %v7451_v57 = vpop.permute.xlu1 %7450  ;;  %v8085_v60 = vld [vmem:[#allocation11 + $0x68] sm:$0xff]  ;;  %6927 = vrot.lane.b32.xlu0 %v7342_v36, %s12646_s13 }
 0x8f3   : > { %7538 = vst.msk [vmem:[#allocation11 + $0x78] sm:$0xff] %vm18339_vm10, %v7451_v57  ;;  %10875 = vmatmul.mubr.msk.f32.gmra.mrb[116].mxu1 %vm18340_vm9, %v8085_v60  ;;  %vm18350_vm10 = vmmov %vm18340_vm9  ;;  %v16850_v60 = vld [vmem:[#allocation10 + $0x111] sm:$0xff] }
 0x8f4   : > { %7641 = vrot.lane.b32.xlu1 %v7377_v41, %s12647_s29  ;;  %v7113_v3 = vpop.permute.xlu0 %7112  ;;  %vm18351_vm9 = vmmov %vm18329_vm2  ;;  %v16858_v41 = vld [vmem:[#allocation10 + $0x119] sm:$0xff] }
 0x8f5   : > { %7198 = vst.msk [vmem:[#allocation12 + $0x80] sm:$0xff] %vm18329_vm2, %v7113_v3  ;;  %vm18353_vm2 = vmmov %vm18350_vm10 }
 0x8f6   : > { %v7793_v42 = vpop.permute.xlu1 %7792  ;;  %7472 = vrot.lane.b32.xlu0 %v16348_v9, %s12644_s21 }
 0x8f7   : > { %7879 = vst.msk [vmem:[#allocation12 + $0x78] sm:$0xff] %vm18343_vm7, %v7793_v42  ;;  %vm16838_vm7 = vcmp.ne.s32.totalorder %v6246_v23, 15  ;;  %v7249_v23 = vld [vmem:[#allocation10 + $0x127] sm:$0xff] }
 0x8f8   : > { %6929 = vrot.lane.b32.xlu1 %v6800_v31, %s12646_s13  ;;  %v7791_v22 = vpop.permute.xlu0 %7790  ;;  %v6804_v29 = vsel %vm16838_vm7, %v7347_v34, 0.0  ;;  %v7383_v42 = vsel %vm16838_vm7, %v16858_v41, 0.0  ;;  %v10129_v31 = vld [vmem:[%s17539_s5 + $0x90] sm:$0xff] }
 0x8f9   : > { %7878 = vst.msk [vmem:[#allocation12 + $0x70] sm:$0xff] %vm18344_vm15, %v7791_v22  ;;  %vm18356_vm15 = vmmov %vm18345_vm6  ;;  %v16874_v22 = vpack.c.bf16 %v10130_v12, %v10129_v31 }
 0x8fa   : > { %v7929_v0 = vpop.permute.xlu1 %7928  ;;  %8014 = vst.msk [vmem:[#allocation12 + $0x70] sm:$0xff] %vm7693_vm1, %v7927_v18  ;;  %7643 = vrot.lane.b32.xlu0 %v7344_v4, %s12647_s29 }
 0x8fb   : > { %8015 = vst.msk [vmem:[#allocation12 + $0x78] sm:$0xff] %vm7693_vm1, %v7929_v0  ;;  %11733 = vmatprep.subr.bf16.mxu1 %v16874_v22 }
 0x8fc   : > { %7474 = vrot.lane.b32.xlu1 %v16366_v48, %s12644_s21  ;;  %v7620_v51 = vpop.permute.xlu0 %7619 }
 0x8fd   : > { %7708 = vst.msk [vmem:[#allocation11 + $0x70] sm:$0xff] %vm7693_vm1, %v7620_v51 }
 0x8fe   : > { %v7115_v26 = vpop.permute.xlu1 %7114  ;;  %6931 = vrot.lane.b32.xlu0 %v7344_v4, %s12646_s13 }
 0x8ff   : > { %7199 = vst.msk [vmem:[#allocation12 + $0x88] sm:$0xff] %vm18345_vm6, %v7115_v26  ;;  %vm18357_vm6 = vmmov %vm18349_vm11  ;;  %v18363_v26 = vsel %vm16261_vm4, %v16308_v46, 0.0 }
 0x900   : > { %7645 = vrot.lane.b32.xlu1 %v7379_v15, %s12647_s29  ;;  %v6908_v20 = vpop.permute.xlu0 %6907  ;;  %vm18358_vm12 = vmmov %vm18357_vm6 }
 0x901   : > { %6994 = vst.msk [vmem:[#allocation11 + $0x80] sm:$0xff] %vm18348_vm8, %v6908_v20  ;;  %vm18366_vm4 = vmmov %vm18348_vm8 }
 0x902   : > { %v7622_v43 = vpop.permute.xlu1 %7621  ;;  %7476 = vrot.lane.b32.xlu0 %v16389_v7, %s12644_s21 }
 0x903   : > { %7709 = vst.msk [vmem:[#allocation11 + $0x78] sm:$0xff] %vm7693_vm1, %v7622_v43 }
 0x904   : > { %6933 = vrot.lane.b32.xlu1 %v6802_v1, %s12646_s13  ;;  %v7453_v28 = vpop.permute.xlu0 %7452  ;;  %v8086_v37 = vld [vmem:[#allocation11 + $0x70] sm:$0xff] }
 0x905   : > { %7539 = vst.msk [vmem:[#allocation11 + $0x80] sm:$0xff] %vm18349_vm11, %v7453_v28  ;;  %10877 = vmatprep.mubr.msk.f32.mxu1 %vm18350_vm10, %v8086_v37  ;;  %vm18359_vm11 = vmmov %vm18348_vm8 }
 0x906   : > { %v6910_v47 = vpop.permute.xlu1 %6909  ;;  %7647 = vrot.lane.b32.xlu0 %v7346_v61, %s12647_s29  ;;  %vm18360_vm10 = vmmov %vm18357_vm6 }
 0x907   : > { %6995 = vst.msk [vmem:[#allocation11 + $0x88] sm:$0xff] %vm18351_vm9, %v6910_v47  ;;  %vm18361_vm9 = vmmov %vm18353_vm2 }
 0x908   : > { %7478 = vrot.lane.b32.xlu1 %v16410_v58, %s12644_s21  ;;  %v7931_v17 = vpop.permute.xlu0 %7930  ;;  %vm18365_vm7 = vmmov %vm18361_vm9 }
 0x90a   : > { %v7455_v38 = vpop.permute.xlu1 %7454  ;;  %v8087_v49 = vld [vmem:[#allocation11 + $0x78] sm:$0xff]  ;;  %6935 = vrot.lane.b32.xlu0 %v7346_v61, %s12646_s13 }
 0x90b   : > { %7540 = vst.msk [vmem:[#allocation11 + $0x88] sm:$0xff] %vm18352_vm14, %v7455_v38  ;;  %10878 = vmatmul.mubr.msk.f32.gmra.mrb[118].mxu1 %vm18353_vm2, %v8087_v49  ;;  %vm18362_vm14 = vmmov %vm18348_vm8  ;;  %v7317_v49 = vld [vmem:[#allocation10 + $0x128] sm:$0xff] }
 0x90c   : > { %7649 = vrot.lane.b32.xlu1 %v7381_v16, %s12647_s29  ;;  %v7117_v36 = vpop.permute.xlu0 %7116  ;;  %vm18364_vm2 = vmmov %vm18357_vm6 }
 0x90d   : > { %7200 = vst.msk [vmem:[#allocation12 + $0x90] sm:$0xff] %vm18356_vm15, %v7117_v36  ;;  %vm18367_vm15 = vmmov %vm18364_vm2  ;;  %v6260_v36 = vand.u32 15, %v6024_v44 }
 0x90e   : > { %v7797_v35 = vpop.permute.xlu1 %7796  ;;  %7480 = vrot.lane.b32.xlu0 %v16429_v30, %s12644_s21 }
 0x90f   : > { %7881 = vst.msk [vmem:[#allocation12 + $0x88] sm:$0xff] %vm18357_vm6, %v7797_v35  ;;  %vm18368_vm6 = vmmov %vm18364_vm2 }
 0x910   : > { %6937 = vrot.lane.b32.xlu1 %v6804_v29, %s12646_s13  ;;  %v7795_v18 = vpop.permute.xlu0 %7794  ;;  %v7351_v29 = vld [vmem:[#allocation10 + $0x129] sm:$0xff] }
 0x911   : > { %7880 = vst.msk [vmem:[#allocation12 + $0x80] sm:$0xff] %vm18358_vm12, %v7795_v18  ;;  %vm18370_vm12 = vmmov %vm18366_vm4  ;;  %v7350_v18 = vld [vmem:[#allocation10 + $0x121] sm:$0xff] }
 0x912   : > { %v7933_v57 = vpop.permute.xlu1 %7932  ;;  %8016 = vst.msk [vmem:[#allocation12 + $0x80] sm:$0xff] %vm7693_vm1, %v7931_v17  ;;  %7651 = vrot.lane.b32.xlu0 %v16850_v60, %s12647_s29 }
 0x913   : > { %8017 = vst.msk [vmem:[#allocation12 + $0x88] sm:$0xff] %vm7693_vm1, %v7933_v57  ;;  %v17127_v57 = vld [vmem:[#allocation12 + $0x20] sm:$0xff] }
 0x914   : > { %7482 = vrot.lane.b32.xlu1 %v16448_v5, %s12644_s21  ;;  %v7624_v54 = vpop.permute.xlu0 %7623 }
 0x915   : > { %7710 = vst.msk [vmem:[#allocation11 + $0x80] sm:$0xff] %vm7693_vm1, %v7624_v54 }
 0x916   : > { %v7119_v3 = vpop.permute.xlu1 %7118  ;;  %7942 = vrot.lane.b32.xlu0 %v16267_v53, %s12647_s29 }
 0x917   : > { %7201 = vst.msk [vmem:[#allocation12 + $0x98] sm:$0xff] %vm18348_vm8, %v7119_v3  ;;  %vm18371_vm8 = vmmov %vm18366_vm4 }
 0x918   : > { %7653 = vrot.lane.b32.xlu1 %v7383_v42, %s12647_s29  ;;  %v6912_v0 = vpop.permute.xlu0 %6911 }
 0x919   : > { %6996 = vst.msk [vmem:[#allocation11 + $0x90] sm:$0xff] %vm18359_vm11, %v6912_v0  ;;  %vm18373_vm11 = vmmov %vm18365_vm7 }
 0x91a   : > { %v7626_v4 = vpop.permute.xlu1 %7625  ;;  %7128 = vrot.lane.b32.xlu0 %v16267_v53, %s12646_s13 }
 0x91b   : > { %7711 = vst.msk [vmem:[#allocation11 + $0x88] sm:$0xff] %vm7693_vm1, %v7626_v4  ;;  %v18401_v4 = vld [vmem:[#allocation48_spill] sm:$0xff] }
 0x91c   : > { %7944 = vrot.lane.b32.xlu1 %v16287_v39, %s12647_s29  ;;  %v7457_v6 = vpop.permute.xlu0 %7456  ;;  %v16883_v45 = vld [vmem:[#allocation11 + $0x80] sm:$0xff] }
 0x91d   : > { %7541 = vst.msk [vmem:[#allocation11 + $0x90] sm:$0xff] %vm18360_vm10, %v7457_v6  ;;  %10880 = vmatprep.mubr.msk.f32.mxu1 %vm18361_vm9, %v16883_v45  ;;  %vm18374_vm10 = vmmov %vm18366_vm4  ;;  %vm18375_vm9 = vnez %v18248_v10  ;;  %v7216_v6 = vld [vmem:[#allocation10 + $0x1f] sm:$0xff] }
 0x91e   : > { %v6914_v51 = vpop.permute.xlu1 %6913  ;;  %7810 = vrot.lane.b32.xlu0 %v18363_v26, %s12644_s21  ;;  %v18376_v59 = vsel %vm18375_vm9, %v16391_v8, 0.0 }
 0x91f   : > { %6997 = vst.msk [vmem:[#allocation11 + $0x98] sm:$0xff] %vm18362_vm14, %v6914_v51  ;;  %vm18377_vm14 = vmmov %vm18364_vm2  ;;  %v18402_v51 = vld [vmem:[#allocation49_spill] sm:$0xff] }
 0x920   : > { %7130 = vrot.lane.b32.xlu1 %v16287_v39, %s12646_s13  ;;  %v7935_v53 = vpop.permute.xlu0 %7934 }
 0x922   : > { %v7459_v15 = vpop.permute.xlu1 %7458  ;;  %v16896_v33 = vld [vmem:[#allocation11 + $0x88] sm:$0xff]  ;;  %7946 = vrot.lane.b32.xlu0 %v16306_v11, %s12647_s29 }
 0x923   : > { %7542 = vst.msk [vmem:[#allocation11 + $0x98] sm:$0xff] %vm18364_vm2, %v7459_v15  ;;  %10881 = vmatmul.mubr.msk.f32.gmra.mrb[120].mxu1 %vm18365_vm7, %v16896_v33  ;;  %v7250_v15 = vsel %vm16746_vm3, %v7216_v6, 0.0 }
 0x924   : > { %7812 = vrot.lane.b32.xlu1 %v16327_v13, %s12644_s21  ;;  %v7121_v55 = vpop.permute.xlu0 %7120  ;;  %v18369_v13 = vsel %vm16300_vm5, %v16350_v27, 0.0  ;;  %vm18372_vm5 = vmmov %vm18364_vm2 }
 0x925   : > { %7202 = vst.msk [vmem:[#allocation12 + $0xa0] sm:$0xff] %vm18366_vm4, %v7121_v55  ;;  %vm18378_vm2 = vmmov %vm18365_vm7 }
 0x926   : > { %v7801_v46 = vpop.permute.xlu1 %7800  ;;  %7132 = vrot.lane.b32.xlu0 %v16306_v11, %s12646_s13  ;;  %vm18379_vm7 = vmmov %vm18366_vm4 }
 0x927   : > { %7883 = vst.msk [vmem:[#allocation12 + $0x98] sm:$0xff] %vm18367_vm15, %v7801_v46  ;;  %vm18380_vm4 = vmmov %vm18372_vm5 }
 0x928   : > { %7948 = vrot.lane.b32.xlu1 %v16325_v24, %s12647_s29  ;;  %v7799_v39 = vpop.permute.xlu0 %7798  ;;  %vm18381_vm15 = vmmov %vm18380_vm4 }
 0x929   : > { %7882 = vst.msk [vmem:[#allocation12 + $0x90] sm:$0xff] %vm18368_vm6, %v7799_v39  ;;  %vm18383_vm6 = vmmov %vm18379_vm7 }
 0x92a   : > { %v7937_v20 = vpop.permute.xlu1 %7936  ;;  %8018 = vst.msk [vmem:[#allocation12 + $0x90] sm:$0xff] %vm7693_vm1, %v7935_v53  ;;  %7814 = vrot.lane.b32.xlu0 %v18369_v13, %s12644_s21  ;;  %vm18390_vm9 = vmmov %vm18378_vm2  ;;  %v7217_v13 = vld [vmem:[#allocation10 + $0x27] sm:$0xff] }
 0x92b   : > { %8019 = vst.msk [vmem:[#allocation12 + $0x98] sm:$0xff] %vm7693_vm1, %v7937_v20  ;;  %v18407_v20 = vld [vmem:[#allocation51_spill] sm:$0xff] }
 0x92c   : > { %7134 = vrot.lane.b32.xlu1 %v16325_v24, %s12646_s13  ;;  %v7628_v11 = vpop.permute.xlu0 %7627 }
 0x92d   : > { %7712 = vst.msk [vmem:[#allocation11 + $0x90] sm:$0xff] %vm7693_vm1, %v7628_v11 }
 0x92e   : > { %v7123_v43 = vpop.permute.xlu1 %7122  ;;  %7950 = vrot.lane.b32.xlu0 %v16348_v9, %s12647_s29 }
 0x92f   : > { %7203 = vst.msk [vmem:[#allocation12 + $0xa8] sm:$0xff] %vm18370_vm12, %v7123_v43  ;;  %vm18384_vm12 = vmmov %vm18383_vm6 }
 0x930   : > { %7816 = vrot.lane.b32.xlu1 %v16368_v52, %s12644_s21  ;;  %v6916_v25 = vpop.permute.xlu0 %6915 }
 0x931   : > { %6998 = vst.msk [vmem:[#allocation11 + $0xa0] sm:$0xff] %vm18371_vm8, %v6916_v25  ;;  %vm18386_vm8 = vmmov %vm18378_vm2  ;;  %v18409_v25 = vld [vmem:[#allocation72_spill] sm:$0xff] }
 0x932   : > { %v7630_v19 = vpop.permute.xlu1 %7629  ;;  %7136 = vrot.lane.b32.xlu0 %v16348_v9, %s12646_s13 }
 0x933   : > { %7713 = vst.msk [vmem:[#allocation11 + $0x98] sm:$0xff] %vm7693_vm1, %v7630_v19 }
 0x934   : > { %7952 = vrot.lane.b32.xlu1 %v16366_v48, %s12647_s29  ;;  %v7461_v24 = vpop.permute.xlu0 %7460  ;;  %v16933_v27 = vld [vmem:[#allocation11 + $0x90] sm:$0xff] }
 0x935   : > { %7543 = vst.msk [vmem:[#allocation11 + $0xa0] sm:$0xff] %vm18372_vm5, %v7461_v24  ;;  %10883 = vmatprep.mubr.msk.f32.mxu1 %vm18373_vm11, %v16933_v27  ;;  %vm18387_vm5 = vmmov %vm18383_vm6 }
 0x936   : > { %v6918_v52 = vpop.permute.xlu1 %6917  ;;  %7818 = vrot.lane.b32.xlu0 %v18376_v59, %s12644_s21  ;;  %vm18388_vm11 = vmmov %vm18380_vm4 }
 0x937   : > { %6999 = vst.msk [vmem:[#allocation11 + $0xa8] sm:$0xff] %vm18374_vm10, %v6918_v52  ;;  %vm18389_vm10 = vmmov %vm18380_vm4 }
 0x938   : > { %7138 = vrot.lane.b32.xlu1 %v16366_v48, %s12646_s13  ;;  %v7939_v9 = vpop.permute.xlu0 %7938 }
 0x93a   : > { %v7463_v1 = vpop.permute.xlu1 %7462  ;;  %v16946_v40 = vld [vmem:[#allocation11 + $0x98] sm:$0xff]  ;;  %7954 = vrot.lane.b32.xlu0 %v16389_v7, %s12647_s29 }
 0x93b   : > { %7544 = vst.msk [vmem:[#allocation11 + $0xa8] sm:$0xff] %vm18377_vm14, %v7463_v1  ;;  %10884 = vmatmul.mubr.msk.f32.gmra.mrb[122].mxu1 %vm18378_vm2, %v16946_v40  ;;  %vm18392_vm14 = vcmask 97280   ;;  %vm18393_vm2 = vmmov %vm18387_vm5 }
 0x93c   : > { %7820 = vrot.lane.b32.xlu1 %v16412_v50, %s12644_s21  ;;  %v7125_v10 = vpop.permute.xlu0 %7124  ;;  %v18382_v50 = vsel %vm16383_vm13, %v16431_v21, 0.0  ;;  %vm18385_vm13 = vmmov %vm18380_vm4  ;;  %7013 = vst.msk [vmem:[#allocation12 + $0x8] sm:$0xff] %vm18392_vm14, %v6502_v32 }
 0x93d   : > { %7204 = vst.msk [vmem:[#allocation12 + $0xb0] sm:$0xff] %vm18379_vm7, %v7125_v10  ;;  %vm17013_vm7 = vcmp.ne.s32.totalorder %v6260_v36, 15  ;;  %vm18406_vm3 = vmmov %vm18393_vm2 }
 0x93e   : > { %v7805_v8 = vpop.permute.xlu1 %7804  ;;  %7140 = vrot.lane.b32.xlu0 %v16389_v7, %s12646_s13  ;;  %v7385_v3 = vsel %vm17013_vm7, %v7351_v29, 0.0  ;;  %v6806_v55 = vsel %vm17013_vm7, %v16858_v41, 0.0  ;;  %v10133_v29 = vld [vmem:[%s17539_s5 + $0xb0] sm:$0xff] }
 0x93f   : > { %7885 = vst.msk [vmem:[#allocation12 + $0xa8] sm:$0xff] %vm18380_vm4, %v7805_v8 }
 0x940   : > { %7956 = vrot.lane.b32.xlu1 %v16410_v58, %s12647_s29  ;;  %v7803_v48 = vpop.permute.xlu0 %7802 }
 0x941   : > { %7884 = vst.msk [vmem:[#allocation12 + $0xa0] sm:$0xff] %vm18381_vm15, %v7803_v48  ;;  %vm18397_vm15 = vmmov %vm18386_vm8 }
 0x942   : > { %v7941_v2 = vpop.permute.xlu1 %7940  ;;  %8020 = vst.msk [vmem:[#allocation12 + $0xa0] sm:$0xff] %vm7693_vm1, %v7939_v9  ;;  %7822 = vrot.lane.b32.xlu0 %v18382_v50, %s12644_s21 }
 0x943   : > { %8021 = vst.msk [vmem:[#allocation12 + $0xa8] sm:$0xff] %vm7693_vm1, %v7941_v2 }
 0x944   : > { %7142 = vrot.lane.b32.xlu1 %v16410_v58, %s12646_s13  ;;  %v7632_v7 = vpop.permute.xlu0 %7631  ;;  %v7248_v58 = vld [vmem:[#allocation10 + $0x11f] sm:$0xff] }
 0x945   : > { %7714 = vst.msk [vmem:[#allocation11 + $0xa0] sm:$0xff] %vm7693_vm1, %v7632_v7  ;;  %v7282_v61 = vsel %vm16424_vm0, %v7248_v58, 0.0  ;;  %vm18391_vm0 = vmmov %vm18380_vm4 }
 0x946   : > { %v7127_v28 = vpop.permute.xlu1 %7126  ;;  %7958 = vrot.lane.b32.xlu0 %v16429_v30, %s12647_s29  ;;  %vm18396_vm4 = vmmov %vm18391_vm0 }
 0x947   : > { %7205 = vst.msk [vmem:[#allocation12 + $0xb8] sm:$0xff] %vm18383_vm6, %v7127_v28  ;;  %vm18398_vm6 = vmmov %vm18393_vm2 }
 0x948   : > { %7824 = vrot.lane.b32.xlu1 %v16456_v14, %s12644_s21  ;;  %v6920_v37 = vpop.permute.xlu0 %6919  ;;  %vm18411_vm14 = vmmov %vm18396_vm4 }
 0x949   : > { %7000 = vst.msk [vmem:[#allocation11 + $0xb0] sm:$0xff] %vm18384_vm12, %v6920_v37  ;;  %vm18399_vm12 = vmmov %vm18391_vm0 }
 0x94a   : > { %v7634_v56 = vpop.permute.xlu1 %7633  ;;  %7144 = vrot.lane.b32.xlu0 %v16429_v30, %s12646_s13  ;;  %v7316_v30 = vld [vmem:[#allocation10 + $0x120] sm:$0xff] }
 0x94b   : > { %7715 = vst.msk [vmem:[#allocation11 + $0xa8] sm:$0xff] %vm7693_vm1, %v7634_v56 }
 0x94c   : > { %7960 = vrot.lane.b32.xlu1 %v16448_v5, %s12647_s29  ;;  %v7465_v21 = vpop.permute.xlu0 %7464  ;;  %v16983_v47 = vld [vmem:[#allocation11 + $0xa0] sm:$0xff] }
 0x94d   : > { %7545 = vst.msk [vmem:[#allocation11 + $0xb0] sm:$0xff] %vm18385_vm13, %v7465_v21  ;;  %10886 = vmatprep.mubr.msk.f32.mxu1 %vm18386_vm8, %v16983_v47  ;;  %vm18400_vm13 = vmmov %vm18386_vm8 }
 0x94e   : > { %v6922_v14 = vpop.permute.xlu1 %6921  ;;  %7826 = vrot.lane.b32.xlu0 %v7282_v61, %s12644_s21  ;;  %vm18403_vm8 = vmmov %vm18393_vm2 }
 0x94f   : > { %7001 = vst.msk [vmem:[#allocation11 + $0xb8] sm:$0xff] %vm18387_vm5, %v6922_v14  ;;  %vm18404_vm5 = vmmov %vm18391_vm0 }
 0x950   : > { %7146 = vrot.lane.b32.xlu1 %v16448_v5, %s12646_s13  ;;  %v7807_v34 = vpop.permute.xlu0 %7806 }
 0x951   : > { %7886 = vst.msk [vmem:[#allocation12 + $0xb0] sm:$0xff] %vm18388_vm11, %v7807_v34  ;;  %vm18405_vm11 = vmmov %vm18390_vm9 }
 0x952   : > { %v7467_v17 = vpop.permute.xlu1 %7466  ;;  %v16995_v38 = vld [vmem:[#allocation11 + $0xa8] sm:$0xff]  ;;  %7962 = vrot.lane.b32.xlu0 %v7316_v30, %s12647_s29 }
 0x953   : > { %7546 = vst.msk [vmem:[#allocation11 + $0xb8] sm:$0xff] %vm18389_vm10, %v7467_v17  ;;  %10887 = vmatmul.mubr.msk.f32.gmra.mrb[124].mxu1 %vm18390_vm9, %v16995_v38  ;;  %vm18408_vm10 = vmmov %vm18391_vm0 }
 0x954   : > { %7828 = vrot.lane.b32.xlu1 %v7249_v23, %s12644_s21  ;;  %v7636_v5 = vpop.permute.xlu0 %7635 }
 0x955   : > { %7716 = vst.msk [vmem:[#allocation11 + $0xb0] sm:$0xff] %vm7693_vm1, %v7636_v5  ;;  %v10131_v5 = vld [vmem:[%s17539_s5 + $0xa0] sm:$0xff] }
 0x956   : > { %v7809_v16 = vpop.permute.xlu1 %7808  ;;  %6939 = vrot.lane.b32.xlu0 %v16850_v60, %s12646_s13 }
 0x957   : > { %7887 = vst.msk [vmem:[#allocation12 + $0xb8] sm:$0xff] %vm18391_vm0, %v7809_v16  ;;  %vm18410_vm0 = vmmov %vm18393_vm2  ;;  %v17111_v16 = vld [vmem:[#allocation12 + $0x10] sm:$0xff] }
 0x958   : > { %7964 = vrot.lane.b32.xlu1 %v7317_v49, %s12647_s29  ;;  %v6924_v35 = vpop.permute.xlu0 %6923  ;;  %vm18413_vm7 = vmmov %vm18410_vm0 }
 0x959   : > { %7002 = vst.msk [vmem:[#allocation11 + $0xc0] sm:$0xff] %vm18393_vm2, %v6924_v35  ;;  %vm18412_vm2 = vmmov %vm18390_vm9 }
 0x95a   : > { %v7638_v63 = vpop.permute.xlu1 %7637  ;;  %7484 = vrot.lane.b32.xlu0 %v7316_v30, %s12644_s21 }
 0x95b   : > { %7717 = vst.msk [vmem:[#allocation11 + $0xb8] sm:$0xff] %vm7693_vm1, %v7638_v63  ;;  %v17116_v63 = vld [vmem:[#allocation12 + $0x18] sm:$0xff] }
 0x95c   : > { %7486 = vrot.lane.b32.xlu1 %v7317_v49, %s12644_s21  ;;  %v7469_v60 = vpop.permute.xlu0 %7468  ;;  %v17017_v54 = vld [vmem:[#allocation11 + $0xb0] sm:$0xff]  ;;  %v10132_v49 = vld [vmem:[%s17539_s5 + $0xa8] sm:$0xff] }
 0x95d   : > { %7547 = vst.msk [vmem:[#allocation11 + $0xc0] sm:$0xff] %vm18396_vm4, %v7469_v60  ;;  %10889 = vmatprep.mubr.msk.f32.mxu1 %vm18397_vm15, %v17017_v54  ;;  %vm18414_vm15 = vmmov %vm18412_vm2  ;;  %v11736_v36 = vpack.c.bf16 %v10132_v49, %v10131_v5  ;;  %v17222_v5 = vld [vmem:[#allocation12 + $0xa8] sm:$0xff] }
 0x95e   : > { %v6926_v42 = vpop.permute.xlu1 %6925  ;;  %7655 = vrot.lane.b32.xlu0 %v7350_v18, %s12647_s29  ;;  %v10134_v18 = vld [vmem:[%s17539_s5 + $0xb8] sm:$0xff] }
 0x95f   : > { %7003 = vst.msk [vmem:[#allocation11 + $0xc8] sm:$0xff] %vm18398_vm6, %v6926_v42  ;;  %vm18415_vm6 = vmmov %vm18410_vm0 }
 0x960   : > { %7657 = vrot.lane.b32.xlu1 %v7385_v3, %s12647_s29  ;;  %v7640_v31 = vpop.permute.xlu0 %7639  ;;  %v11740_v3 = vpack.c.bf16 %v10134_v18, %v10133_v29 }
 0x961   : > { %7718 = vst.msk [vmem:[#allocation11 + $0xc0] sm:$0xff] %vm7693_vm1, %v7640_v31  ;;  %v17133_v31 = vld [vmem:[#allocation12 + $0x28] sm:$0xff] }
 0x962   : > { %v7471_v12 = vpop.permute.xlu1 %7470  ;;  %v17028_v0 = vld [vmem:[#allocation11 + $0xb8] sm:$0xff]  ;;  %7080 = vrot.lane.b32.xlu0 %v18401_v4, %s12646_s13 }
 0x963   : > { %7548 = vst.msk [vmem:[#allocation11 + $0xc8] sm:$0xff] %vm18399_vm12, %v7471_v12  ;;  %10890 = vmatmul.mubr.msk.f32.gmra.mrb[126].mxu1 %vm18400_vm13, %v17028_v0  ;;  %vm18416_vm12 = vmmov %vm18396_vm4  ;;  %v8066_v12 = vld [vmem:[%s17539_s5] sm:$0xff]  ;;  %v8067_v4 = vld [vmem:[%s17539_s5 + $0x8] sm:$0xff] }
 0x964   : > { %7082 = vrot.lane.b32.xlu1 %v18402_v51, %s12646_s13  ;;  %v6928_v26 = vpop.permute.xlu0 %6927  ;;  %vm18417_vm13 = vmmov %vm18412_vm2  ;;  %v17148_v51 = vpack.c.bf16 %v8067_v4, %v8066_v12 }
 0x965   : > { %7004 = vst.msk [vmem:[#allocation11 + $0xd0] sm:$0xff] %vm18403_vm8, %v6928_v26  ;;  %vm18418_vm8 = vmmov %vm18410_vm0 }
 0x966   : > { %v7642_v53 = vpop.permute.xlu1 %7641  ;;  %7762 = vrot.lane.b32.xlu0 %v7250_v15, %s12644_s21  ;;  %v17156_v15 = vld [vmem:[#allocation12 + $0x40] sm:$0xff] }
 0x967   : > { %7719 = vst.msk [vmem:[#allocation11 + $0xc8] sm:$0xff] %vm7693_vm1, %v7642_v53  ;;  %v17151_v53 = vld [vmem:[#allocation12 + $0x38] sm:$0xff] }
 0x968   : > { %6941 = vrot.lane.b32.xlu1 %v6806_v55, %s12646_s13  ;;  %v7473_v46 = vpop.permute.xlu0 %7472  ;;  %v17046_v39 = vld [vmem:[#allocation11 + $0xc0] sm:$0xff] }
 0x969   : > { %7549 = vst.msk [vmem:[#allocation11 + $0xd0] sm:$0xff] %vm18404_vm5, %v7473_v46  ;;  %10892 = vmatprep.mubr.msk.f32.mxu1 %vm18405_vm11, %v17046_v39  ;;  %vm18419_vm5 = vmmov %vm18396_vm4 }
 0x96a   : > { %v6930_v62 = vpop.permute.xlu1 %6929  ;;  %7898 = vrot.lane.b32.xlu0 %v18407_v20, %s12647_s29  ;;  %vm18420_vm11 = vmmov %vm18412_vm2  ;;  %v17167_v20 = vld [vmem:[#allocation12 + $0x50] sm:$0xff] }
 0x96b   : > { %7005 = vst.msk [vmem:[#allocation11 + $0xd8] sm:$0xff] %vm18406_vm3, %v6930_v62  ;;  %vm18421_vm3 = vmmov %vm18410_vm0  ;;  %v17162_v62 = vld [vmem:[#allocation12 + $0x48] sm:$0xff] }
 0x96c   : > { %7764 = vrot.lane.b32.xlu1 %v7217_v13, %s12644_s21  ;;  %v7644_v41 = vpop.permute.xlu0 %7643 }
 0x96d   : > { %7720 = vst.msk [vmem:[#allocation11 + $0xd0] sm:$0xff] %vm7693_vm1, %v7644_v41 }
 0x96e   : > { %v7475_v11 = vpop.permute.xlu1 %7474  ;;  %v17056_v43 = vld [vmem:[#allocation11 + $0xc8] sm:$0xff] }
 0x96f   : > { %7550 = vst.msk [vmem:[#allocation11 + $0xd8] sm:$0xff] %vm18408_vm10, %v7475_v11  ;;  %10893 = vmatmul.mubr.msk.f32.gmra.mrb[128].mxu1 %vm18390_vm9, %v17056_v43  ;;  %vm18422_vm10 = vmmov %vm18412_vm2  ;;  %v17172_v11 = vld [vmem:[#allocation12 + $0x58] sm:$0xff] }
 0x970   : > { %7900 = vrot.lane.b32.xlu1 %v18409_v25, %s12647_s29  ;;  %v6932_v19 = vpop.permute.xlu0 %6931  ;;  %vm18423_vm9 = vmmov %vm18396_vm4  ;;  %v17177_v25 = vld [vmem:[#allocation12 + $0x60] sm:$0xff] }
 0x971   : > { %7006 = vst.msk [vmem:[#allocation11 + $0xe0] sm:$0xff] %vm18410_vm0, %v6932_v19 }
 0x972   : > { %v7646_v24 = vpop.permute.xlu1 %7645 }
 0x973   : > { %7721 = vst.msk [vmem:[#allocation11 + $0xd8] sm:$0xff] %vm7693_vm1, %v7646_v24 }
 0x974   : > { %v7477_v52 = vpop.permute.xlu0 %7476  ;;  %v17065_v59 = vld [vmem:[#allocation11 + $0xd0] sm:$0xff] }
 0x975   : > { %7551 = vst.msk [vmem:[#allocation11 + $0xe0] sm:$0xff] %vm18411_vm14, %v7477_v52  ;;  %10895 = vmatprep.mubr.msk.f32.mxu1 %vm18412_vm2, %v17065_v59  ;;  %vm18424_vm14 = vmmov %vm18412_vm2  ;;  %v17182_v52 = vld [vmem:[#allocation12 + $0x68] sm:$0xff] }
 0x976   : > { %v6934_v9 = vpop.permute.xlu1 %6933 }
 0x977   : > { %7007 = vst.msk [vmem:[#allocation11 + $0xe8] sm:$0xff] %vm18413_vm7, %v6934_v9  ;;  %vm18425_vm7 = vmmov %vm18396_vm4  ;;  %v17187_v9 = vld [vmem:[#allocation12 + $0x70] sm:$0xff] }
 0x978   : > { %v7648_v1 = vpop.permute.xlu0 %7647 }
 0x979   : > { %7722 = vst.msk [vmem:[#allocation11 + $0xe0] sm:$0xff] %vm7693_vm1, %v7648_v1 }
 0x97a   : > { %v7479_v10 = vpop.permute.xlu1 %7478  ;;  %v17072_v8 = vld [vmem:[#allocation11 + $0xd8] sm:$0xff] }
 0x97b   : > { %7552 = vst.msk [vmem:[#allocation11 + $0xe8] sm:$0xff] %vm18396_vm4, %v7479_v10  ;;  %10896 = vmatmul.mubr.msk.f32.gmra.mrb[130].mxu1 %vm18414_vm15, %v17072_v8  ;;  %vm18426_vm4 = vmmov %vm18412_vm2 }
 0x97c   : > { %v6936_v48 = vpop.permute.xlu0 %6935  ;;  %vm18427_vm15 = vmmov %vm18412_vm2 }
 0x97d   : > { %7008 = vst.msk [vmem:[#allocation11 + $0xf0] sm:$0xff] %vm18415_vm6, %v6936_v48  ;;  %vm18428_vm6 = vmmov %vm18410_vm0  ;;  %v17192_v48 = vld [vmem:[#allocation12 + $0x78] sm:$0xff] }
 0x97e   : > { %v7650_v2 = vpop.permute.xlu1 %7649 }
 0x97f   : > { %7723 = vst.msk [vmem:[#allocation11 + $0xe8] sm:$0xff] %vm7693_vm1, %v7650_v2  ;;  %v17197_v2 = vld [vmem:[#allocation12 + $0x80] sm:$0xff] }
 0x980   : > { %v7481_v50 = vpop.permute.xlu0 %7480  ;;  %v17079_v7 = vld [vmem:[#allocation11 + $0xe0] sm:$0xff] }
 0x981   : > { %7553 = vst.msk [vmem:[#allocation11 + $0xf0] sm:$0xff] %vm18416_vm12, %v7481_v50  ;;  %10898 = vmatprep.mubr.msk.f32.mxu1 %vm18417_vm13, %v17079_v7  ;;  %vm18429_vm12 = vmmov %vm18412_vm2 }
 0x982   : > { %v6938_v28 = vpop.permute.xlu1 %6937  ;;  %vm18430_vm13 = vmmov %vm18412_vm2 }
 0x983   : > { %7009 = vst.msk [vmem:[#allocation11 + $0xf8] sm:$0xff] %vm18418_vm8, %v6938_v28  ;;  %vm18431_vm8 = vmmov %vm18419_vm5 }
 0x984   : > { %v7652_v37 = vpop.permute.xlu0 %7651 }
 0x985   : > { %7724 = vst.msk [vmem:[#allocation11 + $0xf0] sm:$0xff] %vm7693_vm1, %v7652_v37  ;;  %v17202_v37 = vld [vmem:[#allocation12 + $0x88] sm:$0xff] }
 0x986   : > { %v7483_v56 = vpop.permute.xlu1 %7482  ;;  %v17086_v58 = vld [vmem:[#allocation11 + $0xe8] sm:$0xff] }
 0x987   : > { %7554 = vst.msk [vmem:[#allocation11 + $0xf8] sm:$0xff] %vm18419_vm5, %v7483_v56  ;;  %10899 = vmatmul.mubr.msk.f32.gmra.mrb[132].mxu1 %vm18420_vm11, %v17086_v58  ;;  %vm18432_vm5 = vmmov %vm18410_vm0  ;;  %v17207_v56 = vld [vmem:[#allocation12 + $0x90] sm:$0xff] }
 0x988   : > { %v7943_v21 = vpop.permute.xlu0 %7942  ;;  %vm18433_vm11 = vmmov %vm18412_vm2 }
 0x989   : > { %8022 = vst.msk [vmem:[#allocation12 + $0xb0] sm:$0xff] %vm7693_vm1, %v7943_v21 }
 0x98a   : > { %v7654_v14 = vpop.permute.xlu1 %7653 }
 0x98b   : > { %7725 = vst.msk [vmem:[#allocation11 + $0xf8] sm:$0xff] %vm7693_vm1, %v7654_v14 }
 0x98c   : > { %v7129_v61 = vpop.permute.xlu0 %7128  ;;  %v17093_v30 = vld [vmem:[#allocation11 + $0xf0] sm:$0xff] }
 0x98d   : > { %7206 = vst.msk [vmem:[#allocation12 + $0xc0] sm:$0xff] %vm18421_vm3, %v7129_v61  ;;  %10901 = vmatprep.mubr.msk.f32.mxu1 %vm18422_vm10, %v17093_v30  ;;  %vm18434_vm3 = vmmov %vm18412_vm2  ;;  %v17212_v61 = vld [vmem:[#allocation12 + $0x98] sm:$0xff] }
 0x98e   : > { %v7945_v34 = vpop.permute.xlu1 %7944  ;;  %vm18435_vm10 = vmmov %vm18425_vm7 }
 0x98f   : > { %8023 = vst.msk [vmem:[#allocation12 + $0xb8] sm:$0xff] %vm7693_vm1, %v7945_v34  ;;  %v17217_v34 = vld [vmem:[#allocation12 + $0xa0] sm:$0xff] }
 0x990   : > { %v7811_v23 = vpop.permute.xlu0 %7810  ;;  %v17227_v49 = vld [vmem:[#allocation12 + $0xb0] sm:$0xff] }
 0x991   : > { %7888 = vst.msk [vmem:[#allocation12 + $0xc0] sm:$0xff] %vm18423_vm9, %v7811_v23  ;;  %vm18436_vm9 = vmmov %vm18412_vm2 }
 0x992   : > { %v7131_v17 = vpop.permute.xlu1 %7130  ;;  %v17100_v44 = vld [vmem:[#allocation11 + $0xf8] sm:$0xff] }
 0x993   : > { %7207 = vst.msk [vmem:[#allocation12 + $0xc8] sm:$0xff] %vm18410_vm0, %v7131_v17  ;;  %10902 = vmatmul.mubr.msk.f32.gmra.mrb[134].mxu1 %vm18424_vm14, %v17100_v44  ;;  %vm18437_vm0 = vmmov %vm18412_vm2 }
 0x994   : > { %10916 = vmatprep.mubr.msk.f32.mxu1 %vm18412_vm2, %v17111_v16  ;;  %v7947_v32 = vpop.permute.xlu0 %7946  ;;  %vm18438_vm14 = vmmov %vm18432_vm5 }
 0x995   : > { %8024 = vst.msk [vmem:[#allocation12 + $0xc0] sm:$0xff] %vm7693_vm1, %v7947_v32  ;;  %vm18439_vm2 = vmmov %vm18437_vm0 }
 0x996   : > { %v7813_v35 = vpop.permute.xlu1 %7812 }
 0x997   : > { %7889 = vst.msk [vmem:[#allocation12 + $0xc8] sm:$0xff] %vm18425_vm7, %v7813_v35  ;;  %10917 = vmatmul.mubr.msk.f32.vlgmr.msra.gmra.mrb[104].mxu1 %vm18426_vm4, %v17116_v63  ;;  %vm18440_vm7 = vmmov %vm18437_vm0  ;;  %v17232_v35 = vld [vmem:[#allocation12 + $0xb8] sm:$0xff] }
 0x998   : > { %10919 = vmatprep.mubr.msk.f32.mxu1 %vm18427_vm15, %v17127_v57  ;;  %11735 = vmatpush3.bf16.msra.mxu1 %v16874_v22  ;;  %v7133_v60 = vpop.permute.xlu0 %7132  ;;  %v17144_v22 = vld [vmem:[#allocation12 + $0x30] sm:$0xff]  ;;  %vm18441_vm4 = vmmov %vm18431_vm8 }
 0x999   : > { %11737 = vmatprep.subr.bf16.mxu1 %v11736_v36  ;;  %7208 = vst.msk [vmem:[#allocation12 + $0xd0] sm:$0xff] %vm18428_vm6, %v7133_v60  ;;  %vm18442_vm15 = vmmov %vm18432_vm5 }
 0x99a   : > { %v7949_v42 = vpop.permute.xlu1 %7948  ;;  %vm18443_vm6 = vmmov %vm18437_vm0 }
 0x99b   : > { %8025 = vst.msk [vmem:[#allocation12 + $0xc8] sm:$0xff] %vm7693_vm1, %v7949_v42  ;;  %10920 = vmatmul.mubr.msk.f32.gmra.mrb[106].mxu1 %vm18429_vm12, %v17133_v31  ;;  %vm18444_vm12 = vmmov %vm18437_vm0 }
 0x99c   : > { %10922 = vmatprep.mubr.msk.f32.mxu1 %vm18430_vm13, %v17144_v22  ;;  %11739 = vmatpush3.bf16.msra.mxu1 %v11736_v36  ;;  %v7815_v6 = vpop.permute.xlu0 %7814  ;;  %vm18445_vm13 = vmmov %vm18441_vm4  ;;  %v17237_v29 = vld [vmem:[#allocation12 + $0xc0] sm:$0xff] }
 0x99d   : > { %11741 = vmatprep.subr.bf16.mxu1 %v11740_v3  ;;  %7890 = vst.msk [vmem:[#allocation12 + $0xd0] sm:$0xff] %vm18431_vm8, %v7815_v6  ;;  %vm18446_vm8 = vmmov %vm18437_vm0 }
 0x99e   : > { %v7135_v26 = vpop.permute.xlu1 %7134 }
 0x99f   : > { %7209 = vst.msk [vmem:[#allocation12 + $0xd8] sm:$0xff] %vm18432_vm5, %v7135_v26  ;;  %10923 = vmatmul.mubr.msk.f32.gmra.mrb[108].mxu1 %vm18433_vm11, %v17151_v53  ;;  %vm18447_vm5 = vmmov %vm18437_vm0 }
 0x9a0   : > { %10925 = vmatprep.mubr.msk.f32.mxu1 %vm18434_vm3, %v17156_v15  ;;  %11743 = vmatpush3.bf16.msra.mxu1 %v11740_v3  ;;  %v7951_v55 = vpop.permute.xlu0 %7950  ;;  %vm18448_vm11 = vmmov %vm18438_vm14 }
 0x9a1   : > { %11745 = vmatprep.subr.bf16.mxu1 %v17148_v51  ;;  %8026 = vst.msk [vmem:[#allocation12 + $0xd0] sm:$0xff] %vm7693_vm1, %v7951_v55  ;;  %vm18449_vm3 = vmmov %vm18437_vm0 }
 0x9a2   : > { %v7817_v46 = vpop.permute.xlu1 %7816  ;;  %v17242_v3 = vld [vmem:[#allocation12 + $0xc8] sm:$0xff] }
 0x9a3   : > { %7891 = vst.msk [vmem:[#allocation12 + $0xd8] sm:$0xff] %vm18435_vm10, %v7817_v46  ;;  %10926 = vmatmul.mubr.msk.f32.gmra.mrb[110].mxu1 %vm18436_vm9, %v17162_v62  ;;  %vm18450_vm10 = vmmov %vm18437_vm0 }
 0x9a4   : > { %10928 = vmatprep.mubr.msk.f32.mxu1 %vm18437_vm0, %v17167_v20  ;;  %v7137_v13 = vpop.permute.xlu0 %7136  ;;  %vm18451_vm9 = vmmov %vm18441_vm4 }
 0x9a5   : > { %7210 = vst.msk [vmem:[#allocation12 + $0xe0] sm:$0xff] %vm18438_vm14, %v7137_v13  ;;  %vm18452_vm0 = vmmov %vm18448_vm11 }
 0x9a6   : > { %v7953_v41 = vpop.permute.xlu1 %7952  ;;  %vm18453_vm14 = vmmov %vm18439_vm2 }
 0x9a7   : > { %8027 = vst.msk [vmem:[#allocation12 + $0xd8] sm:$0xff] %vm7693_vm1, %v7953_v41  ;;  %10929 = vmatmul.mubr.msk.f32.gmra.mrb[112].mxu1 %vm18439_vm2, %v17172_v11 }
 0x9a8   : > { %10931 = vmatprep.mubr.msk.f32.mxu1 %vm18440_vm7, %v17177_v25  ;;  %v7819_v19 = vpop.permute.xlu0 %7818  ;;  %vm18454_vm7 = vmmov %vm18441_vm4  ;;  %v17247_v42 = vld [vmem:[#allocation12 + $0xd0] sm:$0xff] }
 0x9a9   : > { %7892 = vst.msk [vmem:[#allocation12 + $0xe0] sm:$0xff] %vm18441_vm4, %v7819_v19  ;;  %vm18455_vm4 = vmmov %vm18439_vm2 }
 0x9aa   : > { %v7139_v24 = vpop.permute.xlu1 %7138 }
 0x9ab   : > { %7211 = vst.msk [vmem:[#allocation12 + $0xe8] sm:$0xff] %vm18442_vm15, %v7139_v24  ;;  %10932 = vmatmul.mubr.msk.f32.gmra.mrb[114].mxu1 %vm18443_vm6, %v17182_v52  ;;  %vm18456_vm15 = vmmov %vm18439_vm2 }
 0x9ac   : > { %10934 = vmatprep.mubr.msk.f32.mxu1 %vm18444_vm12, %v17187_v9  ;;  %v7955_v1 = vpop.permute.xlu0 %7954  ;;  %vm18457_vm6 = vmmov %vm18452_vm0 }
 0x9ad   : > { %8028 = vst.msk [vmem:[#allocation12 + $0xe0] sm:$0xff] %vm7693_vm1, %v7955_v1  ;;  %vm18458_vm12 = vmmov %vm18439_vm2 }
 0x9ae   : > { %v7821_v10 = vpop.permute.xlu1 %7820  ;;  %v17252_v6 = vld [vmem:[#allocation12 + $0xd8] sm:$0xff] }
 0x9af   : > { %7893 = vst.msk [vmem:[#allocation12 + $0xe8] sm:$0xff] %vm18445_vm13, %v7821_v10  ;;  %10935 = vmatmul.mubr.msk.f32.gmra.mrb[116].mxu1 %vm18446_vm8, %v17192_v48  ;;  %vm18459_vm13 = vmmov %vm18439_vm2 }
 0x9b0   : > { %10937 = vmatprep.mubr.msk.f32.mxu1 %vm18447_vm5, %v17197_v2  ;;  %v7141_v50 = vpop.permute.xlu0 %7140  ;;  %vm18460_vm8 = vmmov %vm18454_vm7 }
 0x9b1   : > { %7212 = vst.msk [vmem:[#allocation12 + $0xf0] sm:$0xff] %vm18448_vm11, %v7141_v50  ;;  %vm18461_vm5 = vmmov %vm18452_vm0 }
 0x9b2   : > { %v7957_v28 = vpop.permute.xlu1 %7956  ;;  %vm18462_vm11 = vmmov %vm18439_vm2 }
 0x9b3   : > { %8029 = vst.msk [vmem:[#allocation12 + $0xe8] sm:$0xff] %vm7693_vm1, %v7957_v28  ;;  %10938 = vmatmul.mubr.msk.f32.gmra.mrb[118].mxu1 %vm18449_vm3, %v17202_v37  ;;  %vm18463_vm3 = vmmov %vm18439_vm2 }
 0x9b4   : > { %10940 = vmatprep.mubr.msk.f32.mxu1 %vm18450_vm10, %v17207_v56  ;;  %v7823_v21 = vpop.permute.xlu0 %7822  ;;  %vm18464_vm10 = vmmov %vm18454_vm7  ;;  %v17257_v26 = vld [vmem:[#allocation12 + $0xe0] sm:$0xff] }
 0x9b5   : > { %7894 = vst.msk [vmem:[#allocation12 + $0xf0] sm:$0xff] %vm18451_vm9, %v7823_v21  ;;  %vm18465_vm9 = vmmov %vm18439_vm2 }
 0x9b6   : > { %v7143_v14 = vpop.permute.xlu1 %7142 }
 0x9b7   : > { %7213 = vst.msk [vmem:[#allocation12 + $0xf8] sm:$0xff] %vm18452_vm0, %v7143_v14  ;;  %10941 = vmatmul.mubr.msk.f32.gmra.mrb[120].mxu1 %vm18453_vm14, %v17212_v61  ;;  %vm18466_vm0 = vmmov %vm18439_vm2  ;;  %v8068_v14 = vld [vmem:[%s17539_s5 + $0x10] sm:$0xff] }
 0x9b8   : > { %10943 = vmatprep.mubr.msk.f32.mxu1 %vm18439_vm2, %v17217_v34  ;;  %v7959_v23 = vpop.permute.xlu0 %7958  ;;  %vm18467_vm14 = vmmov %vm18461_vm5 }
 0x9b9   : > { %8030 = vst.msk [vmem:[#allocation12 + $0xf0] sm:$0xff] %vm7693_vm1, %v7959_v23  ;;  %vm18468_vm2 = vmmov %vm18466_vm0  ;;  %v8069_v23 = vld [vmem:[%s17539_s5 + $0x18] sm:$0xff] }
 0x9ba   : > { %v7825_v17 = vpop.permute.xlu1 %7824  ;;  %v17262_v13 = vld [vmem:[#allocation12 + $0xe8] sm:$0xff] }
 0x9bb   : > { %7895 = vst.msk [vmem:[#allocation12 + $0xf8] sm:$0xff] %vm18454_vm7, %v7825_v17  ;;  %10944 = vmatmul.mubr.msk.f32.gmra.mrb[122].mxu1 %vm18455_vm4, %v17222_v5  ;;  %vm18469_vm7 = vmmov %vm18466_vm0  ;;  %v8792_v17 = vld [vmem:[#allocation11 + $0x10] sm:$0xff] }
 0x9bc   : > { %10946 = vmatprep.mubr.msk.f32.mxu1 %vm18456_vm15, %v17227_v49  ;;  %v7145_v32 = vpop.permute.xlu0 %7144  ;;  %vm18470_vm4 = vmmov %vm18460_vm8 }
 0x9bd   : > { %7214 = vst.msk [vmem:[#allocation12 + $0x100] sm:$0xff] %vm18457_vm6, %v7145_v32  ;;  %vm18471_vm15 = vmmov %vm18466_vm0 }
 0x9be   : > { %v7961_v36 = vpop.permute.xlu1 %7960  ;;  %vm18472_vm6 = vmmov %vm18466_vm0 }
 0x9bf   : > { %8031 = vst.msk [vmem:[#allocation12 + $0xf8] sm:$0xff] %vm7693_vm1, %v7961_v36  ;;  %10947 = vmatmul.mubr.msk.f32.gmra.mrb[124].mxu1 %vm18458_vm12, %v17232_v35  ;;  %vm18473_vm12 = vmmov %vm18466_vm0  ;;  %v11748_v36 = vpack.c.bf16 %v8069_v23, %v8068_v14  ;;  %v8797_v23 = vld [vmem:[#allocation11 + $0x38] sm:$0xff] }
 0x9c0   : > { %10949 = vmatprep.mubr.msk.f32.mxu1 %vm18459_vm13, %v17237_v29  ;;  %v7827_v18 = vpop.permute.xlu0 %7826  ;;  %v17267_v41 = vld [vmem:[#allocation12 + $0xf0] sm:$0xff]  ;;  %vm18474_vm13 = vmmov %vm18466_vm0 }
 0x9c1   : > { %7896 = vst.msk [vmem:[#allocation12 + $0x100] sm:$0xff] %vm18460_vm8, %v7827_v18  ;;  %vm18475_vm8 = vmmov %vm18461_vm5 }
 0x9c2   : > { %v7147_v60 = vpop.permute.xlu1 %7146 }
 0x9c3   : > { %7215 = vst.msk [vmem:[#allocation12 + $0x108] sm:$0xff] %vm18461_vm5, %v7147_v60  ;;  %10950 = vmatmul.mubr.msk.f32.gmra.mrb[126].mxu1 %vm18462_vm11, %v17242_v3  ;;  %v8793_v60 = vld [vmem:[#allocation11 + $0x18] sm:$0xff]  ;;  %vm18476_vm11 = vmmov %vm18466_vm0 }
 0x9c4   : > { %10952 = vmatprep.mubr.msk.f32.mxu1 %vm18463_vm3, %v17247_v42  ;;  %v7963_v12 = vpop.permute.xlu0 %7962  ;;  %vm18477_vm3 = vmmov %vm18466_vm0 }
 0x9c5   : > { %8032 = vst.msk [vmem:[#allocation12 + $0x100] sm:$0xff] %vm7693_vm1, %v7963_v12  ;;  %v8070_v12 = vld [vmem:[%s17539_s5 + $0x20] sm:$0xff] }
 0x9c6   : > { %v7829_v4 = vpop.permute.xlu1 %7828  ;;  %v17272_v10 = vld [vmem:[#allocation12 + $0xf8] sm:$0xff] }
 0x9c7   : > { %7897 = vst.msk [vmem:[#allocation12 + $0x108] sm:$0xff] %vm18464_vm10, %v7829_v4  ;;  %10953 = vmatmul.mubr.msk.f32.gmra.mrb[128].mxu1 %vm18465_vm9, %v17252_v6  ;;  %v8071_v4 = vld [vmem:[%s17539_s5 + $0x28] sm:$0xff]  ;;  %vm18478_vm10 = vmmov %vm18470_vm4 }
 0x9c8   : > { %10955 = vmatprep.mubr.msk.f32.mxu1 %vm18466_vm0, %v17257_v26  ;;  %v6940_v55 = vpop.permute.xlu0 %6939  ;;  %vm18479_vm9 = vmmov %vm18461_vm5 }
 0x9c9   : > { %7010 = vst.msk [vmem:[#allocation11 + $0x100] sm:$0xff] %vm18467_vm14, %v6940_v55  ;;  %v8794_v55 = vld [vmem:[#allocation11 + $0x20] sm:$0xff]  ;;  %vm18480_vm14 = vmmov %vm18470_vm4 }
 0x9ca   : > { %v7965_v46 = vpop.permute.xlu1 %7964 }
 0x9cb   : > { %8033 = vst.msk [vmem:[#allocation12 + $0x108] sm:$0xff] %vm7693_vm1, %v7965_v46  ;;  %10956 = vmatmul.mubr.msk.f32.gmra.mrb[130].mxu1 %vm18468_vm2, %v17262_v13  ;;  %vm18481_vm2 = vmmov %vm18466_vm0 }
 0x9cc   : > { %10958 = vmatprep.mubr.msk.f32.mxu1 %vm18469_vm7, %v17267_v41  ;;  %v7485_v19 = vpop.permute.xlu0 %7484  ;;  %v8462_v24 = vld [vmem:[#allocation12 + $0x100] sm:$0xff]  ;;  %vm18482_vm7 = vmmov %vm18470_vm4 }
 0x9cd   : > { %7555 = vst.msk [vmem:[#allocation11 + $0x100] sm:$0xff] %vm18470_vm4, %v7485_v19  ;;  %v11752_v19 = vpack.c.bf16 %v8071_v4, %v8070_v12  ;;  %vm18483_vm4 = vmmov %vm18466_vm0  ;;  %v8804_v12 = vld [vmem:[#allocation11 + $0x70] sm:$0xff]  ;;  %v8805_v4 = vld [vmem:[#allocation11 + $0x78] sm:$0xff] }
 0x9ce   : > { %v7487_v1 = vpop.permute.xlu1 %7486 }
 0x9cf   : > { %10959 = vmatmul.mubr.msk.f32.gmra.mrb[132].mxu1 %vm18471_vm15, %v17272_v10  ;;  %vm18484_vm15 = vmmov %vm18466_vm0 }
 0x9d0   : > { %10961 = vmatprep.mubr.msk.f32.mxu1 %vm18472_vm6, %v8462_v24  ;;  %v7656_v50 = vpop.permute.xlu0 %7655  ;;  %vm18485_vm6 = vmmov %vm18466_vm0 }
 0x9d1   : > { %7726 = vst.msk [vmem:[#allocation11 + $0x100] sm:$0xff] %vm7693_vm1, %v7656_v50  ;;  %v8795_v50 = vld [vmem:[#allocation11 + $0x28] sm:$0xff] }
 0x9d2   : > { %v7658_v28 = vpop.permute.xlu1 %7657  ;;  %v8463_v21 = vld [vmem:[#allocation12 + $0x108] sm:$0xff] }
 0x9d3   : > { %10962 = vmatmul.mubr.msk.f32.gmra.mrb[134].mxu1 %vm18473_vm12, %v8463_v21  ;;  %v8796_v21 = vld [vmem:[#allocation11 + $0x30] sm:$0xff]  ;;  %vm18486_vm12 = vmmov %vm18466_vm0 }
 0x9d4   : > { %10976 = vmatprep.mubr.msk.f32.mxu1 %vm18474_vm13, %v8792_v17  ;;  %v7081_v32 = vpop.permute.xlu0 %7080  ;;  %v8798_v17 = vld [vmem:[#allocation11 + $0x40] sm:$0xff]  ;;  %vm18487_vm13 = vmmov %vm18466_vm0 }
 0x9d5   : > { %7182 = vst.msk [vmem:[#allocation12] sm:$0xff] %vm18475_vm8, %v7081_v32  ;;  %v8799_v32 = vld [vmem:[#allocation11 + $0x48] sm:$0xff]  ;;  %vm18488_vm8 = vmmov %vm18466_vm0 }
 0x9d6   : > { %v7083_v18 = vpop.permute.xlu1 %7082 }
 0x9d7   : > { %7183 = vst.msk [vmem:[#allocation12 + $0x8] sm:$0xff] %vm18461_vm5, %v7083_v18  ;;  %10977 = vmatmul.mubr.msk.f32.vlgmr.msra.gmra.mrb[104].mxu1 %vm18476_vm11, %v8793_v60  ;;  %v8802_v18 = vld [vmem:[#allocation11 + $0x60] sm:$0xff]  ;;  %v8803_v60 = vld [vmem:[#allocation11 + $0x68] sm:$0xff]  ;;  %vm18489_vm5 = vmmov %vm18466_vm0 }
 0x9d8   : > { %10979 = vmatprep.mubr.msk.f32.mxu1 %vm18477_vm3, %v8794_v55  ;;  %11747 = vmatpush3.bf16.msra.mxu1 %v17148_v51  ;;  %v7763_v46 = vpop.permute.xlu0 %7762  ;;  %vm18490_vm11 = vmmov %vm18466_vm0 }
 0x9d9   : > { %11749 = vmatprep.subr.bf16.mxu1 %v11748_v36  ;;  %7864 = vst.msk [vmem:[#allocation12] sm:$0xff] %vm18478_vm10, %v7763_v46  ;;  %vm18491_vm3 = vmmov %vm18466_vm0 }
 0x9da   : > { %v6942_v24 = vpop.permute.xlu1 %6941  ;;  %vm18493_vm10 = vmmov %vm18466_vm0 }
 0x9db   : > { %7011 = vst.msk [vmem:[#allocation11 + $0x108] sm:$0xff] %vm18479_vm9, %v6942_v24  ;;  %10980 = vmatmul.mubr.msk.f32.gmra.mrb[106].mxu1 %vm18466_vm0, %v8795_v50  ;;  %vm18494_vm9 = vmmov %vm18466_vm0 }
 0x9dc   : > { %7556 = vst.msk [vmem:[#allocation11 + $0x108] sm:$0xff] %vm18480_vm14, %v7487_v1  ;;  %10982 = vmatprep.mubr.msk.f32.mxu1 %vm18481_vm2, %v8796_v21  ;;  %11751 = vmatpush3.bf16.msra.mxu1 %v11748_v36  ;;  %v7899_v51 = vpop.permute.xlu0 %7898  ;;  %v8801_v36 = vld [vmem:[#allocation11 + $0x58] sm:$0xff]  ;;  %vm18495_vm14 = vmmov %vm18466_vm0 }
 0x9dd   : > { %7727 = vst.msk [vmem:[#allocation11 + $0x108] sm:$0xff] %vm7693_vm1, %v7658_v28  ;;  %11753 = vmatprep.subr.bf16.mxu1 %v11752_v19  ;;  %8000 = vst.msk [vmem:[#allocation12] sm:$0xff] %vm7693_vm1, %v7899_v51  ;;  %v8800_v28 = vld [vmem:[#allocation11 + $0x50] sm:$0xff] }
 0x9de   : > { %v7765_v14 = vpop.permute.xlu1 %7764  ;;  %vm18496_vm2 = vmmov %vm18466_vm0 }
 0x9df   : > { %7865 = vst.msk [vmem:[#allocation12 + $0x8] sm:$0xff] %vm18482_vm7, %v7765_v14  ;;  %10983 = vmatmul.mubr.msk.f32.gmra.mrb[108].mxu1 %vm18483_vm4, %v8797_v23  ;;  %vm18497_vm7 = vmmov %vm18466_vm0 }
 0x9e0   : > { %10985 = vmatprep.mubr.msk.f32.mxu1 %vm18484_vm15, %v8798_v17  ;;  %11755 = vmatpush3.bf16.msra.mxu1 %v11752_v19  ;;  %vm18498_vm4 = vmmov %vm18466_vm0 }
 0x9e1   : > { %vm18499_vm15 = vmmov %vm18466_vm0 }
 0x9e2   : > { %v7901_v1 = vpop.permute.xlu1 %7900 }
 0x9e3   : > { %8001 = vst.msk [vmem:[#allocation12 + $0x8] sm:$0xff] %vm7693_vm1, %v7901_v1  ;;  %10986 = vmatmul.mubr.msk.f32.gmra.mrb[110].mxu1 %vm18485_vm6, %v8799_v32  ;;  %vm18492_vm1 = vmmov %vm18466_vm0 }
 0x9e4   : > { %10988 = vmatprep.mubr.msk.f32.mxu1 %vm18486_vm12, %v8800_v28  ;;  %vm18500_vm6 = vmmov %vm18466_vm0 }
 0x9e5   : > { %vm18501_vm12 = vmmov %vm18466_vm0 }
 0x9e7   : > { %10989 = vmatmul.mubr.msk.f32.gmra.mrb[112].mxu1 %vm18487_vm13, %v8801_v36  ;;  %vm18502_vm13 = vmmov %vm18466_vm0 }
 0x9e8   : > { %10991 = vmatprep.mubr.msk.f32.mxu1 %vm18488_vm8, %v8802_v18  ;;  %vm18503_vm8 = vmmov %vm18466_vm0 }
 0x9eb   : > { %10992 = vmatmul.mubr.msk.f32.gmra.mrb[114].mxu1 %vm18489_vm5, %v8803_v60  ;;  %vm18504_vm5 = vmmov %vm18466_vm0 }
 0x9ec   : > { %10994 = vmatprep.mubr.msk.f32.mxu1 %vm18490_vm11, %v8804_v12  ;;  %vm18505_vm11 = vmmov %vm18466_vm0 }
 0x9ef   : > { %10995 = vmatmul.mubr.msk.f32.gmra.mrb[116].mxu1 %vm18491_vm3, %v8805_v4  ;;  %vm18506_vm3 = vmmov %vm18466_vm0 }
 0x9f0   : > { %10997 = vmatprep.mubr.msk.f32.mxu1 %vm18492_vm1, %v16883_v45  ;;  %v8822_v45 = vld [vmem:[#allocation11 + $0x100] sm:$0xff]  ;;  %vm18507_vm1 = vmmov %vm18466_vm0 }
 0x9f3   : > { %10998 = vmatmul.mubr.msk.f32.gmra.mrb[118].mxu1 %vm18493_vm10, %v16896_v33  ;;  %v8823_v33 = vld [vmem:[#allocation11 + $0x108] sm:$0xff]  ;;  %vm18508_vm10 = vmmov %vm18466_vm0 }
 0x9f4   : > { %11000 = vmatprep.mubr.msk.f32.mxu1 %vm18494_vm9, %v16933_v27  ;;  %v8034_v27 = vld [vmem:[#allocation12] sm:$0xff]  ;;  %vm18509_vm9 = vmmov %vm18466_vm0 }
 0x9f7   : > { %11001 = vmatmul.mubr.msk.f32.gmra.mrb[120].mxu1 %vm18466_vm0, %v16946_v40  ;;  %v8035_v40 = vld [vmem:[#allocation12 + $0x8] sm:$0xff] }
 0x9f8   : > { %11003 = vmatprep.mubr.msk.f32.mxu1 %vm18495_vm14, %v16983_v47  ;;  %vm18510_vm14 = vmmov %vm18466_vm0  ;;  %v17411_v47 = vld [vmem:[#allocation18] ss:$0 sm:$0xff] }
 0x9fb   : > { %11004 = vmatmul.mubr.msk.f32.gmra.mrb[122].mxu1 %vm18496_vm2, %v16995_v38  ;;  %vm18511_vm2 = vmmov %vm18466_vm0 }
 0x9fc   : > { %11006 = vmatprep.mubr.msk.f32.mxu1 %vm18497_vm7, %v17017_v54  ;;  %vm18512_vm7 = vmmov %vm18466_vm0 }
 0x9ff   : > { %11007 = vmatmul.mubr.msk.f32.gmra.mrb[124].mxu1 %vm18498_vm4, %v17028_v0  ;;  %vm18513_vm4 = vmmov %vm18466_vm0 }
 0xa00   : > { %11009 = vmatprep.mubr.msk.f32.mxu1 %vm18499_vm15, %v17046_v39  ;;  %vm18514_vm15 = vmmov %vm18466_vm0 }
 0xa03   : > { %11010 = vmatmul.mubr.msk.f32.gmra.mrb[126].mxu1 %vm18500_vm6, %v17056_v43  ;;  %vm18515_vm6 = vmmov %vm18466_vm0 }
 0xa04   : > { %11012 = vmatprep.mubr.msk.f32.mxu1 %vm18501_vm12, %v17065_v59  ;;  %vm18516_vm12 = vmmov %vm18466_vm0 }
 0xa07   : > { %11013 = vmatmul.mubr.msk.f32.gmra.mrb[128].mxu1 %vm18502_vm13, %v17072_v8  ;;  %vm18517_vm13 = vmmov %vm18466_vm0 }
 0xa08   : > { %11015 = vmatprep.mubr.msk.f32.mxu1 %vm18503_vm8, %v17079_v7  ;;  %vm18518_vm8 = vmmov %vm18466_vm0 }
 0xa0b   : > { %11016 = vmatmul.mubr.msk.f32.gmra.mrb[130].mxu1 %vm18504_vm5, %v17086_v58  ;;  %vm18519_vm5 = vmmov %vm18466_vm0 }
 0xa0c   : > { %11018 = vmatprep.mubr.msk.f32.mxu1 %vm18505_vm11, %v17093_v30  ;;  %vm18520_vm11 = vmmov %vm18466_vm0 }
 0xa0f   : > { %11019 = vmatmul.mubr.msk.f32.gmra.mrb[132].mxu1 %vm18506_vm3, %v17100_v44  ;;  %vm18521_vm3 = vmmov %vm18466_vm0 }
 0xa10   : > { %11021 = vmatprep.mubr.msk.f32.mxu1 %vm18507_vm1, %v8822_v45  ;;  %vm18522_vm1 = vmmov %vm18466_vm0 }
 0xa13   : > { %11022 = vmatmul.mubr.msk.f32.gmra.mrb[134].mxu1 %vm18508_vm10, %v8823_v33  ;;  %vm18523_vm10 = vmmov %vm18466_vm0 }
 0xa14   : > { %11036 = vmatprep.mubr.msk.f32.mxu1 %vm18509_vm9, %v8034_v27  ;;  %vm18524_vm9 = vmmov %vm18466_vm0 }
 0xa17   : > { %11037 = vmatmul.mubr.msk.f32.vlgmr.msra.gmra.mrb[104].mxu1 %vm18466_vm0, %v8035_v40 }
 0xa18   : > { %11039 = vmatprep.mubr.msk.f32.mxu1 %vm18510_vm14, %v17111_v16  ;;  %vm18525_vm14 = vmmov %vm18466_vm0 }
 0xa1b   : > { %11040 = vmatmul.mubr.msk.f32.gmra.mrb[106].mxu1 %vm18511_vm2, %v17116_v63  ;;  %vm18526_vm2 = vmmov %vm18466_vm0 }
 0xa1c   : > { %11042 = vmatprep.mubr.msk.f32.mxu1 %vm18512_vm7, %v17127_v57  ;;  %vm18527_vm7 = vmmov %vm18466_vm0 }
 0xa1f   : > { %11043 = vmatmul.mubr.msk.f32.gmra.mrb[108].mxu1 %vm18513_vm4, %v17133_v31  ;;  %vm18528_vm4 = vmmov %vm18466_vm0 }
 0xa20   : > { %11045 = vmatprep.mubr.msk.f32.mxu1 %vm18514_vm15, %v17144_v22  ;;  %vm18529_vm15 = vmmov %vm18466_vm0 }
 0xa23   : > { %11046 = vmatmul.mubr.msk.f32.gmra.mrb[110].mxu1 %vm18515_vm6, %v17151_v53  ;;  %vm18530_vm6 = vmmov %vm18466_vm0 }
 0xa24   : > { %11048 = vmatprep.mubr.msk.f32.mxu1 %vm18516_vm12, %v17156_v15  ;;  %vm18531_vm12 = vmmov %vm18466_vm0 }
 0xa27   : > { %11049 = vmatmul.mubr.msk.f32.gmra.mrb[112].mxu1 %vm18517_vm13, %v17162_v62  ;;  %vm18532_vm13 = vmmov %vm18466_vm0 }
 0xa28   : > { %11051 = vmatprep.mubr.msk.f32.mxu1 %vm18518_vm8, %v17167_v20  ;;  %vm18533_vm8 = vmmov %vm18466_vm0 }
 0xa2b   : > { %11052 = vmatmul.mubr.msk.f32.gmra.mrb[114].mxu1 %vm18519_vm5, %v17172_v11  ;;  %vm18534_vm5 = vmmov %vm18466_vm0 }
 0xa2c   : > { %11054 = vmatprep.mubr.msk.f32.mxu1 %vm18520_vm11, %v17177_v25  ;;  %vm18535_vm11 = vmmov %vm18466_vm0 }
 0xa2f   : > { %11055 = vmatmul.mubr.msk.f32.gmra.mrb[116].mxu1 %vm18521_vm3, %v17182_v52  ;;  %vm18536_vm3 = vmmov %vm18466_vm0 }
 0xa30   : > { %11057 = vmatprep.mubr.msk.f32.mxu1 %vm18522_vm1, %v17187_v9  ;;  %vm18537_vm1 = vmmov %vm18466_vm0 }
 0xa33   : > { %11058 = vmatmul.mubr.msk.f32.gmra.mrb[118].mxu1 %vm18523_vm10, %v17192_v48  ;;  %vm18538_vm10 = vmmov %vm18466_vm0 }
 0xa34   : > { %11060 = vmatprep.mubr.msk.f32.mxu1 %vm18524_vm9, %v17197_v2  ;;  %vm18539_vm9 = vcmask 97280  }
 0xa37   : > { %11061 = vmatmul.mubr.msk.f32.gmra.mrb[120].mxu1 %vm18466_vm0, %v17202_v37  ;;  %vm18540_vm0 = vmmov %vm18539_vm9 }
 0xa38   : > { %11063 = vmatprep.mubr.msk.f32.mxu1 %vm18525_vm14, %v17207_v56  ;;  %vm18541_vm14 = vmmov %vm18540_vm0 }
 0xa3b   : > { %11064 = vmatmul.mubr.msk.f32.gmra.mrb[122].mxu1 %vm18526_vm2, %v17212_v61  ;;  %vm18542_vm2 = vmmov %vm18540_vm0 }
 0xa3c   : > { %11066 = vmatprep.mubr.msk.f32.mxu1 %vm18527_vm7, %v17217_v34  ;;  %vm18543_vm7 = vmmov %vm18540_vm0 }
 0xa3f   : > { %11067 = vmatmul.mubr.msk.f32.gmra.mrb[124].mxu1 %vm18528_vm4, %v17222_v5  ;;  %vm18544_vm4 = vmmov %vm18540_vm0 }
 0xa40   : > { %11069 = vmatprep.mubr.msk.f32.mxu1 %vm18529_vm15, %v17227_v49  ;;  %vm18545_vm15 = vmmov %vm18540_vm0 }
 0xa43   : > { %11070 = vmatmul.mubr.msk.f32.gmra.mrb[126].mxu1 %vm18530_vm6, %v17232_v35  ;;  %vm18546_vm6 = vmmov %vm18540_vm0 }
 0xa44   : > { %11072 = vmatprep.mubr.msk.f32.mxu1 %vm18531_vm12, %v17237_v29  ;;  %vm18547_vm12 = vmmov %vm18540_vm0 }
 0xa47   : > { %11073 = vmatmul.mubr.msk.f32.gmra.mrb[128].mxu1 %vm18532_vm13, %v17242_v3  ;;  %vm18548_vm13 = vmmov %vm18540_vm0 }
 0xa48   : > { %11075 = vmatprep.mubr.msk.f32.mxu1 %vm18533_vm8, %v17247_v42  ;;  %vm18549_vm8 = vmmov %vm18540_vm0 }
 0xa4b   : > { %11076 = vmatmul.mubr.msk.f32.gmra.mrb[130].mxu1 %vm18534_vm5, %v17252_v6  ;;  %vm18550_vm5 = vmmov %vm18540_vm0 }
 0xa4c   : > { %11078 = vmatprep.mubr.msk.f32.mxu1 %vm18535_vm11, %v17257_v26  ;;  %vm18551_vm11 = vmmov %vm18540_vm0 }
 0xa4f   : > { %11079 = vmatmul.mubr.msk.f32.gmra.mrb[132].mxu1 %vm18536_vm3, %v17262_v13  ;;  %vm18552_vm3 = vmmov %vm18540_vm0 }
 0xa50   : > { %11081 = vmatprep.mubr.msk.f32.mxu1 %vm18537_vm1, %v17267_v41  ;;  %vm18553_vm1 = vmmov %vm18540_vm0 }
 0xa53   : > { %11082 = vmatmul.mubr.msk.f32.gmra.mrb[134].mxu1 %vm18538_vm10, %v17272_v10  ;;  %vm18554_vm10 = vmmov %vm18540_vm0 }
 0xaea   : > { %v11038_v38 = vpop.f32.mrb[104].mxu1 }
 0xaeb   : > { %v9545_v54 = vadd.f32 %v11038_v38, %v17411_v47  ;;  %v9314_v0 = vpop.f32.mrb[105].mxu1 }
 0xaec   : > { %v9544_v39 = vadd.f32 %v17411_v47, %v9314_v0 }
 0xaed   : > { %v9577_v43 = vsub.f32 0.0, %v9545_v54 }
 0xaee   : > { %v9576_v59 = vsub.f32 0.0, %v9544_v39  ;;  %v11041_v8 = vpop.f32.mrb[106].mxu1 }
 0xaef   : > { %v9610_v7 = vmul.f32 1.442695, %v9577_v43  ;;  %v9547_v58 = vadd.f32 %v11041_v8, %v17411_v47  ;;  %v9324_v30 = vpop.f32.mrb[107].mxu1 }
 0xaf0   : > { %v9608_v44 = vmul.f32 1.442695, %v9576_v59  ;;  %v9546_v16 = vadd.f32 %v17411_v47, %v9324_v30 }
 0xaf1   : > { %12283 = vpow2.f32 %v9610_v7  ;;  %v9579_v63 = vsub.f32 0.0, %v9547_v58 }
 0xaf2   : > { %12285 = vpow2.f32 %v9608_v44  ;;  %v9578_v57 = vsub.f32 0.0, %v9546_v16  ;;  %v11044_v31 = vpop.f32.mrb[108].mxu1 }
 0xaf3   : > { %v9614_v22 = vmul.f32 1.442695, %v9579_v63  ;;  %v9549_v53 = vadd.f32 %v11044_v31, %v17411_v47  ;;  %v9334_v15 = vpop.f32.mrb[109].mxu1 }
 0xaf4   : > { %v9612_v62 = vmul.f32 1.442695, %v9578_v57  ;;  %v9548_v20 = vadd.f32 %v17411_v47, %v9334_v15 }
 0xaf5   : > { %12287 = vpow2.f32 %v9614_v22  ;;  %v9581_v11 = vsub.f32 0.0, %v9549_v53 }
 0xaf6   : > { %12289 = vpow2.f32 %v9612_v62  ;;  %v9580_v25 = vsub.f32 0.0, %v9548_v20  ;;  %v11047_v52 = vpop.f32.mrb[110].mxu1 }
 0xaf7   : > { %v9618_v9 = vmul.f32 1.442695, %v9581_v11  ;;  %v9551_v48 = vadd.f32 %v11047_v52, %v17411_v47  ;;  %v9344_v2 = vpop.f32.mrb[111].mxu1 }
 0xaf8   : > { %v9616_v37 = vmul.f32 1.442695, %v9580_v25  ;;  %v9550_v56 = vadd.f32 %v17411_v47, %v9344_v2 }
 0xaf9   : > { %12291 = vpow2.f32 %v9618_v9  ;;  %v9583_v61 = vsub.f32 0.0, %v9551_v48 }
 0xafa   : > { %12293 = vpow2.f32 %v9616_v37  ;;  %v9582_v34 = vsub.f32 0.0, %v9550_v56  ;;  %v11050_v5 = vpop.f32.mrb[112].mxu1 }
 0xafb   : > { %v12284_v49 = vpop.eup %12283  ;;  %v9622_v35 = vmul.f32 1.442695, %v9583_v61  ;;  %v9553_v29 = vadd.f32 %v11050_v5, %v17411_v47  ;;  %v9354_v3 = vpop.f32.mrb[113].mxu1 }
 0xafc   : > { %v12286_v42 = vpop.eup %12285  ;;  %v9673_v6 = vadd.f32 1.0, %v12284_v49  ;;  %v9620_v26 = vmul.f32 1.442695, %v9582_v34  ;;  %v9552_v13 = vadd.f32 %v17411_v47, %v9354_v3 }
 0xafd   : > { %v9672_v41 = vadd.f32 1.0, %v12286_v42  ;;  %12295 = vpow2.f32 %v9622_v35  ;;  %v9585_v10 = vsub.f32 0.0, %v9553_v29 }
 0xafe   : > { %12297 = vrcp.f32 %v9673_v6  ;;  %v9584_v55 = vsub.f32 0.0, %v9552_v13  ;;  %v11053_v46 = vpop.f32.mrb[114].mxu1 }
 0xaff   : > { %v12288_v19 = vpop.eup %12287  ;;  %12299 = vrcp.f32 %v9672_v41  ;;  %v9626_v24 = vmul.f32 1.442695, %v9585_v10  ;;  %v9555_v50 = vadd.f32 %v11053_v46, %v17411_v47  ;;  %v9364_v21 = vpop.f32.mrb[115].mxu1 }
 0xb00   : > { %v12290_v51 = vpop.eup %12289  ;;  %v9675_v14 = vadd.f32 1.0, %v12288_v19  ;;  %12301 = vpow2.f32 %v9620_v26  ;;  %v9624_v23 = vmul.f32 1.442695, %v9584_v55  ;;  %v9554_v17 = vadd.f32 %v17411_v47, %v9364_v21 }
 0xb01   : > { %v9674_v1 = vadd.f32 1.0, %v12290_v51  ;;  %12303 = vpow2.f32 %v9626_v24  ;;  %v9587_v32 = vsub.f32 0.0, %v9555_v50 }
 0xb02   : > { %12305 = vrcp.f32 %v9675_v14  ;;  %v9586_v28 = vsub.f32 0.0, %v9554_v17  ;;  %v11056_v36 = vpop.f32.mrb[116].mxu1 }
 0xb03   : > { %v12292_v18 = vpop.eup %12291  ;;  %12307 = vrcp.f32 %v9674_v1  ;;  %v9630_v60 = vmul.f32 1.442695, %v9587_v32  ;;  %v9557_v12 = vadd.f32 %v11056_v36, %v17411_v47  ;;  %v9374_v4 = vpop.f32.mrb[117].mxu1 }
 0xb04   : > { %v12294_v45 = vpop.eup %12293  ;;  %v9677_v33 = vadd.f32 1.0, %v12292_v18  ;;  %12309 = vpow2.f32 %v9624_v23  ;;  %v9628_v27 = vmul.f32 1.442695, %v9586_v28  ;;  %v9556_v40 = vadd.f32 %v17411_v47, %v9374_v4 }
 0xb05   : > { %v9676_v38 = vadd.f32 1.0, %v12294_v45  ;;  %12311 = vpow2.f32 %v9630_v60  ;;  %v9589_v54 = vsub.f32 0.0, %v9557_v12 }
 0xb06   : > { %12313 = vrcp.f32 %v9677_v33  ;;  %v9588_v0 = vsub.f32 0.0, %v9556_v40  ;;  %v11059_v39 = vpop.f32.mrb[118].mxu1 }
 0xb07   : > { %v12296_v43 = vpop.eup %12295  ;;  %12315 = vrcp.f32 %v9676_v38  ;;  %v9634_v59 = vmul.f32 1.442695, %v9589_v54  ;;  %v9559_v8 = vadd.f32 %v11059_v39, %v17411_v47  ;;  %v9384_v7 = vpop.f32.mrb[119].mxu1 }
 0xb08   : > { %v12298_v58 = vpop.eup %12297  ;;  %v9679_v30 = vadd.f32 1.0, %v12296_v43  ;;  %12317 = vpow2.f32 %v9628_v27  ;;  %v9632_v44 = vmul.f32 1.442695, %v9588_v0  ;;  %v9558_v16 = vadd.f32 %v17411_v47, %v9384_v7 }
 0xb09   : > { %v12300_v63 = vpop.eup %12299  ;;  %9737 = vst.msk [vmem:[%s17437_s28 + $0x8] sm:$0xff] %vm18539_vm9, %v12298_v58  ;;  %12319 = vpow2.f32 %v9634_v59  ;;  %v9591_v57 = vsub.f32 0.0, %v9559_v8  ;;  %vm18555_vm9 = vmmov %vm18540_vm0 }
 0xb0a   : > { %v12302_v31 = vpop.eup %12301  ;;  %9736 = vst.msk [vmem:[%s17437_s28] sm:$0xff] %vm18540_vm0, %v12300_v63  ;;  %12321 = vrcp.f32 %v9679_v30  ;;  %v9590_v22 = vsub.f32 0.0, %v9558_v16  ;;  %v11062_v53 = vpop.f32.mrb[120].mxu1 }
 0xb0b   : > { %v12304_v15 = vpop.eup %12303  ;;  %v9678_v62 = vadd.f32 1.0, %v12302_v31  ;;  %12323 = vpow2.f32 %v9632_v44  ;;  %v9638_v20 = vmul.f32 1.442695, %v9591_v57  ;;  %v9561_v11 = vadd.f32 %v11062_v53, %v17411_v47  ;;  %v9394_v25 = vpop.f32.mrb[121].mxu1 }
 0xb0c   : > { %v12306_v52 = vpop.eup %12305  ;;  %v9681_v9 = vadd.f32 1.0, %v12304_v15  ;;  %v9636_v48 = vmul.f32 1.442695, %v9590_v22  ;;  %v9560_v2 = vadd.f32 %v17411_v47, %v9394_v25 }
 0xb0d   : > { %v12308_v37 = vpop.eup %12307  ;;  %9739 = vst.msk [vmem:[%s17437_s28 + $0x18] sm:$0xff] %vm18541_vm14, %v12306_v52  ;;  %12325 = vrcp.f32 %v9678_v62  ;;  %v9593_v56 = vsub.f32 0.0, %v9561_v11  ;;  %vm18556_vm14 = vmmov %vm18540_vm0 }
 0xb0e   : > { %v12310_v61 = vpop.eup %12309  ;;  %9738 = vst.msk [vmem:[%s17437_s28 + $0x10] sm:$0xff] %vm18542_vm2, %v12308_v37  ;;  %12327 = vrcp.f32 %v9681_v9  ;;  %v9592_v34 = vsub.f32 0.0, %v9560_v2  ;;  %v11065_v5 = vpop.f32.mrb[122].mxu1  ;;  %vm18557_vm2 = vmmov %vm18540_vm0 }
 0xb0f   : > { %v12312_v49 = vpop.eup %12311  ;;  %v9680_v35 = vadd.f32 1.0, %v12310_v61  ;;  %12329 = vpow2.f32 %v9638_v20  ;;  %v9642_v29 = vmul.f32 1.442695, %v9593_v56  ;;  %v9563_v3 = vadd.f32 %v11065_v5, %v17411_v47  ;;  %v9404_v42 = vpop.f32.mrb[123].mxu1 }
 0xb10   : > { %v12314_v6 = vpop.eup %12313  ;;  %v9683_v26 = vadd.f32 1.0, %v12312_v49  ;;  %12331 = vpow2.f32 %v9636_v48  ;;  %v9640_v13 = vmul.f32 1.442695, %v9592_v34  ;;  %v9562_v41 = vadd.f32 %v17411_v47, %v9404_v42 }
 0xb11   : > { %v12316_v10 = vpop.eup %12315  ;;  %9741 = vst.msk [vmem:[%s17437_s28 + $0x28] sm:$0xff] %vm18543_vm7, %v12314_v6  ;;  %12333 = vrcp.f32 %v9680_v35  ;;  %v9595_v55 = vsub.f32 0.0, %v9563_v3  ;;  %vm18558_vm7 = vmmov %vm18540_vm0 }
 0xb12   : > { %v12318_v46 = vpop.eup %12317  ;;  %9740 = vst.msk [vmem:[%s17437_s28 + $0x20] sm:$0xff] %vm18544_vm4, %v12316_v10  ;;  %12335 = vrcp.f32 %v9683_v26  ;;  %v9594_v19 = vsub.f32 0.0, %v9562_v41  ;;  %v11068_v24 = vpop.f32.mrb[124].mxu1  ;;  %vm18559_vm4 = vmmov %vm18540_vm0 }
 0xb13   : > { %v12320_v50 = vpop.eup %12319  ;;  %v9682_v21 = vadd.f32 1.0, %v12318_v46  ;;  %12337 = vpow2.f32 %v9642_v29  ;;  %v9646_v51 = vmul.f32 1.442695, %v9595_v55  ;;  %v9565_v14 = vadd.f32 %v11068_v24, %v17411_v47  ;;  %v9414_v23 = vpop.f32.mrb[125].mxu1 }
 0xb14   : > { %v12322_v17 = vpop.eup %12321  ;;  %v9685_v1 = vadd.f32 1.0, %v12320_v50  ;;  %12339 = vpow2.f32 %v9640_v13  ;;  %v9564_v32 = vadd.f32 %v17411_v47, %v9414_v23  ;;  %v9644_v36 = vmul.f32 1.442695, %v9594_v19 }
 0xb15   : > { %v12324_v28 = vpop.eup %12323  ;;  %9743 = vst.msk [vmem:[%s17437_s28 + $0x38] sm:$0xff] %vm18545_vm15, %v12322_v17  ;;  %12341 = vrcp.f32 %v9682_v21  ;;  %v9597_v18 = vsub.f32 0.0, %v9565_v14  ;;  %vm18560_vm15 = vmmov %vm18540_vm0 }
 0xb16   : > { %12343 = vrcp.f32 %v9685_v1  ;;  %v9684_v60 = vadd.f32 1.0, %v12324_v28  ;;  %v9596_v12 = vsub.f32 0.0, %v9564_v32  ;;  %v11071_v4 = vpop.f32.mrb[126].mxu1 }
 0xb17   : > { %v12326_v45 = vpop.eup %12325  ;;  %12345 = vpow2.f32 %v9646_v51  ;;  %v9650_v33 = vmul.f32 1.442695, %v9597_v18  ;;  %v9567_v27 = vadd.f32 %v11071_v4, %v17411_v47  ;;  %v9424_v40 = vpop.f32.mrb[127].mxu1 }
 0xb18   : > { %v12328_v38 = vpop.eup %12327  ;;  %9742 = vst.msk [vmem:[%s17437_s28 + $0x30] sm:$0xff] %vm18546_vm6, %v12326_v45  ;;  %12347 = vrcp.f32 %v9684_v60  ;;  %v9648_v54 = vmul.f32 1.442695, %v9596_v12  ;;  %v9566_v0 = vadd.f32 %v17411_v47, %v9424_v40  ;;  %vm18561_vm6 = vmmov %vm18540_vm0 }
 0xb19   : > { %v12330_v39 = vpop.eup %12329  ;;  %9745 = vst.msk [vmem:[%s17437_s28 + $0x48] sm:$0xff] %vm18547_vm12, %v12328_v38  ;;  %12349 = vpow2.f32 %v9644_v36  ;;  %v9599_v43 = vsub.f32 0.0, %v9567_v27  ;;  %vm18562_vm12 = vmmov %vm18540_vm0 }
 0xb1a   : > { %v12332_v59 = vpop.eup %12331  ;;  %v9687_v8 = vadd.f32 1.0, %v12330_v39  ;;  %12351 = vpow2.f32 %v9650_v33  ;;  %v9598_v7 = vsub.f32 0.0, %v9566_v0  ;;  %v11074_v58 = vpop.f32.mrb[128].mxu1 }
 0xb1b   : > { %v12334_v30 = vpop.eup %12333  ;;  %v9686_v44 = vadd.f32 1.0, %v12332_v59  ;;  %12353 = vpow2.f32 %v9648_v54  ;;  %v9654_v16 = vmul.f32 1.442695, %v9599_v43  ;;  %v9569_v63 = vadd.f32 %v11074_v58, %v17411_v47  ;;  %v9434_v57 = vpop.f32.mrb[129].mxu1 }
 0xb1c   : > { %v12336_v31 = vpop.eup %12335  ;;  %9744 = vst.msk [vmem:[%s17437_s28 + $0x40] sm:$0xff] %vm18548_vm13, %v12334_v30  ;;  %12355 = vrcp.f32 %v9687_v8  ;;  %v9652_v22 = vmul.f32 1.442695, %v9598_v7  ;;  %v9568_v53 = vadd.f32 %v17411_v47, %v9434_v57  ;;  %vm18563_vm13 = vmmov %vm18540_vm0 }
 0xb1d   : > { %v12338_v15 = vpop.eup %12337  ;;  %9747 = vst.msk [vmem:[%s17437_s28 + $0x58] sm:$0xff] %vm18549_vm8, %v12336_v31  ;;  %12357 = vrcp.f32 %v9686_v44  ;;  %v9601_v62 = vsub.f32 0.0, %v9569_v63  ;;  %vm18564_vm8 = vmmov %vm18540_vm0 }
 0xb1e   : > { %v12340_v20 = vpop.eup %12339  ;;  %v9689_v11 = vadd.f32 1.0, %v12338_v15  ;;  %12359 = vpow2.f32 %v9654_v16  ;;  %v9600_v25 = vsub.f32 0.0, %v9568_v53  ;;  %v11077_v52 = vpop.f32.mrb[130].mxu1 }
 0xb1f   : > { %v12342_v9 = vpop.eup %12341  ;;  %v9688_v48 = vadd.f32 1.0, %v12340_v20  ;;  %12361 = vpow2.f32 %v9652_v22  ;;  %v9658_v2 = vmul.f32 1.442695, %v9601_v62  ;;  %v9571_v37 = vadd.f32 %v11077_v52, %v17411_v47  ;;  %v9444_v56 = vpop.f32.mrb[131].mxu1 }
 0xb20   : > { %v12344_v61 = vpop.eup %12343  ;;  %9746 = vst.msk [vmem:[%s17437_s28 + $0x50] sm:$0xff] %vm18550_vm5, %v12342_v9  ;;  %12363 = vrcp.f32 %v9689_v11  ;;  %v9656_v34 = vmul.f32 1.442695, %v9600_v25  ;;  %v9570_v5 = vadd.f32 %v17411_v47, %v9444_v56  ;;  %vm18565_vm5 = vmmov %vm18540_vm0 }
 0xb21   : > { %v12346_v49 = vpop.eup %12345  ;;  %9749 = vst.msk [vmem:[%s17437_s28 + $0x68] sm:$0xff] %vm18551_vm11, %v12344_v61  ;;  %12365 = vrcp.f32 %v9688_v48  ;;  %v9603_v35 = vsub.f32 0.0, %v9571_v37  ;;  %vm18566_vm11 = vmmov %vm18540_vm0 }
 0xb22   : > { %v12348_v29 = vpop.eup %12347  ;;  %v9691_v3 = vadd.f32 1.0, %v12346_v49  ;;  %12367 = vpow2.f32 %v9658_v2  ;;  %v9602_v42 = vsub.f32 0.0, %v9570_v5  ;;  %v11080_v6 = vpop.f32.mrb[132].mxu1 }
 0xb23   : > { %v12350_v26 = vpop.eup %12349  ;;  %9748 = vst.msk [vmem:[%s17437_s28 + $0x60] sm:$0xff] %vm18552_vm3, %v12348_v29  ;;  %12369 = vpow2.f32 %v9656_v34  ;;  %v9662_v13 = vmul.f32 1.442695, %v9603_v35  ;;  %v9573_v41 = vadd.f32 %v11080_v6, %v17411_v47  ;;  %v9454_v10 = vpop.f32.mrb[133].mxu1  ;;  %vm18567_vm3 = vmmov %vm18540_vm0 }
 0xb24   : > { %v12352_v55 = vpop.eup %12351  ;;  %12371 = vrcp.f32 %v9691_v3  ;;  %v9690_v46 = vadd.f32 1.0, %v12350_v26  ;;  %v9572_v19 = vadd.f32 %v17411_v47, %v9454_v10  ;;  %v9660_v21 = vmul.f32 1.442695, %v9602_v42 }
 0xb25   : > { %v12354_v24 = vpop.eup %12353  ;;  %v9693_v50 = vadd.f32 1.0, %v12352_v55  ;;  %12373 = vpow2.f32 %v9662_v13  ;;  %v9605_v51 = vsub.f32 0.0, %v9573_v41 }
 0xb26   : > { %v12356_v14 = vpop.eup %12355  ;;  %12375 = vrcp.f32 %v9690_v46  ;;  %v9692_v23 = vadd.f32 1.0, %v12354_v24  ;;  %v9604_v17 = vsub.f32 0.0, %v9572_v19  ;;  %v11083_v1 = vpop.f32.mrb[134].mxu1 }
 0xb27   : > { %v12358_v32 = vpop.eup %12357  ;;  %9751 = vst.msk [vmem:[%s17437_s28 + $0x78] sm:$0xff] %vm18553_vm1, %v12356_v14  ;;  %12377 = vrcp.f32 %v9693_v50  ;;  %v9666_v28 = vmul.f32 1.442695, %v9605_v51  ;;  %v9575_v36 = vadd.f32 %v11083_v1, %v17411_v47  ;;  %v9464_v18 = vpop.f32.mrb[135].mxu1  ;;  %vm18568_vm1 = vmmov %vm18540_vm0 }
 0xb28   : > { %v12360_v60 = vpop.eup %12359  ;;  %9750 = vst.msk [vmem:[%s17437_s28 + $0x70] sm:$0xff] %vm18554_vm10, %v12358_v32  ;;  %12379 = vrcp.f32 %v9692_v23  ;;  %v9574_v12 = vadd.f32 %v17411_v47, %v9464_v18  ;;  %v9664_v33 = vmul.f32 1.442695, %v9604_v17  ;;  %vm18569_vm10 = vmmov %vm18540_vm0 }
 0xb29   : > { %v12362_v4 = vpop.eup %12361  ;;  %v9695_v45 = vadd.f32 1.0, %v12360_v60  ;;  %12381 = vpow2.f32 %v9660_v21  ;;  %v9607_v27 = vsub.f32 0.0, %v9575_v36 }
 0xb2a   : > { %v12364_v40 = vpop.eup %12363  ;;  %v9694_v38 = vadd.f32 1.0, %v12362_v4  ;;  %12383 = vpow2.f32 %v9666_v28  ;;  %v9606_v54 = vsub.f32 0.0, %v9574_v12 }
 0xb2b   : > { %v12366_v0 = vpop.eup %12365  ;;  %9753 = vst.msk [vmem:[%s17437_s28 + $0x88] sm:$0xff] %vm18555_vm9, %v12364_v40  ;;  %12385 = vrcp.f32 %v9695_v45  ;;  %v9670_v39 = vmul.f32 1.442695, %v9607_v27 }
 0xb2c   : > { %v12368_v43 = vpop.eup %12367  ;;  %9752 = vst.msk [vmem:[%s17437_s28 + $0x80] sm:$0xff] %vm18540_vm0, %v12366_v0  ;;  %12387 = vrcp.f32 %v9694_v38  ;;  %v9668_v8 = vmul.f32 1.442695, %v9606_v54 }
 0xb2d   : > { %v12370_v47 = vpop.eup %12369  ;;  %v9697_v59 = vadd.f32 1.0, %v12368_v43  ;;  %12389 = vpow2.f32 %v9664_v33 }
 0xb2e   : > { %v12372_v7 = vpop.eup %12371  ;;  %v9696_v58 = vadd.f32 1.0, %v12370_v47  ;;  %12391 = vpow2.f32 %v9670_v39 }
 0xb2f   : > { %v12374_v30 = vpop.eup %12373  ;;  %9755 = vst.msk [vmem:[%s17437_s28 + $0x98] sm:$0xff] %vm18556_vm14, %v12372_v7  ;;  %12393 = vrcp.f32 %v9697_v59 }
 0xb30   : > { %v12376_v44 = vpop.eup %12375  ;;  %12395 = vrcp.f32 %v9696_v58  ;;  %v9699_v16 = vadd.f32 1.0, %v12374_v30 }
 0xb31   : > { %v12378_v63 = vpop.eup %12377  ;;  %9754 = vst.msk [vmem:[%s17437_s28 + $0x90] sm:$0xff] %vm18557_vm2, %v12376_v44  ;;  %12397 = vpow2.f32 %v9668_v8 }
 0xb32   : > { %v12380_v57 = vpop.eup %12379  ;;  %9757 = vst.msk [vmem:[%s17437_s28 + $0xa8] sm:$0xff] %vm18558_vm7, %v12378_v63  ;;  %12399 = vrcp.f32 %v9699_v16 }
 0xb33   : > { %v12382_v31 = vpop.eup %12381  ;;  %9756 = vst.msk [vmem:[%s17437_s28 + $0xa0] sm:$0xff] %vm18559_vm4, %v12380_v57 }
 0xb34   : > { %v12384_v22 = vpop.eup %12383  ;;  %v9698_v53 = vadd.f32 1.0, %v12382_v31 }
 0xb35   : > { %v12386_v15 = vpop.eup %12385  ;;  %v9701_v62 = vadd.f32 1.0, %v12384_v22 }
 0xb36   : > { %v12388_v20 = vpop.eup %12387  ;;  %9759 = vst.msk [vmem:[%s17437_s28 + $0xb8] sm:$0xff] %vm18560_vm15, %v12386_v15  ;;  %12401 = vrcp.f32 %v9698_v53 }
 0xb37   : > { %v12390_v11 = vpop.eup %12389  ;;  %9758 = vst.msk [vmem:[%s17437_s28 + $0xb0] sm:$0xff] %vm18561_vm6, %v12388_v20  ;;  %12403 = vrcp.f32 %v9701_v62 }
 0xb38   : > { %v12392_v25 = vpop.eup %12391  ;;  %v9700_v52 = vadd.f32 1.0, %v12390_v11 }
 0xb39   : > { %v12394_v9 = vpop.eup %12393  ;;  %v9703_v48 = vadd.f32 1.0, %v12392_v25 }
 0xb3a   : > { %v12396_v2 = vpop.eup %12395  ;;  %9761 = vst.msk [vmem:[%s17437_s28 + $0xc8] sm:$0xff] %vm18562_vm12, %v12394_v9  ;;  %12405 = vrcp.f32 %v9700_v52 }
 0xb3b   : > { %v12398_v37 = vpop.eup %12397  ;;  %9760 = vst.msk [vmem:[%s17437_s28 + $0xc0] sm:$0xff] %vm18563_vm13, %v12396_v2  ;;  %12407 = vrcp.f32 %v9703_v48 }
 0xb3c   : > { %v12400_v56 = vpop.eup %12399  ;;  %v9702_v61 = vadd.f32 1.0, %v12398_v37 }
 0xb3d   : > { %9763 = vst.msk [vmem:[%s17437_s28 + $0xd8] sm:$0xff] %vm18564_vm8, %v12400_v56 }
 0xb3e   : > { %12409 = vrcp.f32 %v9702_v61 }
 0xb40   : > { %v12402_v34 = vpop.eup %12401 }
 0xb41   : > { %v12404_v5 = vpop.eup %12403  ;;  %9762 = vst.msk [vmem:[%s17437_s28 + $0xd0] sm:$0xff] %vm18565_vm5, %v12402_v34 }
 0xb42   : > { %9765 = vst.msk [vmem:[%s17437_s28 + $0xe8] sm:$0xff] %vm18566_vm11, %v12404_v5 }
 0xb44   : > { %v12406_v49 = vpop.eup %12405 }
 0xb45   : > { %v12408_v35 = vpop.eup %12407  ;;  %9764 = vst.msk [vmem:[%s17437_s28 + $0xe0] sm:$0xff] %vm18567_vm3, %v12406_v49 }
 0xb46   : > { %9767 = vst.msk [vmem:[%s17437_s28 + $0xf8] sm:$0xff] %vm18568_vm1, %v12408_v35 }
 0xb48   : > { %v12410_v29 = vpop.eup %12409 }
 0xb49   : > { %9766 = vst.msk [vmem:[%s17437_s28 + $0xf0] sm:$0xff] %vm18569_vm10, %v12410_v29 }
 0xb4a PF: > { %p22_p6 = scmp.ge.s32.totalorder %s12863_s27, 4   ;;  %s18570_s30 = smov %s12619_s10 }
 0xb4b   : > { %s18571_s10 = smov %s12623_s11  ;;  %s18572_s11 = smov %s12874_s19 }
 0xb4c   : > { %s18573_s12 = smov %s12863_s27  ;;  %24 = sbr.rel (!%p22_p6) target bundleno = 8 (0x8), region = 125 }
 0xb53   :  { %9789 = vsyncpa [#allocation14], 1 }
 0xb54   :  { %9791 = vsyncpa [#allocation14 + $0x1], 1 }
 0xb55   :  { %9792 = vsyncpa [#allocation16], 1 }
 0xb56   :  { %9793 = vsyncpa [#allocation19], 1 }
 0xb57   :  { %9794 = vsyncpa [#allocation22], 1 }

</bundles_post_ra>
